<compile_context>
chip_gen: v6e
topology: v6e:2x2x1
jax: 0.10.0
libtpu: 0.0.40
codegen_flags: <defaults>
</compile_context>

<pallas_src>
import functools
import math

import jax
import jax.numpy as jnp
from jax.experimental import pallas as pl
from jax.experimental.pallas import tpu as pltpu

# ---------------- model configuration (ViT-Small, scaled-down spatial) -------
PATCH = 16
EMBED = 384          # model_hidden_dict['ViT']
NUM_HEADS = 6
HEAD_DIM = EMBED // NUM_HEADS
MLP_DIM = EMBED * 4
DEPTH = 12
HIDDEN = 256
TARGETS = 5          # setting='multi'
LN_EPS = 1e-6
BN_EPS = 1e-5
NEG_SLOPE = 0.01     # LeakyReLU default


# =========================== in-kernel helpers ================================

def _ln(x, g, b, eps=LN_EPS):
    mu = jnp.mean(x, axis=-1, keepdims=True)
    var = jnp.mean(jnp.square(x - mu), axis=-1, keepdims=True)
    return (x - mu) * jax.lax.rsqrt(var + eps) * g + b


def _erf(x):
    # Abramowitz & Stegun 7.1.26 polynomial (|err| < 1.5e-7), exp/abs only.
    a1, a2, a3, a4, a5 = 0.254829592, -0.284496736, 1.421413741, -1.453152027, 1.061405429
    p = 0.3275911
    sign = jnp.where(x >= 0.0, 1.0, -1.0)
    ax = jnp.abs(x)
    t = 1.0 / (1.0 + p * ax)
    poly = ((((a5 * t + a4) * t + a3) * t + a2) * t + a1) * t
    return sign * (1.0 - poly * jnp.exp(-ax * ax))


def _gelu(x):
    # exact GELU (nn.GELU) via erf approximation
    return 0.5 * x * (1.0 + _erf(x * 0.7071067811865476))


def _bf16(x):
    return x.astype(jnp.bfloat16)


# =========================== Pallas kernels ==================================

def _linear_kernel(x_ref, w_ref, b_ref, o_ref):
    # x f32/bf16, w bf16, bias f32 -> f32 out
    o_ref[...] = jnp.dot(_bf16(x_ref[...]), w_ref[...],
                         preferred_element_type=jnp.float32) + b_ref[...]


def _backbone_kernel(x_ref, g1_ref, b1_ref, wqkv_ref, bqkv_ref,
                     wproj_ref, bproj_ref, g2_ref, b2_ref,
                     wfc1_ref, bfc1_ref, wfc2_ref, bfc2_ref,
                     o_ref, acc_ref, *, t_valid):
    """One fused pre-norm ViT block per grid step.

    grid = (batch, depth); residual stream (T_pad, D) lives in acc_ref (VMEM)
    across the depth axis; per-depth weights are streamed via BlockSpec.
    """
    d = pl.program_id(1)

    @pl.when(d == 0)
    def _():
        acc_ref[...] = x_ref[...]

    x = acc_ref[...]                                   # (T_pad, D) f32 residual
    t_pad = x.shape[0]

    # ---------------- attention sub-block ----------------
    h = _ln(x, g1_ref[...], b1_ref[...])
    qkv = jnp.dot(_bf16(h), wqkv_ref[...],
                  preferred_element_type=jnp.float32) + bqkv_ref[...]   # (T_pad, 3D)
    q = qkv[:, :EMBED]
    k = qkv[:, EMBED:2 * EMBED]
    v = qkv[:, 2 * EMBED:]

    # key mask for padded token rows (t_valid is static)
    col = jax.lax.broadcasted_iota(jnp.int32, (t_pad, t_pad), 1)
    neg = jnp.where(col < t_valid, 0.0, -1e30).astype(jnp.float32)
    scale = 1.0 / math.sqrt(HEAD_DIM)

    outs = []
    for hh in range(NUM_HEADS):                        # static loop over heads
        sl = slice(hh * HEAD_DIM, (hh + 1) * HEAD_DIM)
        qh = _bf16(q[:, sl])
        kh = _bf16(k[:, sl])
        vh = _bf16(v[:, sl])
        s = jax.lax.dot_general(qh, kh, (((1,), (1,)), ((), ())),
                                preferred_element_type=jnp.float32) * scale + neg
        s = s - jnp.max(s, axis=-1, keepdims=True)
        p = jnp.exp(s)
        p = p * pl.reciprocal(jnp.sum(p, axis=-1, keepdims=True), approx=True)
        outs.append(jnp.dot(_bf16(p), vh, preferred_element_type=jnp.float32))
    attn = jnp.concatenate(outs, axis=-1)              # lane-dense (T_pad, D)

    x = x + jnp.dot(_bf16(attn), wproj_ref[...],
                    preferred_element_type=jnp.float32) + bproj_ref[...]

    # ---------------- MLP sub-block ----------------
    h = _ln(x, g2_ref[...], b2_ref[...])
    h1 = jnp.dot(_bf16(h), wfc1_ref[...],
                 preferred_element_type=jnp.float32) + bfc1_ref[...]
    h1 = _gelu(h1)
    x = x + jnp.dot(_bf16(h1), wfc2_ref[...],
                    preferred_element_type=jnp.float32) + bfc2_ref[...]

    acc_ref[...] = x
    o_ref[...] = x


def _head_kernel(x_ref, ng_ref, nb_ref, w1_ref, b1_ref, bns_ref, bnb_ref,
                 w2_ref, b2_ref, o_ref, *, neg_slope):
    # final backbone LN (on cls rows only) + fc head, fully fused
    h = _ln(x_ref[...], ng_ref[...], nb_ref[...])
    h = jnp.dot(_bf16(h), w1_ref[...], preferred_element_type=jnp.float32) + b1_ref[...]
    h = h * bns_ref[...] + bnb_ref[...]                # eval-mode BatchNorm1d (folded)
    h = jnp.where(h >= 0.0, h, neg_slope * h)          # LeakyReLU(0.01)
    # Dropout(p=0.5) is identity in eval mode
    o_ref[...] = jnp.dot(_bf16(h), w2_ref[...],
                         preferred_element_type=jnp.float32) + b2_ref[...]


# =========================== kernel wrappers =================================

def _full(shape):
    return pl.BlockSpec(shape, lambda i: (0,) * len(shape))


def patch_embed_call(patches, w_bf16, b_row):
    M, K = patches.shape
    N = w_bf16.shape[1]
    return pl.pallas_call(
        _linear_kernel,
        out_shape=jax.ShapeDtypeStruct((M, N), jnp.float32),
        grid=(1,),
        in_specs=[_full((M, K)), _full((K, N)), _full((1, N))],
        out_specs=_full((M, N)),
    )(patches, w_bf16, b_row)


def vit_backbone(tokens, blocks, t_valid):
    """tokens: (B, T_pad, D) f32 -> (B, T_pad, D) f32 after 12 fused blocks."""
    B, T_pad, D = tokens.shape

    tok_spec = pl.BlockSpec((None, T_pad, D), lambda b, d: (b, 0, 0))

    def w_spec(arr):
        shape = arr.shape[1:]
        return pl.BlockSpec((None,) + shape, lambda b, d: (d,) + (0,) * len(shape))

    order = ["g1", "b1", "wqkv", "bqkv", "wproj", "bproj",
             "g2", "b2", "wfc1", "bfc1", "wfc2", "bfc2"]
    weight_args = [blocks[k] for k in order]

    return pl.pallas_call(
        functools.partial(_backbone_kernel, t_valid=t_valid),
        out_shape=jax.ShapeDtypeStruct((B, T_pad, D), jnp.float32),
        grid_spec=pltpu.PrefetchScalarGridSpec(
            num_scalar_prefetch=0,
            grid=(B, DEPTH),
            in_specs=[tok_spec] + [w_spec(a) for a in weight_args],
            out_specs=tok_spec,
            scratch_shapes=[pltpu.VMEM((T_pad, D), jnp.float32)],
        ),
        compiler_params=pltpu.CompilerParams(
            dimension_semantics=("parallel", "arbitrary")),
    )(tokens, *weight_args)


def fc_head_call(feat, params):
    B, D = feat.shape
    p = params["head"]
    Hh = p["w1"].shape[1]
    No = p["w2"].shape[1]
    inv = p["bn_gamma"] * jax.lax.rsqrt(p["bn_var"] + BN_EPS)
    bn_scale = inv.reshape(1, Hh)
    bn_shift = (p["bn_beta"] - p["bn_mean"] * inv).reshape(1, Hh)
    return pl.pallas_call(
        functools.partial(_head_kernel, neg_slope=NEG_SLOPE),
        out_shape=jax.ShapeDtypeStruct((B, No), jnp.float32),
        grid=(1,),
        in_specs=[_full((B, D)), _full((1, D)), _full((1, D)),
                  _full((D, Hh)), _full((1, Hh)), _full((1, Hh)), _full((1, Hh)),
                  _full((Hh, No)), _full((1, No))],
        out_specs=_full((B, No)),
    )(feat, params["norm_g"].reshape(1, D), params["norm_b"].reshape(1, D),
      p["w1"], p["b1"].reshape(1, Hh), bn_scale, bn_shift,
      p["w2"], p["b2"].reshape(1, No))


# =========================== model glue ======================================

def prediction_model_forward(x, params):
    x = x.astype(jnp.float32)                                     # x.float()
    B, C, H, W = x.shape
    gh, gw = H // PATCH, W // PATCH

    # ---- fold eval-mode BatchNorm2d(3) into the patch-embed linear ----------
    inv = params["bn2d_gamma"] * jax.lax.rsqrt(params["bn2d_var"] + BN_EPS)
    shift = params["bn2d_beta"] - params["bn2d_mean"] * inv
    row_scale = jnp.repeat(inv, PATCH * PATCH)                    # (C*P*P,)
    row_shift = jnp.repeat(shift, PATCH * PATCH)
    w_fold = (params["patch_w"] * row_scale[:, None]).astype(jnp.bfloat16)
    b_fold = params["patch_b"] + row_shift @ params["patch_w"]

    # ---- patch extraction (Conv2d k=16,s=16 == per-patch matmul) ------------
    p = x.reshape(B, C, gh, PATCH, gw, PATCH)
    p = jnp.transpose(p, (0, 2, 4, 1, 3, 5)).reshape(B * gh * gw, C * PATCH * PATCH)
    tokens = patch_embed_call(p, w_fold, b_fold.reshape(1, EMBED))
    tokens = tokens.reshape(B, gh * gw, EMBED)

    # ---- cls token + pos embed, pad token rows to a sublane multiple --------
    cls = jnp.broadcast_to(params["cls_token"], (B, 1, EMBED))
    x_tok = jnp.concatenate([cls, tokens], axis=1) + params["pos_embed"]
    T = gh * gw + 1
    T_pad = ((T + 7) // 8) * 8
    x_tok = jnp.pad(x_tok, ((0, 0), (0, T_pad - T), (0, 0)))

    # ---- fused 12-block backbone (single pallas_call) -----------------------
    x_tok = vit_backbone(x_tok, params["blocks"], t_valid=T)

    # ---- final LN + fc head on the cls token --------------------------------
    feat = x_tok[:, 0, :]                                         # (B, 384)
    return fc_head_call(feat, params)                             # (B, 5)


# =========================== deterministic init ==============================

def _xavier_uniform(key, fan_in, fan_out):
    limit = math.sqrt(6.0 / (fan_in + fan_out))
    return jax.random.uniform(key, (fan_in, fan_out), jnp.float32, -limit, limit)


def init_params(key, num_patches):
    ks = jax.random.split(key, 10)

    def nrm(k, shape):
        return 0.02 * jax.random.normal(k, shape, jnp.float32)

    kb = jax.random.split(ks[0], 4)
    blocks = dict(
        g1=jnp.ones((DEPTH, 1, EMBED), jnp.float32),
        b1=jnp.zeros((DEPTH, 1, EMBED), jnp.float32),
        wqkv=nrm(kb[0], (DEPTH, EMBED, 3 * EMBED)).astype(jnp.bfloat16),
        bqkv=jnp.zeros((DEPTH, 1, 3 * EMBED), jnp.float32),
        wproj=nrm(kb[1], (DEPTH, EMBED, EMBED)).astype(jnp.bfloat16),
        bproj=jnp.zeros((DEPTH, 1, EMBED), jnp.float32),
        g2=jnp.ones((DEPTH, 1, EMBED), jnp.float32),
        b2=jnp.zeros((DEPTH, 1, EMBED), jnp.float32),
        wfc1=nrm(kb[2], (DEPTH, EMBED, MLP_DIM)).astype(jnp.bfloat16),
        bfc1=jnp.zeros((DEPTH, 1, MLP_DIM), jnp.float32),
        wfc2=nrm(kb[3], (DEPTH, MLP_DIM, EMBED)).astype(jnp.bfloat16),
        bfc2=jnp.zeros((DEPTH, 1, EMBED), jnp.float32),
    )

    params = dict(
        # BatchNorm2d(3) (fresh module, eval mode); folded into patch embed
        bn2d_gamma=jnp.ones((3,), jnp.float32), bn2d_beta=jnp.zeros((3,), jnp.float32),
        bn2d_mean=jnp.zeros((3,), jnp.float32), bn2d_var=jnp.ones((3,), jnp.float32),
        # ViT backbone (synthetic weights instead of timm pretrained)
        patch_w=nrm(ks[1], (3 * PATCH * PATCH, EMBED)),
        patch_b=jnp.zeros((EMBED,), jnp.float32),
        cls_token=nrm(ks[2], (1, 1, EMBED)),
        pos_embed=nrm(ks[3], (1, num_patches + 1, EMBED)),
        blocks=blocks,
        norm_g=jnp.ones((EMBED,), jnp.float32), norm_b=jnp.zeros((EMBED,), jnp.float32),
        # fc head
        head=dict(
            w1=_xavier_uniform(ks[4], EMBED, HIDDEN).astype(jnp.bfloat16),
            b1=jnp.full((HIDDEN,), 0.01, jnp.float32),
            bn_gamma=jnp.ones((HIDDEN,), jnp.float32),
            bn_beta=jnp.zeros((HIDDEN,), jnp.float32),
            bn_mean=jnp.zeros((HIDDEN,), jnp.float32),
            bn_var=jnp.ones((HIDDEN,), jnp.float32),
            w2=_xavier_uniform(ks[5], HIDDEN, TARGETS).astype(jnp.bfloat16),
            b2=jnp.full((TARGETS,), 0.01, jnp.float32),
        ),
    )
    return params


# =========================== main ============================================

if __name__ == "__main__":
    key = jax.random.PRNGKey(0)
    k_x, k_p = jax.random.split(key)

    # small synthetic image: B=2, C=3, 32x32 -> 2x2=4 patches (+ cls = 5 tokens)
    B, H, W = 2, 32, 32
    x = jax.random.normal(k_x, (B, 3, H, W), jnp.float32)
    num_patches = (H // PATCH) * (W // PATCH)

    params = init_params(k_p, num_patches)

    fwd = jax.jit(prediction_model_forward)
    out = fwd(x, params)
    out = jax.block_until_ready(out)

    assert out.shape == (B, TARGETS) and out.dtype == jnp.float32
    assert bool(jnp.all(jnp.isfinite(out)))
    print("KERNEL_OK")
</pallas_src>

<mosaic_0001>
module attributes {stable_mosaic.version = 11 : i64} {
  func.func @_linear_kernel(%arg0: i32, %arg1: memref<8x768xf32, #tpu.memory_space<vmem>>, %arg2: memref<768x384xbf16, #tpu.memory_space<vmem>>, %arg3: memref<1x384xf32, #tpu.memory_space<vmem>>, %arg4: memref<8x384xf32, #tpu.memory_space<vmem>>) attributes {dimension_semantics = [#tpu.dimension_semantics<arbitrary>], iteration_bounds = array<i64: 1>, scalar_prefetch = 0 : i64, scratch_operands = 0 : i64, tpu.core_type = #tpu.core_type<tc>, window_params = [{pipeline_mode = #tpu.pipeline_mode<synchronous>, transform_indices = @transform_0, window_bounds = array<i64: 8, 768>}, {pipeline_mode = #tpu.pipeline_mode<synchronous>, transform_indices = @transform_1, window_bounds = array<i64: 768, 384>}, {pipeline_mode = #tpu.pipeline_mode<synchronous>, transform_indices = @transform_2, window_bounds = array<i64: 1, 384>}, {pipeline_mode = #tpu.pipeline_mode<synchronous>, transform_indices = @transform_3, window_bounds = array<i64: 8, 384>}]} {
    %c0 = arith.constant 0 : index
    %c0_0 = arith.constant 0 : index
    %0 = vector.load %arg1[%c0, %c0_0] : memref<8x768xf32, #tpu.memory_space<vmem>>, vector<8x768xf32>
    %1 = arith.truncf %0 : vector<8x768xf32> to vector<8x768xbf16>
    %c0_1 = arith.constant 0 : index
    %c0_2 = arith.constant 0 : index
    %2 = vector.load %arg2[%c0_1, %c0_2] : memref<768x384xbf16, #tpu.memory_space<vmem>>, vector<768x384xbf16>
    %cst = arith.constant dense<0.000000e+00> : vector<8x384xf32>
    %3 = tpu.matmul %1, %2, %cst {dimension_numbers = #tpu.dot_dimension_numbers<[1], [0], [0], [1], [0, 0, 1, 1], [], []>} : vector<8x768xbf16>, vector<768x384xbf16>, vector<8x384xf32> -> vector<8x384xf32>
    %c0_3 = arith.constant 0 : index
    %c0_4 = arith.constant 0 : index
    %4 = vector.load %arg3[%c0_3, %c0_4] : memref<1x384xf32, #tpu.memory_space<vmem>>, vector<1x384xf32>
    %5 = vector.broadcast %4 : vector<1x384xf32> to vector<8x384xf32>
    %6 = arith.addf %3, %5 : vector<8x384xf32>
    %c0_5 = arith.constant 0 : index
    %c0_6 = arith.constant 0 : index
    %7 = vector.load %arg4[%c0_5, %c0_6] : memref<8x384xf32, #tpu.memory_space<vmem>>, vector<8x384xf32>
    tpu.vector_store %arg4[%c0_5, %c0_6], %6 {strides = array<i32>} : memref<8x384xf32, #tpu.memory_space<vmem>>, vector<8x384xf32>,
    return
  }
  func.func @transform_0(%arg0: i32) -> (i32, i32) {
    %c0_i32 = arith.constant 0 : i32
    %c0_i32_0 = arith.constant 0 : i32
    %c0_i32_1 = arith.constant 0 : i32
    return %c0_i32, %c0_i32_0 : i32, i32
  }
  func.func @transform_1(%arg0: i32) -> (i32, i32) {
    %c0_i32 = arith.constant 0 : i32
    %c0_i32_0 = arith.constant 0 : i32
    %c0_i32_1 = arith.constant 0 : i32
    return %c0_i32, %c0_i32_0 : i32, i32
  }
  func.func @transform_2(%arg0: i32) -> (i32, i32) {
    %c0_i32 = arith.constant 0 : i32
    %c0_i32_0 = arith.constant 0 : i32
    %c0_i32_1 = arith.constant 0 : i32
    return %c0_i32, %c0_i32_0 : i32, i32
  }
  func.func @transform_3(%arg0: i32) -> (i32, i32) {
    %c0_i32 = arith.constant 0 : i32
    %c0_i32_0 = arith.constant 0 : i32
    %c0_i32_1 = arith.constant 0 : i32
    return %c0_i32, %c0_i32_0 : i32, i32
  }
}

module attributes {stable_mosaic.version = 11 : i64} {
  func.func @_backbone_kernel(%arg0: i32, %arg1: i32, %arg2: memref<1x8x384xf32, #tpu.memory_space<vmem>>, %arg3: memref<1x1x384xf32, #tpu.memory_space<vmem>>, %arg4: memref<1x1x384xf32, #tpu.memory_space<vmem>>, %arg5: memref<1x384x1152xbf16, #tpu.memory_space<vmem>>, %arg6: memref<1x1x1152xf32, #tpu.memory_space<vmem>>, %arg7: memref<1x384x384xbf16, #tpu.memory_space<vmem>>, %arg8: memref<1x1x384xf32, #tpu.memory_space<vmem>>, %arg9: memref<1x1x384xf32, #tpu.memory_space<vmem>>, %arg10: memref<1x1x384xf32, #tpu.memory_space<vmem>>, %arg11: memref<1x384x1536xbf16, #tpu.memory_space<vmem>>, %arg12: memref<1x1x1536xf32, #tpu.memory_space<vmem>>, %arg13: memref<1x1536x384xbf16, #tpu.memory_space<vmem>>, %arg14: memref<1x1x384xf32, #tpu.memory_space<vmem>>, %arg15: memref<1x8x384xf32, #tpu.memory_space<vmem>>, %arg16: memref<8x384xf32, #tpu.memory_space<vmem>>) attributes {dimension_semantics = [#tpu.dimension_semantics<parallel>, #tpu.dimension_semantics<arbitrary>], iteration_bounds = array<i64: 2, 12>, scalar_prefetch = 0 : i64, scratch_operands = 1 : i64, tpu.core_type = #tpu.core_type<tc>, window_params = [{transform_indices = @transform_0, window_bounds = array<i64: 1, 8, 384>}, {transform_indices = @transform_1, window_bounds = array<i64: 1, 1, 384>}, {transform_indices = @transform_2, window_bounds = array<i64: 1, 1, 384>}, {transform_indices = @transform_3, window_bounds = array<i64: 1, 384, 1152>}, {transform_indices = @transform_4, window_bounds = array<i64: 1, 1, 1152>}, {transform_indices = @transform_5, window_bounds = array<i64: 1, 384, 384>}, {transform_indices = @transform_6, window_bounds = array<i64: 1, 1, 384>}, {transform_indices = @transform_7, window_bounds = array<i64: 1, 1, 384>}, {transform_indices = @transform_8, window_bounds = array<i64: 1, 1, 384>}, {transform_indices = @transform_9, window_bounds = array<i64: 1, 384, 1536>}, {transform_indices = @transform_10, window_bounds = array<i64: 1, 1, 1536>}, {transform_indices = @transform_11, window_bounds = array<i64: 1, 1536, 384>}, {transform_indices = @transform_12, window_bounds = array<i64: 1, 1, 384>}, {transform_indices = @transform_13, window_bounds = array<i64: 1, 8, 384>}]} {
    %c0_i32 = arith.constant 0 : i32
    %0 = arith.cmpi eq, %arg1, %c0_i32 : i32
    %1 = arith.extui %0 : i1 to i32
    %c0_i32_0 = arith.constant 0 : i32
    %2 = arith.cmpi ne, %1, %c0_i32_0 : i32
    scf.if %2 {
      %c0_104 = arith.constant 0 : index
      %c0_105 = arith.constant 0 : index
      %c0_106 = arith.constant 0 : index
      %277 = vector.load %arg2[%c0_104, %c0_105, %c0_106] : memref<1x8x384xf32, #tpu.memory_space<vmem>>, vector<1x8x384xf32>
      %278 = vector.shape_cast %277 : vector<1x8x384xf32> to vector<8x384xf32>
      %c0_107 = arith.constant 0 : index
      %c0_108 = arith.constant 0 : index
      %279 = vector.load %arg16[%c0_107, %c0_108] : memref<8x384xf32, #tpu.memory_space<vmem>>, vector<8x384xf32>
      tpu.vector_store %arg16[%c0_107, %c0_108], %278 {strides = array<i32>} : memref<8x384xf32, #tpu.memory_space<vmem>>, vector<8x384xf32>,
    } else {
    }
    %c0 = arith.constant 0 : index
    %c0_1 = arith.constant 0 : index
    %3 = vector.load %arg16[%c0, %c0_1] : memref<8x384xf32, #tpu.memory_space<vmem>>, vector<8x384xf32>
    %c0_2 = arith.constant 0 : index
    %c0_3 = arith.constant 0 : index
    %c0_4 = arith.constant 0 : index
    %4 = vector.load %arg3[%c0_2, %c0_3, %c0_4] : memref<1x1x384xf32, #tpu.memory_space<vmem>>, vector<1x1x384xf32>
    %5 = vector.shape_cast %4 : vector<1x1x384xf32> to vector<1x384xf32>
    %c0_5 = arith.constant 0 : index
    %c0_6 = arith.constant 0 : index
    %c0_7 = arith.constant 0 : index
    %6 = vector.load %arg4[%c0_5, %c0_6, %c0_7] : memref<1x1x384xf32, #tpu.memory_space<vmem>>, vector<1x1x384xf32>
    %7 = vector.shape_cast %6 : vector<1x1x384xf32> to vector<1x384xf32>
    %cst = arith.constant dense<0.000000e+00> : vector<8xf32>
    %8 = vector.multi_reduction <add>, %3, %cst [1] : vector<8x384xf32> to vector<8xf32>
    %9 = vector.shape_cast %8 : vector<8xf32> to vector<8x1xf32>
    %cst_8 = arith.constant 3.840000e+02 : f32
    %10 = vector.broadcast %cst_8 : f32 to vector<8x1xf32>
    %11 = arith.divf %9, %10 : vector<8x1xf32>
    %12 = vector.broadcast %11 : vector<8x1xf32> to vector<8x384xf32>
    %13 = arith.subf %3, %12 : vector<8x384xf32>
    %14 = arith.mulf %13, %13 : vector<8x384xf32>
    %cst_9 = arith.constant dense<0.000000e+00> : vector<8xf32>
    %15 = vector.multi_reduction <add>, %14, %cst_9 [1] : vector<8x384xf32> to vector<8xf32>
    %16 = vector.shape_cast %15 : vector<8xf32> to vector<8x1xf32>
    %cst_10 = arith.constant 3.840000e+02 : f32
    %17 = vector.broadcast %cst_10 : f32 to vector<8x1xf32>
    %18 = arith.divf %16, %17 : vector<8x1xf32>
    %19 = vector.broadcast %11 : vector<8x1xf32> to vector<8x384xf32>
    %20 = arith.subf %3, %19 : vector<8x384xf32>
    %cst_11 = arith.constant 9.99999997E-7 : f32
    %21 = vector.broadcast %cst_11 : f32 to vector<8x1xf32>
    %22 = arith.addf %18, %21 : vector<8x1xf32>
    %23 = math.rsqrt %22 : vector<8x1xf32>
    %24 = vector.broadcast %23 : vector<8x1xf32> to vector<8x384xf32>
    %25 = arith.mulf %20, %24 : vector<8x384xf32>
    %26 = vector.broadcast %5 : vector<1x384xf32> to vector<8x384xf32>
    %27 = arith.mulf %25, %26 : vector<8x384xf32>
    %28 = vector.broadcast %7 : vector<1x384xf32> to vector<8x384xf32>
    %29 = arith.addf %27, %28 : vector<8x384xf32>
    %30 = arith.truncf %29 : vector<8x384xf32> to vector<8x384xbf16>
    %c0_12 = arith.constant 0 : index
    %c0_13 = arith.constant 0 : index
    %c0_14 = arith.constant 0 : index
    %31 = vector.load %arg5[%c0_12, %c0_13, %c0_14] : memref<1x384x1152xbf16, #tpu.memory_space<vmem>>, vector<1x384x1152xbf16>
    %32 = vector.shape_cast %31 : vector<1x384x1152xbf16> to vector<384x1152xbf16>
    %cst_15 = arith.constant dense<0.000000e+00> : vector<8x1152xf32>
    %33 = tpu.matmul %30, %32, %cst_15 {dimension_numbers = #tpu.dot_dimension_numbers<[1], [0], [0], [1], [0, 0, 1, 1], [], []>} : vector<8x384xbf16>, vector<384x1152xbf16>, vector<8x1152xf32> -> vector<8x1152xf32>
    %c0_16 = arith.constant 0 : index
    %c0_17 = arith.constant 0 : index
    %c0_18 = arith.constant 0 : index
    %34 = vector.load %arg6[%c0_16, %c0_17, %c0_18] : memref<1x1x1152xf32, #tpu.memory_space<vmem>>, vector<1x1x1152xf32>
    %35 = vector.shape_cast %34 : vector<1x1x1152xf32> to vector<1x1152xf32>
    %36 = vector.broadcast %35 : vector<1x1152xf32> to vector<8x1152xf32>
    %37 = arith.addf %33, %36 : vector<8x1152xf32>
    %38 = vector.extract_strided_slice %37 {offsets = [0, 0], sizes = [8, 384], strides = [1, 1]} : vector<8x1152xf32> to vector<8x384xf32>
    %39 = vector.extract_strided_slice %37 {offsets = [0, 384], sizes = [8, 384], strides = [1, 1]} : vector<8x1152xf32> to vector<8x384xf32>
    %40 = vector.extract_strided_slice %37 {offsets = [0, 768], sizes = [8, 384], strides = [1, 1]} : vector<8x1152xf32> to vector<8x384xf32>
    %41 = tpu.iota {dimensions = array<i32: 1>} : vector<8x8xi32>
    %c5_i32 = arith.constant 5 : i32
    %42 = vector.broadcast %c5_i32 : i32 to vector<8x8xi32>
    %43 = arith.cmpi slt, %41, %42 : vector<8x8xi32>
    %cst_19 = arith.constant 0.000000e+00 : f32
    %cst_20 = arith.constant -1.000000e+30 : f32
    %44 = vector.broadcast %cst_19 : f32 to vector<8x8xf32>
    %45 = vector.broadcast %cst_20 : f32 to vector<8x8xf32>
    %46 = arith.select %43, %44, %45 : vector<8x8xi1>, vector<8x8xf32>
    %47 = vector.extract_strided_slice %38 {offsets = [0, 0], sizes = [8, 64], strides = [1, 1]} : vector<8x384xf32> to vector<8x64xf32>
    %48 = arith.truncf %47 : vector<8x64xf32> to vector<8x64xbf16>
    %49 = vector.extract_strided_slice %39 {offsets = [0, 0], sizes = [8, 64], strides = [1, 1]} : vector<8x384xf32> to vector<8x64xf32>
    %50 = arith.truncf %49 : vector<8x64xf32> to vector<8x64xbf16>
    %51 = vector.extract_strided_slice %40 {offsets = [0, 0], sizes = [8, 64], strides = [1, 1]} : vector<8x384xf32> to vector<8x64xf32>
    %52 = arith.truncf %51 : vector<8x64xf32> to vector<8x64xbf16>
    %cst_21 = arith.constant dense<0.000000e+00> : vector<8x8xf32>
    %53 = tpu.matmul %48, %50, %cst_21 {dimension_numbers = #tpu.dot_dimension_numbers<[1], [1], [0], [0], [0, 0, 1, 0], [], []>} : vector<8x64xbf16>, vector<8x64xbf16>, vector<8x8xf32> -> vector<8x8xf32>
    %cst_22 = arith.constant 1.250000e-01 : f32
    %54 = vector.broadcast %cst_22 : f32 to vector<8x8xf32>
    %55 = arith.mulf %53, %54 : vector<8x8xf32>
    %56 = arith.addf %55, %46 : vector<8x8xf32>
    %cst_23 = arith.constant dense<0xFF800000> : vector<8xf32>
    %57 = vector.multi_reduction <maximumf>, %56, %cst_23 [1] : vector<8x8xf32> to vector<8xf32>
    %58 = vector.shape_cast %57 : vector<8xf32> to vector<8x1xf32>
    %59 = vector.broadcast %58 : vector<8x1xf32> to vector<8x8xf32>
    %60 = arith.subf %56, %59 : vector<8x8xf32>
    %61 = math.exp %60 : vector<8x8xf32>
    %cst_24 = arith.constant dense<0.000000e+00> : vector<8xf32>
    %62 = vector.multi_reduction <add>, %61, %cst_24 [1] : vector<8x8xf32> to vector<8xf32>
    %63 = vector.shape_cast %62 : vector<8xf32> to vector<8x1xf32>
    %64 = tpu.reciprocal %63 {approx = true} : vector<8x1xf32> -> vector<8x1xf32>
    %65 = vector.broadcast %64 : vector<8x1xf32> to vector<8x8xf32>
    %66 = arith.mulf %61, %65 : vector<8x8xf32>
    %67 = arith.truncf %66 : vector<8x8xf32> to vector<8x8xbf16>
    %cst_25 = arith.constant dense<0.000000e+00> : vector<8x64xf32>
    %68 = tpu.matmul %67, %52, %cst_25 {dimension_numbers = #tpu.dot_dimension_numbers<[1], [0], [0], [1], [0, 0, 1, 1], [], []>} : vector<8x8xbf16>, vector<8x64xbf16>, vector<8x64xf32> -> vector<8x64xf32>
    %69 = vector.extract_strided_slice %38 {offsets = [0, 64], sizes = [8, 64], strides = [1, 1]} : vector<8x384xf32> to vector<8x64xf32>
    %70 = arith.truncf %69 : vector<8x64xf32> to vector<8x64xbf16>
    %71 = vector.extract_strided_slice %39 {offsets = [0, 64], sizes = [8, 64], strides = [1, 1]} : vector<8x384xf32> to vector<8x64xf32>
    %72 = arith.truncf %71 : vector<8x64xf32> to vector<8x64xbf16>
    %73 = vector.extract_strided_slice %40 {offsets = [0, 64], sizes = [8, 64], strides = [1, 1]} : vector<8x384xf32> to vector<8x64xf32>
    %74 = arith.truncf %73 : vector<8x64xf32> to vector<8x64xbf16>
    %cst_26 = arith.constant dense<0.000000e+00> : vector<8x8xf32>
    %75 = tpu.matmul %70, %72, %cst_26 {dimension_numbers = #tpu.dot_dimension_numbers<[1], [1], [0], [0], [0, 0, 1, 0], [], []>} : vector<8x64xbf16>, vector<8x64xbf16>, vector<8x8xf32> -> vector<8x8xf32>
    %cst_27 = arith.constant 1.250000e-01 : f32
    %76 = vector.broadcast %cst_27 : f32 to vector<8x8xf32>
    %77 = arith.mulf %75, %76 : vector<8x8xf32>
    %78 = arith.addf %77, %46 : vector<8x8xf32>
    %cst_28 = arith.constant dense<0xFF800000> : vector<8xf32>
    %79 = vector.multi_reduction <maximumf>, %78, %cst_28 [1] : vector<8x8xf32> to vector<8xf32>
    %80 = vector.shape_cast %79 : vector<8xf32> to vector<8x1xf32>
    %81 = vector.broadcast %80 : vector<8x1xf32> to vector<8x8xf32>
    %82 = arith.subf %78, %81 : vector<8x8xf32>
    %83 = math.exp %82 : vector<8x8xf32>
    %cst_29 = arith.constant dense<0.000000e+00> : vector<8xf32>
    %84 = vector.multi_reduction <add>, %83, %cst_29 [1] : vector<8x8xf32> to vector<8xf32>
    %85 = vector.shape_cast %84 : vector<8xf32> to vector<8x1xf32>
    %86 = tpu.reciprocal %85 {approx = true} : vector<8x1xf32> -> vector<8x1xf32>
    %87 = vector.broadcast %86 : vector<8x1xf32> to vector<8x8xf32>
    %88 = arith.mulf %83, %87 : vector<8x8xf32>
    %89 = arith.truncf %88 : vector<8x8xf32> to vector<8x8xbf16>
    %cst_30 = arith.constant dense<0.000000e+00> : vector<8x64xf32>
    %90 = tpu.matmul %89, %74, %cst_30 {dimension_numbers = #tpu.dot_dimension_numbers<[1], [0], [0], [1], [0, 0, 1, 1], [], []>} : vector<8x8xbf16>, vector<8x64xbf16>, vector<8x64xf32> -> vector<8x64xf32>
    %91 = vector.extract_strided_slice %38 {offsets = [0, 128], sizes = [8, 64], strides = [1, 1]} : vector<8x384xf32> to vector<8x64xf32>
    %92 = arith.truncf %91 : vector<8x64xf32> to vector<8x64xbf16>
    %93 = vector.extract_strided_slice %39 {offsets = [0, 128], sizes = [8, 64], strides = [1, 1]} : vector<8x384xf32> to vector<8x64xf32>
    %94 = arith.truncf %93 : vector<8x64xf32> to vector<8x64xbf16>
    %95 = vector.extract_strided_slice %40 {offsets = [0, 128], sizes = [8, 64], strides = [1, 1]} : vector<8x384xf32> to vector<8x64xf32>
    %96 = arith.truncf %95 : vector<8x64xf32> to vector<8x64xbf16>
    %cst_31 = arith.constant dense<0.000000e+00> : vector<8x8xf32>
    %97 = tpu.matmul %92, %94, %cst_31 {dimension_numbers = #tpu.dot_dimension_numbers<[1], [1], [0], [0], [0, 0, 1, 0], [], []>} : vector<8x64xbf16>, vector<8x64xbf16>, vector<8x8xf32> -> vector<8x8xf32>
    %cst_32 = arith.constant 1.250000e-01 : f32
    %98 = vector.broadcast %cst_32 : f32 to vector<8x8xf32>
    %99 = arith.mulf %97, %98 : vector<8x8xf32>
    %100 = arith.addf %99, %46 : vector<8x8xf32>
    %cst_33 = arith.constant dense<0xFF800000> : vector<8xf32>
    %101 = vector.multi_reduction <maximumf>, %100, %cst_33 [1] : vector<8x8xf32> to vector<8xf32>
    %102 = vector.shape_cast %101 : vector<8xf32> to vector<8x1xf32>
    %103 = vector.broadcast %102 : vector<8x1xf32> to vector<8x8xf32>
    %104 = arith.subf %100, %103 : vector<8x8xf32>
    %105 = math.exp %104 : vector<8x8xf32>
    %cst_34 = arith.constant dense<0.000000e+00> : vector<8xf32>
    %106 = vector.multi_reduction <add>, %105, %cst_34 [1] : vector<8x8xf32> to vector<8xf32>
    %107 = vector.shape_cast %106 : vector<8xf32> to vector<8x1xf32>
    %108 = tpu.reciprocal %107 {approx = true} : vector<8x1xf32> -> vector<8x1xf32>
    %109 = vector.broadcast %108 : vector<8x1xf32> to vector<8x8xf32>
    %110 = arith.mulf %105, %109 : vector<8x8xf32>
    %111 = arith.truncf %110 : vector<8x8xf32> to vector<8x8xbf16>
    %cst_35 = arith.constant dense<0.000000e+00> : vector<8x64xf32>
    %112 = tpu.matmul %111, %96, %cst_35 {dimension_numbers = #tpu.dot_dimension_numbers<[1], [0], [0], [1], [0, 0, 1, 1], [], []>} : vector<8x8xbf16>, vector<8x64xbf16>, vector<8x64xf32> -> vector<8x64xf32>
    %113 = vector.extract_strided_slice %38 {offsets = [0, 192], sizes = [8, 64], strides = [1, 1]} : vector<8x384xf32> to vector<8x64xf32>
    %114 = arith.truncf %113 : vector<8x64xf32> to vector<8x64xbf16>
    %115 = vector.extract_strided_slice %39 {offsets = [0, 192], sizes = [8, 64], strides = [1, 1]} : vector<8x384xf32> to vector<8x64xf32>
    %116 = arith.truncf %115 : vector<8x64xf32> to vector<8x64xbf16>
    %117 = vector.extract_strided_slice %40 {offsets = [0, 192], sizes = [8, 64], strides = [1, 1]} : vector<8x384xf32> to vector<8x64xf32>
    %118 = arith.truncf %117 : vector<8x64xf32> to vector<8x64xbf16>
    %cst_36 = arith.constant dense<0.000000e+00> : vector<8x8xf32>
    %119 = tpu.matmul %114, %116, %cst_36 {dimension_numbers = #tpu.dot_dimension_numbers<[1], [1], [0], [0], [0, 0, 1, 0], [], []>} : vector<8x64xbf16>, vector<8x64xbf16>, vector<8x8xf32> -> vector<8x8xf32>
    %cst_37 = arith.constant 1.250000e-01 : f32
    %120 = vector.broadcast %cst_37 : f32 to vector<8x8xf32>
    %121 = arith.mulf %119, %120 : vector<8x8xf32>
    %122 = arith.addf %121, %46 : vector<8x8xf32>
    %cst_38 = arith.constant dense<0xFF800000> : vector<8xf32>
    %123 = vector.multi_reduction <maximumf>, %122, %cst_38 [1] : vector<8x8xf32> to vector<8xf32>
    %124 = vector.shape_cast %123 : vector<8xf32> to vector<8x1xf32>
    %125 = vector.broadcast %124 : vector<8x1xf32> to vector<8x8xf32>
    %126 = arith.subf %122, %125 : vector<8x8xf32>
    %127 = math.exp %126 : vector<8x8xf32>
    %cst_39 = arith.constant dense<0.000000e+00> : vector<8xf32>
    %128 = vector.multi_reduction <add>, %127, %cst_39 [1] : vector<8x8xf32> to vector<8xf32>
    %129 = vector.shape_cast %128 : vector<8xf32> to vector<8x1xf32>
    %130 = tpu.reciprocal %129 {approx = true} : vector<8x1xf32> -> vector<8x1xf32>
    %131 = vector.broadcast %130 : vector<8x1xf32> to vector<8x8xf32>
    %132 = arith.mulf %127, %131 : vector<8x8xf32>
    %133 = arith.truncf %132 : vector<8x8xf32> to vector<8x8xbf16>
    %cst_40 = arith.constant dense<0.000000e+00> : vector<8x64xf32>
    %134 = tpu.matmul %133, %118, %cst_40 {dimension_numbers = #tpu.dot_dimension_numbers<[1], [0], [0], [1], [0, 0, 1, 1], [], []>} : vector<8x8xbf16>, vector<8x64xbf16>, vector<8x64xf32> -> vector<8x64xf32>
    %135 = vector.extract_strided_slice %38 {offsets = [0, 256], sizes = [8, 64], strides = [1, 1]} : vector<8x384xf32> to vector<8x64xf32>
    %136 = arith.truncf %135 : vector<8x64xf32> to vector<8x64xbf16>
    %137 = vector.extract_strided_slice %39 {offsets = [0, 256], sizes = [8, 64], strides = [1, 1]} : vector<8x384xf32> to vector<8x64xf32>
    %138 = arith.truncf %137 : vector<8x64xf32> to vector<8x64xbf16>
    %139 = vector.extract_strided_slice %40 {offsets = [0, 256], sizes = [8, 64], strides = [1, 1]} : vector<8x384xf32> to vector<8x64xf32>
    %140 = arith.truncf %139 : vector<8x64xf32> to vector<8x64xbf16>
    %cst_41 = arith.constant dense<0.000000e+00> : vector<8x8xf32>
    %141 = tpu.matmul %136, %138, %cst_41 {dimension_numbers = #tpu.dot_dimension_numbers<[1], [1], [0], [0], [0, 0, 1, 0], [], []>} : vector<8x64xbf16>, vector<8x64xbf16>, vector<8x8xf32> -> vector<8x8xf32>
    %cst_42 = arith.constant 1.250000e-01 : f32
    %142 = vector.broadcast %cst_42 : f32 to vector<8x8xf32>
    %143 = arith.mulf %141, %142 : vector<8x8xf32>
    %144 = arith.addf %143, %46 : vector<8x8xf32>
    %cst_43 = arith.constant dense<0xFF800000> : vector<8xf32>
    %145 = vector.multi_reduction <maximumf>, %144, %cst_43 [1] : vector<8x8xf32> to vector<8xf32>
    %146 = vector.shape_cast %145 : vector<8xf32> to vector<8x1xf32>
    %147 = vector.broadcast %146 : vector<8x1xf32> to vector<8x8xf32>
    %148 = arith.subf %144, %147 : vector<8x8xf32>
    %149 = math.exp %148 : vector<8x8xf32>
    %cst_44 = arith.constant dense<0.000000e+00> : vector<8xf32>
    %150 = vector.multi_reduction <add>, %149, %cst_44 [1] : vector<8x8xf32> to vector<8xf32>
    %151 = vector.shape_cast %150 : vector<8xf32> to vector<8x1xf32>
    %152 = tpu.reciprocal %151 {approx = true} : vector<8x1xf32> -> vector<8x1xf32>
    %153 = vector.broadcast %152 : vector<8x1xf32> to vector<8x8xf32>
    %154 = arith.mulf %149, %153 : vector<8x8xf32>
    %155 = arith.truncf %154 : vector<8x8xf32> to vector<8x8xbf16>
    %cst_45 = arith.constant dense<0.000000e+00> : vector<8x64xf32>
    %156 = tpu.matmul %155, %140, %cst_45 {dimension_numbers = #tpu.dot_dimension_numbers<[1], [0], [0], [1], [0, 0, 1, 1], [], []>} : vector<8x8xbf16>, vector<8x64xbf16>, vector<8x64xf32> -> vector<8x64xf32>
    %157 = vector.extract_strided_slice %38 {offsets = [0, 320], sizes = [8, 64], strides = [1, 1]} : vector<8x384xf32> to vector<8x64xf32>
    %158 = arith.truncf %157 : vector<8x64xf32> to vector<8x64xbf16>
    %159 = vector.extract_strided_slice %39 {offsets = [0, 320], sizes = [8, 64], strides = [1, 1]} : vector<8x384xf32> to vector<8x64xf32>
    %160 = arith.truncf %159 : vector<8x64xf32> to vector<8x64xbf16>
    %161 = vector.extract_strided_slice %40 {offsets = [0, 320], sizes = [8, 64], strides = [1, 1]} : vector<8x384xf32> to vector<8x64xf32>
    %162 = arith.truncf %161 : vector<8x64xf32> to vector<8x64xbf16>
    %cst_46 = arith.constant dense<0.000000e+00> : vector<8x8xf32>
    %163 = tpu.matmul %158, %160, %cst_46 {dimension_numbers = #tpu.dot_dimension_numbers<[1], [1], [0], [0], [0, 0, 1, 0], [], []>} : vector<8x64xbf16>, vector<8x64xbf16>, vector<8x8xf32> -> vector<8x8xf32>
    %cst_47 = arith.constant 1.250000e-01 : f32
    %164 = vector.broadcast %cst_47 : f32 to vector<8x8xf32>
    %165 = arith.mulf %163, %164 : vector<8x8xf32>
    %166 = arith.addf %165, %46 : vector<8x8xf32>
    %cst_48 = arith.constant dense<0xFF800000> : vector<8xf32>
    %167 = vector.multi_reduction <maximumf>, %166, %cst_48 [1] : vector<8x8xf32> to vector<8xf32>
    %168 = vector.shape_cast %167 : vector<8xf32> to vector<8x1xf32>
    %169 = vector.broadcast %168 : vector<8x1xf32> to vector<8x8xf32>
    %170 = arith.subf %166, %169 : vector<8x8xf32>
    %171 = math.exp %170 : vector<8x8xf32>
    %cst_49 = arith.constant dense<0.000000e+00> : vector<8xf32>
    %172 = vector.multi_reduction <add>, %171, %cst_49 [1] : vector<8x8xf32> to vector<8xf32>
    %173 = vector.shape_cast %172 : vector<8xf32> to vector<8x1xf32>
    %174 = tpu.reciprocal %173 {approx = true} : vector<8x1xf32> -> vector<8x1xf32>
    %175 = vector.broadcast %174 : vector<8x1xf32> to vector<8x8xf32>
    %176 = arith.mulf %171, %175 : vector<8x8xf32>
    %177 = arith.truncf %176 : vector<8x8xf32> to vector<8x8xbf16>
    %cst_50 = arith.constant dense<0.000000e+00> : vector<8x64xf32>
    %178 = tpu.matmul %177, %162, %cst_50 {dimension_numbers = #tpu.dot_dimension_numbers<[1], [0], [0], [1], [0, 0, 1, 1], [], []>} : vector<8x8xbf16>, vector<8x64xbf16>, vector<8x64xf32> -> vector<8x64xf32>
    %179 = tpu.concatenate %68, %90, %112, %134, %156, %178 in 1 : vector<8x64xf32>, vector<8x64xf32>, vector<8x64xf32>, vector<8x64xf32>, vector<8x64xf32>, vector<8x64xf32> -> vector<8x384xf32>
    %180 = arith.truncf %179 : vector<8x384xf32> to vector<8x384xbf16>
    %c0_51 = arith.constant 0 : index
    %c0_52 = arith.constant 0 : index
    %c0_53 = arith.constant 0 : index
    %181 = vector.load %arg7[%c0_51, %c0_52, %c0_53] : memref<1x384x384xbf16, #tpu.memory_space<vmem>>, vector<1x384x384xbf16>
    %182 = vector.shape_cast %181 : vector<1x384x384xbf16> to vector<384x384xbf16>
    %cst_54 = arith.constant dense<0.000000e+00> : vector<8x384xf32>
    %183 = tpu.matmul %180, %182, %cst_54 {dimension_numbers = #tpu.dot_dimension_numbers<[1], [0], [0], [1], [0, 0, 1, 1], [], []>} : vector<8x384xbf16>, vector<384x384xbf16>, vector<8x384xf32> -> vector<8x384xf32>
    %184 = arith.addf %3, %183 : vector<8x384xf32>
    %c0_55 = arith.constant 0 : index
    %c0_56 = arith.constant 0 : index
    %c0_57 = arith.constant 0 : index
    %185 = vector.load %arg8[%c0_55, %c0_56, %c0_57] : memref<1x1x384xf32, #tpu.memory_space<vmem>>, vector<1x1x384xf32>
    %186 = vector.shape_cast %185 : vector<1x1x384xf32> to vector<1x384xf32>
    %187 = vector.broadcast %186 : vector<1x384xf32> to vector<8x384xf32>
    %188 = arith.addf %184, %187 : vector<8x384xf32>
    %c0_58 = arith.constant 0 : index
    %c0_59 = arith.constant 0 : index
    %c0_60 = arith.constant 0 : index
    %189 = vector.load %arg9[%c0_58, %c0_59, %c0_60] : memref<1x1x384xf32, #tpu.memory_space<vmem>>, vector<1x1x384xf32>
    %190 = vector.shape_cast %189 : vector<1x1x384xf32> to vector<1x384xf32>
    %c0_61 = arith.constant 0 : index
    %c0_62 = arith.constant 0 : index
    %c0_63 = arith.constant 0 : index
    %191 = vector.load %arg10[%c0_61, %c0_62, %c0_63] : memref<1x1x384xf32, #tpu.memory_space<vmem>>, vector<1x1x384xf32>
    %192 = vector.shape_cast %191 : vector<1x1x384xf32> to vector<1x384xf32>
    %cst_64 = arith.constant dense<0.000000e+00> : vector<8xf32>
    %193 = vector.multi_reduction <add>, %188, %cst_64 [1] : vector<8x384xf32> to vector<8xf32>
    %194 = vector.shape_cast %193 : vector<8xf32> to vector<8x1xf32>
    %cst_65 = arith.constant 3.840000e+02 : f32
    %195 = vector.broadcast %cst_65 : f32 to vector<8x1xf32>
    %196 = arith.divf %194, %195 : vector<8x1xf32>
    %197 = vector.broadcast %196 : vector<8x1xf32> to vector<8x384xf32>
    %198 = arith.subf %188, %197 : vector<8x384xf32>
    %199 = arith.mulf %198, %198 : vector<8x384xf32>
    %cst_66 = arith.constant dense<0.000000e+00> : vector<8xf32>
    %200 = vector.multi_reduction <add>, %199, %cst_66 [1] : vector<8x384xf32> to vector<8xf32>
    %201 = vector.shape_cast %200 : vector<8xf32> to vector<8x1xf32>
    %cst_67 = arith.constant 3.840000e+02 : f32
    %202 = vector.broadcast %cst_67 : f32 to vector<8x1xf32>
    %203 = arith.divf %201, %202 : vector<8x1xf32>
    %204 = vector.broadcast %196 : vector<8x1xf32> to vector<8x384xf32>
    %205 = arith.subf %188, %204 : vector<8x384xf32>
    %cst_68 = arith.constant 9.99999997E-7 : f32
    %206 = vector.broadcast %cst_68 : f32 to vector<8x1xf32>
    %207 = arith.addf %203, %206 : vector<8x1xf32>
    %208 = math.rsqrt %207 : vector<8x1xf32>
    %209 = vector.broadcast %208 : vector<8x1xf32> to vector<8x384xf32>
    %210 = arith.mulf %205, %209 : vector<8x384xf32>
    %211 = vector.broadcast %190 : vector<1x384xf32> to vector<8x384xf32>
    %212 = arith.mulf %210, %211 : vector<8x384xf32>
    %213 = vector.broadcast %192 : vector<1x384xf32> to vector<8x384xf32>
    %214 = arith.addf %212, %213 : vector<8x384xf32>
    %215 = arith.truncf %214 : vector<8x384xf32> to vector<8x384xbf16>
    %c0_69 = arith.constant 0 : index
    %c0_70 = arith.constant 0 : index
    %c0_71 = arith.constant 0 : index
    %216 = vector.load %arg11[%c0_69, %c0_70, %c0_71] : memref<1x384x1536xbf16, #tpu.memory_space<vmem>>, vector<1x384x1536xbf16>
    %217 = vector.shape_cast %216 : vector<1x384x1536xbf16> to vector<384x1536xbf16>
    %cst_72 = arith.constant dense<0.000000e+00> : vector<8x1536xf32>
    %218 = tpu.matmul %215, %217, %cst_72 {dimension_numbers = #tpu.dot_dimension_numbers<[1], [0], [0], [1], [0, 0, 1, 1], [], []>} : vector<8x384xbf16>, vector<384x1536xbf16>, vector<8x1536xf32> -> vector<8x1536xf32>
    %c0_73 = arith.constant 0 : index
    %c0_74 = arith.constant 0 : index
    %c0_75 = arith.constant 0 : index
    %219 = vector.load %arg12[%c0_73, %c0_74, %c0_75] : memref<1x1x1536xf32, #tpu.memory_space<vmem>>, vector<1x1x1536xf32>
    %220 = vector.shape_cast %219 : vector<1x1x1536xf32> to vector<1x1536xf32>
    %221 = vector.broadcast %220 : vector<1x1536xf32> to vector<8x1536xf32>
    %222 = arith.addf %218, %221 : vector<8x1536xf32>
    %cst_76 = arith.constant 5.000000e-01 : f32
    %223 = vector.broadcast %cst_76 : f32 to vector<8x1536xf32>
    %224 = arith.mulf %223, %222 : vector<8x1536xf32>
    %cst_77 = arith.constant 0.707106769 : f32
    %225 = vector.broadcast %cst_77 : f32 to vector<8x1536xf32>
    %226 = arith.mulf %222, %225 : vector<8x1536xf32>
    %cst_78 = arith.constant 0.000000e+00 : f32
    %227 = vector.broadcast %cst_78 : f32 to vector<8x1536xf32>
    %228 = arith.cmpf oge, %226, %227 : vector<8x1536xf32>
    %cst_79 = arith.constant 1.000000e+00 : f32
    %cst_80 = arith.constant -1.000000e+00 : f32
    %229 = vector.broadcast %cst_79 : f32 to vector<8x1536xf32>
    %230 = vector.broadcast %cst_80 : f32 to vector<8x1536xf32>
    %231 = arith.select %228, %229, %230 : vector<8x1536xi1>, vector<8x1536xf32>
    %232 = math.absf %226 : vector<8x1536xf32>
    %cst_81 = arith.constant 0.327591091 : f32
    %233 = vector.broadcast %cst_81 : f32 to vector<8x1536xf32>
    %234 = arith.mulf %233, %232 : vector<8x1536xf32>
    %cst_82 = arith.constant 1.000000e+00 : f32
    %235 = vector.broadcast %cst_82 : f32 to vector<8x1536xf32>
    %236 = arith.addf %235, %234 : vector<8x1536xf32>
    %cst_83 = arith.constant 1.000000e+00 : f32
    %237 = vector.broadcast %cst_83 : f32 to vector<8x1536xf32>
    %238 = arith.divf %237, %236 : vector<8x1536xf32>
    %cst_84 = arith.constant 1.06140542 : f32
    %239 = vector.broadcast %cst_84 : f32 to vector<8x1536xf32>
    %240 = arith.mulf %239, %238 : vector<8x1536xf32>
    %cst_85 = arith.constant -1.45315206 : f32
    %241 = vector.broadcast %cst_85 : f32 to vector<8x1536xf32>
    %242 = arith.addf %240, %241 : vector<8x1536xf32>
    %243 = arith.mulf %242, %238 : vector<8x1536xf32>
    %cst_86 = arith.constant 1.42141378 : f32
    %244 = vector.broadcast %cst_86 : f32 to vector<8x1536xf32>
    %245 = arith.addf %243, %244 : vector<8x1536xf32>
    %246 = arith.mulf %245, %238 : vector<8x1536xf32>
    %cst_87 = arith.constant -0.284496725 : f32
    %247 = vector.broadcast %cst_87 : f32 to vector<8x1536xf32>
    %248 = arith.addf %246, %247 : vector<8x1536xf32>
    %249 = arith.mulf %248, %238 : vector<8x1536xf32>
    %cst_88 = arith.constant 0.254829586 : f32
    %250 = vector.broadcast %cst_88 : f32 to vector<8x1536xf32>
    %251 = arith.addf %249, %250 : vector<8x1536xf32>
    %252 = arith.mulf %251, %238 : vector<8x1536xf32>
    %cst_89 = arith.constant 0.000000e+00 : f32
    %253 = vector.broadcast %cst_89 : f32 to vector<8x1536xf32>
    %254 = arith.subf %253, %232 : vector<8x1536xf32>
    %255 = arith.mulf %254, %232 : vector<8x1536xf32>
    %256 = math.exp %255 : vector<8x1536xf32>
    %257 = arith.mulf %252, %256 : vector<8x1536xf32>
    %cst_90 = arith.constant 1.000000e+00 : f32
    %258 = vector.broadcast %cst_90 : f32 to vector<8x1536xf32>
    %259 = arith.subf %258, %257 : vector<8x1536xf32>
    %260 = arith.mulf %231, %259 : vector<8x1536xf32>
    %cst_91 = arith.constant 1.000000e+00 : f32
    %261 = vector.broadcast %cst_91 : f32 to vector<8x1536xf32>
    %262 = arith.addf %261, %260 : vector<8x1536xf32>
    %263 = arith.mulf %224, %262 : vector<8x1536xf32>
    %264 = arith.truncf %263 : vector<8x1536xf32> to vector<8x1536xbf16>
    %c0_92 = arith.constant 0 : index
    %c0_93 = arith.constant 0 : index
    %c0_94 = arith.constant 0 : index
    %265 = vector.load %arg13[%c0_92, %c0_93, %c0_94] : memref<1x1536x384xbf16, #tpu.memory_space<vmem>>, vector<1x1536x384xbf16>
    %266 = vector.shape_cast %265 : vector<1x1536x384xbf16> to vector<1536x384xbf16>
    %cst_95 = arith.constant dense<0.000000e+00> : vector<8x384xf32>
    %267 = tpu.matmul %264, %266, %cst_95 {dimension_numbers = #tpu.dot_dimension_numbers<[1], [0], [0], [1], [0, 0, 1, 1], [], []>} : vector<8x1536xbf16>, vector<1536x384xbf16>, vector<8x384xf32> -> vector<8x384xf32>
    %268 = arith.addf %188, %267 : vector<8x384xf32>
    %c0_96 = arith.constant 0 : index
    %c0_97 = arith.constant 0 : index
    %c0_98 = arith.constant 0 : index
    %269 = vector.load %arg14[%c0_96, %c0_97, %c0_98] : memref<1x1x384xf32, #tpu.memory_space<vmem>>, vector<1x1x384xf32>
    %270 = vector.shape_cast %269 : vector<1x1x384xf32> to vector<1x384xf32>
    %271 = vector.broadcast %270 : vector<1x384xf32> to vector<8x384xf32>
    %272 = arith.addf %268, %271 : vector<8x384xf32>
    %c0_99 = arith.constant 0 : index
    %c0_100 = arith.constant 0 : index
    %273 = vector.load %arg16[%c0_99, %c0_100] : memref<8x384xf32, #tpu.memory_space<vmem>>, vector<8x384xf32>
    tpu.vector_store %arg16[%c0_99, %c0_100], %272 {strides = array<i32>} : memref<8x384xf32, #tpu.memory_space<vmem>>, vector<8x384xf32>,
    %c0_101 = arith.constant 0 : index
    %c0_102 = arith.constant 0 : index
    %c0_103 = arith.constant 0 : index
    %274 = vector.load %arg15[%c0_101, %c0_102, %c0_103] : memref<1x8x384xf32, #tpu.memory_space<vmem>>, vector<1x8x384xf32>
    %275 = vector.shape_cast %274 : vector<1x8x384xf32> to vector<8x384xf32>
    %276 = vector.shape_cast %272 : vector<8x384xf32> to vector<1x8x384xf32>
    tpu.vector_store %arg15[%c0_101, %c0_102, %c0_103], %276 {strides = array<i32>} : memref<1x8x384xf32, #tpu.memory_space<vmem>>, vector<1x8x384xf32>,
    return
  }
  func.func @transform_0(%arg0: i32, %arg1: i32) -> (i32, i32, i32) {
    %c0_i32 = arith.constant 0 : i32
    %c0_i32_0 = arith.constant 0 : i32
    %c0_i32_1 = arith.constant 0 : i32
    return %arg0, %c0_i32, %c0_i32_0 : i32, i32, i32
  }
  func.func @transform_1(%arg0: i32, %arg1: i32) -> (i32, i32, i32) {
    %c0_i32 = arith.constant 0 : i32
    %c0_i32_0 = arith.constant 0 : i32
    %c0_i32_1 = arith.constant 0 : i32
    return %arg1, %c0_i32, %c0_i32_0 : i32, i32, i32
  }
  func.func @transform_2(%arg0: i32, %arg1: i32) -> (i32, i32, i32) {
    %c0_i32 = arith.constant 0 : i32
    %c0_i32_0 = arith.constant 0 : i32
    %c0_i32_1 = arith.constant 0 : i32
    return %arg1, %c0_i32, %c0_i32_0 : i32, i32, i32
  }
  func.func @transform_3(%arg0: i32, %arg1: i32) -> (i32, i32, i32) {
    %c0_i32 = arith.constant 0 : i32
    %c0_i32_0 = arith.constant 0 : i32
    %c0_i32_1 = arith.constant 0 : i32
    return %arg1, %c0_i32, %c0_i32_0 : i32, i32, i32
  }
  func.func @transform_4(%arg0: i32, %arg1: i32) -> (i32, i32, i32) {
    %c0_i32 = arith.constant 0 : i32
    %c0_i32_0 = arith.constant 0 : i32
    %c0_i32_1 = arith.constant 0 : i32
    return %arg1, %c0_i32, %c0_i32_0 : i32, i32, i32
  }
  func.func @transform_5(%arg0: i32, %arg1: i32) -> (i32, i32, i32) {
    %c0_i32 = arith.constant 0 : i32
    %c0_i32_0 = arith.constant 0 : i32
    %c0_i32_1 = arith.constant 0 : i32
    return %arg1, %c0_i32, %c0_i32_0 : i32, i32, i32
  }
  func.func @transform_6(%arg0: i32, %arg1: i32) -> (i32, i32, i32) {
    %c0_i32 = arith.constant 0 : i32
    %c0_i32_0 = arith.constant 0 : i32
    %c0_i32_1 = arith.constant 0 : i32
    return %arg1, %c0_i32, %c0_i32_0 : i32, i32, i32
  }
  func.func @transform_7(%arg0: i32, %arg1: i32) -> (i32, i32, i32) {
    %c0_i32 = arith.constant 0 : i32
    %c0_i32_0 = arith.constant 0 : i32
    %c0_i32_1 = arith.constant 0 : i32
    return %arg1, %c0_i32, %c0_i32_0 : i32, i32, i32
  }
  func.func @transform_8(%arg0: i32, %arg1: i32) -> (i32, i32, i32) {
    %c0_i32 = arith.constant 0 : i32
    %c0_i32_0 = arith.constant 0 : i32
    %c0_i32_1 = arith.constant 0 : i32
    return %arg1, %c0_i32, %c0_i32_0 : i32, i32, i32
  }
  func.func @transform_9(%arg0: i32, %arg1: i32) -> (i32, i32, i32) {
    %c0_i32 = arith.constant 0 : i32
    %c0_i32_0 = arith.constant 0 : i32
    %c0_i32_1 = arith.constant 0 : i32
    return %arg1, %c0_i32, %c0_i32_0 : i32, i32, i32
  }
  func.func @transform_10(%arg0: i32, %arg1: i32) -> (i32, i32, i32) {
    %c0_i32 = arith.constant 0 : i32
    %c0_i32_0 = arith.constant 0 : i32
    %c0_i32_1 = arith.constant 0 : i32
    return %arg1, %c0_i32, %c0_i32_0 : i32, i32, i32
  }
  func.func @transform_11(%arg0: i32, %arg1: i32) -> (i32, i32, i32) {
    %c0_i32 = arith.constant 0 : i32
    %c0_i32_0 = arith.constant 0 : i32
    %c0_i32_1 = arith.constant 0 : i32
    return %arg1, %c0_i32, %c0_i32_0 : i32, i32, i32
  }
  func.func @transform_12(%arg0: i32, %arg1: i32) -> (i32, i32, i32) {
    %c0_i32 = arith.constant 0 : i32
    %c0_i32_0 = arith.constant 0 : i32
    %c0_i32_1 = arith.constant 0 : i32
    return %arg1, %c0_i32, %c0_i32_0 : i32, i32, i32
  }
  func.func @transform_13(%arg0: i32, %arg1: i32) -> (i32, i32, i32) {
    %c0_i32 = arith.constant 0 : i32
    %c0_i32_0 = arith.constant 0 : i32
    %c0_i32_1 = arith.constant 0 : i32
    return %arg0, %c0_i32, %c0_i32_0 : i32, i32, i32
  }
}

module attributes {stable_mosaic.version = 11 : i64} {
  func.func @_head_kernel(%arg0: i32, %arg1: memref<2x384xf32, #tpu.memory_space<vmem>>, %arg2: memref<1x384xf32, #tpu.memory_space<vmem>>, %arg3: memref<1x384xf32, #tpu.memory_space<vmem>>, %arg4: memref<384x256xbf16, #tpu.memory_space<vmem>>, %arg5: memref<1x256xf32, #tpu.memory_space<vmem>>, %arg6: memref<1x256xf32, #tpu.memory_space<vmem>>, %arg7: memref<1x256xf32, #tpu.memory_space<vmem>>, %arg8: memref<256x5xbf16, #tpu.memory_space<vmem>>, %arg9: memref<1x5xf32, #tpu.memory_space<vmem>>, %arg10: memref<2x5xf32, #tpu.memory_space<vmem>>) attributes {dimension_semantics = [#tpu.dimension_semantics<arbitrary>], iteration_bounds = array<i64: 1>, scalar_prefetch = 0 : i64, scratch_operands = 0 : i64, tpu.core_type = #tpu.core_type<tc>, window_params = [{pipeline_mode = #tpu.pipeline_mode<synchronous>, transform_indices = @transform_0, window_bounds = array<i64: 2, 384>}, {pipeline_mode = #tpu.pipeline_mode<synchronous>, transform_indices = @transform_1, window_bounds = array<i64: 1, 384>}, {pipeline_mode = #tpu.pipeline_mode<synchronous>, transform_indices = @transform_2, window_bounds = array<i64: 1, 384>}, {pipeline_mode = #tpu.pipeline_mode<synchronous>, transform_indices = @transform_3, window_bounds = array<i64: 384, 256>}, {pipeline_mode = #tpu.pipeline_mode<synchronous>, transform_indices = @transform_4, window_bounds = array<i64: 1, 256>}, {pipeline_mode = #tpu.pipeline_mode<synchronous>, transform_indices = @transform_5, window_bounds = array<i64: 1, 256>}, {pipeline_mode = #tpu.pipeline_mode<synchronous>, transform_indices = @transform_6, window_bounds = array<i64: 1, 256>}, {pipeline_mode = #tpu.pipeline_mode<synchronous>, transform_indices = @transform_7, window_bounds = array<i64: 256, 5>}, {pipeline_mode = #tpu.pipeline_mode<synchronous>, transform_indices = @transform_8, window_bounds = array<i64: 1, 5>}, {pipeline_mode = #tpu.pipeline_mode<synchronous>, transform_indices = @transform_9, window_bounds = array<i64: 2, 5>}]} {
    %c0 = arith.constant 0 : index
    %c0_0 = arith.constant 0 : index
    %0 = vector.load %arg1[%c0, %c0_0] : memref<2x384xf32, #tpu.memory_space<vmem>>, vector<2x384xf32>
    %c0_1 = arith.constant 0 : index
    %c0_2 = arith.constant 0 : index
    %1 = vector.load %arg2[%c0_1, %c0_2] : memref<1x384xf32, #tpu.memory_space<vmem>>, vector<1x384xf32>
    %c0_3 = arith.constant 0 : index
    %c0_4 = arith.constant 0 : index
    %2 = vector.load %arg3[%c0_3, %c0_4] : memref<1x384xf32, #tpu.memory_space<vmem>>, vector<1x384xf32>
    %cst = arith.constant dense<0.000000e+00> : vector<2xf32>
    %3 = vector.multi_reduction <add>, %0, %cst [1] : vector<2x384xf32> to vector<2xf32>
    %4 = vector.shape_cast %3 : vector<2xf32> to vector<2x1xf32>
    %cst_5 = arith.constant 3.840000e+02 : f32
    %5 = vector.broadcast %cst_5 : f32 to vector<2x1xf32>
    %6 = arith.divf %4, %5 : vector<2x1xf32>
    %7 = vector.broadcast %6 : vector<2x1xf32> to vector<2x384xf32>
    %8 = arith.subf %0, %7 : vector<2x384xf32>
    %9 = arith.mulf %8, %8 : vector<2x384xf32>
    %cst_6 = arith.constant dense<0.000000e+00> : vector<2xf32>
    %10 = vector.multi_reduction <add>, %9, %cst_6 [1] : vector<2x384xf32> to vector<2xf32>
    %11 = vector.shape_cast %10 : vector<2xf32> to vector<2x1xf32>
    %cst_7 = arith.constant 3.840000e+02 : f32
    %12 = vector.broadcast %cst_7 : f32 to vector<2x1xf32>
    %13 = arith.divf %11, %12 : vector<2x1xf32>
    %14 = vector.broadcast %6 : vector<2x1xf32> to vector<2x384xf32>
    %15 = arith.subf %0, %14 : vector<2x384xf32>
    %cst_8 = arith.constant 9.99999997E-7 : f32
    %16 = vector.broadcast %cst_8 : f32 to vector<2x1xf32>
    %17 = arith.addf %13, %16 : vector<2x1xf32>
    %18 = math.rsqrt %17 : vector<2x1xf32>
    %19 = vector.broadcast %18 : vector<2x1xf32> to vector<2x384xf32>
    %20 = arith.mulf %15, %19 : vector<2x384xf32>
    %21 = vector.broadcast %1 : vector<1x384xf32> to vector<2x384xf32>
    %22 = arith.mulf %20, %21 : vector<2x384xf32>
    %23 = vector.broadcast %2 : vector<1x384xf32> to vector<2x384xf32>
    %24 = arith.addf %22, %23 : vector<2x384xf32>
    %25 = arith.truncf %24 : vector<2x384xf32> to vector<2x384xbf16>
    %c0_9 = arith.constant 0 : index
    %c0_10 = arith.constant 0 : index
    %26 = vector.load %arg4[%c0_9, %c0_10] : memref<384x256xbf16, #tpu.memory_space<vmem>>, vector<384x256xbf16>
    %cst_11 = arith.constant dense<0.000000e+00> : vector<2x256xf32>
    %27 = tpu.matmul %25, %26, %cst_11 {dimension_numbers = #tpu.dot_dimension_numbers<[1], [0], [0], [1], [0, 0, 1, 1], [], []>} : vector<2x384xbf16>, vector<384x256xbf16>, vector<2x256xf32> -> vector<2x256xf32>
    %c0_12 = arith.constant 0 : index
    %c0_13 = arith.constant 0 : index
    %28 = vector.load %arg5[%c0_12, %c0_13] : memref<1x256xf32, #tpu.memory_space<vmem>>, vector<1x256xf32>
    %29 = vector.broadcast %28 : vector<1x256xf32> to vector<2x256xf32>
    %30 = arith.addf %27, %29 : vector<2x256xf32>
    %c0_14 = arith.constant 0 : index
    %c0_15 = arith.constant 0 : index
    %31 = vector.load %arg6[%c0_14, %c0_15] : memref<1x256xf32, #tpu.memory_space<vmem>>, vector<1x256xf32>
    %32 = vector.broadcast %31 : vector<1x256xf32> to vector<2x256xf32>
    %33 = arith.mulf %30, %32 : vector<2x256xf32>
    %c0_16 = arith.constant 0 : index
    %c0_17 = arith.constant 0 : index
    %34 = vector.load %arg7[%c0_16, %c0_17] : memref<1x256xf32, #tpu.memory_space<vmem>>, vector<1x256xf32>
    %35 = vector.broadcast %34 : vector<1x256xf32> to vector<2x256xf32>
    %36 = arith.addf %33, %35 : vector<2x256xf32>
    %cst_18 = arith.constant 0.000000e+00 : f32
    %37 = vector.broadcast %cst_18 : f32 to vector<2x256xf32>
    %38 = arith.cmpf oge, %36, %37 : vector<2x256xf32>
    %cst_19 = arith.constant 0.00999999977 : f32
    %39 = vector.broadcast %cst_19 : f32 to vector<2x256xf32>
    %40 = arith.mulf %39, %36 : vector<2x256xf32>
    %41 = arith.select %38, %36, %40 : vector<2x256xi1>, vector<2x256xf32>
    %42 = arith.truncf %41 : vector<2x256xf32> to vector<2x256xbf16>
    %c0_20 = arith.constant 0 : index
    %c0_21 = arith.constant 0 : index
    %43 = vector.load %arg8[%c0_20, %c0_21] : memref<256x5xbf16, #tpu.memory_space<vmem>>, vector<256x5xbf16>
    %cst_22 = arith.constant dense<0.000000e+00> : vector<2x5xf32>
    %44 = tpu.matmul %42, %43, %cst_22 {dimension_numbers = #tpu.dot_dimension_numbers<[1], [0], [0], [1], [0, 0, 1, 1], [], []>} : vector<2x256xbf16>, vector<256x5xbf16>, vector<2x5xf32> -> vector<2x5xf32>
    %c0_23 = arith.constant 0 : index
    %c0_24 = arith.constant 0 : index
    %45 = vector.load %arg9[%c0_23, %c0_24] : memref<1x5xf32, #tpu.memory_space<vmem>>, vector<1x5xf32>
    %46 = vector.broadcast %45 : vector<1x5xf32> to vector<2x5xf32>
    %47 = arith.addf %44, %46 : vector<2x5xf32>
    %c0_25 = arith.constant 0 : index
    %c0_26 = arith.constant 0 : index
    %48 = vector.load %arg10[%c0_25, %c0_26] : memref<2x5xf32, #tpu.memory_space<vmem>>, vector<2x5xf32>
    tpu.vector_store %arg10[%c0_25, %c0_26], %47 {strides = array<i32>} : memref<2x5xf32, #tpu.memory_space<vmem>>, vector<2x5xf32>,
    return
  }
  func.func @transform_0(%arg0: i32) -> (i32, i32) {
    %c0_i32 = arith.constant 0 : i32
    %c0_i32_0 = arith.constant 0 : i32
    %c0_i32_1 = arith.constant 0 : i32
    return %c0_i32, %c0_i32_0 : i32, i32
  }
  func.func @transform_1(%arg0: i32) -> (i32, i32) {
    %c0_i32 = arith.constant 0 : i32
    %c0_i32_0 = arith.constant 0 : i32
    %c0_i32_1 = arith.constant 0 : i32
    return %c0_i32, %c0_i32_0 : i32, i32
  }
  func.func @transform_2(%arg0: i32) -> (i32, i32) {
    %c0_i32 = arith.constant 0 : i32
    %c0_i32_0 = arith.constant 0 : i32
    %c0_i32_1 = arith.constant 0 : i32
    return %c0_i32, %c0_i32_0 : i32, i32
  }
  func.func @transform_3(%arg0: i32) -> (i32, i32) {
    %c0_i32 = arith.constant 0 : i32
    %c0_i32_0 = arith.constant 0 : i32
    %c0_i32_1 = arith.constant 0 : i32
    return %c0_i32, %c0_i32_0 : i32, i32
  }
  func.func @transform_4(%arg0: i32) -> (i32, i32) {
    %c0_i32 = arith.constant 0 : i32
    %c0_i32_0 = arith.constant 0 : i32
    %c0_i32_1 = arith.constant 0 : i32
    return %c0_i32, %c0_i32_0 : i32, i32
  }
  func.func @transform_5(%arg0: i32) -> (i32, i32) {
    %c0_i32 = arith.constant 0 : i32
    %c0_i32_0 = arith.constant 0 : i32
    %c0_i32_1 = arith.constant 0 : i32
    return %c0_i32, %c0_i32_0 : i32, i32
  }
  func.func @transform_6(%arg0: i32) -> (i32, i32) {
    %c0_i32 = arith.constant 0 : i32
    %c0_i32_0 = arith.constant 0 : i32
    %c0_i32_1 = arith.constant 0 : i32
    return %c0_i32, %c0_i32_0 : i32, i32
  }
  func.func @transform_7(%arg0: i32) -> (i32, i32) {
    %c0_i32 = arith.constant 0 : i32
    %c0_i32_0 = arith.constant 0 : i32
    %c0_i32_1 = arith.constant 0 : i32
    return %c0_i32, %c0_i32_0 : i32, i32
  }
  func.func @transform_8(%arg0: i32) -> (i32, i32) {
    %c0_i32 = arith.constant 0 : i32
    %c0_i32_0 = arith.constant 0 : i32
    %c0_i32_1 = arith.constant 0 : i32
    return %c0_i32, %c0_i32_0 : i32, i32
  }
  func.func @transform_9(%arg0: i32) -> (i32, i32) {
    %c0_i32 = arith.constant 0 : i32
    %c0_i32_0 = arith.constant 0 : i32
    %c0_i32_1 = arith.constant 0 : i32
    return %c0_i32, %c0_i32_0 : i32, i32
  }
}

</mosaic_0001>

<bundles_post_ra>
// kernel: prediction_model_forward.3
= control target key start
LH: loop header
LB: loop body
LE: loop exit
PB: predicated region body
PF: predicated region fallthrough
CT: control target
= control target key end

     0   :  { %s2158_s1 = inlined_call_operand.vmem [shape: bf16[768,384], index: 1, kind: input, shape index: {}]   ;;  %s2159_s0 = inlined_call_operand.vmem [shape: f32[8,768], index: 0, kind: input, shape index: {}]   ;;  %s2160_s2 = inlined_call_operand.vmem [shape: f32[1,384], index: 2, kind: input, shape index: {}]   ;;  %s2161_s3 = inlined_call_operand.vmem [shape: f32[8,384], index: 3, kind: output, shape index: {}]  }
   0x1   :  { %v1464_v0 = vld [vmem:[%s2158_s1 + $0xac] ss:$12 sps:$4 sm:$0xff]   ;;  %v1468_v2 = vld [vmem:[%s2158_s1 + $0xa8] ss:$12 sps:$4 sm:$0xff]   ;;  %v1474_v6 = vld [vmem:[%s2158_s1 + $0x90] ss:$12 sps:$4 sm:$0xff]  }
   0x2   :  { %v1466_v1 = vld [vmem:[%s2158_s1 + $0x22c] ss:$12 sps:$4 sm:$0xff]   ;;  %1004 = vmatprep.subr.bf16.mxu0 %v1464_v0  ;;  %v1469_v3 = vld [vmem:[%s2158_s1 + $0x228] ss:$12 sps:$4 sm:$0xff]   ;;  %v1475_v7 = vld [vmem:[%s2158_s1 + $0x210] ss:$12 sps:$4 sm:$0xff]  }
   0x3   :  { %1045 = vmatprep.subr.bf16.mxu1 %v1466_v1  ;;  %v1470_v4 = vld [vmem:[%s2158_s1 + $0x94] ss:$12 sps:$4 sm:$0xff]   ;;  %1005 = vmatpush1.bf16.msra.mxu0 %v1468_v2  ;;  %v1476_v8 = vld [vmem:[%s2158_s1 + $0x7c] ss:$12 sps:$4 sm:$0xff]   ;;  %v1480_v10 = vld [vmem:[%s2158_s1 + $0x78] ss:$12 sps:$4 sm:$0xff]  }
   0x4   :  { %1046 = vmatpush1.bf16.msra.mxu1 %v1469_v3  ;;  %v1472_v5 = vld [vmem:[%s2158_s1 + $0x214] ss:$12 sps:$4 sm:$0xff]   ;;  %1006 = vmatprep.subr.bf16.mxu0 %v1470_v4  ;;  %v1478_v9 = vld [vmem:[%s2158_s1 + $0x1fc] ss:$12 sps:$4 sm:$0xff]   ;;  %v1481_v11 = vld [vmem:[%s2158_s1 + $0x1f8] ss:$12 sps:$4 sm:$0xff]  }
   0x5   :  { %1047 = vmatprep.subr.bf16.mxu1 %v1472_v5  ;;  %v1482_v12 = vld [vmem:[%s2158_s1 + $0x64] ss:$12 sps:$4 sm:$0xff]   ;;  %v1486_v14 = vld [vmem:[%s2158_s1 + $0x60] ss:$12 sps:$4 sm:$0xff]   ;;  %v1492_v18 = vld [vmem:[%s2158_s1 + $0x48] ss:$12 sps:$4 sm:$0xff]  }
   0x6   :  { %v1484_v13 = vld [vmem:[%s2158_s1 + $0x1e4] ss:$12 sps:$4 sm:$0xff]   ;;  %v1487_v15 = vld [vmem:[%s2158_s1 + $0x1e0] ss:$12 sps:$4 sm:$0xff]   ;;  %v1493_v19 = vld [vmem:[%s2158_s1 + $0x1c8] ss:$12 sps:$4 sm:$0xff]  }
   0x7   :  { %1007 = vmatpush1.bf16.msra.mxu0 %v1474_v6  ;;  %v1488_v16 = vld [vmem:[%s2158_s1 + $0x4c] ss:$12 sps:$4 sm:$0xff]   ;;  %v1494_v20 = vld [vmem:[%s2158_s1 + $0x34] ss:$12 sps:$4 sm:$0xff]   ;;  %v1498_v22 = vld [vmem:[%s2158_s1 + $0x30] ss:$12 sps:$4 sm:$0xff]  }
   0x8   :  { %1048 = vmatpush1.bf16.msra.mxu1 %v1475_v7  ;;  %1008 = vmatprep.subr.bf16.mxu0 %v1476_v8  ;;  %v1490_v17 = vld [vmem:[%s2158_s1 + $0x1cc] ss:$12 sps:$4 sm:$0xff]   ;;  %v1496_v21 = vld [vmem:[%s2158_s1 + $0x1b4] ss:$12 sps:$4 sm:$0xff]   ;;  %v1499_v23 = vld [vmem:[%s2158_s1 + $0x1b0] ss:$12 sps:$4 sm:$0xff]  }
   0x9   :  { %1049 = vmatprep.subr.bf16.mxu1 %v1478_v9  ;;  %v1500_v24 = vld [vmem:[%s2158_s1 + $0x1c] ss:$12 sps:$4 sm:$0xff]   ;;  %v1504_v26 = vld [vmem:[%s2158_s1 + $0x18] ss:$12 sps:$4 sm:$0xff]   ;;  %v1510_v30 = vld [vmem:[%s2158_s1] ss:$12 sps:$4 sm:$0xff]  }
   0xa   :  { %v1502_v25 = vld [vmem:[%s2158_s1 + $0x19c] ss:$12 sps:$4 sm:$0xff]   ;;  %v1505_v27 = vld [vmem:[%s2158_s1 + $0x198] ss:$12 sps:$4 sm:$0xff]   ;;  %v1511_v31 = vld [vmem:[%s2158_s1 + $0x180] ss:$12 sps:$4 sm:$0xff]  }
   0xb   :  { %1009 = vmatpush1.bf16.msra.mxu0 %v1480_v10  ;;  %v1506_v28 = vld [vmem:[%s2158_s1 + $0x4] ss:$12 sps:$4 sm:$0xff]   ;;  %v1512_v32 = vld [vmem:[%s2158_s1 + $0x16c] ss:$12 sps:$4 sm:$0xff]   ;;  %v1516_v34 = vld [vmem:[%s2158_s1 + $0x168] ss:$12 sps:$4 sm:$0xff]  }
   0xc   :  { %1050 = vmatpush1.bf16.msra.mxu1 %v1481_v11  ;;  %1010 = vmatprep.subr.bf16.mxu0 %v1482_v12  ;;  %v1508_v29 = vld [vmem:[%s2158_s1 + $0x184] ss:$12 sps:$4 sm:$0xff]   ;;  %v1514_v33 = vld [vmem:[%s2158_s1 + $0x2ec] ss:$12 sps:$4 sm:$0xff]   ;;  %v1517_v35 = vld [vmem:[%s2158_s1 + $0x2e8] ss:$12 sps:$4 sm:$0xff]  }
   0xd   :  { %1051 = vmatprep.subr.bf16.mxu1 %v1484_v13  ;;  %v1518_v36 = vld [vmem:[%s2158_s1 + $0x154] ss:$12 sps:$4 sm:$0xff]   ;;  %v1522_v38 = vld [vmem:[%s2158_s1 + $0x150] ss:$12 sps:$4 sm:$0xff]   ;;  %v1528_v42 = vld [vmem:[%s2158_s1 + $0x138] ss:$12 sps:$4 sm:$0xff]  }
   0xe   :  { %v1520_v37 = vld [vmem:[%s2158_s1 + $0x2d4] ss:$12 sps:$4 sm:$0xff]   ;;  %v1523_v39 = vld [vmem:[%s2158_s1 + $0x2d0] ss:$12 sps:$4 sm:$0xff]   ;;  %v1529_v43 = vld [vmem:[%s2158_s1 + $0x2b8] ss:$12 sps:$4 sm:$0xff]  }
   0xf   :  { %1011 = vmatpush1.bf16.msra.mxu0 %v1486_v14  ;;  %v1524_v40 = vld [vmem:[%s2158_s1 + $0x13c] ss:$12 sps:$4 sm:$0xff]   ;;  %v1530_v44 = vld [vmem:[%s2158_s1 + $0x124] ss:$12 sps:$4 sm:$0xff]   ;;  %v1534_v47 = vld [vmem:[%s2158_s1 + $0x120] ss:$12 sps:$4 sm:$0xff]  }
  0x10   :  { %1052 = vmatpush1.bf16.msra.mxu1 %v1487_v15  ;;  %1012 = vmatprep.subr.bf16.mxu0 %v1488_v16  ;;  %v1526_v41 = vld [vmem:[%s2158_s1 + $0x2bc] ss:$12 sps:$4 sm:$0xff]   ;;  %v1532_v45 = vld [vmem:[%s2158_s1 + $0x2a4] ss:$12 sps:$4 sm:$0xff]   ;;  %v1535_v50 = vld [vmem:[%s2158_s1 + $0x2a0] ss:$12 sps:$4 sm:$0xff]  }
  0x11   :  { %1053 = vmatprep.subr.bf16.mxu1 %v1490_v17  ;;  %v16_v46 = vld [vmem:[%s2159_s0 + $0x8] sm:$0xff]  ;;  %v18_v49 = vld [vmem:[%s2159_s0 + $0x18] sm:$0xff]  ;;  %v1542_v56 = vld [vmem:[%s2158_s1 + $0xf4] ss:$12 sps:$4 sm:$0xff]  }
  0x12   :  { %v1820_v48 = vpack.c.bf16 %v16_v46, %v16_v46  ;;  %v1536_v51 = vld [vmem:[%s2158_s1 + $0x10c] ss:$12 sps:$4 sm:$0xff]   ;;  %v1831_v52 = vpack.c.bf16 %v18_v49, %v18_v49  ;;  %v1540_v54 = vld [vmem:[%s2158_s1 + $0x108] ss:$12 sps:$4 sm:$0xff]   ;;  %v1546_v58 = vld [vmem:[%s2158_s1 + $0xf0] ss:$12 sps:$4 sm:$0xff]  }
  0x13   :  { %1013 = vmatpush1.bf16.msra.mxu0 %v1492_v18  ;;  %v1538_v53 = vld [vmem:[%s2158_s1 + $0x28c] ss:$12 sps:$4 sm:$0xff]   ;;  %v1541_v55 = vld [vmem:[%s2158_s1 + $0x288] ss:$12 sps:$4 sm:$0xff]   ;;  %v1547_v59 = vld [vmem:[%s2158_s1 + $0x270] ss:$12 sps:$4 sm:$0xff]  }
  0x14   :  { %1054 = vmatpush1.bf16.msra.mxu1 %v1493_v19  ;;  %1014 = vmatprep.subr.bf16.mxu0 %v1494_v20  ;;  %v1544_v57 = vld [vmem:[%s2158_s1 + $0x274] ss:$12 sps:$4 sm:$0xff]   ;;  %v1548_v60 = vld [vmem:[%s2158_s1 + $0xdc] ss:$12 sps:$4 sm:$0xff]   ;;  %v1552_v62 = vld [vmem:[%s2158_s1 + $0xd8] ss:$12 sps:$4 sm:$0xff]  }
  0x15   :  { %1055 = vmatprep.subr.bf16.mxu1 %v1496_v21  ;;  %1036 = vmatprep.mubr.bf16.mxu0 %v1820_v48  ;;  %v1550_v61 = vld [vmem:[%s2158_s1 + $0x25c] ss:$12 sps:$4 sm:$0xff]   ;;  %v1553_v63 = vld [vmem:[%s2158_s1 + $0x258] ss:$12 sps:$4 sm:$0xff]   ;;  %v1558_v2 = vld [vmem:[%s2158_s1 + $0xc0] ss:$12 sps:$4 sm:$0xff]  }
  0x16   :  { %1077 = vmatprep.mubr.bf16.mxu1 %v1831_v52  ;;  %v1554_v0 = vld [vmem:[%s2158_s1 + $0xc4] ss:$12 sps:$4 sm:$0xff]   ;;  %v1559_v3 = vld [vmem:[%s2158_s1 + $0x240] ss:$12 sps:$4 sm:$0xff]   ;;  %v1560_v8 = vld [vmem:[%s2158_s1 + $0x3a8] ss:$12 sps:$4 sm:$0xff]  }
  0x17   :  { %1015 = vmatpush1.bf16.msra.mxu0 %v1498_v22  ;;  %v1556_v1 = vld [vmem:[%s2158_s1 + $0x244] ss:$12 sps:$4 sm:$0xff]   ;;  %v1562_v6 = vld [vmem:[%s2158_s1 + $0x3ac] ss:$12 sps:$4 sm:$0xff]   ;;  %v1567_v12 = vld [vmem:[%s2158_s1 + $0x394] ss:$12 sps:$4 sm:$0xff]  }
  0x18   :  { %1056 = vmatpush1.bf16.msra.mxu1 %v1499_v23  ;;  %1016 = vmatprep.subr.bf16.mxu0 %v1500_v24  ;;  %v15_v4 = vld [vmem:[%s2159_s0] sm:$0xff]  ;;  %v17_v5 = vld [vmem:[%s2159_s0 + $0x10] sm:$0xff]  ;;  %v1572_v16 = vld [vmem:[%s2158_s1 + $0x37c] ss:$12 sps:$4 sm:$0xff]  }
  0x19   :  { %1057 = vmatprep.subr.bf16.mxu1 %v1502_v25  ;;  %v1563_v7 = vld [vmem:[%s2158_s1 + $0x170] ss:$12 sps:$4 sm:$0xff]   ;;  %v1895_v9 = vpack.c.bf16 %v15_v4, %v15_v4  ;;  %v1897_v10 = vpack.c.bf16 %v17_v5, %v17_v5  ;;  %v1568_v13 = vld [vmem:[%s2158_s1 + $0x158] ss:$12 sps:$4 sm:$0xff]   ;;  %v1573_v17 = vld [vmem:[%s2158_s1 + $0x140] ss:$12 sps:$4 sm:$0xff]  }
  0x1a   :  { %v1564_v11 = vld [vmem:[%s2158_s1 + $0xb0] ss:$12 sps:$4 sm:$0xff]   ;;  %v1569_v15 = vld [vmem:[%s2158_s1 + $0x98] ss:$12 sps:$4 sm:$0xff]   ;;  %v1574_v19 = vld [vmem:[%s2158_s1 + $0x80] ss:$12 sps:$4 sm:$0xff]  }
  0x1b   :  { %1017 = vmatpush1.bf16.msra.mxu0 %v1504_v26  ;;  %v1565_v14 = vld [vmem:[%s2158_s1 + $0x390] ss:$12 sps:$4 sm:$0xff]   ;;  %v1570_v18 = vld [vmem:[%s2158_s1 + $0x378] ss:$12 sps:$4 sm:$0xff]   ;;  %v1578_v21 = vld [vmem:[%s2158_s1 + $0x128] ss:$12 sps:$4 sm:$0xff]  }
  0x1c   :  { %1058 = vmatpush1.bf16.msra.mxu1 %v1505_v27  ;;  %1018 = vmatprep.subr.bf16.mxu0 %v1506_v28  ;;  %v1577_v20 = vld [vmem:[%s2158_s1 + $0x364] ss:$12 sps:$4 sm:$0xff]   ;;  %v1575_v22 = vld [vmem:[%s2158_s1 + $0x360] ss:$12 sps:$4 sm:$0xff]   ;;  %v1579_v23 = vld [vmem:[%s2158_s1 + $0x68] ss:$12 sps:$4 sm:$0xff]  }
  0x1d   :  { %1059 = vmatprep.subr.bf16.mxu1 %v1508_v29  ;;  %v1582_v24 = vld [vmem:[%s2158_s1 + $0x34c] ss:$12 sps:$4 sm:$0xff]   ;;  %v1583_v25 = vld [vmem:[%s2158_s1 + $0x110] ss:$12 sps:$4 sm:$0xff]   ;;  %v1580_v26 = vld [vmem:[%s2158_s1 + $0x348] ss:$12 sps:$4 sm:$0xff]  }
  0x1e   :  { %v1584_v27 = vld [vmem:[%s2158_s1 + $0x50] ss:$12 sps:$4 sm:$0xff]   ;;  %v1587_v28 = vld [vmem:[%s2158_s1 + $0x334] ss:$12 sps:$4 sm:$0xff]   ;;  %v1588_v29 = vld [vmem:[%s2158_s1 + $0xf8] ss:$12 sps:$4 sm:$0xff]  }
  0x1f   :  { %1019 = vmatpush1.bf16.msra.mxu0 %v1510_v30  ;;  %v1585_v30 = vld [vmem:[%s2158_s1 + $0x330] ss:$12 sps:$4 sm:$0xff]   ;;  %v20_v46 = vld [vmem:[%s2159_s0 + $0x28] sm:$0xff]  ;;  %v1609_v49 = vld [vmem:[%s2158_s1 + $0x218] ss:$12 sps:$4 sm:$0xff]  }
  0x20   :  { %1060 = vmatpush1.bf16.msra.mxu1 %v1511_v31  ;;  %1020 = vmatprep.subr.bf16.mxu0 %v1512_v32  ;;  %v1589_v31 = vld [vmem:[%s2158_s1 + $0x38] ss:$12 sps:$4 sm:$0xff]   ;;  %v1592_v32 = vld [vmem:[%s2158_s1 + $0x31c] ss:$12 sps:$4 sm:$0xff]   ;;  %v1634_v5 = vld [vmem:[%s2158_s1 + $0x1a0] ss:$12 sps:$4 sm:$0xff]  }
  0x21   :  { %1061 = vmatprep.subr.bf16.mxu1 %v1514_v33  ;;  %v1593_v33 = vld [vmem:[%s2158_s1 + $0xe0] ss:$12 sps:$4 sm:$0xff]   ;;  %v1630_v4 = vld [vmem:[%s2158_s1 + $0x3d8] ss:$12 sps:$4 sm:$0xff]  }
  0x23   :  { %1021 = vmatpush2.bf16.msra.mxu0 %v1516_v34  ;;  %v1590_v34 = vld [vmem:[%s2158_s1 + $0x318] ss:$12 sps:$4 sm:$0xff]  }
  0x24   :  { %1062 = vmatpush2.bf16.msra.mxu1 %v1517_v35  ;;  %1022 = vmatprep.subr.bf16.mxu0 %v1518_v36  ;;  %v1594_v35 = vld [vmem:[%s2158_s1 + $0x20] ss:$12 sps:$4 sm:$0xff]   ;;  %v1597_v36 = vld [vmem:[%s2158_s1 + $0x304] ss:$12 sps:$4 sm:$0xff]  }
  0x25   :  { %1063 = vmatprep.subr.bf16.mxu1 %v1520_v37  ;;  %v1598_v37 = vld [vmem:[%s2158_s1 + $0xc8] ss:$12 sps:$4 sm:$0xff]  }
  0x27   :  { %1023 = vmatpush2.bf16.msra.mxu0 %v1522_v38  ;;  %v1595_v38 = vld [vmem:[%s2158_s1 + $0x300] ss:$12 sps:$4 sm:$0xff]  }
  0x28   :  { %1064 = vmatpush2.bf16.msra.mxu1 %v1523_v39  ;;  %1024 = vmatprep.subr.bf16.mxu0 %v1524_v40  ;;  %v1599_v39 = vld [vmem:[%s2158_s1 + $0x8] ss:$12 sps:$4 sm:$0xff]   ;;  %v1602_v40 = vld [vmem:[%s2158_s1 + $0x46c] ss:$12 sps:$4 sm:$0xff]  }
  0x29   :  { %1065 = vmatprep.subr.bf16.mxu1 %v1526_v41  ;;  %v1603_v41 = vld [vmem:[%s2158_s1 + $0x2f0] ss:$12 sps:$4 sm:$0xff]  }
  0x2b   :  { %1025 = vmatpush2.bf16.msra.mxu0 %v1528_v42  ;;  %v1600_v42 = vld [vmem:[%s2158_s1 + $0x468] ss:$12 sps:$4 sm:$0xff]  }
  0x2c   :  { %1066 = vmatpush2.bf16.msra.mxu1 %v1529_v43  ;;  %1026 = vmatprep.subr.bf16.mxu0 %v1530_v44  ;;  %v1604_v43 = vld [vmem:[%s2158_s1 + $0x230] ss:$12 sps:$4 sm:$0xff]   ;;  %v1607_v44 = vld [vmem:[%s2158_s1 + $0x454] ss:$12 sps:$4 sm:$0xff]  }
  0x2d   :  { %1067 = vmatprep.subr.bf16.mxu1 %v1532_v45  ;;  %v1608_v45 = vld [vmem:[%s2158_s1 + $0x2d8] ss:$12 sps:$4 sm:$0xff]  }
  0x2f   :  { %1027 = vmatpush2.bf16.msra.mxu0 %v1534_v47  ;;  %v1605_v47 = vld [vmem:[%s2158_s1 + $0x450] ss:$12 sps:$4 sm:$0xff]  }
  0x30   :  { %1068 = vmatpush2.bf16.msra.mxu1 %v1535_v50  ;;  %1028 = vmatprep.subr.bf16.mxu0 %v1536_v51  ;;  %v1612_v50 = vld [vmem:[%s2158_s1 + $0x43c] ss:$12 sps:$4 sm:$0xff]   ;;  %v1613_v51 = vld [vmem:[%s2158_s1 + $0x2c0] ss:$12 sps:$4 sm:$0xff]  }
  0x31   :  { %1069 = vmatprep.subr.bf16.mxu1 %v1538_v53  ;;  %v1610_v53 = vld [vmem:[%s2158_s1 + $0x438] ss:$12 sps:$4 sm:$0xff]  }
  0x33   :  { %1029 = vmatpush2.bf16.msra.mxu0 %v1540_v54  ;;  %v1614_v54 = vld [vmem:[%s2158_s1 + $0x200] ss:$12 sps:$4 sm:$0xff]  }
  0x34   :  { %1070 = vmatpush2.bf16.msra.mxu1 %v1541_v55  ;;  %1030 = vmatprep.subr.bf16.mxu0 %v1542_v56  ;;  %v1617_v55 = vld [vmem:[%s2158_s1 + $0x424] ss:$12 sps:$4 sm:$0xff]   ;;  %v1618_v56 = vld [vmem:[%s2158_s1 + $0x2a8] ss:$12 sps:$4 sm:$0xff]  }
  0x35   :  { %1071 = vmatprep.subr.bf16.mxu1 %v1544_v57  ;;  %v1619_v57 = vld [vmem:[%s2158_s1 + $0x1e8] ss:$12 sps:$4 sm:$0xff]  }
  0x37   :  { %1031 = vmatpush2.bf16.msra.mxu0 %v1546_v58  ;;  %v1622_v58 = vld [vmem:[%s2158_s1 + $0x40c] ss:$12 sps:$4 sm:$0xff]  }
  0x38   :  { %1072 = vmatpush2.bf16.msra.mxu1 %v1547_v59  ;;  %1032 = vmatprep.subr.bf16.mxu0 %v1548_v60  ;;  %v1623_v59 = vld [vmem:[%s2158_s1 + $0x290] ss:$12 sps:$4 sm:$0xff]   ;;  %v1620_v60 = vld [vmem:[%s2158_s1 + $0x408] ss:$12 sps:$4 sm:$0xff]  }
  0x39   :  { %1073 = vmatprep.subr.bf16.mxu1 %v1550_v61  ;;  %v1624_v61 = vld [vmem:[%s2158_s1 + $0x1d0] ss:$12 sps:$4 sm:$0xff]  }
  0x3b   :  { %1033 = vmatpush2.bf16.msra.mxu0 %v1552_v62  ;;  %v1627_v62 = vld [vmem:[%s2158_s1 + $0x3f4] ss:$12 sps:$4 sm:$0xff]  }
  0x3c   :  { %1074 = vmatpush2.bf16.msra.mxu1 %v1553_v63  ;;  %1034 = vmatprep.subr.bf16.mxu0 %v1554_v0  ;;  %v1628_v63 = vld [vmem:[%s2158_s1 + $0x278] ss:$12 sps:$4 sm:$0xff]   ;;  %v1625_v0 = vld [vmem:[%s2158_s1 + $0x3f0] ss:$12 sps:$4 sm:$0xff]  }
  0x3d   :  { %1075 = vmatprep.subr.bf16.mxu1 %v1556_v1  ;;  %v1629_v1 = vld [vmem:[%s2158_s1 + $0x1b8] ss:$12 sps:$4 sm:$0xff]  }
  0x3f   :  { %1035 = vmatpush2.bf16.msra.mxu0 %v1558_v2  ;;  %v1632_v2 = vld [vmem:[%s2158_s1 + $0x3dc] ss:$12 sps:$4 sm:$0xff]  }
  0x40   :  { %1076 = vmatpush2.bf16.msra.mxu1 %v1559_v3  ;;  %1086 = vmatprep.subr.bf16.mxu0 %v1562_v6  ;;  %v1633_v3 = vld [vmem:[%s2158_s1 + $0x260] ss:$12 sps:$4 sm:$0xff]   ;;  %v1637_v6 = vld [vmem:[%s2158_s1 + $0x3c4] ss:$12 sps:$4 sm:$0xff]  }
  0x41   :  { %1398 = vmatprep.subr.bf16.mxu1 %v1563_v7  ;;  %v1638_v7 = vld [vmem:[%s2158_s1 + $0x248] ss:$12 sps:$4 sm:$0xff]  }
  0x42   :  { %1037 = vmatmul.mubr.bf16.vlgmr.msra.gmra.mxu0 %v1895_v9 }
  0x43   :  { %1078 = vmatmul.mubr.bf16.vlgmr.msra.gmra.mxu1 %v1897_v10  ;;  %1087 = vmatpush1.bf16.msra.mxu0 %v1560_v8  ;;  %v1635_v8 = vld [vmem:[%s2158_s1 + $0x3c0] ss:$12 sps:$4 sm:$0xff]  }
  0x44   :  { %1399 = vmatpush3.bf16.msra.mxu1 %v1564_v11  ;;  %1088 = vmatprep.subr.bf16.mxu0 %v1567_v12  ;;  %v19_v11 = vld [vmem:[%s2159_s0 + $0x20] sm:$0xff]  ;;  %v1640_v12 = vld [vmem:[%s2158_s1 + $0x470] ss:$12 sps:$4 sm:$0xff]  }
  0x45   :  { %1400 = vmatprep.subr.bf16.mxu1 %v1568_v13  ;;  %1159 = vmatprep.mubr.bf16.mxu1 %v1820_v48  ;;  %v2013_v48 = vpack.c.bf16 %v20_v46, %v20_v46  ;;  %v25_v13 = vpack.c.bf16 %v19_v11, %v19_v11 }
  0x47   :  { %1089 = vmatpush1.bf16.msra.mxu0 %v1565_v14  ;;  %1118 = vmatprep.mubr.bf16.mxu0 %v2013_v48  ;;  %v1641_v14 = vld [vmem:[%s2158_s1 + $0x3b0] ss:$12 sps:$4 sm:$0xff]  }
  0x48   :  { %1401 = vmatpush3.bf16.msra.mxu1 %v1569_v15  ;;  %1090 = vmatprep.subr.bf16.mxu0 %v1572_v16  ;;  %v1642_v15 = vld [vmem:[%s2158_s1 + $0x458] ss:$12 sps:$4 sm:$0xff]  }
  0x49   :  { %1402 = vmatprep.subr.bf16.mxu1 %v1573_v17  ;;  %v1643_v16 = vld [vmem:[%s2158_s1 + $0x398] ss:$12 sps:$4 sm:$0xff]   ;;  %v1644_v17 = vld [vmem:[%s2158_s1 + $0x440] ss:$12 sps:$4 sm:$0xff]  }
  0x4b   :  { %1091 = vmatpush1.bf16.msra.mxu0 %v1570_v18  ;;  %v1645_v18 = vld [vmem:[%s2158_s1 + $0x380] ss:$12 sps:$4 sm:$0xff]  }
  0x4c   :  { %1403 = vmatpush3.bf16.msra.mxu1 %v1574_v19  ;;  %1092 = vmatprep.subr.bf16.mxu0 %v1577_v20  ;;  %v1647_v19 = vld [vmem:[%s2158_s1 + $0x368] ss:$12 sps:$4 sm:$0xff]   ;;  %v1648_v20 = vld [vmem:[%s2158_s1 + $0x410] ss:$12 sps:$4 sm:$0xff]  }
  0x4d   :  { %1404 = vmatprep.subr.bf16.mxu1 %v1578_v21  ;;  %v1649_v21 = vld [vmem:[%s2158_s1 + $0x350] ss:$12 sps:$4 sm:$0xff]  }
  0x4f   :  { %1093 = vmatpush1.bf16.msra.mxu0 %v1575_v22  ;;  %v1650_v22 = vld [vmem:[%s2158_s1 + $0x3f8] ss:$12 sps:$4 sm:$0xff]  }
  0x50   :  { %1405 = vmatpush3.bf16.msra.mxu1 %v1579_v23  ;;  %1094 = vmatprep.subr.bf16.mxu0 %v1582_v24  ;;  %v1651_v23 = vld [vmem:[%s2158_s1 + $0x338] ss:$12 sps:$4 sm:$0xff]   ;;  %v1652_v24 = vld [vmem:[%s2158_s1 + $0x3e0] ss:$12 sps:$4 sm:$0xff]  }
  0x51   :  { %1406 = vmatprep.subr.bf16.mxu1 %v1583_v25  ;;  %v1653_v25 = vld [vmem:[%s2158_s1 + $0x320] ss:$12 sps:$4 sm:$0xff]  }
  0x53   :  { %1095 = vmatpush1.bf16.msra.mxu0 %v1580_v26  ;;  %v1654_v26 = vld [vmem:[%s2158_s1 + $0x3c8] ss:$12 sps:$4 sm:$0xff]  }
  0x54   :  { %1407 = vmatpush3.bf16.msra.mxu1 %v1584_v27  ;;  %1096 = vmatprep.subr.bf16.mxu0 %v1587_v28  ;;  %v1655_v27 = vld [vmem:[%s2158_s1 + $0x308] ss:$12 sps:$4 sm:$0xff]  }
  0x55   :  { %1408 = vmatprep.subr.bf16.mxu1 %v1588_v29 }
  0x57   :  { %1097 = vmatpush1.bf16.msra.mxu0 %v1585_v30 }
  0x58   :  { %1409 = vmatpush3.bf16.msra.mxu1 %v1589_v31  ;;  %1098 = vmatprep.subr.bf16.mxu0 %v1592_v32 }
  0x59   :  { %1410 = vmatprep.subr.bf16.mxu1 %v1593_v33 }
  0x5b   :  { %1099 = vmatpush1.bf16.msra.mxu0 %v1590_v34 }
  0x5c   :  { %1411 = vmatpush3.bf16.msra.mxu1 %v1594_v35  ;;  %1100 = vmatprep.subr.bf16.mxu0 %v1597_v36 }
  0x5d   :  { %1412 = vmatprep.subr.bf16.mxu1 %v1598_v37 }
  0x5f   :  { %1101 = vmatpush1.bf16.msra.mxu0 %v1595_v38 }
  0x60   :  { %1413 = vmatpush3.bf16.msra.mxu1 %v1599_v39  ;;  %1102 = vmatprep.subr.bf16.mxu0 %v1602_v40  ;;  %v221_v40 = vlaneseq }
  0x61   :  { %1420 = vmatprep.subr.bf16.mxu1 %v1603_v41 }
  0x62   :  { %v222_v41 = vshrl.u32 %v221_v40, 7 }
  0x63   :  { %1160 = vmatmul.mubr.bf16.vlgmr.msra.gmra.mxu1 %v1895_v9  ;;  %1103 = vmatpush2.bf16.msra.mxu0 %v1600_v42  ;;  %v1639_v9 = vld [vmem:[%s2158_s1 + $0x188] ss:$12 sps:$4 sm:$0xff]  }
  0x64   :  { %1421 = vmatpush3.bf16.msra.mxu1 %v1604_v43  ;;  %1104 = vmatprep.subr.bf16.mxu0 %v1607_v44  ;;  %v223_v42 = vsub.s32 0, %v222_v41  ;;  %v219_v43 = vld [vmem:[%s2160_s2] sm:$0x7]  ;;  %v227_v44 = vsub.s32 1, %v222_v41 }
  0x65   :  { %1422 = vmatprep.subr.bf16.mxu1 %v1608_v45  ;;  %1199 = vmatprep.mubr.bf16.mxu1 %v1831_v52  ;;  %v1615_v52 = vld [vmem:[%s2158_s1 + $0x420] ss:$12 sps:$4 sm:$0xff]  }
  0x66   :  { %v224_v45 = vrot.slane %v219_v43, %v223_v42  ;;  %v228_v46 = vrot.slane %v219_v43, %v227_v44 }
  0x67   :  { %1105 = vmatpush2.bf16.msra.mxu0 %v1605_v47 }
  0x68   :  { %1423 = vmatpush3.bf16.msra.mxu1 %v1609_v49  ;;  %1106 = vmatprep.subr.bf16.mxu0 %v1612_v50 }
  0x69   :  { %1424 = vmatprep.subr.bf16.mxu1 %v1613_v51 }
  0x6b   :  { %1107 = vmatpush2.bf16.msra.mxu0 %v1610_v53 }
  0x6c   :  { %1425 = vmatpush3.bf16.msra.mxu1 %v1614_v54  ;;  %1108 = vmatprep.subr.bf16.mxu0 %v1617_v55 }
  0x6d   :  { %1426 = vmatprep.subr.bf16.mxu1 %v1618_v56 }
  0x6f   :  { %1109 = vmatpush2.bf16.msra.mxu0 %v1615_v52 }
  0x70   :  { %1427 = vmatpush3.bf16.msra.mxu1 %v1619_v57  ;;  %1110 = vmatprep.subr.bf16.mxu0 %v1622_v58 }
  0x71   :  { %1428 = vmatprep.subr.bf16.mxu1 %v1623_v59 }
  0x73   :  { %1111 = vmatpush2.bf16.msra.mxu0 %v1620_v60 }
  0x74   :  { %1429 = vmatpush3.bf16.msra.mxu1 %v1624_v61  ;;  %1112 = vmatprep.subr.bf16.mxu0 %v1627_v62  ;;  %v231_v61 = vsub.s32 2, %v222_v41 }
  0x75   :  { %1430 = vmatprep.subr.bf16.mxu1 %v1628_v63 }
  0x76   :  { %v232_v62 = vrot.slane %v219_v43, %v231_v61 }
  0x77   :  { %1113 = vmatpush2.bf16.msra.mxu0 %v1625_v0 }
  0x78   :  { %1431 = vmatpush3.bf16.msra.mxu1 %v1629_v1  ;;  %1114 = vmatprep.subr.bf16.mxu0 %v1632_v2 }
  0x79   :  { %1432 = vmatprep.subr.bf16.mxu1 %v1633_v3 }
  0x7b   :  { %1115 = vmatpush2.bf16.msra.mxu0 %v1630_v4 }
  0x7c   :  { %1433 = vmatpush3.bf16.msra.mxu1 %v1634_v5  ;;  %1116 = vmatprep.subr.bf16.mxu0 %v1637_v6 }
  0x7d   :  { %1434 = vmatprep.subr.bf16.mxu1 %v1638_v7 }
  0x7f   :  { %1117 = vmatpush2.bf16.msra.mxu0 %v1635_v8 }
  0x80   :  { %1435 = vmatpush3.bf16.msra.mxu1 %v1639_v9  ;;  %1442 = vmatprep.subr.bf16.mxu0 %v1640_v12 }
  0x82   :  { %1119 = vmatmul.mubr.bf16.vlgmr.msra.gmra.mxu0 %v25_v13 }
  0x83   :  { %1200 = vmatmul.mubr.bf16.vlgmr.msra.gmra.mxu1 %v1897_v10  ;;  %1443 = vmatpush3.bf16.msra.mxu0 %v1641_v14  ;;  %v1646_v10 = vld [vmem:[%s2158_s1 + $0x428] ss:$12 sps:$4 sm:$0xff]  }
  0x84   :  { %1239 = vmatprep.mubr.bf16.mxu0 %v2013_v48  ;;  %1444 = vmatprep.subr.bf16.mxu0 %v1642_v15 }
  0x87   :  { %1445 = vmatpush3.bf16.msra.mxu0 %v1643_v16 }
  0x88   :  { %1446 = vmatprep.subr.bf16.mxu0 %v1644_v17 }
  0x8b   :  { %1447 = vmatpush3.bf16.msra.mxu0 %v1645_v18 }
  0x8c   :  { %1448 = vmatprep.subr.bf16.mxu0 %v1646_v10 }
  0x8f   :  { %1449 = vmatpush3.bf16.msra.mxu0 %v1647_v19 }
  0x90   :  { %1450 = vmatprep.subr.bf16.mxu0 %v1648_v20 }
  0x93   :  { %1451 = vmatpush3.bf16.msra.mxu0 %v1649_v21 }
  0x94   :  { %1452 = vmatprep.subr.bf16.mxu0 %v1650_v22 }
  0x97   :  { %1453 = vmatpush3.bf16.msra.mxu0 %v1651_v23 }
  0x98   :  { %1454 = vmatprep.subr.bf16.mxu0 %v1652_v24 }
  0x9b   :  { %1455 = vmatpush3.bf16.msra.mxu0 %v1653_v25 }
  0x9c   :  { %1456 = vmatprep.subr.bf16.mxu0 %v1654_v26 }
  0x9f   :  { %1457 = vmatpush3.bf16.msra.mxu0 %v1655_v27 }
  0xa2   :  { %1240 = vmatmul.mubr.bf16.vlgmr.msra.gmra.mxu0 %v25_v13 }
 0x102   :  { %v1038_v28 = vpop.f32.mrf.mxu0 }
 0x103   :  { %v1079_v29 = vpop.f32.mrf.mxu1  ;;  %v1039_v47 = vadd.f32 %v1038_v28, %v224_v45 }
 0x104   :  { %v1040_v30 = vpop.f32.mrf.mxu0 }
 0x105   :  { %v1081_v31 = vpop.f32.mrf.mxu1  ;;  %v1041_v48 = vadd.f32 %v1040_v30, %v228_v46  ;;  %v1080_v49 = vadd.f32 %v1079_v29, %v1039_v47 }
 0x106   :  { %v1042_v32 = vpop.f32.mrf.mxu0 }
 0x107   :  { %v1083_v33 = vpop.f32.mrf.mxu1  ;;  %v1082_v53 = vadd.f32 %v1081_v31, %v1041_v48 }
 0x108   :  { %v1043_v34 = vpop.f32.mrf.mxu0 }
 0x109   :  { %v1084_v35 = vpop.f32.mrf.mxu1 }
 0x123   :  { %v1414_v36 = vpop.f32.mrf.mxu1 }
 0x125   :  { %v1415_v37 = vpop.f32.mrf.mxu1 }
 0x126   :  { %v1416_v63 = vadd.f32 %v1415_v37, %v1414_v36 }
 0x127   :  { %v1417_v38 = vpop.f32.mrf.mxu1 }
 0x128   :  { %v1162_v0 = vadd.f32 %v1416_v63, %v232_v62 }
 0x129   :  { %v1418_v39 = vpop.f32.mrf.mxu1 }
 0x142   :  { %v1120_v50 = vpop.f32.mrf.mxu0 }
 0x143   :  { %v1436_v51 = vpop.f32.mrf.mxu1  ;;  %v1121_v54 = vadd.f32 %v1120_v50, %v1080_v49 }
 0x144   :  { %v1122_v55 = vpop.f32.mrf.mxu0 }
 0x145   :  { %v1437_v56 = vpop.f32.mrf.mxu1  ;;  %1247 = vst [vmem:[%s2161_s3] sm:$0xff] %v1121_v54  ;;  %v1123_v52 = vadd.f32 %v1122_v55, %v1082_v53 }
 0x146   :  { %v1124_v57 = vpop.f32.mrf.mxu0  ;;  %v1438_v1 = vadd.f32 %v1437_v56, %v1436_v51 }
 0x147   :  { %v1439_v58 = vpop.f32.mrf.mxu1  ;;  %1248 = vst [vmem:[%s2161_s3 + $0x8] sm:$0xff] %v1123_v52 }
 0x148   :  { %v1125_v59 = vpop.f32.mrf.mxu0  ;;  %v1202_v4 = vadd.f32 %v1438_v1, %v1162_v0 }
 0x149   :  { %v1440_v60 = vpop.f32.mrf.mxu1 }
 0x162   :  { %v1458_v2 = vpop.f32.mrf.mxu0 }
 0x164   :  { %v1459_v3 = vpop.f32.mrf.mxu0 }
 0x165   :  { %v1460_v5 = vadd.f32 %v1459_v3, %v1458_v2 }
 0x166   :  { %v1461_v6 = vpop.f32.mrf.mxu0 }
 0x167   :  { %v1242_v7 = vadd.f32 %v1460_v5, %v1202_v4 }
 0x168   :  { %v1462_v8 = vpop.f32.mrf.mxu0 }
 0x169   :  { %1249 = vst [vmem:[%s2161_s3 + $0x10] sm:$0xff] %v1242_v7 }

// kernel: prediction_model_forward.5
= control target key start
LH: loop header
LB: loop body
LE: loop exit
PB: predicated region body
PF: predicated region fallthrough
CT: control target
= control target key end

     0   :  { %v42_v1 = vlaneseq  ;;  %v1016_v2 = vmov 1983009808   ;;  %vm57_vm0 = vcmask 1041408   ;;  %s1334_s0 = inlined_call_operand.vmem [shape: f32[2,384], index: 0, kind: input, shape index: {}]   ;;  %s1335_s1 = inlined_call_operand.vmem [shape: f32[1,384], index: 1, kind: input, shape index: {}]   ;;  %s1336_s2 = inlined_call_operand.vmem [shape: f32[1,384], index: 2, kind: input, shape index: {}]   ;;  %s1337_s3 = inlined_call_operand.vmem [shape: bf16[384,256], index: 3, kind: input, shape index: {}]   ;;  %s1338_s4 = inlined_call_operand.vmem [shape: f32[1,256], index: 4, kind: input, shape index: {}]   ;;  %s1339_s5 = inlined_call_operand.vmem [shape: f32[1,256], index: 5, kind: input, shape index: {}]   ;;  %s1340_s6 = inlined_call_operand.vmem [shape: f32[1,256], index: 6, kind: input, shape index: {}]   ;;  %s1341_s7 = inlined_call_operand.vmem [shape: bf16[256,5], index: 7, kind: input, shape index: {}]   ;;  %s1342_s8 = inlined_call_operand.vmem [shape: f32[1,5], index: 8, kind: input, shape index: {}]   ;;  %s1343_s9 = inlined_call_operand.hbm [shape: f32[2,5], index: 9, kind: output, shape index: {}]  }
   0x1   :  { %v34_v0 = vld [vmem:[%s1334_s0] sm:$0x3f]  ;;  %v40_v3 = vunpack.c.l.s4 %v1016_v2 }
   0x2   :  { %v1073_v4 = vshrl.u32 %v42_v1, 7  ;;  %v38_v5 = vcombine.high %v34_v0, %v34_v0 }
   0x3   :  { %v41_v6 = vunpack.c.0.s8 %v40_v3 }
   0x5   :  { %v1076_v7 = vsub.s32 %v41_v6, %v1073_v4 }
   0x7   :  { %v45_v8 = vrot.slane %v34_v0, %v1076_v7  ;;  %v52_v9 = vrot.slane %v38_v5, %v1076_v7 }
   0x9   :  { %v53_v10 = vcombine.high %v45_v8, %v45_v8  ;;  %v58_v11 = vsel %vm57_vm0, %v45_v8, 0.0  ;;  %v61_v13 = vsel %vm57_vm0, %v52_v9, 0.0 }
   0xb   :  { %v59_v12 = vsel %vm57_vm0, %v53_v10, 0.0 }
   0xc   :  { %v60_v14 = vadd.f32 %v59_v12, %v58_v11 }
   0xe   :  { %v62_v15 = vadd.f32 %v61_v13, %v60_v14 }
  0x10   :  { %63 = vadd.xlane.f32.xlu0 %v62_v15 }
  0x11   :  { %14 = vsyncpa [#allocation3], 0  ;;  %v904_v16 = vld [vmem:[%s1337_s3 + $0x74] ss:$8 sps:$4 sm:$0xff]   ;;  %v906_v17 = vld [vmem:[%s1337_s3 + $0x70] ss:$8 sps:$4 sm:$0xff]  }
  0x12   :  { %v907_v18 = vld [vmem:[%s1337_s3 + $0x64] ss:$8 sps:$4 sm:$0xff]   ;;  %503 = vmatprep.subr.bf16.mxu0 %v904_v16  ;;  %v909_v19 = vld [vmem:[%s1337_s3 + $0x60] ss:$8 sps:$4 sm:$0xff]   ;;  %v910_v20 = vld [vmem:[%s1337_s3 + $0x54] ss:$8 sps:$4 sm:$0xff]  }
  0x13   :  { %504 = vmatpush1.bf16.msra.mxu0 %v906_v17  ;;  %v912_v21 = vld [vmem:[%s1337_s3 + $0x50] ss:$8 sps:$4 sm:$0xff]   ;;  %v913_v22 = vld [vmem:[%s1337_s3 + $0x44] ss:$8 sps:$4 sm:$0xff]   ;;  %v915_v23 = vld [vmem:[%s1337_s3 + $0x40] ss:$8 sps:$4 sm:$0xff]  }
  0x14   :  { %505 = vmatprep.subr.bf16.mxu0 %v907_v18  ;;  %v916_v24 = vld [vmem:[%s1337_s3 + $0x34] ss:$8 sps:$4 sm:$0xff]   ;;  %v918_v25 = vld [vmem:[%s1337_s3 + $0x30] ss:$8 sps:$4 sm:$0xff]   ;;  %v919_v26 = vld [vmem:[%s1337_s3 + $0x24] ss:$8 sps:$4 sm:$0xff]  }
  0x15   :  { %v921_v27 = vld [vmem:[%s1337_s3 + $0x20] ss:$8 sps:$4 sm:$0xff]   ;;  %v922_v28 = vld [vmem:[%s1337_s3 + $0x14] ss:$8 sps:$4 sm:$0xff]   ;;  %v924_v29 = vld [vmem:[%s1337_s3 + $0x10] ss:$8 sps:$4 sm:$0xff]  }
  0x16   :  { %v925_v30 = vld [vmem:[%s1337_s3 + $0x4] ss:$8 sps:$4 sm:$0xff]   ;;  %v927_v31 = vld [vmem:[%s1337_s3] ss:$8 sps:$4 sm:$0xff]   ;;  %v1017_v32 = vmov 269488144  }
  0x17   :  { %506 = vmatpush1.bf16.msra.mxu0 %v909_v19  ;;  %v69_v33 = vunpack.c.l.s4 %v1017_v32  ;;  %v928_v50 = vld [vmem:[%s1337_s3 + $0x174] ss:$8 sps:$4 sm:$0xff]   ;;  %v932_v52 = vld [vmem:[%s1337_s3 + $0x170] ss:$8 sps:$4 sm:$0xff]   ;;  %v934_v54 = vld [vmem:[%s1337_s3 + $0x164] ss:$8 sps:$4 sm:$0xff]  }
  0x18   :  { %507 = vmatprep.subr.bf16.mxu0 %v910_v20  ;;  %v930_v51 = vld [vmem:[%s1337_s3 + $0xf4] ss:$8 sps:$4 sm:$0xff]   ;;  %544 = vmatprep.subr.bf16.mxu1 %v928_v50  ;;  %v933_v53 = vld [vmem:[%s1337_s3 + $0xf0] ss:$8 sps:$4 sm:$0xff]   ;;  %v936_v55 = vld [vmem:[%s1337_s3 + $0xe4] ss:$8 sps:$4 sm:$0xff]  }
  0x19   :  { %v70_v34 = vunpack.c.0.s8 %v69_v33  ;;  %545 = vmatpush1.bf16.msra.mxu1 %v932_v52  ;;  %v938_v56 = vld [vmem:[%s1337_s3 + $0x160] ss:$8 sps:$4 sm:$0xff]   ;;  %v940_v58 = vld [vmem:[%s1337_s3 + $0x154] ss:$8 sps:$4 sm:$0xff]   ;;  %v944_v60 = vld [vmem:[%s1337_s3 + $0x150] ss:$8 sps:$4 sm:$0xff]  }
  0x1a   :  { %546 = vmatprep.subr.bf16.mxu1 %v934_v54  ;;  %v939_v57 = vld [vmem:[%s1337_s3 + $0xe0] ss:$8 sps:$4 sm:$0xff]   ;;  %v942_v59 = vld [vmem:[%s1337_s3 + $0xd4] ss:$8 sps:$4 sm:$0xff]   ;;  %v945_v61 = vld [vmem:[%s1337_s3 + $0xd0] ss:$8 sps:$4 sm:$0xff]  }
  0x1b   :  { %508 = vmatpush1.bf16.msra.mxu0 %v912_v21  ;;  %v1132_v35 = vsub.s32 %v70_v34, %v1073_v4  ;;  %v946_v62 = vld [vmem:[%s1337_s3 + $0x144] ss:$8 sps:$4 sm:$0xff]   ;;  %v951_v1 = vld [vmem:[%s1337_s3 + $0xc0] ss:$8 sps:$4 sm:$0xff]   ;;  %v952_v2 = vld [vmem:[%s1337_s3 + $0x134] ss:$8 sps:$4 sm:$0xff]  }
  0x1c   :  { %509 = vmatprep.subr.bf16.mxu0 %v913_v22  ;;  %v948_v63 = vld [vmem:[%s1337_s3 + $0xc4] ss:$8 sps:$4 sm:$0xff]   ;;  %v954_v3 = vld [vmem:[%s1337_s3 + $0xb4] ss:$8 sps:$4 sm:$0xff]   ;;  %v956_v5 = vld [vmem:[%s1337_s3 + $0x130] ss:$8 sps:$4 sm:$0xff]  }
  0x1d   :  { %547 = vmatpush1.bf16.msra.mxu1 %v938_v56  ;;  %v1018_v6 = vmov 0   ;;  %v957_v8 = vld [vmem:[%s1337_s3 + $0xb0] ss:$8 sps:$4 sm:$0xff]   ;;  %v958_v9 = vld [vmem:[%s1337_s3 + $0x124] ss:$8 sps:$4 sm:$0xff]   ;;  %vm796_vm3 = vcmask 33792  }
  0x1e   :  { %548 = vmatprep.subr.bf16.mxu1 %v940_v58  ;;  %576 = vmatprep.mubr.bf16.mxu1 %v1018_v6  ;;  %v960_v10 = vld [vmem:[%s1337_s3 + $0xa4] ss:$8 sps:$4 sm:$0xff]   ;;  %v962_v11 = vld [vmem:[%s1337_s3 + $0x120] ss:$8 sps:$4 sm:$0xff]   ;;  %v964_v13 = vld [vmem:[%s1337_s3 + $0x114] ss:$8 sps:$4 sm:$0xff]  }
  0x1f   :  { %510 = vmatpush1.bf16.msra.mxu0 %v915_v23  ;;  %v963_v12 = vld [vmem:[%s1337_s3 + $0xa0] ss:$8 sps:$4 sm:$0xff]   ;;  %v966_v14 = vld [vmem:[%s1337_s3 + $0x94] ss:$8 sps:$4 sm:$0xff]   ;;  %v968_v15 = vld [vmem:[%s1337_s3 + $0x110] ss:$8 sps:$4 sm:$0xff]  }
  0x20   :  { %511 = vmatprep.subr.bf16.mxu0 %v916_v24  ;;  %v969_v16 = vld [vmem:[%s1337_s3 + $0x90] ss:$8 sps:$4 sm:$0xff]   ;;  %v970_v17 = vld [vmem:[%s1337_s3 + $0x104] ss:$8 sps:$4 sm:$0xff]   ;;  %v974_v19 = vld [vmem:[%s1337_s3 + $0x100] ss:$8 sps:$4 sm:$0xff]  }
  0x21   :  { %549 = vmatpush1.bf16.msra.mxu1 %v944_v60  ;;  %v972_v18 = vld [vmem:[%s1337_s3 + $0x84] ss:$8 sps:$4 sm:$0xff]   ;;  %v975_v20 = vld [vmem:[%s1337_s3 + $0x80] ss:$8 sps:$4 sm:$0xff]   ;;  %v976_v21 = vld [vmem:[%s1341_s7 + $0x78] sm:$0xff]  }
  0x22   :  { %550 = vmatprep.subr.bf16.mxu1 %v946_v62  ;;  %v977_v54 = vld [vmem:[%s1341_s7 + $0x38] sm:$0xff]   ;;  %v981_v58 = vld [vmem:[%s1341_s7 + $0x28] sm:$0xff]   ;;  %v983_v60 = vld [vmem:[%s1341_s7 + $0x20] sm:$0xff]  }
  0x23   :  { %512 = vmatpush1.bf16.msra.mxu0 %v918_v25  ;;  %v1244_v25 = vsub.s32 0, %v1073_v4  ;;  %v985_v62 = vld [vmem:[%s1341_s7 + $0x18] sm:$0xff]   ;;  %v251_v6 = vld [vmem:[%s1338_s4] sm:$0x3] }
  0x24   :  { %513 = vmatprep.subr.bf16.mxu0 %v919_v26  ;;  %v1247_v26 = vsub.s32 1, %v1073_v4 }
  0x27   :  { %514 = vmatpush1.bf16.msra.mxu0 %v921_v27  ;;  %v35_v27 = vld [vmem:[%s1335_s1] sm:$0x7] }
  0x28   :  { %515 = vmatprep.subr.bf16.mxu0 %v922_v28  ;;  %v36_v28 = vld [vmem:[%s1336_s2] sm:$0x7] }
  0x29   :  { %v153_v32 = vrot.slane %v36_v28, %v1244_v25  ;;  %v157_v33 = vrot.slane %v36_v28, %v1247_v26 }
  0x2b   :  { %516 = vmatpush1.bf16.msra.mxu0 %v924_v29  ;;  %v122_v29 = vrot.slane %v35_v27, %v1244_v25 }
  0x2c   :  { %517 = vmatprep.subr.bf16.mxu0 %v925_v30  ;;  %v126_v30 = vrot.slane %v35_v27, %v1247_v26 }
  0x2f   :  { %518 = vmatpush1.bf16.msra.mxu0 %v927_v31  ;;  %v129_v31 = vsub.s32 2, %v1073_v4 }
  0x30   :  { %519 = vmatprep.subr.bf16.mxu0 %v930_v51 }
  0x31   :  { %v130_v34 = vrot.slane %v35_v27, %v129_v31 }
  0x33   :  { %520 = vmatpush2.bf16.msra.mxu0 %v933_v53 }
  0x34   :  { %521 = vmatprep.subr.bf16.mxu0 %v936_v55 }
  0x37   :  { %522 = vmatpush2.bf16.msra.mxu0 %v939_v57  ;;  %v979_v57 = vld [vmem:[%s1341_s7 + $0x30] sm:$0xff]  }
  0x38   :  { %523 = vmatprep.subr.bf16.mxu0 %v942_v59  ;;  %v982_v59 = vld [vmem:[%s1341_s7 + $0x60] sm:$0xff]  }
  0x3b   :  { %524 = vmatpush2.bf16.msra.mxu0 %v945_v61  ;;  %v984_v61 = vld [vmem:[%s1341_s7 + $0x58] sm:$0xff]  }
  0x3c   :  { %525 = vmatprep.subr.bf16.mxu0 %v948_v63  ;;  %v986_v63 = vld [vmem:[%s1341_s7 + $0x50] sm:$0xff]  }
  0x3f   :  { %526 = vmatpush2.bf16.msra.mxu0 %v951_v1  ;;  %v988_v1 = vld [vmem:[%s1341_s7 + $0x48] sm:$0xff]  }
  0x40   :  { %527 = vmatprep.subr.bf16.mxu0 %v954_v3  ;;  %v990_v3 = vld [vmem:[%s1341_s7 + $0x40] sm:$0xff]  }
  0x43   :  { %528 = vmatpush2.bf16.msra.mxu0 %v957_v8  ;;  %v256_v8 = vrot.slane %v251_v6, %v1244_v25 }
  0x44   :  { %529 = vmatprep.subr.bf16.mxu0 %v960_v10 }
  0x47   :  { %530 = vmatpush2.bf16.msra.mxu0 %v963_v12 }
  0x48   :  { %531 = vmatprep.subr.bf16.mxu0 %v966_v14 }
  0x4b   :  { %532 = vmatpush2.bf16.msra.mxu0 %v969_v16 }
  0x4c   :  { %533 = vmatprep.subr.bf16.mxu0 %v972_v18 }
  0x4f   :  { %534 = vmatpush2.bf16.msra.mxu0 %v975_v20 }
  0x99   :  { %v64_v36 = vpop.xlane.xlu0 %63 }
  0x9a   :  { %v66_v37 = vmul.f32 0.0026041667, %v64_v36  ;;  %v131_v36 = vcombine.low %v122_v29, %v126_v30 }
  0x9c   :  { %v74_v38 = vrot.slane %v66_v37, %v1132_v35  ;;  %v161_v37 = vrot.slane %v36_v28, %v129_v31 }
  0x9e   :  { %v1135_v39 = vsub.f32 %v34_v0, %v74_v38  ;;  %v950_v0 = vld [vmem:[%s1337_s3 + $0x140] ss:$8 sps:$4 sm:$0xff]   ;;  %v162_v38 = vcombine.low %v153_v32, %v157_v33 }
  0x9f   :  { %551 = vmatpush1.bf16.msra.mxu1 %v950_v0  ;;  %v987_v0 = vld [vmem:[%s1341_s7 + $0x10] sm:$0xff]  }
  0xa0   :  { %v77_v40 = vmul.f32 %v1135_v39, %v1135_v39  ;;  %552 = vmatprep.subr.bf16.mxu1 %v952_v2  ;;  %v989_v2 = vld [vmem:[%s1341_s7 + $0x8] sm:$0xff]  }
  0xa2   :  { %v79_v41 = vcombine.high %v77_v40, %v77_v40  ;;  %v86_v42 = vrot.slane %v77_v40, %v1076_v7  ;;  %v138_v40 = vrot.slane %v131_v36, %v1076_v7 }
  0xa3   :  { %553 = vmatpush1.bf16.msra.mxu1 %v956_v5  ;;  %v991_v5 = vld [vmem:[%s1341_s7] sm:$0xff]  }
  0xa4   :  { %v93_v43 = vrot.slane %v79_v41, %v1076_v7  ;;  %v94_v44 = vcombine.high %v86_v42, %v86_v42  ;;  %v98_v45 = vsel %vm57_vm0, %v86_v42, 0.0  ;;  %554 = vmatprep.subr.bf16.mxu1 %v958_v9  ;;  %v145_v41 = vrot.slane %v130_v34, %v1076_v7  ;;  %v585_v9 = vld [vmem:[%s1339_s5] sm:$0x3] }
  0xa5   :  { %v169_v42 = vrot.slane %v162_v38, %v1076_v7 }
  0xa6   :  { %v99_v46 = vsel %vm57_vm0, %v94_v44, 0.0  ;;  %v101_v48 = vsel %vm57_vm0, %v93_v43, 0.0  ;;  %v176_v43 = vrot.slane %v161_v37, %v1076_v7  ;;  %v146_v4 = vcombine.low %v138_v40, %v145_v41 }
  0xa7   :  { %v100_v47 = vadd.f32 %v99_v46, %v98_v45  ;;  %555 = vmatpush1.bf16.msra.mxu1 %v962_v11  ;;  %v260_v11 = vrot.slane %v251_v6, %v1247_v26 }
  0xa8   :  { %556 = vmatprep.subr.bf16.mxu1 %v964_v13  ;;  %v599_v13 = vld [vmem:[%s1340_s6] sm:$0x3]  ;;  %s1019_s6 = smov [#allocation2]  }
  0xa9   :  { %v102_v49 = vadd.f32 %v101_v48, %v100_v47  ;;  %v177_v47 = vcombine.low %v169_v42, %v176_v43  ;;  %v608_v28 = vrot.slane %v599_v13, %v1247_v26 }
  0xab   :  { %103 = vadd.xlane.f32.xlu0 %v102_v49  ;;  %557 = vmatpush1.bf16.msra.mxu1 %v968_v15  ;;  %v590_v15 = vrot.slane %v585_v9, %v1244_v25 }
  0xac   :  { %558 = vmatprep.subr.bf16.mxu1 %v970_v17 }
  0xaf   :  { %559 = vmatpush1.bf16.msra.mxu1 %v974_v19  ;;  %v604_v19 = vrot.slane %v599_v13, %v1244_v25 }
  0xb0   :  { %877 = vmatprep.subr.bf16.mxu1 %v976_v21  ;;  %v594_v21 = vrot.slane %v585_v9, %v1247_v26  ;;  %v860_v26 = vld [vmem:[%s1342_s8] ss:$0 sm:$0xff] }
 0x134   :  { %v104_v22 = vpop.xlane.xlu0 %103 }
 0x135   :  { %v105_v23 = vmul.f32 0.0026041667, %v104_v22 }
 0x137   :  { %v106_v24 = vadd.f32 1e-06, %v105_v23 }
 0x139   :  { %992 = vrsqrt.f32 %v106_v24 }
 0x146   :  { %v993_v44 = vpop.eup %992 }
 0x147   :  { %v115_v45 = vrot.slane %v993_v44, %v1132_v35  ;;  %v978_v35 = vld [vmem:[%s1341_s7 + $0x70] sm:$0xff]  }
 0x149   :  { %v117_v46 = vmul.f32 %v115_v45, %v1135_v39 }
 0x14b   :  { %v148_v48 = vmul.f32 %v146_v4, %v117_v46 }
 0x14d   :  { %v179_v49 = vadd.f32 %v177_v47, %v148_v48 }
 0x14f   :  { %v188_v50 = vrot.slane %v179_v49, %v1076_v7  ;;  %v181_v51 = vcombine.high %v179_v49, %v179_v49 }
 0x151   :  { %v196_v52 = vcombine.high %v188_v50, %v188_v50  ;;  %v195_v53 = vrot.slane %v181_v51, %v1076_v7  ;;  %v200_v39 = vpack.c.bf16 %v188_v50, %v188_v50  ;;  %v980_v7 = vld [vmem:[%s1341_s7 + $0x68] sm:$0xff]   ;;  %s804_s7 = sshll.u32 %s1019_s6, 4  ;;  %s805_s7 = int_to_ptr.vmem [resolvable:$true] %s804_s7 }
 0x152   :  { %s994_s0 = scalar_lea.vmem %s805_s7, 32  ;;  %p999_p1 = scmp.lt.s32.totalorder %s805_s7, %s805_s7 }
 0x153   :  { %v201_v55 = vpack.c.bf16 %v196_v52, %v196_v52  ;;  %v202_v56 = vpack.c.bf16 %v195_v53, %v195_v53  ;;  %p995_p0 = scmp.ne.s32.totalorder %s805_s7, %s994_s0  ;;  %p1000_p2 = scmp.lt.s32.totalorder %s994_s0, %s994_s0 }
 0x155   :  { %535 = vmatprep.mubr.bf16.mxu0 %v201_v55  ;;  %577 = vmatmul.mubr.bf16.vlgmr.msra.gmra.mxu1 %v202_v56  ;;  %p1001_p3 = por %p1000_p2, %p999_p1 }
 0x156   :  { %536 = vmatmul.mubr.bf16.vlgmr.msra.gmra.mxu0 %v200_v39  ;;  %878 = vmatpush3.bf16.msra.mxu1 %v977_v54 }
 0x157   :  { %879 = vmatprep.subr.bf16.mxu1 %v978_v35  ;;  %p1002_p4 = pnand %p1001_p3, %p995_p0 }
 0x15a   :  { %880 = vmatpush3.bf16.msra.mxu1 %v979_v57 }
 0x15b   :  { %881 = vmatprep.subr.bf16.mxu1 %v980_v7 }
 0x15e   :  { %882 = vmatpush3.bf16.msra.mxu1 %v981_v58 }
 0x15f   :  { %883 = vmatprep.subr.bf16.mxu1 %v982_v59 }
 0x162   :  { %884 = vmatpush3.bf16.msra.mxu1 %v983_v60 }
 0x163   :  { %885 = vmatprep.subr.bf16.mxu1 %v984_v61 }
 0x166   :  { %886 = vmatpush3.bf16.msra.mxu1 %v985_v62 }
 0x167   :  { %887 = vmatprep.subr.bf16.mxu1 %v986_v63 }
 0x16a   :  { %888 = vmatpush3.bf16.msra.mxu1 %v987_v0 }
 0x16b   :  { %889 = vmatprep.subr.bf16.mxu1 %v988_v1 }
 0x16e   :  { %890 = vmatpush3.bf16.msra.mxu1 %v989_v2 }
 0x16f   :  { %891 = vmatprep.subr.bf16.mxu1 %v990_v3 }
 0x172   :  { %892 = vmatpush3.bf16.msra.mxu1 %v991_v5 }
 0x215   :  { %v578_v10 = vpop.f32.mrf.mxu1 }
 0x216   :  { %v537_v12 = vpop.f32.mrf.mxu0 }
 0x217   :  { %v538_v14 = vadd.f32 %v537_v12, %v256_v8  ;;  %v580_v16 = vpop.f32.mrf.mxu1 }
 0x218   :  { %v539_v17 = vpop.f32.mrf.mxu0 }
 0x219   :  { %v579_v18 = vadd.f32 %v578_v10, %v538_v14  ;;  %v540_v20 = vadd.f32 %v539_v17, %v260_v11  ;;  %v582_v22 = vpop.f32.mrf.mxu1 }
 0x21a   :  { %v541_v23 = vpop.f32.mrf.mxu0 }
 0x21b   :  { %v597_v24 = vmul.f32 %v590_v15, %v579_v18  ;;  %v581_v27 = vadd.f32 %v580_v16, %v540_v20  ;;  %v583_v29 = vpop.f32.mrf.mxu1 }
 0x21c   :  { %v542_v30 = vpop.f32.mrf.mxu0 }
 0x21d   :  { %v611_v31 = vadd.f32 %v604_v19, %v597_v24  ;;  %v598_v32 = vmul.f32 %v594_v21, %v581_v27 }
 0x21f   :  { %v615_v33 = vmul.f32 0.01, %v611_v31  ;;  %v612_v34 = vadd.f32 %v608_v28, %v598_v32  ;;  %vm613_vm1 = vcmp.ge.f32.partialorder %v611_v31, 0.0 }
 0x221   :  { %vm614_vm2 = vcmp.ge.f32.partialorder %v612_v34, 0.0  ;;  %v616_v36 = vmul.f32 0.01, %v612_v34  ;;  %v617_v37 = vsel %vm613_vm1, %v611_v31, %v615_v33 }
 0x222   :  { %v619_v40 = vpack.c.bf16 %v617_v37, %v617_v37 }
 0x223   :  { %v618_v25 = vsel %vm614_vm2, %v612_v34, %v616_v36 }
 0x224   :  { %v620_v38 = vpack.c.bf16 %v618_v25, %v618_v25 }
 0x226   :  { %788 = vmatprep.mubr.bf16.mxu1 %v620_v38 }
 0x227   :  { %789 = vmatmul.mubr.bf16.vlgmr.msra.gmra.mxu1 %v619_v40 }
 0x2e7   :  { %v893_v41 = vpop.f32.mrf.mxu1 }
 0x2e9   :  { %v894_v42 = vpop.f32.mrf.mxu1 }
 0x2ea   :  { %v895_v43 = vadd.f32 %v894_v42, %v893_v41 }
 0x2eb   :  { %v896_v44 = vpop.f32.mrf.mxu1 }
 0x2ec   :  { %v791_v45 = vadd.f32 %v895_v43, %v860_v26 }
 0x2ed   :  { %v897_v4 = vpop.f32.mrf.mxu1 }
 0x2ee   :  { %797 = vst.msk [vmem:[#allocation2] sm:$0x3] %vm796_vm3, %v791_v45 }
 0x2ef   :  { %1005 = shalt.err (!%p1002_p4)
}
 0x2f0   :  { %807 = dma.vmem_to_hbm [thread:$0]  %s805_s7, 32, %s1343_s9, [#allocation3]  }
 0x2f1   :  { %1014 = dma.done.wait [#allocation3], 32  }
 0x2f2   :  { %1015 = vsyncadd [#allocation3], 4294967264 }
 0x2f3   :  { %811 = vsyncpa [#allocation3], 1 }

// kernel: prediction_model_forward.4
= control target key start
LH: loop header
LB: loop body
LE: loop exit
PB: predicated region body
PF: predicated region fallthrough
CT: control target
= control target key end

     0   :  { %s14004_s0 = inlined_call_operand.vmem [shape: f32[2,8,384], index: 0, kind: input, shape index: {}]   ;;  %s14005_s1 = inlined_call_operand.vmem [shape: f32[12,1,384], index: 1, kind: input, shape index: {}]   ;;  %s14006_s2 = inlined_call_operand.vmem [shape: f32[12,1,384], index: 2, kind: input, shape index: {}]   ;;  %s14007_s3 = inlined_call_operand.hbm [shape: bf16[12,384,1152], index: 3, kind: input, shape index: {}]   ;;  %s14008_s4 = inlined_call_operand.vmem [shape: f32[12,1,1152], index: 4, kind: input, shape index: {}]   ;;  %s14009_s5 = inlined_call_operand.hbm [shape: bf16[12,384,384], index: 5, kind: input, shape index: {}]   ;;  %s14010_s6 = inlined_call_operand.vmem [shape: f32[12,1,384], index: 6, kind: input, shape index: {}]   ;;  %s14011_s7 = inlined_call_operand.vmem [shape: f32[12,1,384], index: 7, kind: input, shape index: {}]   ;;  %s14012_s8 = inlined_call_operand.vmem [shape: f32[12,1,384], index: 8, kind: input, shape index: {}]   ;;  %s14013_s9 = inlined_call_operand.hbm [shape: bf16[12,384,1536], index: 9, kind: input, shape index: {}]   ;;  %s14014_s10 = inlined_call_operand.vmem [shape: f32[12,1,1536], index: 10, kind: input, shape index: {}]   ;;  %s14015_s11 = inlined_call_operand.hbm [shape: bf16[12,1536,384], index: 11, kind: input, shape index: {}]   ;;  %s14016_s12 = inlined_call_operand.vmem [shape: f32[12,1,384], index: 12, kind: input, shape index: {}]   ;;  %s14017_s13 = inlined_call_operand.vmem [shape: f32[2,8,384], index: 13, kind: output, shape index: {}]  }
   0x1   :  { %14029 = sst [smem:[#allocation23_spill]] %s14004_s0 }
   0x2   :  { %14030 = sst [smem:[#allocation24_spill]] %s14007_s3 }
   0x3   :  { %14031 = sst [smem:[#allocation25_spill]] %s14008_s4 }
   0x4   :  { %14032 = sst [smem:[#allocation26_spill]] %s14009_s5 }
   0x5   :  { %14033 = sst [smem:[#allocation27_spill]] %s14010_s6 }
   0x6   :  { %14034 = sst [smem:[#allocation28_spill]] %s14011_s7 }
   0x7   :  { %14035 = sst [smem:[#allocation29_spill]] %s14012_s8 }
   0x8   :  { %14036 = sst [smem:[#allocation30_spill]] %s14013_s9 }
   0x9   :  { %14037 = sst [smem:[#allocation31_spill]] %s14014_s10 }
   0xa   :  { %14038 = sst [smem:[#allocation32_spill]] %s14015_s11 }
   0xb   :  { %14039 = sst [smem:[#allocation33_spill]] %s14016_s12 }
   0xc   :  { %14040 = sst [smem:[#allocation34_spill]] %s14017_s13 }
   0xd   :  { %18 = vsyncpa [#allocation4], 0 }
   0xe   :  { %20 = vsyncpa [#allocation4 + $0x1], 0 }
   0xf   :  { %21 = vsyncpa [#allocation6], 0 }
  0x10   :  { %23 = vsyncpa [#allocation6 + $0x1], 0 }
  0x11   :  { %24 = vsyncpa [#allocation9], 0 }
  0x12   :  { %26 = vsyncpa [#allocation9 + $0x1], 0  ;;  %s12276_s25 = smov 0   ;;  %s12278_s26 = smov 0  }
  0x13   :  { %s12280_s27 = smov 0   ;;  %s12282_s28 = smov 0  }
  0x14   :  { %s12284_s29 = smov 0   ;;  %s12286_s30 = smov 0  }
  0x15   :  { %s12288_s14 = smov 0   ;;  %s12290_s15 = smov 0  }
  0x16 LB: > { %14041 = sst [smem:[#allocation13_spill]] %s12164_s26  ;;  %s14019_s16 = sadd.s32 4294967295, %s12188_s15   ;;  %s12188_s15 = sphi %s12290_s15, %s32_s15   ;;  %s12184_s14 = sphi %s12288_s14, %s14085_s14   ;;  %s12180_s30 = sphi %s12286_s30, %s14084_s30   ;;  %s12176_s29 = sphi %s12284_s29, %s14083_s29   ;;  %s12172_s28 = sphi %s12282_s28, %s14082_s28   ;;  %s12168_s27 = sphi %s12280_s27, %s14081_s27   ;;  %s12164_s26 = sphi %s12278_s26, %s14080_s26   ;;  %s12160_s25 = sphi %s12276_s25, %s14079_s25  }
  0x17   : > { %14042 = sst [smem:[#allocation14_spill]] %s12168_s27  ;;  %s41_s17 = sadd.s32 1, %s12180_s30 }
  0x18   : > { %14043 = sst [smem:[#allocation15_spill]] %s12180_s30  ;;  %p42_p0 = scmp.ge.s32.totalorder %s41_s17, 12 }
  0x19   : > { %14044 = sst [smem:[#allocation16_spill]] %s12184_s14  ;;  %s44_s18 = sadd.s32 1, %s12184_s14 }
  0x1a   : > { %14045 = sst [smem:[#allocation17_spill]] %s12188_s15  ;;  %s129_s19 = sadd.s32 1, %s12168_s27 }
  0x1b   : > { %p136_p1 = scmp.ne.s32.totalorder %s12168_s27, %s12164_s26  ;;  %s14087_s17 = smov (%p42_p0, %s41_s17), 0 }
  0x1c   : > { %14046 = sst [smem:[#allocation18_spill]] %s14087_s17  ;;  %s14089_s18 = smov (!%p42_p0, %s44_s18), %s12184_s14 }
  0x1d   : > { %s126_s20 = ssub.s32 %s12180_s30, %s14087_s17  ;;  %p137_p2 = scmp.eq.s32.totalorder %s12188_s15, 0 }
  0x1e   : > { %p46_p3 = scmp.ge.s32.totalorder %s14089_s18, 2  ;;  %p127_p4 = scmp.eq.s32.totalorder %s126_s20, 0 }
  0x1f   : > { %p138_p5 = por %p137_p2, %p136_p1  ;;  %p142_p6 = scmp.ne.s32.totalorder %s12164_s26, %s12160_s25 }
  0x20   : > { %s14091_s18 = smov (%p46_p3, %s14089_s18), 0  ;;  %p143_p7 = scmp.eq.s32.totalorder %s14019_s16, 0 }
  0x21   : > { %14047 = sst [smem:[#allocation19_spill]] %s14091_s18  ;;  %p10616_p8 = scmp.lt.s32.totalorder %s12188_s15, 24 }
  0x22   : > { %s12330_s21 = scalar_select %p127_p4, %s12168_s27, %s129_s19  }
  0x23   : > { %s12336_s22 = sand.u32 1, %s12168_s27   ;;  %p12338_p9 = por %p143_p7, %p142_p6 }
  0x24   : > { %14048 = sst [smem:[#allocation20_spill]] %s12330_s21  ;;  %s476_s24 = sand.u32 1, %s12188_s15  }
  0x25   : > { %p12343_p10 = pnand %p10616_p8, %p138_p5  ;;  %s10582_s25 = smul.u32 576, %s12336_s22 }
  0x26   : > { %s10583_s19 = smul.u32 9216, %s12180_s30  ;;  %s14051_s5 = sld [smem:[#allocation26_spill]] }
  0x27   : > { %s480_s14 = scalar_lea.vmem [#allocation5], %s10582_s25  ;;  %p9367_p11 = scmp.ge.s32.totalorder %s12188_s15, 1 }
  0x28   : > { %s487_s21 = sshll.u32 %s480_s14, 4  ;;  %s12353_s27 = scalar_lea.sflag [#allocation6], %s476_s24  ;;  %s488_s21 = int_to_ptr.vmem [resolvable:$true] %s487_s21 }
  0x29   : > { %p12004_p12 = pneg %p12343_p10  ;;  %s12015_s10 = scalar_lea.vmem %s488_s21, 9216 }
  0x2a   : > { %p12016_p13 = scmp.ne.s32.totalorder %s488_s21, %s12015_s10  ;;  %s12190_s13 = smov [#allocation5]  }
  0x2b   : > { %s12020_s12 = sshll.u32 %s12190_s13, 4  ;;  %s12021_s12 = int_to_ptr.vmem [resolvable:$false] %s12020_s12 }
  0x2c   : > { %s486_s16 = scalar_lea.hbm %s14051_s5, %s10583_s19  ;;  %p12018_p0 = pnand %p12016_p13, %p12004_p12 }
  0x2d   : > { %s12022_s8 = scalar_lea.vmem %s12021_s12, 18432  ;;  %p12023_p2 = scmp.lt.s32.totalorder %s488_s21, %s12021_s12 }
  0x2e   : > { %p12019_p1 = pneg %p12018_p0  ;;  %p12024_p3 = scmp.lt.s32.totalorder %s12022_s8, %s12015_s10 }
  0x30   : > { %p12025_p4 = por %p12024_p3, %p12023_p2 }
  0x32   : > { %p12026_p5 = pnand %p12025_p4, %p12019_p1 }
  0x34   : > { %12029 = shalt.err (!%p12026_p5)
}
  0x35   : > { %s14022_s14 = smov 192   ;;  %s14023_s17 = smov 12  }
  0x36   : > { %10609 = dma.hbm_to_vmem [thread:$0]  (!%p12343_p10), %s486_s16, 9216, %s488_s21, %s12353_s27, %s14022_s14, %s14022_s14, %s14023_s17  }
  0x37   : > { %p572_p6 = scmp.lt.s32.totalorder %s12188_s15, 25  ;;  %s10580_s10 = smul.u32 1728, %s12336_s22 }
  0x38   : > { %s10581_s12 = smul.u32 27648, %s12180_s30  ;;  %s14053_s3 = sld [smem:[#allocation24_spill]] }
  0x39   : > { %p12369_p7 = pnand %p9367_p11, %p572_p6  ;;  %s452_s25 = scalar_lea.vmem [#allocation3], %s10580_s10 }
  0x3a   : > { %s459_s19 = sshll.u32 %s452_s25, 4  ;;  %s10584_s5 = smul.u32 2304, %s12336_s22  ;;  %s460_s19 = int_to_ptr.vmem [resolvable:$true] %s459_s19 }
  0x3b   : > { %s449_s7 = scalar_lea.sflag [#allocation4], %s12336_s22  ;;  %s12043_s6 = scalar_lea.vmem %s460_s19, 27648 }
  0x3c   : > { %p12044_p8 = scmp.ne.s32.totalorder %s460_s19, %s12043_s6  ;;  %s12193_s16 = smov [#allocation3]  }
  0x3d   : > { %s12048_s21 = sshll.u32 %s12193_s16, 4  ;;  %s12049_s21 = int_to_ptr.vmem [resolvable:$false] %s12048_s21 }
  0x3e   : > { %s458_s24 = scalar_lea.hbm %s14053_s3, %s10581_s12  ;;  %p12046_p13 = pnand %p12044_p8, %p12004_p12 }
  0x3f   : > { %s12050_s14 = scalar_lea.vmem %s12049_s21, 55296  ;;  %p12051_p0 = scmp.lt.s32.totalorder %s460_s19, %s12049_s21 }
  0x40   : > { %p12047_p11 = pneg %p12046_p13  ;;  %p12052_p1 = scmp.lt.s32.totalorder %s12050_s14, %s12043_s6 }
  0x42   : > { %p12053_p2 = por %p12052_p1, %p12051_p0 }
  0x44   : > { %p12054_p3 = pnand %p12053_p2, %p12047_p11 }
  0x46   : > { %12057 = shalt.err (!%p12054_p3)
}
  0x47   : > { %s12194_s10 = smov 576   ;;  %s12195_s12 = smov 36  }
  0x48   : > { %10606 = dma.hbm_to_vmem [thread:$0]  (!%p12343_p10), %s458_s24, 27648, %s460_s19, %s449_s7, %s12194_s10, %s12194_s10, %s12195_s12  }
  0x49   : > { %s10585_s13 = smul.u32 36864, %s12180_s30  ;;  %s522_s18 = scalar_lea.vmem [#allocation7], %s10584_s5 }
  0x4a   : > { %s529_s25 = sshll.u32 %s522_s18, 4  ;;  %s14054_s9 = sld [smem:[#allocation30_spill]]  ;;  %s530_s25 = int_to_ptr.vmem [resolvable:$true] %s529_s25 }
  0x4b   : > { %s12071_s6 = scalar_lea.vmem %s530_s25, 36864  ;;  %s12196_s14 = smov [#allocation7]  }
  0x4c   : > { %p12072_p4 = scmp.ne.s32.totalorder %s530_s25, %s12071_s6  ;;  %s12076_s3 = sshll.u32 %s12196_s14, 4  ;;  %s12077_s3 = int_to_ptr.vmem [resolvable:$false] %s12076_s3 }
  0x4d   : > { %s12078_s4 = scalar_lea.vmem %s12077_s3, 73728  ;;  %p12079_p8 = scmp.lt.s32.totalorder %s530_s25, %s12077_s3 }
  0x4e   : > { %p12074_p5 = pnand %p12072_p4, %p12004_p12  ;;  %p12080_p13 = scmp.lt.s32.totalorder %s12078_s4, %s12071_s6 }
  0x50   : > { %s528_s21 = scalar_lea.hbm %s14054_s9, %s10585_s13  ;;  %p12075_p6 = pneg %p12074_p5 }
  0x51   : > { %p12081_p11 = por %p12080_p13, %p12079_p8 }
  0x53   : > { %p12082_p0 = pnand %p12081_p11, %p12075_p6 }
  0x55   : > { %12085 = shalt.err (!%p12082_p0)
}
  0x56   : > { %s12197_s7 = smov 768   ;;  %s12198_s17 = smov 48  }
  0x57   : > { %10612 = dma.hbm_to_vmem [thread:$0]  (!%p12343_p10), %s528_s21, 36864, %s530_s25, %s12353_s27, %s12197_s7, %s12197_s7, %s12198_s17  }
  0x58   : > { %s14055_s11 = sld [smem:[#allocation32_spill]]  ;;  %s550_s12 = scalar_lea.vmem [#allocation8], %s10584_s5 }
  0x59   : > { %s557_s3 = sshll.u32 %s550_s12, 4  ;;  %s547_s4 = scalar_lea.sflag [#allocation9], %s12336_s22  ;;  %s558_s3 = int_to_ptr.vmem [resolvable:$true] %s557_s3 }
  0x5a   : > { %s12099_s18 = scalar_lea.vmem %s558_s3, 36864  ;;  %s12199_s16 = smov [#allocation8]  }
  0x5b   : > { %p12100_p1 = scmp.ne.s32.totalorder %s558_s3, %s12099_s18  ;;  %s12104_s6 = sshll.u32 %s12199_s16, 4  ;;  %s12105_s6 = int_to_ptr.vmem [resolvable:$false] %s12104_s6 }
  0x5c   : > { %s12106_s14 = scalar_lea.vmem %s12105_s6, 73728  ;;  %p12107_p4 = scmp.lt.s32.totalorder %s558_s3, %s12105_s6 }
  0x5d   : > { %p12102_p2 = pnand %p12100_p1, %p12004_p12  ;;  %p12108_p5 = scmp.lt.s32.totalorder %s12106_s14, %s12099_s18 }
  0x5e   : > { %s556_s10 = scalar_lea.hbm %s14055_s11, %s10585_s13 }
  0x5f   : > { %p12103_p3 = pneg %p12102_p2  ;;  %p12109_p6 = por %p12108_p5, %p12107_p4 }
  0x61   : > { %p12110_p8 = pnand %p12109_p6, %p12103_p3 }
  0x63   : > { %12113 = shalt.err (!%p12110_p8)
}
  0x64   : > { %s14056_s5 = smov 12   ;;  %s14057_s27 = smov 192  }
  0x65   : > { %10615 = dma.hbm_to_vmem [thread:$0]  (!%p12343_p10), %s556_s10, 36864, %s558_s3, %s547_s4, %s14057_s27, %s14057_s27, %s14056_s5  }
  0x66   : > { %576 = sbr.rel (%p12369_p7) target bundleno = 3477 (0xd95), region = 72 }
  0x6b   : > { %s578_s22 = sand.u32 1, %s12164_s26  }
  0x6c   : > { %s10588_s13 = smul.u32 1728, %s578_s22  ;;  %s579_s25 = scalar_lea.sflag [#allocation4], %s578_s22 }
  0x6e   : > { %s12414_s21 = scalar_lea.vmem [#allocation3], %s10588_s13 }
  0x6f   : > { %12147 = dma.done.wait (%p12338_p9), %s579_s25, 27648  }
  0x70   : > { %12149 = vsyncadd (%p12338_p9), %s579_s25, 4294939648  ;;  %s14058_s20 = sadd.s32 4294967295, %s12188_s15   ;;  %s10589_s17 = smul.u32 576, %s578_s22 }
  0x71   : > { %s587_s7 = sand.u32 1, %s14058_s20  }
  0x72   : > { %s588_s24 = scalar_lea.sflag [#allocation6], %s587_s7  ;;  %s12422_s8 = scalar_lea.vmem [#allocation5], %s10589_s17 }
  0x73   : > { %12151 = dma.done.wait (%p12338_p9), %s588_s24, 46080  }
  0x74   : > { %12153 = vsyncadd (%p12338_p9), %s588_s24, 4294921216  ;;  %s10590_s19 = smul.u32 2304, %s578_s22  ;;  %s606_s12 = scalar_lea.sflag [#allocation9], %s578_s22 }
  0x76   : > { %s12428_s10 = scalar_lea.vmem [#allocation7], %s10590_s19  ;;  %s12430_s3 = scalar_lea.vmem [#allocation8], %s10590_s19 }
  0x77   : > { %14059 = sst [smem:[#allocation21_spill]] %s12428_s10 }
  0x78   : > { %14060 = sst [smem:[#allocation22_spill]] %s12430_s3 }
  0x79   : > { %12155 = dma.done.wait (%p12338_p9), %s606_s12, 36864  }
  0x7a   : > { %12157 = vsyncadd (%p12338_p9), %s606_s12, 4294930432  ;;  %p704_p10 = scmp.lt.s32.totalorder %s12176_s29, 1  ;;  %p709_p12 = scmp.lt.s32.totalorder %s12172_s28, 11 }
  0x7b   : > { %s14061_s0 = sld [smem:[#allocation23_spill]]  ;;  %p9370_p9 = scmp.ne.s32.totalorder %s12172_s28, 0 }
  0x7c   : > { %s14093_s29 = smov (!%p704_p10, %s12176_s29), 1  ;;  %s14062_s24 = sld [smem:[#allocation25_spill]] }
  0x7d   : > { %s710_s4 = scalar_select %p709_p12, %s12172_s28, 11 }
  0x7e   : > { %s10591_s18 = smul.u32 24, %s14093_s29  ;;  %s14064_s30 = sld [smem:[#allocation28_spill]] }
  0x7f   : > { %s12440_s16 = smul.u32 3, %s710_s4  ;;  %s14065_s22 = sld [smem:[#allocation29_spill]] }
  0x80   : > { %s10593_s5 = smul.u32 9, %s710_s4  ;;  %s14066_s29 = sld [smem:[#allocation33_spill]] }
  0x81   : > { %s708_s23 = scalar_lea.vmem %s14061_s0, %s10591_s18  ;;  %s10594_s3 = smul.u32 12, %s710_s4 }
  0x82   : > { %s12456_s19 = scalar_lea.vmem %s14062_s24, %s10593_s5  ;;  %s14067_s17 = sld [smem:[#allocation34_spill]] }
  0x83   : > { %s14068_s14 = sld [smem:[#allocation31_spill]] }
  0x84   : > { %s728_s26 = scalar_lea.vmem %s14064_s30, %s12440_s16 }
  0x85   : > { %s732_s13 = scalar_lea.vmem %s14065_s22, %s12440_s16  ;;  %750 = sbr.rel (%p9370_p9) target bundleno = 141 (0x8d), region = 92 }
  0x86   : > { %s740_s10 = scalar_lea.vmem %s14066_s29, %s12440_s16 }
  0x88   : > { %s12477_s24 = scalar_lea.vmem %s14067_s17, %s10591_s18 }
  0x89   : > { %s12482_s9 = scalar_lea.vmem %s14068_s14, %s10594_s3 }
  0x8a   : > { %v751_v0 = vld [vmem:[%s708_s23] sm:$0xff]  ;;  %v752_v1 = vld [vmem:[%s708_s23 + $0x8] sm:$0xff]  ;;  %v753_v2 = vld [vmem:[%s708_s23 + $0x10] sm:$0xff] }
  0x8b   : > { %754 = vst [vmem:[#allocation2 + $0x10] sm:$0xff] %v751_v0  ;;  %755 = vst [vmem:[#allocation2] sm:$0xff] %v752_v1 }
  0x8c   : > { %756 = vst [vmem:[#allocation2 + $0x8] sm:$0xff] %v753_v2 }
  0x8d PF: > { %v10698_v8 = vld [vmem:[%s12414_s21 + $0x1fc] ss:$36 sps:$4 sm:$0xff]   ;;  %v10701_v10 = vld [vmem:[%s12414_s21 + $0x1b4] ss:$36 sps:$4 sm:$0xff]   ;;  %v10704_v12 = vld [vmem:[%s12414_s21 + $0x16c] ss:$36 sps:$4 sm:$0xff]   ;;  %s14069_s28 = scalar_lea.vmem %s14005_s1, %s12440_s16  ;;  %s14070_s3 = scalar_lea.vmem %s14006_s2, %s12440_s16 }
  0x8e   : > { %v10700_v9 = vld [vmem:[%s12414_s21 + $0x1f8] ss:$36 sps:$4 sm:$0xff]   ;;  %2218 = vmatprep.subr.bf16.mxu0 %v10698_v8  ;;  %v10703_v11 = vld [vmem:[%s12414_s21 + $0x1b0] ss:$36 sps:$4 sm:$0xff]   ;;  %v10706_v16 = vld [vmem:[%s12414_s21 + $0x168] ss:$36 sps:$4 sm:$0xff]   ;;  %v785_v8 = vlaneseq }
  0x8f   : > { %2219 = vmatpush1.bf16.msra.mxu0 %v10700_v9  ;;  %v10722_v13 = vld [vmem:[%s12414_s21 + $0x67c] ss:$36 sps:$4 sm:$0xff]   ;;  %v10728_v15 = vld [vmem:[%s12414_s21 + $0x634] ss:$36 sps:$4 sm:$0xff]   ;;  %v10707_v17 = vld [vmem:[%s12414_s21 + $0x124] ss:$36 sps:$4 sm:$0xff]  }
  0x90   : > { %2220 = vmatprep.subr.bf16.mxu0 %v10701_v10  ;;  %v10726_v14 = vld [vmem:[%s12414_s21 + $0x678] ss:$36 sps:$4 sm:$0xff]   ;;  %2259 = vmatprep.subr.bf16.mxu1 %v10722_v13  ;;  %v10732_v18 = vld [vmem:[%s12414_s21 + $0x630] ss:$36 sps:$4 sm:$0xff]   ;;  %v10709_v19 = vld [vmem:[%s12414_s21 + $0x120] ss:$36 sps:$4 sm:$0xff]  }
  0x91   : > { %2260 = vmatpush1.bf16.msra.mxu1 %v10726_v14  ;;  %v10710_v20 = vld [vmem:[%s12414_s21 + $0xdc] ss:$36 sps:$4 sm:$0xff]   ;;  %v10713_v22 = vld [vmem:[%s12414_s21 + $0x94] ss:$36 sps:$4 sm:$0xff]   ;;  %v10716_v24 = vld [vmem:[%s12414_s21 + $0x4c] ss:$36 sps:$4 sm:$0xff]  }
  0x92   : > { %v757_v3 = vld [vmem:[#allocation2 + $0x10] sm:$0xff]  ;;  %v758_v4 = vld [vmem:[#allocation2] sm:$0xff]  ;;  %2261 = vmatprep.subr.bf16.mxu1 %v10728_v15  ;;  %v10715_v23 = vld [vmem:[%s12414_s21 + $0x90] ss:$36 sps:$4 sm:$0xff]   ;;  %v12200_v61 = vmov 0   ;;  %v12549_v9 = vshrl.u32 %v785_v8, 7 }
  0x93   : > { %v759_v5 = vld [vmem:[#allocation2 + $0x8] sm:$0xff]  ;;  %v762_v6 = vadd.f32 %v758_v4, %v757_v3  ;;  %2221 = vmatpush1.bf16.msra.mxu0 %v10703_v11  ;;  %v10712_v21 = vld [vmem:[%s12414_s21 + $0xd8] ss:$36 sps:$4 sm:$0xff]   ;;  %v10718_v25 = vld [vmem:[%s12414_s21 + $0x48] ss:$36 sps:$4 sm:$0xff]   ;;  %2291 = vmatprep.mubr.bf16.mxu1 %v12200_v61  ;;  %vm12202_vm0 = vmmov 0  }
  0x94   : > { %2222 = vmatprep.subr.bf16.mxu0 %v10704_v12  ;;  %v10719_v26 = vld [vmem:[%s12414_s21 + $0x4] ss:$36 sps:$4 sm:$0xff]   ;;  %v10724_v28 = vld [vmem:[%s12414_s21 + $0x43c] ss:$36 sps:$4 sm:$0xff]   ;;  %v10730_v30 = vld [vmem:[%s12414_s21 + $0x3f4] ss:$36 sps:$4 sm:$0xff]  }
  0x95   : > { %v763_v7 = vadd.f32 %v762_v6, %v759_v5  ;;  %2262 = vmatpush1.bf16.msra.mxu1 %v10732_v18  ;;  %v10721_v27 = vld [vmem:[%s12414_s21] ss:$36 sps:$4 sm:$0xff]   ;;  %v10727_v29 = vld [vmem:[%s12414_s21 + $0x438] ss:$36 sps:$4 sm:$0xff]   ;;  %v10733_v31 = vld [vmem:[%s12414_s21 + $0x3f0] ss:$36 sps:$4 sm:$0xff]  }
  0x96   : > { %v10734_v42 = vld [vmem:[%s12414_s21 + $0x5ec] ss:$36 sps:$4 sm:$0xff]   ;;  %v10740_v46 = vld [vmem:[%s12414_s21 + $0x5a4] ss:$36 sps:$4 sm:$0xff]   ;;  %v10746_v50 = vld [vmem:[%s12414_s21 + $0x55c] ss:$36 sps:$4 sm:$0xff]  }
  0x97   : > { %764 = vadd.xlane.f32.xlu0 %v763_v7  ;;  %2223 = vmatpush1.bf16.msra.mxu0 %v10706_v16  ;;  %v10736_v43 = vld [vmem:[%s12414_s21 + $0x3ac] ss:$36 sps:$4 sm:$0xff]   ;;  %v10742_v47 = vld [vmem:[%s12414_s21 + $0x364] ss:$36 sps:$4 sm:$0xff]   ;;  %v10748_v51 = vld [vmem:[%s12414_s21 + $0x31c] ss:$36 sps:$4 sm:$0xff]  }
  0x98   : > { %2224 = vmatprep.subr.bf16.mxu0 %v10707_v17  ;;  %v10738_v44 = vld [vmem:[%s12414_s21 + $0x5e8] ss:$36 sps:$4 sm:$0xff]   ;;  %2263 = vmatprep.subr.bf16.mxu1 %v10734_v42  ;;  %v10744_v48 = vld [vmem:[%s12414_s21 + $0x5a0] ss:$36 sps:$4 sm:$0xff]   ;;  %v10750_v52 = vld [vmem:[%s12414_s21 + $0x558] ss:$36 sps:$4 sm:$0xff]  }
  0x99   : > { %v10739_v45 = vld [vmem:[%s12414_s21 + $0x3a8] ss:$36 sps:$4 sm:$0xff]   ;;  %2264 = vmatpush1.bf16.msra.mxu1 %v10738_v44  ;;  %v10745_v49 = vld [vmem:[%s12414_s21 + $0x360] ss:$36 sps:$4 sm:$0xff]   ;;  %v10751_v53 = vld [vmem:[%s12414_s21 + $0x318] ss:$36 sps:$4 sm:$0xff]  }
  0x9a   : > { %2265 = vmatprep.subr.bf16.mxu1 %v10740_v46  ;;  %v10752_v54 = vld [vmem:[%s12414_s21 + $0x514] ss:$36 sps:$4 sm:$0xff]   ;;  %v10758_v58 = vld [vmem:[%s12414_s21 + $0x4cc] ss:$36 sps:$4 sm:$0xff]   ;;  %v10764_v63 = vld [vmem:[%s12414_s21 + $0x484] ss:$36 sps:$4 sm:$0xff]  }
  0x9b   : > { %2225 = vmatpush1.bf16.msra.mxu0 %v10709_v19  ;;  %v10754_v55 = vld [vmem:[%s12414_s21 + $0x2d4] ss:$36 sps:$4 sm:$0xff]   ;;  %v10760_v59 = vld [vmem:[%s12414_s21 + $0x28c] ss:$36 sps:$4 sm:$0xff]   ;;  %v10766_v0 = vld [vmem:[%s12414_s21 + $0x244] ss:$36 sps:$4 sm:$0xff]  }
  0x9c   : > { %2226 = vmatprep.subr.bf16.mxu0 %v10710_v20  ;;  %v10756_v56 = vld [vmem:[%s12414_s21 + $0x510] ss:$36 sps:$4 sm:$0xff]   ;;  %v10762_v60 = vld [vmem:[%s12414_s21 + $0x4c8] ss:$36 sps:$4 sm:$0xff]   ;;  %v10768_v1 = vld [vmem:[%s12414_s21 + $0x480] ss:$36 sps:$4 sm:$0xff]  }
  0x9d   : > { %2266 = vmatpush1.bf16.msra.mxu1 %v10744_v48  ;;  %v10757_v57 = vld [vmem:[%s12414_s21 + $0x2d0] ss:$36 sps:$4 sm:$0xff]   ;;  %v10763_v62 = vld [vmem:[%s12414_s21 + $0x288] ss:$36 sps:$4 sm:$0xff]   ;;  %v10769_v2 = vld [vmem:[%s12414_s21 + $0x240] ss:$36 sps:$4 sm:$0xff]  }
  0x9e   : > { %2267 = vmatprep.subr.bf16.mxu1 %v10746_v50  ;;  %v760_v10 = vld [vmem:[%s14069_s28] sm:$0x7]  ;;  %v12557_v11 = vsub.s32 1, %v12549_v9  ;;  %v12560_v12 = vsub.s32 2, %v12549_v9  ;;  %v12563_v13 = vsub.s32 0, %v12549_v9  ;;  %vm2633_vm1 = vcmask 523264  }
  0x9f   : > { %2227 = vmatpush1.bf16.msra.mxu0 %v10712_v21  ;;  %v761_v14 = vld [vmem:[%s14070_s3] sm:$0x7]  ;;  %v10782_v42 = vld [vmem:[%s12414_s21 + $0x170] ss:$36 sps:$4 sm:$0xff]   ;;  %v10794_v50 = vld [vmem:[%s12414_s21 + $0xe0] ss:$36 sps:$4 sm:$0xff]  }
  0xa0   : > { %2228 = vmatprep.subr.bf16.mxu0 %v10713_v22  ;;  %v792_v15 = vrot.slane %v760_v10, %v12557_v11  ;;  %v796_v16 = vrot.slane %v760_v10, %v12560_v12  ;;  %v788_v17 = vrot.slane %v760_v10, %v12563_v13  ;;  %v811_v19 = vrot.slane %v761_v14, %v12557_v11  ;;  %v10790_v44 = vld [vmem:[%s12414_s21 + $0x12c] ss:$36 sps:$4 sm:$0xff]   ;;  %v10796_v48 = vld [vmem:[%s12414_s21 + $0xe4] ss:$36 sps:$4 sm:$0xff]   ;;  %s14071_s18 = sld [smem:[#allocation27_spill]] }
  0xa1   : > { %2268 = vmatpush1.bf16.msra.mxu1 %v10750_v52  ;;  %v815_v20 = vrot.slane %v761_v14, %v12560_v12  ;;  %v10788_v46 = vld [vmem:[%s12414_s21 + $0x128] ss:$36 sps:$4 sm:$0xff]   ;;  %v10802_v52 = vld [vmem:[%s12414_s21 + $0x9c] ss:$36 sps:$4 sm:$0xff]   ;;  %vm2698_vm2 = vcmask 1043456   ;;  %vm2682_vm4 = vcmask 64512  }
  0xa2   : > { %2269 = vmatprep.subr.bf16.mxu1 %v10752_v54  ;;  %v10800_v54 = vld [vmem:[%s12414_s21 + $0x98] ss:$36 sps:$4 sm:$0xff]   ;;  %v10827_v10 = vld [vmem:[%s12414_s21 + $0x1c0] ss:$36 sps:$4 sm:$0xff]   ;;  %s14073_s29 = sld [smem:[#allocation21_spill]] }
  0xa3   : > { %2229 = vmatpush1.bf16.msra.mxu0 %v10715_v23 }
  0xa4   : > { %2230 = vmatprep.subr.bf16.mxu0 %v10716_v24  ;;  %v807_v24 = vrot.slane %v761_v14, %v12563_v13  ;;  %v10832_v14 = vld [vmem:[%s12414_s21 + $0x3b4] ss:$36 sps:$4 sm:$0xff]  }
  0xa5   : > { %2270 = vmatpush1.bf16.msra.mxu1 %v10756_v56  ;;  %v10808_v56 = vld [vmem:[%s12414_s21 + $0x54] ss:$36 sps:$4 sm:$0xff]  }
  0xa6   : > { %2271 = vmatprep.subr.bf16.mxu1 %v10758_v58  ;;  %v10806_v58 = vld [vmem:[%s12414_s21 + $0x50] ss:$36 sps:$4 sm:$0xff]   ;;  %s14072_s23 = scalar_lea.vmem %s14071_s18, %s12440_s16 }
  0xa7   : > { %2231 = vmatpush1.bf16.msra.mxu0 %v10718_v25 }
  0xa8   : > { %2232 = vmatprep.subr.bf16.mxu0 %v10719_v26 }
  0xa9   : > { %2272 = vmatpush1.bf16.msra.mxu1 %v10762_v60  ;;  %v10814_v60 = vld [vmem:[%s12414_s21 + $0xc] ss:$36 sps:$4 sm:$0xff]  }
  0xaa   : > { %2273 = vmatprep.subr.bf16.mxu1 %v10764_v63  ;;  %v10812_v63 = vld [vmem:[%s12414_s21 + $0x8] ss:$36 sps:$4 sm:$0xff]  }
  0xab   : > { %2233 = vmatpush1.bf16.msra.mxu0 %v10721_v27 }
  0xac   : > { %2234 = vmatprep.subr.bf16.mxu0 %v10724_v28  ;;  %v10770_v28 = vld [vmem:[%s12414_s21 + $0x200] ss:$36 sps:$4 sm:$0xff]  }
  0xad   : > { %2274 = vmatpush1.bf16.msra.mxu1 %v10768_v1  ;;  %v10820_v1 = vld [vmem:[%s12414_s21 + $0x444] ss:$36 sps:$4 sm:$0xff]  }
  0xaf   : > { %2235 = vmatpush2.bf16.msra.mxu0 %v10727_v29 }
  0xb0   : > { %2236 = vmatprep.subr.bf16.mxu0 %v10730_v30 }
  0xb3   : > { %2237 = vmatpush2.bf16.msra.mxu0 %v10733_v31 }
  0xb4   : > { %2238 = vmatprep.subr.bf16.mxu0 %v10736_v43  ;;  %v10785_v43 = vld [vmem:[%s12414_s21 + $0x5f0] ss:$36 sps:$4 sm:$0xff]  }
  0xb7   : > { %2239 = vmatpush2.bf16.msra.mxu0 %v10739_v45  ;;  %v10793_v45 = vld [vmem:[%s12414_s21 + $0x5ac] ss:$36 sps:$4 sm:$0xff]  }
  0xb8   : > { %2240 = vmatprep.subr.bf16.mxu0 %v10742_v47  ;;  %v10791_v47 = vld [vmem:[%s12414_s21 + $0x5a8] ss:$36 sps:$4 sm:$0xff]  }
  0xbb   : > { %2241 = vmatpush2.bf16.msra.mxu0 %v10745_v49  ;;  %v10799_v49 = vld [vmem:[%s12414_s21 + $0x564] ss:$36 sps:$4 sm:$0xff]  }
  0xbc   : > { %2242 = vmatprep.subr.bf16.mxu0 %v10748_v51  ;;  %v10797_v51 = vld [vmem:[%s12414_s21 + $0x560] ss:$36 sps:$4 sm:$0xff]  }
  0xbf   : > { %2243 = vmatpush2.bf16.msra.mxu0 %v10751_v53  ;;  %v10805_v53 = vld [vmem:[%s12414_s21 + $0x51c] ss:$36 sps:$4 sm:$0xff]  }
  0xc0   : > { %2244 = vmatprep.subr.bf16.mxu0 %v10754_v55  ;;  %v10803_v55 = vld [vmem:[%s12414_s21 + $0x518] ss:$36 sps:$4 sm:$0xff]  }
  0xc3   : > { %2245 = vmatpush2.bf16.msra.mxu0 %v10757_v57  ;;  %v10811_v57 = vld [vmem:[%s12414_s21 + $0x4d4] ss:$36 sps:$4 sm:$0xff]  }
  0xc4   : > { %2246 = vmatprep.subr.bf16.mxu0 %v10760_v59  ;;  %v10809_v59 = vld [vmem:[%s12414_s21 + $0x4d0] ss:$36 sps:$4 sm:$0xff]  }
  0xc7   : > { %2247 = vmatpush2.bf16.msra.mxu0 %v10763_v62  ;;  %v10817_v62 = vld [vmem:[%s12414_s21 + $0x48c] ss:$36 sps:$4 sm:$0xff]  }
  0xc8   : > { %2248 = vmatprep.subr.bf16.mxu0 %v10766_v0  ;;  %v10815_v0 = vld [vmem:[%s12414_s21 + $0x488] ss:$36 sps:$4 sm:$0xff]  }
  0xcb   : > { %2249 = vmatpush2.bf16.msra.mxu0 %v10769_v2  ;;  %v10823_v2 = vld [vmem:[%s12414_s21 + $0x20c] ss:$36 sps:$4 sm:$0xff]  }
 0x120   : > { %v765_v32 = vpop.xlane.xlu0 %764 }
 0x121   : > { %v767_v33 = vmul.f32 0.0026041667, %v765_v32  ;;  %v10773_v32 = vld [vmem:[%s12414_s21 + $0x680] ss:$36 sps:$4 sm:$0xff]  }
 0x123   : > { %v12509_v34 = vsub.f32 %v757_v3, %v767_v33  ;;  %v12511_v35 = vsub.f32 %v758_v4, %v767_v33  ;;  %v12513_v36 = vsub.f32 %v759_v5, %v767_v33  ;;  %v10772_v3 = vld [vmem:[%s12414_s21 + $0x204] ss:$36 sps:$4 sm:$0xff]  }
 0x124   : > { %2300 = vmatprep.subr.bf16.mxu1 %v10772_v3  ;;  %v10775_v4 = vld [vmem:[%s12414_s21 + $0x684] ss:$36 sps:$4 sm:$0xff]  }
 0x125   : > { %v771_v37 = vmul.f32 %v12509_v34, %v12509_v34  ;;  %v772_v38 = vmul.f32 %v12511_v35, %v12511_v35  ;;  %v773_v39 = vmul.f32 %v12513_v36, %v12513_v36  ;;  %2341 = vmatprep.subr.bf16.mxu0 %v10775_v4  ;;  %v10818_v3 = vld [vmem:[%s12414_s21 + $0x440] ss:$36 sps:$4 sm:$0xff]   ;;  %v10821_v4 = vld [vmem:[%s12414_s21 + $0x208] ss:$36 sps:$4 sm:$0xff]  }
 0x127   : > { %v774_v40 = vadd.f32 %v772_v38, %v771_v37  ;;  %v10781_v37 = vld [vmem:[%s12414_s21 + $0x63c] ss:$36 sps:$4 sm:$0xff]  }
 0x128   : > { %v10776_v38 = vld [vmem:[%s12414_s21 + $0x1b8] ss:$36 sps:$4 sm:$0xff]  }
 0x129   : > { %v775_v41 = vadd.f32 %v774_v40, %v773_v39  ;;  %v10779_v39 = vld [vmem:[%s12414_s21 + $0x638] ss:$36 sps:$4 sm:$0xff]  }
 0x12a   : > { %v10784_v40 = vld [vmem:[%s12414_s21 + $0x174] ss:$36 sps:$4 sm:$0xff]  }
 0x12b   : > { %776 = vadd.xlane.f32.xlu0 %v775_v41  ;;  %v10787_v41 = vld [vmem:[%s12414_s21 + $0x5f4] ss:$36 sps:$4 sm:$0xff]  }
 0x1b4   : > { %v777_v5 = vpop.xlane.xlu0 %776 }
 0x1b5   : > { %v778_v6 = vmul.f32 0.0026041667, %v777_v5  ;;  %v10826_v5 = vld [vmem:[%s12414_s21 + $0x3fc] ss:$36 sps:$4 sm:$0xff]  }
 0x1b7   : > { %v779_v7 = vadd.f32 1e-06, %v778_v6  ;;  %v10829_v6 = vld [vmem:[%s12414_s21 + $0x1c4] ss:$36 sps:$4 sm:$0xff]  }
 0x1b9   : > { %11922 = vrsqrt.f32 %v779_v7  ;;  %v10824_v7 = vld [vmem:[%s12414_s21 + $0x3f8] ss:$36 sps:$4 sm:$0xff]  }
 0x1c6   : > { %v11923_v18 = vpop.eup %11922 }
 0x1c7   : > { %v782_v21 = vmul.f32 %v11923_v18, %v12511_v35  ;;  %v783_v22 = vmul.f32 %v11923_v18, %v12513_v36  ;;  %v781_v23 = vmul.f32 %v11923_v18, %v12509_v34  ;;  %v10778_v36 = vld [vmem:[%s12414_s21 + $0x1bc] ss:$36 sps:$4 sm:$0xff]   ;;  %v10838_v18 = vld [vmem:[%s12414_s21 + $0x36c] ss:$36 sps:$4 sm:$0xff]  }
 0x1c9   : > { %v801_v25 = vmul.f32 %v792_v15, %v782_v21  ;;  %v802_v26 = vmul.f32 %v796_v16, %v783_v22  ;;  %v800_v27 = vmul.f32 %v788_v17, %v781_v23  ;;  %v10835_v15 = vld [vmem:[%s12414_s21 + $0x17c] ss:$36 sps:$4 sm:$0xff]   ;;  %v10830_v16 = vld [vmem:[%s12414_s21 + $0x3b0] ss:$36 sps:$4 sm:$0xff]   ;;  %v10844_v22 = vld [vmem:[%s12414_s21 + $0x324] ss:$36 sps:$4 sm:$0xff]  }
 0x1ca   : > { %v10833_v17 = vld [vmem:[%s12414_s21 + $0x178] ss:$36 sps:$4 sm:$0xff]   ;;  %v10839_v21 = vld [vmem:[%s12414_s21 + $0x130] ss:$36 sps:$4 sm:$0xff]  }
 0x1cb   : > { %v820_v29 = vadd.f32 %v811_v19, %v801_v25  ;;  %v821_v30 = vadd.f32 %v815_v20, %v802_v26  ;;  %v819_v31 = vadd.f32 %v807_v24, %v800_v27  ;;  %v10841_v19 = vld [vmem:[%s12414_s21 + $0x134] ss:$36 sps:$4 sm:$0xff]   ;;  %v10836_v20 = vld [vmem:[%s12414_s21 + $0x368] ss:$36 sps:$4 sm:$0xff]   ;;  %v10842_v24 = vld [vmem:[%s12414_s21 + $0x320] ss:$36 sps:$4 sm:$0xff]  }
 0x1cc   : > { %v10847_v23 = vld [vmem:[%s12414_s21 + $0xec] ss:$36 sps:$4 sm:$0xff]   ;;  %v10850_v26 = vld [vmem:[%s12414_s21 + $0x2dc] ss:$36 sps:$4 sm:$0xff]   ;;  %v10853_v27 = vld [vmem:[%s12414_s21 + $0xa4] ss:$36 sps:$4 sm:$0xff]  }
 0x1cd   : > { %v12581_v33 = vpack.c.bf16 %v820_v29, %v820_v29  ;;  %v12583_v35 = vpack.c.bf16 %v821_v30, %v821_v30  ;;  %v12585_v34 = vpack.c.bf16 %v819_v31, %v819_v31  ;;  %v10845_v25 = vld [vmem:[%s12414_s21 + $0xe8] ss:$36 sps:$4 sm:$0xff]   ;;  %v10851_v29 = vld [vmem:[%s12414_s21 + $0xa0] ss:$36 sps:$4 sm:$0xff]   ;;  %v10856_v30 = vld [vmem:[%s12414_s21 + $0x294] ss:$36 sps:$4 sm:$0xff]  }
 0x1ce   : > { %v10859_v31 = vld [vmem:[%s12414_s21 + $0x5c] ss:$36 sps:$4 sm:$0xff]  }
 0x1cf   : > { %2250 = vmatprep.mubr.bf16.mxu0 %v12581_v33  ;;  %2292 = vmatmul.mubr.bf16.vlgmr.msra.gmra.mxu1 %v12583_v35 }
 0x1d0   : > { %2301 = vmatpush1.bf16.msra.mxu1 %v10770_v28  ;;  %2251 = vmatmul.mubr.bf16.vlgmr.msra.gmra.mxu0 %v12585_v34  ;;  %v10848_v28 = vld [vmem:[%s12414_s21 + $0x2d8] ss:$36 sps:$4 sm:$0xff]  }
 0x1d1   : > { %2332 = vmatprep.mubr.bf16.mxu1 %v12581_v33  ;;  %2342 = vmatpush1.bf16.msra.mxu0 %v10773_v32  ;;  %v10854_v32 = vld [vmem:[%s12414_s21 + $0x290] ss:$36 sps:$4 sm:$0xff]  }
 0x1d2   : > { %2302 = vmatprep.subr.bf16.mxu1 %v10778_v36  ;;  %2343 = vmatprep.subr.bf16.mxu0 %v10781_v37  ;;  %v10857_v36 = vld [vmem:[%s12414_s21 + $0x58] ss:$36 sps:$4 sm:$0xff]   ;;  %v10862_v37 = vld [vmem:[%s12414_s21 + $0x24c] ss:$36 sps:$4 sm:$0xff]  }
 0x1d3   : > { %2373 = vmatprep.mubr.bf16.mxu0 %v12200_v61 }
 0x1d4   : > { %2303 = vmatpush1.bf16.msra.mxu1 %v10776_v38  ;;  %v10865_v38 = vld [vmem:[%s12414_s21 + $0x14] ss:$36 sps:$4 sm:$0xff]  }
 0x1d5   : > { %2344 = vmatpush1.bf16.msra.mxu0 %v10779_v39  ;;  %2304 = vmatprep.subr.bf16.mxu1 %v10784_v40  ;;  %v10860_v39 = vld [vmem:[%s12414_s21 + $0x248] ss:$36 sps:$4 sm:$0xff]   ;;  %v10863_v40 = vld [vmem:[%s12414_s21 + $0x10] ss:$36 sps:$4 sm:$0xff]  }
 0x1d6   : > { %2345 = vmatprep.subr.bf16.mxu0 %v10787_v41  ;;  %v10868_v41 = vld [vmem:[%s12414_s21 + $0x68c] ss:$36 sps:$4 sm:$0xff]  }
 0x1d8   : > { %2305 = vmatpush1.bf16.msra.mxu1 %v10782_v42  ;;  %v10871_v42 = vld [vmem:[%s12414_s21 + $0x44c] ss:$36 sps:$4 sm:$0xff]  }
 0x1d9   : > { %2346 = vmatpush1.bf16.msra.mxu0 %v10785_v43  ;;  %2306 = vmatprep.subr.bf16.mxu1 %v10790_v44  ;;  %v10866_v43 = vld [vmem:[%s12414_s21 + $0x688] ss:$36 sps:$4 sm:$0xff]  }
 0x1da   : > { %2347 = vmatprep.subr.bf16.mxu0 %v10793_v45  ;;  %v10869_v44 = vld [vmem:[%s12414_s21 + $0x448] ss:$36 sps:$4 sm:$0xff]  }
 0x1db   : > { %v10874_v45 = vld [vmem:[%s12414_s21 + $0x644] ss:$36 sps:$4 sm:$0xff]  }
 0x1dc   : > { %2307 = vmatpush1.bf16.msra.mxu1 %v10788_v46  ;;  %v10877_v46 = vld [vmem:[%s12414_s21 + $0x404] ss:$36 sps:$4 sm:$0xff]  }
 0x1dd   : > { %2348 = vmatpush1.bf16.msra.mxu0 %v10791_v47  ;;  %2308 = vmatprep.subr.bf16.mxu1 %v10796_v48  ;;  %v10872_v47 = vld [vmem:[%s12414_s21 + $0x640] ss:$36 sps:$4 sm:$0xff]  }
 0x1de   : > { %2349 = vmatprep.subr.bf16.mxu0 %v10799_v49  ;;  %v10875_v48 = vld [vmem:[%s12414_s21 + $0x400] ss:$36 sps:$4 sm:$0xff]  }
 0x1df   : > { %v10880_v49 = vld [vmem:[%s12414_s21 + $0x5fc] ss:$36 sps:$4 sm:$0xff]  }
 0x1e0   : > { %2309 = vmatpush1.bf16.msra.mxu1 %v10794_v50  ;;  %v10883_v50 = vld [vmem:[%s12414_s21 + $0x3bc] ss:$36 sps:$4 sm:$0xff]  }
 0x1e1   : > { %2350 = vmatpush1.bf16.msra.mxu0 %v10797_v51  ;;  %2310 = vmatprep.subr.bf16.mxu1 %v10802_v52  ;;  %v10878_v51 = vld [vmem:[%s12414_s21 + $0x5f8] ss:$36 sps:$4 sm:$0xff]  }
 0x1e2   : > { %2351 = vmatprep.subr.bf16.mxu0 %v10805_v53  ;;  %v10881_v52 = vld [vmem:[%s12414_s21 + $0x3b8] ss:$36 sps:$4 sm:$0xff]  }
 0x1e3   : > { %v10886_v53 = vld [vmem:[%s12414_s21 + $0x5b4] ss:$36 sps:$4 sm:$0xff]  }
 0x1e4   : > { %2311 = vmatpush1.bf16.msra.mxu1 %v10800_v54  ;;  %v10889_v54 = vld [vmem:[%s12414_s21 + $0x374] ss:$36 sps:$4 sm:$0xff]  }
 0x1e5   : > { %2352 = vmatpush1.bf16.msra.mxu0 %v10803_v55  ;;  %2312 = vmatprep.subr.bf16.mxu1 %v10808_v56  ;;  %v10884_v55 = vld [vmem:[%s12414_s21 + $0x5b0] ss:$36 sps:$4 sm:$0xff]  }
 0x1e6   : > { %2353 = vmatprep.subr.bf16.mxu0 %v10811_v57  ;;  %v10887_v56 = vld [vmem:[%s12414_s21 + $0x370] ss:$36 sps:$4 sm:$0xff]  }
 0x1e7   : > { %v10892_v57 = vld [vmem:[%s12414_s21 + $0x56c] ss:$36 sps:$4 sm:$0xff]  }
 0x1e8   : > { %2313 = vmatpush1.bf16.msra.mxu1 %v10806_v58  ;;  %v10895_v58 = vld [vmem:[%s12414_s21 + $0x32c] ss:$36 sps:$4 sm:$0xff]  }
 0x1e9   : > { %2354 = vmatpush1.bf16.msra.mxu0 %v10809_v59  ;;  %2314 = vmatprep.subr.bf16.mxu1 %v10814_v60  ;;  %v10890_v59 = vld [vmem:[%s12414_s21 + $0x568] ss:$36 sps:$4 sm:$0xff]  }
 0x1ea   : > { %2355 = vmatprep.subr.bf16.mxu0 %v10817_v62  ;;  %v10893_v60 = vld [vmem:[%s12414_s21 + $0x328] ss:$36 sps:$4 sm:$0xff]  }
 0x1eb   : > { %v10898_v62 = vld [vmem:[%s12414_s21 + $0x524] ss:$36 sps:$4 sm:$0xff]  }
 0x1ec   : > { %2315 = vmatpush1.bf16.msra.mxu1 %v10812_v63  ;;  %v10901_v63 = vld [vmem:[%s12414_s21 + $0x2e4] ss:$36 sps:$4 sm:$0xff]  }
 0x1ed   : > { %2356 = vmatpush1.bf16.msra.mxu0 %v10815_v0  ;;  %2316 = vmatprep.subr.bf16.mxu1 %v10820_v1  ;;  %v10896_v0 = vld [vmem:[%s12414_s21 + $0x520] ss:$36 sps:$4 sm:$0xff]  }
 0x1ee   : > { %2382 = vmatprep.subr.bf16.mxu0 %v10823_v2  ;;  %v10899_v1 = vld [vmem:[%s12414_s21 + $0x2e0] ss:$36 sps:$4 sm:$0xff]  }
 0x1ef   : > { %v10904_v2 = vld [vmem:[%s12414_s21 + $0x4dc] ss:$36 sps:$4 sm:$0xff]  }
 0x1f0   : > { %2317 = vmatpush2.bf16.msra.mxu1 %v10818_v3  ;;  %2374 = vmatmul.mubr.bf16.vlgmr.msra.gmra.mxu0 %v12583_v35  ;;  %v10907_v3 = vld [vmem:[%s12414_s21 + $0x29c] ss:$36 sps:$4 sm:$0xff]  }
 0x1f1   : > { %2383 = vmatpush1.bf16.msra.mxu0 %v10821_v4  ;;  %2414 = vmatprep.mubr.bf16.mxu0 %v12581_v33  ;;  %v10902_v4 = vld [vmem:[%s12414_s21 + $0x4d8] ss:$36 sps:$4 sm:$0xff]  }
 0x1f2   : > { %2318 = vmatprep.subr.bf16.mxu1 %v10826_v5  ;;  %2384 = vmatprep.subr.bf16.mxu0 %v10829_v6  ;;  %v10905_v5 = vld [vmem:[%s12414_s21 + $0x298] ss:$36 sps:$4 sm:$0xff]  }
 0x1f3   : > { %v10910_v6 = vld [vmem:[%s12414_s21 + $0x494] ss:$36 sps:$4 sm:$0xff]  }
 0x1f4   : > { %2319 = vmatpush2.bf16.msra.mxu1 %v10824_v7  ;;  %v10913_v7 = vld [vmem:[%s12414_s21 + $0x254] ss:$36 sps:$4 sm:$0xff]  }
 0x1f5   : > { %2385 = vmatpush1.bf16.msra.mxu0 %v10827_v10  ;;  %2320 = vmatprep.subr.bf16.mxu1 %v10832_v14  ;;  %v10908_v10 = vld [vmem:[%s12414_s21 + $0x490] ss:$36 sps:$4 sm:$0xff]  }
 0x1f6   : > { %2386 = vmatprep.subr.bf16.mxu0 %v10835_v15  ;;  %v10911_v14 = vld [vmem:[%s12414_s21 + $0x250] ss:$36 sps:$4 sm:$0xff]  }
 0x1f7   : > { %v10916_v15 = vld [vmem:[%s12414_s21 + $0x214] ss:$36 sps:$4 sm:$0xff]  }
 0x1f8   : > { %2321 = vmatpush2.bf16.msra.mxu1 %v10830_v16  ;;  %v10919_v16 = vld [vmem:[%s12414_s21 + $0x694] ss:$36 sps:$4 sm:$0xff]  }
 0x1f9   : > { %2387 = vmatpush1.bf16.msra.mxu0 %v10833_v17  ;;  %2322 = vmatprep.subr.bf16.mxu1 %v10838_v18  ;;  %v10914_v17 = vld [vmem:[%s12414_s21 + $0x210] ss:$36 sps:$4 sm:$0xff]  }
 0x1fa   : > { %2388 = vmatprep.subr.bf16.mxu0 %v10841_v19  ;;  %v10917_v18 = vld [vmem:[%s12414_s21 + $0x690] ss:$36 sps:$4 sm:$0xff]  }
 0x1fb   : > { %v10922_v19 = vld [vmem:[%s12414_s21 + $0x1cc] ss:$36 sps:$4 sm:$0xff]  }
 0x1fc   : > { %2323 = vmatpush2.bf16.msra.mxu1 %v10836_v20  ;;  %v10925_v20 = vld [vmem:[%s12414_s21 + $0x64c] ss:$36 sps:$4 sm:$0xff]  }
 0x1fd   : > { %2389 = vmatpush1.bf16.msra.mxu0 %v10839_v21  ;;  %2324 = vmatprep.subr.bf16.mxu1 %v10844_v22  ;;  %v10920_v21 = vld [vmem:[%s12414_s21 + $0x1c8] ss:$36 sps:$4 sm:$0xff]  }
 0x1fe   : > { %2390 = vmatprep.subr.bf16.mxu0 %v10847_v23  ;;  %v10923_v22 = vld [vmem:[%s12414_s21 + $0x648] ss:$36 sps:$4 sm:$0xff]  }
 0x1ff   : > { %v10928_v23 = vld [vmem:[%s12414_s21 + $0x184] ss:$36 sps:$4 sm:$0xff]  }
 0x200   : > { %2325 = vmatpush2.bf16.msra.mxu1 %v10842_v24  ;;  %v10931_v24 = vld [vmem:[%s12414_s21 + $0x604] ss:$36 sps:$4 sm:$0xff]  }
 0x201   : > { %2391 = vmatpush1.bf16.msra.mxu0 %v10845_v25  ;;  %2326 = vmatprep.subr.bf16.mxu1 %v10850_v26  ;;  %v10926_v25 = vld [vmem:[%s12414_s21 + $0x180] ss:$36 sps:$4 sm:$0xff]  }
 0x202   : > { %2392 = vmatprep.subr.bf16.mxu0 %v10853_v27  ;;  %v10929_v26 = vld [vmem:[%s12414_s21 + $0x600] ss:$36 sps:$4 sm:$0xff]  }
 0x203   : > { %v10934_v27 = vld [vmem:[%s12414_s21 + $0x13c] ss:$36 sps:$4 sm:$0xff]  }
 0x204   : > { %2327 = vmatpush2.bf16.msra.mxu1 %v10848_v28  ;;  %v10937_v28 = vld [vmem:[%s12414_s21 + $0x5bc] ss:$36 sps:$4 sm:$0xff]  }
 0x205   : > { %2393 = vmatpush1.bf16.msra.mxu0 %v10851_v29  ;;  %2328 = vmatprep.subr.bf16.mxu1 %v10856_v30  ;;  %v10932_v29 = vld [vmem:[%s12414_s21 + $0x138] ss:$36 sps:$4 sm:$0xff]  }
 0x206   : > { %2394 = vmatprep.subr.bf16.mxu0 %v10859_v31  ;;  %v10935_v30 = vld [vmem:[%s12414_s21 + $0x5b8] ss:$36 sps:$4 sm:$0xff]  }
 0x207   : > { %v10940_v31 = vld [vmem:[%s12414_s21 + $0xf4] ss:$36 sps:$4 sm:$0xff]  }
 0x208   : > { %2329 = vmatpush2.bf16.msra.mxu1 %v10854_v32  ;;  %v10943_v32 = vld [vmem:[%s12414_s21 + $0x574] ss:$36 sps:$4 sm:$0xff]  }
 0x209   : > { %2395 = vmatpush1.bf16.msra.mxu0 %v10857_v36  ;;  %2330 = vmatprep.subr.bf16.mxu1 %v10862_v37  ;;  %v10938_v36 = vld [vmem:[%s12414_s21 + $0xf0] ss:$36 sps:$4 sm:$0xff]  }
 0x20a   : > { %2396 = vmatprep.subr.bf16.mxu0 %v10865_v38  ;;  %v10941_v37 = vld [vmem:[%s12414_s21 + $0x570] ss:$36 sps:$4 sm:$0xff]  }
 0x20b   : > { %v10946_v38 = vld [vmem:[%s12414_s21 + $0xac] ss:$36 sps:$4 sm:$0xff]  }
 0x20c   : > { %2331 = vmatpush2.bf16.msra.mxu1 %v10860_v39  ;;  %v10949_v39 = vld [vmem:[%s12414_s21 + $0x52c] ss:$36 sps:$4 sm:$0xff]  }
 0x20d   : > { %2397 = vmatpush1.bf16.msra.mxu0 %v10863_v40  ;;  %2423 = vmatprep.subr.bf16.mxu1 %v10868_v41  ;;  %v10944_v40 = vld [vmem:[%s12414_s21 + $0xa8] ss:$36 sps:$4 sm:$0xff]  }
 0x20e   : > { %2398 = vmatprep.subr.bf16.mxu0 %v10871_v42  ;;  %v10947_v41 = vld [vmem:[%s12414_s21 + $0x528] ss:$36 sps:$4 sm:$0xff]  }
 0x20f   : > { %2333 = vmatmul.mubr.bf16.vlgmr.msra.gmra.mxu1 %v12585_v34  ;;  %v10952_v42 = vld [vmem:[%s12414_s21 + $0x64] ss:$36 sps:$4 sm:$0xff]  }
 0x210   : > { %2424 = vmatpush1.bf16.msra.mxu1 %v10866_v43  ;;  %2455 = vmatprep.mubr.bf16.mxu1 %v12200_v61  ;;  %v10955_v43 = vld [vmem:[%s12414_s21 + $0x4e4] ss:$36 sps:$4 sm:$0xff]  }
 0x211   : > { %2399 = vmatpush2.bf16.msra.mxu0 %v10869_v44  ;;  %2425 = vmatprep.subr.bf16.mxu1 %v10874_v45  ;;  %v10950_v44 = vld [vmem:[%s12414_s21 + $0x60] ss:$36 sps:$4 sm:$0xff]  }
 0x212   : > { %2400 = vmatprep.subr.bf16.mxu0 %v10877_v46  ;;  %v10953_v45 = vld [vmem:[%s12414_s21 + $0x4e0] ss:$36 sps:$4 sm:$0xff]  }
 0x213   : > { %v10958_v46 = vld [vmem:[%s12414_s21 + $0x1c] ss:$36 sps:$4 sm:$0xff]  }
 0x214   : > { %2426 = vmatpush1.bf16.msra.mxu1 %v10872_v47  ;;  %v10961_v47 = vld [vmem:[%s12414_s21 + $0x49c] ss:$36 sps:$4 sm:$0xff]  }
 0x215   : > { %2401 = vmatpush2.bf16.msra.mxu0 %v10875_v48  ;;  %2427 = vmatprep.subr.bf16.mxu1 %v10880_v49  ;;  %v10956_v48 = vld [vmem:[%s12414_s21 + $0x18] ss:$36 sps:$4 sm:$0xff]  }
 0x216   : > { %2402 = vmatprep.subr.bf16.mxu0 %v10883_v50  ;;  %v10959_v49 = vld [vmem:[%s12414_s21 + $0x498] ss:$36 sps:$4 sm:$0xff]  }
 0x217   : > { %v10964_v50 = vld [vmem:[%s12414_s21 + $0x454] ss:$36 sps:$4 sm:$0xff]  }
 0x218   : > { %2428 = vmatpush1.bf16.msra.mxu1 %v10878_v51  ;;  %v10965_v51 = vld [vmem:[%s12414_s21 + $0x458] ss:$36 sps:$4 sm:$0xff]  }
 0x219   : > { %2403 = vmatpush2.bf16.msra.mxu0 %v10881_v52  ;;  %2429 = vmatprep.subr.bf16.mxu1 %v10886_v53  ;;  %v10962_v52 = vld [vmem:[%s12414_s21 + $0x450] ss:$36 sps:$4 sm:$0xff]   ;;  %v10966_v53 = vld [vmem:[%s12414_s21 + $0x218] ss:$36 sps:$4 sm:$0xff]  }
 0x21a   : > { %2404 = vmatprep.subr.bf16.mxu0 %v10889_v54  ;;  %v10969_v54 = vld [vmem:[%s12414_s21 + $0x40c] ss:$36 sps:$4 sm:$0xff]  }
 0x21c   : > { %2430 = vmatpush1.bf16.msra.mxu1 %v10884_v55  ;;  %v10970_v55 = vld [vmem:[%s12414_s21 + $0x410] ss:$36 sps:$4 sm:$0xff]  }
 0x21d   : > { %2405 = vmatpush2.bf16.msra.mxu0 %v10887_v56  ;;  %2431 = vmatprep.subr.bf16.mxu1 %v10892_v57  ;;  %v10967_v56 = vld [vmem:[%s12414_s21 + $0x408] ss:$36 sps:$4 sm:$0xff]   ;;  %v10971_v57 = vld [vmem:[%s12414_s21 + $0x1d0] ss:$36 sps:$4 sm:$0xff]  }
 0x21e   : > { %2406 = vmatprep.subr.bf16.mxu0 %v10895_v58  ;;  %v10974_v58 = vld [vmem:[%s12414_s21 + $0x3c4] ss:$36 sps:$4 sm:$0xff]  }
 0x220   : > { %2432 = vmatpush1.bf16.msra.mxu1 %v10890_v59  ;;  %v10975_v59 = vld [vmem:[%s12414_s21 + $0x3c8] ss:$36 sps:$4 sm:$0xff]  }
 0x221   : > { %2407 = vmatpush2.bf16.msra.mxu0 %v10893_v60  ;;  %2433 = vmatprep.subr.bf16.mxu1 %v10898_v62  ;;  %v10972_v60 = vld [vmem:[%s12414_s21 + $0x3c0] ss:$36 sps:$4 sm:$0xff]   ;;  %v10976_v62 = vld [vmem:[%s12414_s21 + $0x188] ss:$36 sps:$4 sm:$0xff]  }
 0x222   : > { %2408 = vmatprep.subr.bf16.mxu0 %v10901_v63  ;;  %v10979_v63 = vld [vmem:[%s12414_s21 + $0x37c] ss:$36 sps:$4 sm:$0xff]  }
 0x224   : > { %2434 = vmatpush1.bf16.msra.mxu1 %v10896_v0  ;;  %v10980_v0 = vld [vmem:[%s12414_s21 + $0x380] ss:$36 sps:$4 sm:$0xff]  }
 0x225   : > { %2409 = vmatpush2.bf16.msra.mxu0 %v10899_v1  ;;  %2435 = vmatprep.subr.bf16.mxu1 %v10904_v2  ;;  %v10981_v1 = vld [vmem:[%s12414_s21 + $0x140] ss:$36 sps:$4 sm:$0xff]   ;;  %v10984_v2 = vld [vmem:[%s12414_s21 + $0x334] ss:$36 sps:$4 sm:$0xff]  }
 0x226   : > { %2410 = vmatprep.subr.bf16.mxu0 %v10907_v3  ;;  %v10985_v3 = vld [vmem:[%s12414_s21 + $0x338] ss:$36 sps:$4 sm:$0xff]  }
 0x228   : > { %2436 = vmatpush1.bf16.msra.mxu1 %v10902_v4  ;;  %v10982_v4 = vld [vmem:[%s12414_s21 + $0x330] ss:$36 sps:$4 sm:$0xff]  }
 0x229   : > { %2411 = vmatpush2.bf16.msra.mxu0 %v10905_v5  ;;  %2437 = vmatprep.subr.bf16.mxu1 %v10910_v6  ;;  %v10986_v5 = vld [vmem:[%s12414_s21 + $0xf8] ss:$36 sps:$4 sm:$0xff]   ;;  %v10989_v6 = vld [vmem:[%s12414_s21 + $0x2ec] ss:$36 sps:$4 sm:$0xff]  }
 0x22a   : > { %2412 = vmatprep.subr.bf16.mxu0 %v10913_v7  ;;  %v10990_v7 = vld [vmem:[%s12414_s21 + $0x2f0] ss:$36 sps:$4 sm:$0xff]  }
 0x22c   : > { %2438 = vmatpush1.bf16.msra.mxu1 %v10908_v10  ;;  %v10987_v10 = vld [vmem:[%s12414_s21 + $0x2e8] ss:$36 sps:$4 sm:$0xff]  }
 0x22d   : > { %2413 = vmatpush2.bf16.msra.mxu0 %v10911_v14  ;;  %2464 = vmatprep.subr.bf16.mxu1 %v10916_v15  ;;  %v10991_v14 = vld [vmem:[%s12414_s21 + $0xb0] ss:$36 sps:$4 sm:$0xff]   ;;  %v10994_v15 = vld [vmem:[%s12414_s21 + $0x2a4] ss:$36 sps:$4 sm:$0xff]  }
 0x22e   : > { %2505 = vmatprep.subr.bf16.mxu0 %v10919_v16  ;;  %v10995_v16 = vld [vmem:[%s12414_s21 + $0x2a8] ss:$36 sps:$4 sm:$0xff]  }
 0x22f   : > { %2456 = vmatmul.mubr.bf16.vlgmr.msra.gmra.mxu1 %v12583_v35 }
 0x230   : > { %2415 = vmatmul.mubr.bf16.vlgmr.msra.gmra.mxu0 %v12585_v34  ;;  %2465 = vmatpush1.bf16.msra.mxu1 %v10914_v17  ;;  %v10992_v17 = vld [vmem:[%s12414_s21 + $0x2a0] ss:$36 sps:$4 sm:$0xff]  }
 0x231   : > { %2496 = vmatprep.mubr.bf16.mxu1 %v12581_v33  ;;  %2506 = vmatpush1.bf16.msra.mxu0 %v10917_v18  ;;  %v10996_v18 = vld [vmem:[%s12414_s21 + $0x68] ss:$36 sps:$4 sm:$0xff]  }
 0x232   : > { %2466 = vmatprep.subr.bf16.mxu1 %v10922_v19  ;;  %2507 = vmatprep.subr.bf16.mxu0 %v10925_v20  ;;  %v10999_v19 = vld [vmem:[%s12414_s21 + $0x25c] ss:$36 sps:$4 sm:$0xff]  }
 0x233   : > { %2537 = vmatprep.mubr.bf16.mxu0 %v12200_v61  ;;  %v11000_v20 = vld [vmem:[%s12414_s21 + $0x260] ss:$36 sps:$4 sm:$0xff]  }
 0x234   : > { %2467 = vmatpush1.bf16.msra.mxu1 %v10920_v21  ;;  %v10997_v21 = vld [vmem:[%s12414_s21 + $0x258] ss:$36 sps:$4 sm:$0xff]  }
 0x235   : > { %2508 = vmatpush1.bf16.msra.mxu0 %v10923_v22  ;;  %2468 = vmatprep.subr.bf16.mxu1 %v10928_v23  ;;  %v11001_v22 = vld [vmem:[%s12414_s21 + $0x20] ss:$36 sps:$4 sm:$0xff]   ;;  %v11002_v23 = vld [vmem:[%s12414_s21 + $0x698] ss:$36 sps:$4 sm:$0xff]  }
 0x236   : > { %2509 = vmatprep.subr.bf16.mxu0 %v10931_v24  ;;  %v12201_v24 = vmov 0.0  }
 0x238   : > { %2469 = vmatpush1.bf16.msra.mxu1 %v10926_v25  ;;  %v11003_v25 = vld [vmem:[%s12414_s21 + $0x650] ss:$36 sps:$4 sm:$0xff]  }
 0x239   : > { %2510 = vmatpush1.bf16.msra.mxu0 %v10929_v26  ;;  %2470 = vmatprep.subr.bf16.mxu1 %v10934_v27  ;;  %v11004_v26 = vld [vmem:[%s12414_s21 + $0x608] ss:$36 sps:$4 sm:$0xff]   ;;  %v11006_v27 = vld [vmem:[%s12414_s21 + $0x578] ss:$36 sps:$4 sm:$0xff]  }
 0x23a   : > { %2511 = vmatprep.subr.bf16.mxu0 %v10937_v28  ;;  %v11007_v28 = vld [vmem:[%s12414_s21 + $0x530] ss:$36 sps:$4 sm:$0xff]  }
 0x23c   : > { %2471 = vmatpush1.bf16.msra.mxu1 %v10932_v29  ;;  %v11008_v29 = vld [vmem:[%s12414_s21 + $0x4e8] ss:$36 sps:$4 sm:$0xff]  }
 0x23d   : > { %2512 = vmatpush1.bf16.msra.mxu0 %v10935_v30  ;;  %2472 = vmatprep.subr.bf16.mxu1 %v10940_v31  ;;  %v11009_v30 = vld [vmem:[%s12414_s21 + $0x4a0] ss:$36 sps:$4 sm:$0xff]   ;;  %v12782_v31 = vld [vmem:[%s12456_s19] sm:$0xff] }
 0x23e   : > { %2513 = vmatprep.subr.bf16.mxu0 %v10943_v32  ;;  %v1072_v32 = vrot.slane %v12782_v31, %v12563_v13 }
 0x240   : > { %2473 = vmatpush1.bf16.msra.mxu1 %v10938_v36 }
 0x241   : > { %2514 = vmatpush1.bf16.msra.mxu0 %v10941_v37  ;;  %2474 = vmatprep.subr.bf16.mxu1 %v10946_v38  ;;  %v1076_v37 = vrot.slane %v12782_v31, %v12557_v11 }
 0x242   : > { %2515 = vmatprep.subr.bf16.mxu0 %v10949_v39 }
 0x244   : > { %2475 = vmatpush1.bf16.msra.mxu1 %v10944_v40 }
 0x245   : > { %2516 = vmatpush1.bf16.msra.mxu0 %v10947_v41  ;;  %2476 = vmatprep.subr.bf16.mxu1 %v10952_v42 }
 0x246   : > { %2517 = vmatprep.subr.bf16.mxu0 %v10955_v43 }
 0x248   : > { %2477 = vmatpush1.bf16.msra.mxu1 %v10950_v44 }
 0x249   : > { %2518 = vmatpush1.bf16.msra.mxu0 %v10953_v45  ;;  %2478 = vmatprep.subr.bf16.mxu1 %v10958_v46 }
 0x24a   : > { %2519 = vmatprep.subr.bf16.mxu0 %v10961_v47 }
 0x24c   : > { %2479 = vmatpush1.bf16.msra.mxu1 %v10956_v48 }
 0x24d   : > { %2520 = vmatpush1.bf16.msra.mxu0 %v10959_v49  ;;  %2480 = vmatprep.subr.bf16.mxu1 %v10964_v50 }
 0x24e   : > { %10250 = vmatprep.subr.bf16.mxu0 %v10965_v51 }
 0x250   : > { %2481 = vmatpush2.bf16.msra.mxu1 %v10962_v52  ;;  %2538 = vmatmul.mubr.bf16.vlgmr.msra.gmra.mxu0 %v12583_v35  ;;  %v12793_v52 = vsub.s32 3, %v12549_v9 }
 0x251   : > { %10251 = vmatpush3.bf16.msra.mxu0 %v10966_v53  ;;  %2578 = vmatprep.mubr.bf16.mxu0 %v12581_v33  ;;  %v10977_v33 = vld [vmem:[%s12414_s21 + $0x378] ss:$36 sps:$4 sm:$0xff]   ;;  %v1080_v53 = vrot.slane %v12782_v31, %v12560_v12 }
 0x252   : > { %2482 = vmatprep.subr.bf16.mxu1 %v10969_v54  ;;  %10252 = vmatprep.subr.bf16.mxu0 %v10970_v55  ;;  %v1084_v54 = vrot.slane %v12782_v31, %v12793_v52 }
 0x254   : > { %2483 = vmatpush2.bf16.msra.mxu1 %v10967_v56 }
 0x255   : > { %10253 = vmatpush3.bf16.msra.mxu0 %v10971_v57  ;;  %2484 = vmatprep.subr.bf16.mxu1 %v10974_v58 }
 0x256   : > { %10254 = vmatprep.subr.bf16.mxu0 %v10975_v59 }
 0x258   : > { %2485 = vmatpush2.bf16.msra.mxu1 %v10972_v60 }
 0x259   : > { %10255 = vmatpush3.bf16.msra.mxu0 %v10976_v62  ;;  %2486 = vmatprep.subr.bf16.mxu1 %v10979_v63 }
 0x25a   : > { %10256 = vmatprep.subr.bf16.mxu0 %v10980_v0 }
 0x25c   : > { %2487 = vmatpush2.bf16.msra.mxu1 %v10977_v33 }
 0x25d   : > { %10257 = vmatpush3.bf16.msra.mxu0 %v10981_v1  ;;  %2488 = vmatprep.subr.bf16.mxu1 %v10984_v2  ;;  %v1087_v2 = vsub.s32 4, %v12549_v9 }
 0x25e   : > { %10258 = vmatprep.subr.bf16.mxu0 %v10985_v3  ;;  %v1091_v3 = vsub.s32 5, %v12549_v9 }
 0x260   : > { %2489 = vmatpush2.bf16.msra.mxu1 %v10982_v4  ;;  %v1088_v4 = vrot.slane %v12782_v31, %v1087_v2 }
 0x261   : > { %10259 = vmatpush3.bf16.msra.mxu0 %v10986_v5  ;;  %2490 = vmatprep.subr.bf16.mxu1 %v10989_v6  ;;  %v1092_v6 = vrot.slane %v12782_v31, %v1091_v3 }
 0x262   : > { %10260 = vmatprep.subr.bf16.mxu0 %v10990_v7 }
 0x264   : > { %2491 = vmatpush2.bf16.msra.mxu1 %v10987_v10 }
 0x265   : > { %10261 = vmatpush3.bf16.msra.mxu0 %v10991_v14  ;;  %2492 = vmatprep.subr.bf16.mxu1 %v10994_v15 }
 0x266   : > { %10262 = vmatprep.subr.bf16.mxu0 %v10995_v16 }
 0x268   : > { %2493 = vmatpush2.bf16.msra.mxu1 %v10992_v17 }
 0x269   : > { %10263 = vmatpush3.bf16.msra.mxu0 %v10996_v18  ;;  %2494 = vmatprep.subr.bf16.mxu1 %v10999_v19 }
 0x26a   : > { %10264 = vmatprep.subr.bf16.mxu0 %v11000_v20 }
 0x26c   : > { %2495 = vmatpush2.bf16.msra.mxu1 %v10997_v21 }
 0x26d   : > { %10265 = vmatpush3.bf16.msra.mxu0 %v11001_v22  ;;  %10468 = vmatprep.subr.bf16.mxu1 %v12201_v24 }
 0x26e   : > { %10512 = vmatprep.subr.bf16.mxu0 %v12201_v24 }
 0x26f   : > { %2497 = vmatmul.mubr.bf16.vlgmr.msra.gmra.mxu1 %v12585_v34 }
 0x270   : > { %2579 = vmatmul.mubr.bf16.vlgmr.msra.gmra.mxu0 %v12585_v34  ;;  %10469 = vmatpush3.bf16.msra.mxu1 %v11002_v23  ;;  %v11005_v34 = vld [vmem:[%s12414_s21 + $0x5c0] ss:$36 sps:$4 sm:$0xff]   ;;  %s12203_s21 = smov 64  }
 0x271   : > { %10470 = vmatprep.subr.bf16.mxu1 %v12201_v24  ;;  %10484 = vmatprep.mubr.msk.bf16.mxu1 %vm12202_vm0, %v12201_v24 }
 0x272   : > { %10514 = vmatprep.mubr.msk.bf16.mxu0 %vm12202_vm0, %v12201_v24 }
 0x274   : > { %10471 = vmatpush3.bf16.msra.mxu1 %v11003_v25 }
 0x275   : > { %10472 = vmatprep.subr.bf16.mxu1 %v12201_v24 }
 0x278   : > { %10473 = vmatpush3.bf16.msra.mxu1 %v11004_v26 }
 0x279   : > { %10474 = vmatprep.subr.bf16.mxu1 %v12201_v24 }
 0x27c   : > { %10475 = vmatpush3.bf16.msra.mxu1 %v11005_v34 }
 0x27d   : > { %10476 = vmatprep.subr.bf16.mxu1 %v12201_v24 }
 0x280   : > { %10477 = vmatpush3.bf16.msra.mxu1 %v11006_v27 }
 0x281   : > { %10478 = vmatprep.subr.bf16.mxu1 %v12201_v24 }
 0x284   : > { %10479 = vmatpush3.bf16.msra.mxu1 %v11007_v28 }
 0x285   : > { %10480 = vmatprep.subr.bf16.mxu1 %v12201_v24 }
 0x288   : > { %10481 = vmatpush3.bf16.msra.mxu1 %v11008_v29 }
 0x289   : > { %10482 = vmatprep.subr.bf16.mxu1 %v12201_v24 }
 0x28c   : > { %10483 = vmatpush3.bf16.msra.mxu1 %v11009_v30 }
 0x28d   : > { %10488 = vmatprep.subr.bf16.mxu1 %v12201_v24 }
 0x28f   : > { %10485 = vmatmul.mubr.bf16.vlgmr.msra.gmra.mxu1 %v12583_v35  ;;  %v2293_v36 = vpop.f32.mrf.mxu1 }
 0x290   : > { %v2252_v38 = vpop.f32.mrf.mxu0  ;;  %10490 = vmatprep.mubr.msk.bf16.mxu1 %vm12202_vm0, %v12201_v24 }
 0x291   : > { %v2253_v39 = vadd.f32 %v2252_v38, %v1072_v32  ;;  %v2295_v40 = vpop.f32.mrf.mxu1  ;;  %v1095_v32 = vsub.s32 6, %v12549_v9 }
 0x292   : > { %v2254_v41 = vpop.f32.mrf.mxu0 }
 0x293   : > { %v2294_v42 = vadd.f32 %v2293_v36, %v2253_v39  ;;  %v2255_v43 = vadd.f32 %v2254_v41, %v1076_v37  ;;  %v2297_v44 = vpop.f32.mrf.mxu1  ;;  %v1099_v36 = vsub.s32 7, %v12549_v9  ;;  %v1096_v37 = vrot.slane %v12782_v31, %v1095_v32 }
 0x294   : > { %v2256_v45 = vpop.f32.mrf.mxu0 }
 0x295   : > { %v2296_v46 = vadd.f32 %v2295_v40, %v2255_v43  ;;  %v2298_v47 = vpop.f32.mrf.mxu1  ;;  %v12804_v1 = vpack.c.bf16 %v2294_v42, %v2294_v42  ;;  %v1100_v38 = vrot.slane %v12782_v31, %v1099_v36 }
 0x296   : > { %v2257_v48 = vpop.f32.mrf.mxu0 }
 0x297   : > { %v2857_v34 = vpack.c.bf16 %v2296_v46, %v2296_v46 }
 0x2b0   : > { %v2375_v49 = vpop.f32.mrf.mxu0 }
 0x2b2   : > { %v2377_v35 = vpop.f32.mrf.mxu0 }
 0x2b4   : > { %v2379_v50 = vpop.f32.mrf.mxu0 }
 0x2b6   : > { %v2380_v51 = vpop.f32.mrf.mxu0 }
 0x2cf   : > { %v2334_v55 = vpop.f32.mrf.mxu1 }
 0x2d0   : > { %v2335_v56 = vadd.f32 %v2334_v55, %v1080_v53  ;;  %v9371_v53 = vld [vmem:[%s12456_s19 + $0x8] ss:$0 sm:$0xff] }
 0x2d1   : > { %v2336_v57 = vpop.f32.mrf.mxu1 }
 0x2d2   : > { %v12799_v58 = vadd.f32 %v2375_v49, %v2335_v56  ;;  %v2337_v59 = vadd.f32 %v2336_v57, %v1084_v54 }
 0x2d3   : > { %v2338_v60 = vpop.f32.mrf.mxu1 }
 0x2d4   : > { %v2378_v62 = vadd.f32 %v2377_v35, %v2337_v59 }
 0x2d5   : > { %v2339_v63 = vpop.f32.mrf.mxu1 }
 0x2d6   : > { %v2631_v0 = vpack.c.bf16 %v2378_v62, %v2378_v62  ;;  %v2627_v62 = vand.u32 127, %v785_v8 }
 0x2d8   : > { %2746 = vrot.lane.b32.xlu0 %v2631_v0, %s12203_s21  ;;  %v2638_v33 = vsel %vm2633_vm1, %v2631_v0, 0  ;;  %vm2628_vm3 = vcmp.lt.s32.totalorder %v2627_v62, 5  ;;  %v12204_v0 = vmov -1e+30  }
 0x2d9   : > { %10489 = vmatpush3.bf16.xpose.msra.mxu1 %v2638_v33  ;;  %v12849_v33 = vsel %vm2628_vm3, 0.0, %v12204_v0 }
 0x2da   : > { %10494 = vmatprep.subr.bf16.mxu1 %v12201_v24 }
 0x2e0   : > { %10491 = vmatmul.mubr.msk.bf16.vlgmr.msra.gmra.mxu1 %vm2633_vm1, %v12804_v1 }
 0x2e1   : > { %10496 = vmatprep.mubr.msk.bf16.mxu1 %vm12202_vm0, %v12201_v24 }
 0x2ef   : > { %v2457_v5 = vpop.f32.mrf.mxu1 }
 0x2f0   : > { %v2416_v7 = vpop.f32.mrf.mxu0 }
 0x2f1   : > { %v2417_v10 = vadd.f32 %v2416_v7, %v1088_v4  ;;  %v2459_v14 = vpop.f32.mrf.mxu1 }
 0x2f2   : > { %v2418_v15 = vpop.f32.mrf.mxu0 }
 0x2f3   : > { %v2458_v16 = vadd.f32 %v2457_v5, %v2417_v10  ;;  %v2419_v17 = vadd.f32 %v2418_v15, %v1092_v6  ;;  %v2461_v18 = vpop.f32.mrf.mxu1 }
 0x2f4   : > { %v2420_v19 = vpop.f32.mrf.mxu0 }
 0x2f5   : > { %v12818_v20 = vpack.c.bf16 %v2458_v16, %v2458_v16  ;;  %v2460_v21 = vadd.f32 %v2459_v14, %v2419_v17  ;;  %v2462_v22 = vpop.f32.mrf.mxu1 }
 0x2f6   : > { %v2421_v23 = vpop.f32.mrf.mxu0 }
 0x2f7   : > { %v12820_v25 = vpack.c.bf16 %v2460_v21, %v2460_v21  ;;  %v2864_v26 = vsel %vm2633_vm1, %v12818_v20, 0 }
 0x2f8   : > { %10513 = vmatpush3.bf16.xpose.msra.mxu0 %v2864_v26  ;;  %v3081_v26 = vpack.c.bf16 %v12799_v58, %v12799_v58 }
 0x2f9   : > { %3194 = vrot.lane.b32.xlu0 %v12820_v25, %s12203_s21  ;;  %10524 = vmatprep.subr.bf16.mxu0 %v12201_v24 }
 0x2ff   : > { %10515 = vmatmul.mubr.msk.bf16.vlgmr.msra.gmra.mxu0 %vm2633_vm1, %v2857_v34 }
 0x300   : > { %10526 = vmatprep.mubr.msk.bf16.mxu0 %vm12202_vm0, %v12201_v24 }
 0x310   : > { %v2539_v27 = vpop.f32.mrf.mxu0 }
 0x312   : > { %v2541_v28 = vpop.f32.mrf.mxu0 }
 0x314   : > { %v2543_v29 = vpop.f32.mrf.mxu0 }
 0x316   : > { %v2544_v30 = vpop.f32.mrf.mxu0 }
 0x32f   : > { %v2498_v39 = vpop.f32.mrf.mxu1 }
 0x330   : > { %v2499_v40 = vadd.f32 %v2498_v39, %v1096_v37  ;;  %v10266_v41 = vpop.f32.mrf.mxu0 }
 0x331   : > { %v2500_v42 = vpop.f32.mrf.mxu1 }
 0x332   : > { %v2540_v43 = vadd.f32 %v2539_v27, %v2499_v40  ;;  %v2501_v44 = vadd.f32 %v2500_v42, %v1100_v38  ;;  %v10267_v45 = vpop.f32.mrf.mxu0  ;;  %v3088_v40 = vsel %vm2633_vm1, %v12820_v25, 0 }
 0x333   : > { %v10268_v46 = vadd.f32 %v10267_v45, %v10266_v41  ;;  %v2502_v47 = vpop.f32.mrf.mxu1 }
 0x334   : > { %v12838_v48 = vpack.c.bf16 %v2540_v43, %v2540_v43  ;;  %v12840_v49 = vadd.f32 %v2541_v28, %v2501_v44  ;;  %v10269_v35 = vpop.f32.mrf.mxu0 }
 0x335   : > { %v2503_v50 = vpop.f32.mrf.mxu1  ;;  %v2581_v54 = vadd.f32 %v10268_v46, %v9371_v53 }
 0x336   : > { %v10270_v51 = vpop.f32.mrf.mxu0  ;;  %v2700_v31 = vsel %vm2698_vm2, %v12838_v48, 0 }
 0x337   : > { %10495 = vmatpush3.bf16.msra.mxu1 %v2700_v31 }
 0x338   : > { %10500 = vmatprep.subr.bf16.mxu1 %v12201_v24 }
 0x34a   : > { %v2747_v58 = vpop.permute.xlu0 %2746 }
 0x34b   : > { %v2752_v42 = vsel %vm2633_vm1, %v2747_v58, 0 }
 0x34f   : > { %v2620_v55 = vpop.f32.mrf.mxu1 }
 0x350   : > { %v12846_v56 = vadd.f32 %v2620_v55, %v2581_v54 }
 0x351   : > { %v10486_v57 = vpop.f32.mrf.mxu1 }
 0x353   : > { %v2623_v59 = vpop.f32.mrf.mxu1 }
 0x355   : > { %v10487_v60 = vpop.f32.mrf.mxu1 }
 0x36b   : > { %v3195_v43 = vpop.permute.xlu0 %3194 }
 0x36c   : > { %v3200_v25 = vsel %vm2633_vm1, %v3195_v43, 0 }
 0x3a0   : > { %v2674_v63 = vpop.f32.mrf.mxu1 }
 0x3a1   : > { %v2680_v4 = vmul.f32 0.125, %v2674_v63 }
 0x3a2   : > { %v10492_v5 = vpop.f32.mrf.mxu1 }
 0x3a3   : > { %v2681_v6 = vadd.f32 %v2680_v4, %v12849_v33 }
 0x3a4   : > { %v2677_v7 = vpop.f32.mrf.mxu1 }
 0x3a5   : > { %v2683_v10 = vsel %vm2682_vm4, %v2681_v6, -inf }
 0x3a6   : > { %2684 = vmax.xlane.f32.xlu1 %v2683_v10  ;;  %v10493_v14 = vpop.f32.mrf.mxu1 }
 0x3bf   : > { %v2900_v15 = vpop.f32.mrf.mxu0 }
 0x3c0   : > { %v2906_v27 = vmul.f32 0.125, %v2900_v15 }
 0x3c1   : > { %v10516_v16 = vpop.f32.mrf.mxu0 }
 0x3c2   : > { %v2907_v28 = vadd.f32 %v2906_v27, %v12849_v33 }
 0x3c3   : > { %v2903_v17 = vpop.f32.mrf.mxu0 }
 0x3c4   : > { %v2908_v29 = vsel %vm2682_vm4, %v2907_v28, -inf }
 0x3c5   : > { %v10517_v18 = vpop.f32.mrf.mxu0 }
 0x42f   : > { %v2685_v8 = vpop.xlane.xlu1 %2684 }
 0x430   : > { %v2686_v19 = vsub.f32 %v2681_v6, %v2685_v8 }
 0x432   : > { %v2687_v21 = vmul.f32 1.442695, %v2686_v19 }
 0x434   : > { %11924 = vpow2.f32 %v2687_v21 }
 0x441   : > { %v11925_v22 = vpop.eup %11924 }
 0x442   : > { %v2689_v23 = vsel %vm2682_vm4, %v11925_v22, 0.0 }
 0x443   : > { %2690 = vadd.xlane.f32.xlu1 %v2689_v23 }
 0x454   : > { %2743 = vrot.lane.b32.xlu1 %v12804_v1, %s12203_s21 }
 0x458   : > { %2970 = vrot.lane.b32.xlu1 %v12818_v20, %s12203_s21 }
 0x45c   : > { %2967 = vrot.lane.b32.xlu1 %v2857_v34, %s12203_s21 }
 0x460   : > { %3191 = vrot.lane.b32.xlu1 %v3081_v26, %s12203_s21 }
 0x484   : > { %2909 = vmax.xlane.f32.xlu1 %v2908_v29 }
 0x4cc   : > { %v2691_v30 = vpop.xlane.xlu1 %2690 }
 0x4cd   : > { %11926 = vrcp.f32 %v2691_v30 }
 0x4d0   : > { %v2744_v37 = vpop.permute.xlu1 %2743 }
 0x4d4   : > { %v2971_v1 = vpop.permute.xlu1 %2970 }
 0x4d5   : > { %v2976_v38 = vsel %vm2633_vm1, %v2971_v1, 0 }
 0x4d6   : > { %10525 = vmatpush3.bf16.xpose.msra.mxu0 %v2976_v38 }
 0x4d7   : > { %10536 = vmatprep.subr.bf16.mxu0 %v12201_v24 }
 0x4d8   : > { %v2968_v39 = vpop.permute.xlu1 %2967 }
 0x4da   : > { %v11927_v20 = vpop.eup %11926 }
 0x4db   : > { %v2693_v34 = vmul.f32 %v11927_v20, %v11925_v22 }
 0x4dc   : > { %v3192_v44 = vpop.permute.xlu1 %3191 }
 0x4dd   : > { %10527 = vmatmul.mubr.msk.bf16.vlgmr.msra.gmra.mxu0 %vm2633_vm1, %v2968_v39  ;;  %v2694_v41 = vpack.c.bf16 %v2693_v34, %v2693_v34 }
 0x4de   : > { %10537 = vmatpush3.bf16.xpose.msra.mxu0 %v3088_v40  ;;  %10538 = vmatprep.mubr.msk.bf16.mxu0 %vm12202_vm0, %v12201_v24 }
 0x4df   : > { %10497 = vmatmul.mubr.msk.bf16.vlgmr.msra.gmra.mxu1 %vm2682_vm4, %v2694_v41  ;;  %10548 = vmatprep.subr.bf16.mxu0 %v12201_v24 }
 0x4e0   : > { %10501 = vmatpush3.bf16.xpose.msra.mxu1 %v2752_v42  ;;  %10502 = vmatprep.mubr.msk.bf16.mxu1 %vm12202_vm0, %v12201_v24 }
 0x4e1   : > { %10506 = vmatprep.subr.bf16.mxu1 %v12201_v24 }
 0x4e5   : > { %10539 = vmatmul.mubr.msk.bf16.vlgmr.msra.gmra.mxu0 %vm2633_vm1, %v3081_v26 }
 0x4e6   : > { %10549 = vmatpush3.bf16.xpose.msra.mxu0 %v3200_v25  ;;  %10550 = vmatprep.mubr.msk.bf16.mxu0 %vm12202_vm0, %v12201_v24 }
 0x4e7   : > { %10503 = vmatmul.mubr.msk.bf16.vlgmr.msra.gmra.mxu1 %vm2633_vm1, %v2744_v37 }
 0x4e8   : > { %10508 = vmatprep.mubr.msk.bf16.mxu1 %vm12202_vm0, %v12201_v24 }
 0x4ed   : > { %10551 = vmatmul.mubr.msk.bf16.vlgmr.msra.gmra.mxu0 %vm2633_vm1, %v3192_v44 }
 0x50d   : > { %v2910_v35 = vpop.xlane.xlu1 %2909 }
 0x50e   : > { %v2911_v54 = vsub.f32 %v2907_v28, %v2910_v35 }
 0x510   : > { %v2912_v62 = vmul.f32 1.442695, %v2911_v54  ;;  %v3083_v54 = vpack.c.bf16 %v12846_v56, %v12846_v56 }
 0x512   : > { %11928 = vpow2.f32 %v2912_v62 }
 0x51f   : > { %v11929_v30 = vpop.eup %11928 }
 0x520   : > { %v2914_v37 = vsel %vm2682_vm4, %v11929_v30, 0.0 }
 0x59d   : > { %v3012_v45 = vpop.f32.mrf.mxu0 }
 0x59e   : > { %v3018_v63 = vmul.f32 0.125, %v3012_v45 }
 0x59f   : > { %v12885_v46 = vpop.f32.mrf.mxu1  ;;  %v10528_v47 = vpop.f32.mrf.mxu0 }
 0x5a0   : > { %v3019_v16 = vadd.f32 %v3018_v63, %v12849_v33 }
 0x5a1   : > { %v10498_v50 = vpop.f32.mrf.mxu1  ;;  %v3015_v51 = vpop.f32.mrf.mxu0 }
 0x5a2   : > { %v3020_v21 = vsel %vm2682_vm4, %v3019_v16, -inf }
 0x5a3   : > { %v2739_v31 = vpop.f32.mrf.mxu1  ;;  %v10529_v53 = vpop.f32.mrf.mxu0 }
 0x5a5   : > { %v10499_v55 = vpop.f32.mrf.mxu1  ;;  %v3124_v57 = vpop.f32.mrf.mxu0 }
 0x5a6   : > { %v3130_v14 = vmul.f32 0.125, %v3124_v57  ;;  %v2859_v55 = vpack.c.bf16 %v12840_v49, %v12840_v49 }
 0x5a7   : > { %v2788_v59 = vpop.f32.mrf.mxu1  ;;  %v10540_v60 = vpop.f32.mrf.mxu0 }
 0x5a8   : > { %v2794_v0 = vmul.f32 0.125, %v2788_v59  ;;  %v3131_v22 = vadd.f32 %v3130_v14, %v12849_v33 }
 0x5a9   : > { %v10504_v4 = vpop.f32.mrf.mxu1  ;;  %v3127_v5 = vpop.f32.mrf.mxu0 }
 0x5aa   : > { %v2795_v6 = vadd.f32 %v2794_v0, %v12849_v33  ;;  %v3132_v27 = vsel %vm2682_vm4, %v3131_v22, -inf }
 0x5ab   : > { %v2791_v7 = vpop.f32.mrf.mxu1  ;;  %v10541_v10 = vpop.f32.mrf.mxu0 }
 0x5ac   : > { %v2796_v15 = vsel %vm2682_vm4, %v2795_v6, -inf }
 0x5ad   : > { %v3236_v17 = vpop.f32.mrf.mxu0  ;;  %2797 = vmax.xlane.f32.xlu0 %v2796_v15  ;;  %v10505_v18 = vpop.f32.mrf.mxu1 }
 0x5ae   : > { %v3242_v19 = vmul.f32 0.125, %v3236_v17 }
 0x5af   : > { %v10552_v8 = vpop.f32.mrf.mxu0 }
 0x5b0   : > { %v3243_v28 = vadd.f32 %v3242_v19, %v12849_v33  ;;  %v3148_v19 = vsel %vm2698_vm2, %v3083_v54, 0 }
 0x5b1   : > { %v3239_v23 = vpop.f32.mrf.mxu0  ;;  %3021 = vmax.xlane.f32.xlu0 %v3020_v21 }
 0x5b2   : > { %v3244_v29 = vsel %vm2682_vm4, %v3243_v28, -inf }
 0x5b3   : > { %v10553_v26 = vpop.f32.mrf.mxu0 }
 0x5b5   : > { %3133 = vmax.xlane.f32.xlu0 %v3132_v27 }
 0x5b9   : > { %3245 = vmax.xlane.f32.xlu0 %v3244_v29 }
 0x5bd   : > { %2915 = vadd.xlane.f32.xlu0 %v2914_v37  ;;  %v11012_v37 = vld [vmem:[%s12422_s8 + $0xac] ss:$12 sps:$4 sm:$0xff]  }
 0x5be   : > { %3803 = vmatprep.subr.bf16.mxu0 %v11012_v37 }
 0x636   : > { %v2798_v1 = vpop.xlane.xlu0 %2797 }
 0x637   : > { %v2799_v38 = vsub.f32 %v2795_v6, %v2798_v1  ;;  %v2924_v6 = vsel %vm2698_vm2, %v2859_v55, 0  ;;  %v11015_v1 = vld [vmem:[%s12422_s8 + $0x94] ss:$12 sps:$4 sm:$0xff]  }
 0x639   : > { %v2800_v58 = vmul.f32 1.442695, %v2799_v38  ;;  %v11013_v38 = vld [vmem:[%s12422_s8 + $0x90] ss:$12 sps:$4 sm:$0xff]  }
 0x63a   : > { %v3022_v20 = vpop.xlane.xlu0 %3021 }
 0x63b   : > { %v3023_v34 = vsub.f32 %v3019_v16, %v3022_v20  ;;  %v11018_v20 = vld [vmem:[%s12422_s8 + $0x7c] ss:$12 sps:$4 sm:$0xff]  }
 0x63d   : > { %v3024_v39 = vmul.f32 1.442695, %v3023_v34  ;;  %v11031_v34 = vld [vmem:[%s12422_s8 + $0x228] ss:$12 sps:$4 sm:$0xff]  }
 0x63e   : > { %v3134_v40 = vpop.xlane.xlu0 %3133 }
 0x63f   : > { %11930 = vpow2.f32 %v3024_v39  ;;  %v3135_v41 = vsub.f32 %v3131_v22, %v3134_v40  ;;  %v11039_v39 = vld [vmem:[%s12422_s8 + $0x214] ss:$12 sps:$4 sm:$0xff]   ;;  %v11016_v40 = vld [vmem:[%s12422_s8 + $0x78] ss:$12 sps:$4 sm:$0xff]  }
 0x640   : > { %11932 = vpow2.f32 %v2800_v58  ;;  %v11033_v58 = vld [vmem:[%s12422_s8 + $0x22c] ss:$12 sps:$4 sm:$0xff]  }
 0x641   : > { %v3136_v42 = vmul.f32 1.442695, %v3135_v41  ;;  %v11021_v41 = vld [vmem:[%s12422_s8 + $0x64] ss:$12 sps:$4 sm:$0xff]  }
 0x642   : > { %v3246_v33 = vpop.xlane.xlu0 %3245 }
 0x643   : > { %11934 = vpow2.f32 %v3136_v42  ;;  %v3247_v43 = vsub.f32 %v3243_v28, %v3246_v33  ;;  %v11037_v42 = vld [vmem:[%s12422_s8 + $0x210] ss:$12 sps:$4 sm:$0xff]  }
 0x644   : > { %v11045_v33 = vld [vmem:[%s12422_s8 + $0x1fc] ss:$12 sps:$4 sm:$0xff]  }
 0x645   : > { %v3248_v25 = vmul.f32 1.442695, %v3247_v43  ;;  %v11019_v43 = vld [vmem:[%s12422_s8 + $0x60] ss:$12 sps:$4 sm:$0xff]  }
 0x646   : > { %v2916_v60 = vpop.xlane.xlu0 %2915 }
 0x647   : > { %11936 = vpow2.f32 %v3248_v25  ;;  %v11024_v25 = vld [vmem:[%s12422_s8 + $0x4c] ss:$12 sps:$4 sm:$0xff]  }
 0x64c   : > { %v11931_v44 = vpop.eup %11930 }
 0x64d   : > { %v3026_v45 = vsel %vm2682_vm4, %v11931_v44, 0.0  ;;  %v11933_v47 = vpop.eup %11932 }
 0x64e   : > { %3027 = vadd.xlane.f32.xlu1 %v3026_v45  ;;  %v2802_v50 = vsel %vm2682_vm4, %v11933_v47, 0.0  ;;  %v11051_v45 = vld [vmem:[%s12422_s8 + $0x1e4] ss:$12 sps:$4 sm:$0xff]  }
 0x650   : > { %v11935_v35 = vpop.eup %11934 }
 0x651   : > { %v3138_v51 = vsel %vm2682_vm4, %v11935_v35, 0.0 }
 0x652   : > { %2803 = vadd.xlane.f32.xlu1 %v2802_v50  ;;  %3139 = vadd.xlane.f32.xlu0 %v3138_v51  ;;  %v11049_v50 = vld [vmem:[%s12422_s8 + $0x1e0] ss:$12 sps:$4 sm:$0xff]  }
 0x653   : > { %v11057_v51 = vld [vmem:[%s12422_s8 + $0x1cc] ss:$12 sps:$4 sm:$0xff]  }
 0x654   : > { %v11937_v31 = vpop.eup %11936 }
 0x655   : > { %v3250_v53 = vsel %vm2682_vm4, %v11937_v31, 0.0 }
 0x656   : > { %3251 = vadd.xlane.f32.xlu0 %v3250_v53  ;;  %v11030_v53 = vld [vmem:[%s12422_s8 + $0x1c] ss:$12 sps:$4 sm:$0xff]  }
 0x663   : > { %2809 = vrot.lane.b32.xlu1 %v12838_v48, %s12203_s21 }
 0x667   : > { %3257 = vrot.lane.b32.xlu1 %v3083_v54, %s12203_s21  ;;  %v11055_v54 = vld [vmem:[%s12422_s8 + $0x1c8] ss:$12 sps:$4 sm:$0xff]  }
 0x66c   : > { %3033 = vrot.lane.b32.xlu0 %v2859_v55, %s12203_s21  ;;  %v11063_v55 = vld [vmem:[%s12422_s8 + $0x1b4] ss:$12 sps:$4 sm:$0xff]  }
 0x6d7   : > { %v3028_v57 = vpop.xlane.xlu1 %3027 }
 0x6db   : > { %v2804_v59 = vpop.xlane.xlu1 %2803  ;;  %v3140_v48 = vpop.xlane.xlu0 %3139 }
 0x6dc   : > { %11938 = vrcp.f32 %v2804_v59  ;;  %v11036_v59 = vld [vmem:[%s12422_s8 + $0x4] ss:$12 sps:$4 sm:$0xff]  }
 0x6dd   : > { %11940 = vrcp.f32 %v2916_v60  ;;  %v11061_v60 = vld [vmem:[%s12422_s8 + $0x1b0] ss:$12 sps:$4 sm:$0xff]  }
 0x6de   : > { %11942 = vrcp.f32 %v3028_v57  ;;  %v11028_v57 = vld [vmem:[%s12422_s8 + $0x18] ss:$12 sps:$4 sm:$0xff]  }
 0x6df   : > { %v2810_v62 = vpop.permute.xlu1 %2809  ;;  %v3252_v49 = vpop.xlane.xlu0 %3251  ;;  %11944 = vrcp.f32 %v3140_v48  ;;  %v11042_v48 = vld [vmem:[%s12422_s8 + $0x16c] ss:$12 sps:$4 sm:$0xff]  }
 0x6e0   : > { %v2815_v63 = vsel %vm2698_vm2, %v2810_v62, 0  ;;  %11946 = vrcp.f32 %v3252_v49  ;;  %v11069_v62 = vld [vmem:[%s12422_s8 + $0x19c] ss:$12 sps:$4 sm:$0xff]   ;;  %v11073_v49 = vld [vmem:[%s12422_s8 + $0x180] ss:$12 sps:$4 sm:$0xff]  }
 0x6e1   : > { %10507 = vmatpush3.bf16.msra.mxu1 %v2815_v63  ;;  %v11034_v63 = vld [vmem:[%s12422_s8] ss:$12 sps:$4 sm:$0xff]  }
 0x6e2   : > { %10518 = vmatprep.subr.bf16.mxu1 %v12201_v24 }
 0x6e3   : > { %v3034_v10 = vpop.permute.xlu0 %3033  ;;  %v3258_v22 = vpop.permute.xlu1 %3257 }
 0x6e4   : > { %v3039_v16 = vsel %vm2698_vm2, %v3034_v10, 0  ;;  %v3263_v27 = vsel %vm2698_vm2, %v3258_v22, 0  ;;  %v11052_v10 = vld [vmem:[%s12422_s8 + $0x138] ss:$12 sps:$4 sm:$0xff]  }
 0x6e9   : > { %v11939_v56 = vpop.eup %11938 }
 0x6ea   : > { %v2806_v0 = vmul.f32 %v11939_v56, %v11933_v47  ;;  %v11941_v5 = vpop.eup %11940  ;;  %v11022_v47 = vld [vmem:[%s12422_s8 + $0x48] ss:$12 sps:$4 sm:$0xff]   ;;  %v11067_v56 = vld [vmem:[%s12422_s8 + $0x198] ss:$12 sps:$4 sm:$0xff]  }
 0x6eb   : > { %v2918_v7 = vmul.f32 %v11941_v5, %v11929_v30  ;;  %v11943_v15 = vpop.eup %11942  ;;  %v11010_v30 = vld [vmem:[%s12422_s8 + $0xa8] ss:$12 sps:$4 sm:$0xff]  }
 0x6ec   : > { %v2807_v4 = vpack.c.bf16 %v2806_v0, %v2806_v0  ;;  %v3030_v17 = vmul.f32 %v11943_v15, %v11931_v44  ;;  %v11945_v8 = vpop.eup %11944  ;;  %3804 = vmatpush1.bf16.msra.mxu0 %v11010_v30  ;;  %v11043_v44 = vld [vmem:[%s12422_s8 + $0x1f8] ss:$12 sps:$4 sm:$0xff]   ;;  %v11048_v5 = vld [vmem:[%s12422_s8 + $0x154] ss:$12 sps:$4 sm:$0xff]  }
 0x6ed   : > { %v2919_v14 = vpack.c.bf16 %v2918_v7, %v2918_v7  ;;  %v3142_v21 = vmul.f32 %v11945_v8, %v11935_v35  ;;  %v11947_v26 = vpop.eup %11946  ;;  %3805 = vmatprep.subr.bf16.mxu0 %v11015_v1  ;;  %v11027_v35 = vld [vmem:[%s12422_s8 + $0x34] ss:$12 sps:$4 sm:$0xff]   ;;  %v11075_v0 = vld [vmem:[%s12422_s8 + $0x184] ss:$12 sps:$4 sm:$0xff]   ;;  %v11054_v7 = vld [vmem:[%s12422_s8 + $0x13c] ss:$12 sps:$4 sm:$0xff]  }
 0x6ee   : > { %10509 = vmatmul.mubr.msk.bf16.vlgmr.msra.gmra.mxu1 %vm2682_vm4, %v2807_v4  ;;  %v3031_v18 = vpack.c.bf16 %v3030_v17, %v3030_v17  ;;  %v3254_v28 = vmul.f32 %v11947_v26, %v11937_v31  ;;  %v11025_v31 = vld [vmem:[%s12422_s8 + $0x30] ss:$12 sps:$4 sm:$0xff]   ;;  %v11040_v4 = vld [vmem:[%s12422_s8 + $0x168] ss:$12 sps:$4 sm:$0xff]   ;;  %v11058_v15 = vld [vmem:[%s12422_s8 + $0x120] ss:$12 sps:$4 sm:$0xff]  }
 0x6ef   : > { %10519 = vmatpush3.bf16.msra.mxu1 %v2924_v6  ;;  %10520 = vmatprep.mubr.msk.bf16.mxu1 %vm12202_vm0, %v12201_v24  ;;  %v3143_v23 = vpack.c.bf16 %v3142_v21, %v3142_v21  ;;  %v11046_v6 = vld [vmem:[%s12422_s8 + $0x150] ss:$12 sps:$4 sm:$0xff]   ;;  %v11064_v17 = vld [vmem:[%s12422_s8 + $0x108] ss:$12 sps:$4 sm:$0xff]  }
 0x6f0   : > { %10530 = vmatprep.subr.bf16.mxu1 %v12201_v24  ;;  %v3255_v29 = vpack.c.bf16 %v3254_v28, %v3254_v28  ;;  %3806 = vmatpush1.bf16.msra.mxu0 %v11013_v38  ;;  %v11070_v8 = vld [vmem:[%s12422_s8 + $0xf0] ss:$12 sps:$4 sm:$0xff]  }
 0x6f1   : > { %3807 = vmatprep.subr.bf16.mxu0 %v11018_v20  ;;  %v11078_v38 = vld [vmem:[%s12422_s8 + $0xdc] ss:$12 sps:$4 sm:$0xff]   ;;  %v11076_v20 = vld [vmem:[%s12422_s8 + $0xd8] ss:$12 sps:$4 sm:$0xff]  }
 0x6f4   : > { %3808 = vmatpush1.bf16.msra.mxu0 %v11016_v40  ;;  %v11083_v40 = vld [vmem:[%s12422_s8 + $0xc4] ss:$12 sps:$4 sm:$0xff]  }
 0x6f5   : > { %3809 = vmatprep.subr.bf16.mxu0 %v11021_v41  ;;  %v11081_v41 = vld [vmem:[%s12422_s8 + $0xc0] ss:$12 sps:$4 sm:$0xff]  }
 0x6f6   : > { %10521 = vmatmul.mubr.msk.bf16.vlgmr.msra.gmra.mxu1 %vm2682_vm4, %v2919_v14  ;;  %v11060_v14 = vld [vmem:[%s12422_s8 + $0x124] ss:$12 sps:$4 sm:$0xff]  }
 0x6f7   : > { %10531 = vmatpush3.bf16.msra.mxu1 %v3039_v16  ;;  %10532 = vmatprep.mubr.msk.bf16.mxu1 %vm12202_vm0, %v12201_v24  ;;  %v11066_v16 = vld [vmem:[%s12422_s8 + $0x10c] ss:$12 sps:$4 sm:$0xff]  }
 0x6f8   : > { %10542 = vmatprep.subr.bf16.mxu1 %v12201_v24  ;;  %3810 = vmatpush1.bf16.msra.mxu0 %v11019_v43 }
 0x6f9   : > { %3811 = vmatprep.subr.bf16.mxu0 %v11024_v25 }
 0x6fc   : > { %3812 = vmatpush1.bf16.msra.mxu0 %v11022_v47 }
 0x6fd   : > { %3813 = vmatprep.subr.bf16.mxu0 %v11027_v35 }
 0x6fe   : > { %10533 = vmatmul.mubr.msk.bf16.vlgmr.msra.gmra.mxu1 %vm2682_vm4, %v3031_v18  ;;  %v11072_v18 = vld [vmem:[%s12422_s8 + $0xf4] ss:$12 sps:$4 sm:$0xff]  }
 0x6ff   : > { %10543 = vmatpush3.bf16.msra.mxu1 %v3148_v19  ;;  %10544 = vmatprep.mubr.msk.bf16.mxu1 %vm12202_vm0, %v12201_v24 }
 0x700   : > { %10554 = vmatprep.subr.bf16.mxu1 %v12201_v24  ;;  %3814 = vmatpush1.bf16.msra.mxu0 %v11025_v31  ;;  %v11080_v31 = vld [vmem:[%s12422_s8 + $0xb0] ss:$12 sps:$4 sm:$0xff]  }
 0x701   : > { %3815 = vmatprep.subr.bf16.mxu0 %v11030_v53 }
 0x704   : > { %3816 = vmatpush1.bf16.msra.mxu0 %v11028_v57 }
 0x705   : > { %3817 = vmatprep.subr.bf16.mxu0 %v11036_v59 }
 0x706   : > { %10545 = vmatmul.mubr.msk.bf16.vlgmr.msra.gmra.mxu1 %vm2682_vm4, %v3143_v23 }
 0x707   : > { %10555 = vmatpush3.bf16.msra.mxu1 %v3263_v27  ;;  %10556 = vmatprep.mubr.msk.bf16.mxu1 %vm12202_vm0, %v12201_v24 }
 0x708   : > { %3844 = vmatprep.subr.bf16.mxu1 %v11033_v58  ;;  %3818 = vmatpush1.bf16.msra.mxu0 %v11034_v63 }
 0x709   : > { %3819 = vmatprep.subr.bf16.mxu0 %v11042_v48  ;;  %v11086_v48 = vld [vmem:[%s12422_s8 + $0x140] ss:$12 sps:$4 sm:$0xff]  }
 0x70c   : > { %3820 = vmatpush2.bf16.msra.mxu0 %v11040_v4  ;;  %v11087_v4 = vld [vmem:[%s12422_s8 + $0x230] ss:$12 sps:$4 sm:$0xff]  }
 0x70d   : > { %3821 = vmatprep.subr.bf16.mxu0 %v11048_v5  ;;  %v11088_v5 = vld [vmem:[%s12422_s8 + $0x80] ss:$12 sps:$4 sm:$0xff]  }
 0x70e   : > { %10557 = vmatmul.mubr.msk.bf16.vlgmr.msra.gmra.mxu1 %vm2682_vm4, %v3255_v29 }
 0x70f   : > { %3876 = vmatprep.mubr.bf16.mxu1 %v12200_v61  ;;  %3845 = vmatpush1.bf16.msra.mxu1 %v11031_v34  ;;  %v11079_v34 = vld [vmem:[%s12422_s8 + $0x170] ss:$12 sps:$4 sm:$0xff]  }
 0x710   : > { %3846 = vmatprep.subr.bf16.mxu1 %v11039_v39  ;;  %3822 = vmatpush2.bf16.msra.mxu0 %v11046_v6  ;;  %v11091_v6 = vld [vmem:[%s12422_s8 + $0x68] ss:$12 sps:$4 sm:$0xff]  }
 0x711   : > { %3823 = vmatprep.subr.bf16.mxu0 %v11054_v7  ;;  %v11092_v7 = vld [vmem:[%s12422_s8 + $0x110] ss:$12 sps:$4 sm:$0xff]  }
 0x713   : > { %3847 = vmatpush1.bf16.msra.mxu1 %v11037_v42 }
 0x714   : > { %3848 = vmatprep.subr.bf16.mxu1 %v11045_v33  ;;  %3824 = vmatpush2.bf16.msra.mxu0 %v11052_v10  ;;  %v11093_v10 = vld [vmem:[%s12422_s8 + $0x200] ss:$12 sps:$4 sm:$0xff]  }
 0x715   : > { %3825 = vmatprep.subr.bf16.mxu0 %v11060_v14  ;;  %v11094_v14 = vld [vmem:[%s12422_s8 + $0x50] ss:$12 sps:$4 sm:$0xff]  }
 0x717   : > { %3849 = vmatpush1.bf16.msra.mxu1 %v11043_v44 }
 0x718   : > { %3850 = vmatprep.subr.bf16.mxu1 %v11051_v45  ;;  %3826 = vmatpush2.bf16.msra.mxu0 %v11058_v15  ;;  %v11095_v15 = vld [vmem:[%s12422_s8 + $0xf8] ss:$12 sps:$4 sm:$0xff]  }
 0x719   : > { %3827 = vmatprep.subr.bf16.mxu0 %v11066_v16  ;;  %v11096_v16 = vld [vmem:[%s12422_s8 + $0x1e8] ss:$12 sps:$4 sm:$0xff]  }
 0x71b   : > { %3851 = vmatpush1.bf16.msra.mxu1 %v11049_v50 }
 0x71c   : > { %3852 = vmatprep.subr.bf16.mxu1 %v11057_v51  ;;  %3828 = vmatpush2.bf16.msra.mxu0 %v11064_v17  ;;  %v11097_v17 = vld [vmem:[%s12422_s8 + $0x38] ss:$12 sps:$4 sm:$0xff]  }
 0x71d   : > { %3829 = vmatprep.subr.bf16.mxu0 %v11072_v18  ;;  %v11098_v18 = vld [vmem:[%s12422_s8 + $0xe0] ss:$12 sps:$4 sm:$0xff]  }
 0x71f   : > { %3853 = vmatpush1.bf16.msra.mxu1 %v11055_v54  ;;  %v11084_v54 = vld [vmem:[%s12422_s8 + $0x158] ss:$12 sps:$4 sm:$0xff]  }
 0x720   : > { %3854 = vmatprep.subr.bf16.mxu1 %v11063_v55  ;;  %3830 = vmatpush2.bf16.msra.mxu0 %v11070_v8  ;;  %v11099_v8 = vld [vmem:[%s12422_s8 + $0x1d0] ss:$12 sps:$4 sm:$0xff]  }
 0x721   : > { %3831 = vmatprep.subr.bf16.mxu0 %v11078_v38 }
 0x723   : > { %3855 = vmatpush1.bf16.msra.mxu1 %v11061_v60  ;;  %v11085_v60 = vld [vmem:[%s12422_s8 + $0x98] ss:$12 sps:$4 sm:$0xff]  }
 0x724   : > { %3856 = vmatprep.subr.bf16.mxu1 %v11069_v62  ;;  %3832 = vmatpush2.bf16.msra.mxu0 %v11076_v20 }
 0x725   : > { %3833 = vmatprep.subr.bf16.mxu0 %v11083_v40 }
 0x727   : > { %3857 = vmatpush1.bf16.msra.mxu1 %v11067_v56 }
 0x728   : > { %3858 = vmatprep.subr.bf16.mxu1 %v11075_v0  ;;  %3834 = vmatpush2.bf16.msra.mxu0 %v11081_v41 }
 0x729   : > { %10560 = vmatprep.subr.bf16.mxu0 %v12201_v24 }
 0x72b   : > { %3859 = vmatpush1.bf16.msra.mxu1 %v11073_v49  ;;  %v11089_v49 = vld [vmem:[%s12422_s8 + $0x128] ss:$12 sps:$4 sm:$0xff]  }
 0x72c   : > { %10305 = vmatprep.subr.bf16.mxu1 %v11079_v34 }
 0x7ae   : > { %v2851_v19 = vpop.f32.mrf.mxu1 }
 0x7b0   : > { %v10510_v21 = vpop.f32.mrf.mxu1 }
 0x7b1   : > { %v11101_v21 = vld [vmem:[%s12422_s8 + $0xc8] ss:$12 sps:$4 sm:$0xff]  }
 0x7b2   : > { %v2854_v22 = vpop.f32.mrf.mxu1 }
 0x7b3   : > { %v11102_v22 = vld [vmem:[%s12422_s8 + $0x1b8] ss:$12 sps:$4 sm:$0xff]  }
 0x7b4   : > { %v10511_v23 = vpop.f32.mrf.mxu1 }
 0x7b5   : > { %v11103_v23 = vld [vmem:[%s12422_s8 + $0x8] ss:$12 sps:$4 sm:$0xff]  }
 0x7b6   : > { %v2960_v26 = vpop.f32.mrf.mxu1 }
 0x7b8   : > { %v10522_v27 = vpop.f32.mrf.mxu1 }
 0x7b9   : > { %v11105_v27 = vld [vmem:[%s12422_s8 + $0x188] ss:$12 sps:$4 sm:$0xff]  }
 0x7ba   : > { %v2963_v28 = vpop.f32.mrf.mxu1 }
 0x7bc   : > { %v10523_v29 = vpop.f32.mrf.mxu1 }
 0x7be   : > { %v3075_v30 = vpop.f32.mrf.mxu1 }
 0x7bf   : > { %v10693_v45 = vpack.i.bf16 %v2851_v19, %v3075_v30  ;;  %v11100_v19 = vld [vmem:[%s12422_s8 + $0x20] ss:$12 sps:$4 sm:$0xff]  }
 0x7c0   : > { %v10534_v37 = vpop.f32.mrf.mxu1 }
 0x7c2   : > { %v3078_v1 = vpop.f32.mrf.mxu1 }
 0x7c4   : > { %v10535_v58 = vpop.f32.mrf.mxu1 }
 0x7c6   : > { %v3184_v39 = vpop.f32.mrf.mxu1 }
 0x7c8   : > { %v10546_v42 = vpop.f32.mrf.mxu1 }
 0x7c9   : > { %v11998_v42 = vld [vmem:[#allocation2] sm:$0xff] }
 0x7ca   : > { %v3187_v33 = vpop.f32.mrf.mxu1 }
 0x7cc   : > { %v10547_v43 = vpop.f32.mrf.mxu1 }
 0x7ce   : > { %v3299_v25 = vpop.f32.mrf.mxu1 }
 0x7cf   : > { %3314 = vrot.lane.b32.xlu1 %v3299_v25, %s12203_s21 }
 0x7d0   : > { %v10558_v44 = vpop.f32.mrf.mxu1 }
 0x7d1   : > { %v11999_v44 = vld [vmem:[#allocation2 + $0x10] sm:$0xff] }
 0x7d2   : > { %v3302_v47 = vpop.f32.mrf.mxu1 }
 0x7d3   : > { %10694 = vrot.lane.b32.xlu1 %v10693_v45, %s12203_s21 }
 0x7d4   : > { %v10559_v35 = vpop.f32.mrf.mxu1 }
 0x841   : > { %v3315_v50 = vpop.permute.xlu1 %3314 }
 0x842   : > { %v3319_v51 = vsel %vm2633_vm1, %v3184_v39, %v3315_v50 }
 0x843   : > { %v12985_v53 = vpack.c.bf16 %v3319_v51, %v3319_v51 }
 0x845   : > { %3877 = vmatmul.mubr.bf16.vlgmr.msra.gmra.mxu1 %v12985_v53  ;;  %v10695_v55 = vpop.permute.xlu1 %10694 }
 0x846   : > { %10306 = vmatpush3.bf16.msra.mxu1 %v11080_v31  ;;  %v10697_v57 = vunpack.i.h.bf16 %v10695_v55  ;;  %v10696_v59 = vunpack.i.l.bf16 %v10695_v55 }
 0x847   : > { %10307 = vmatprep.subr.bf16.mxu1 %v11084_v54 }
 0x848   : > { %v3317_v62 = vsel %vm2633_vm1, %v12885_v46, %v10697_v57  ;;  %v3318_v63 = vsel %vm2633_vm1, %v2960_v26, %v10696_v59  ;;  %v11090_v46 = vld [vmem:[%s12422_s8 + $0x218] ss:$12 sps:$4 sm:$0xff]   ;;  %v11104_v26 = vld [vmem:[%s12422_s8 + $0x1a0] ss:$12 sps:$4 sm:$0xff]   ;;  %v12000_v59 = vld [vmem:[#allocation2 + $0x8] sm:$0xff] }
 0x849   : > { %v3320_v56 = vpack.c.bf16 %v3317_v62, %v3317_v62  ;;  %v3321_v0 = vpack.c.bf16 %v3318_v63, %v3318_v63 }
 0x84a   : > { %10308 = vmatpush3.bf16.msra.mxu1 %v11085_v60 }
 0x84b   : > { %3835 = vmatprep.mubr.bf16.mxu0 %v3321_v0  ;;  %3917 = vmatprep.mubr.bf16.mxu1 %v3321_v0 }
 0x84c   : > { %3836 = vmatmul.mubr.bf16.vlgmr.msra.gmra.mxu0 %v3320_v56  ;;  %10309 = vmatprep.subr.bf16.mxu1 %v11086_v48 }
 0x84d   : > { %10561 = vmatpush3.bf16.msra.mxu0 %v11087_v4  ;;  %10576 = vmatprep.mubr.msk.bf16.mxu0 %vm12202_vm0, %v12201_v24  ;;  %v11106_v4 = vld [vmem:[%s14073_s29 + $0x2a0] ss:$48 sps:$4 sm:$0xff]  }
 0x84e   : > { %10310 = vmatpush3.bf16.msra.mxu1 %v11088_v5  ;;  %10562 = vmatprep.subr.bf16.mxu0 %v12201_v24  ;;  %v11108_v5 = vld [vmem:[%s14073_s29 + $0x2a4] ss:$48 sps:$4 sm:$0xff]  }
 0x84f   : > { %10311 = vmatprep.subr.bf16.mxu1 %v11089_v49  ;;  %v11111_v49 = vld [vmem:[%s14073_s29 + $0x244] ss:$48 sps:$4 sm:$0xff]  }
 0x851   : > { %10563 = vmatpush3.bf16.msra.mxu0 %v11090_v46  ;;  %v11109_v46 = vld [vmem:[%s14073_s29 + $0x240] ss:$48 sps:$4 sm:$0xff]  }
 0x852   : > { %10312 = vmatpush3.bf16.msra.mxu1 %v11091_v6  ;;  %10564 = vmatprep.subr.bf16.mxu0 %v12201_v24  ;;  %v11114_v6 = vld [vmem:[%s14073_s29 + $0x1e4] ss:$48 sps:$4 sm:$0xff]  }
 0x853   : > { %10313 = vmatprep.subr.bf16.mxu1 %v11092_v7  ;;  %v11130_v7 = vld [vmem:[%s14073_s29 + $0x8a0] ss:$48 sps:$4 sm:$0xff]  }
 0x855   : > { %10565 = vmatpush3.bf16.msra.mxu0 %v11093_v10  ;;  %v11132_v10 = vld [vmem:[%s14073_s29 + $0x8a4] ss:$48 sps:$4 sm:$0xff]  }
 0x856   : > { %10314 = vmatpush3.bf16.msra.mxu1 %v11094_v14  ;;  %10566 = vmatprep.subr.bf16.mxu0 %v12201_v24  ;;  %v11112_v14 = vld [vmem:[%s14073_s29 + $0x1e0] ss:$48 sps:$4 sm:$0xff]  }
 0x857   : > { %10315 = vmatprep.subr.bf16.mxu1 %v11095_v15  ;;  %v11138_v15 = vld [vmem:[%s14073_s29 + $0x844] ss:$48 sps:$4 sm:$0xff]  }
 0x859   : > { %10567 = vmatpush3.bf16.msra.mxu0 %v11096_v16  ;;  %v11117_v16 = vld [vmem:[%s14073_s29 + $0x184] ss:$48 sps:$4 sm:$0xff]  }
 0x85a   : > { %10316 = vmatpush3.bf16.msra.mxu1 %v11097_v17  ;;  %10568 = vmatprep.subr.bf16.mxu0 %v12201_v24  ;;  %v11136_v17 = vld [vmem:[%s14073_s29 + $0x840] ss:$48 sps:$4 sm:$0xff]  }
 0x85b   : > { %10317 = vmatprep.subr.bf16.mxu1 %v11098_v18  ;;  %v11115_v18 = vld [vmem:[%s14073_s29 + $0x180] ss:$48 sps:$4 sm:$0xff]  }
 0x85d   : > { %10569 = vmatpush3.bf16.msra.mxu0 %v11099_v8  ;;  %v11120_v8 = vld [vmem:[%s14073_s29 + $0x124] ss:$48 sps:$4 sm:$0xff]  }
 0x85e   : > { %10318 = vmatpush3.bf16.msra.mxu1 %v11100_v19  ;;  %10570 = vmatprep.subr.bf16.mxu0 %v12201_v24  ;;  %v11118_v19 = vld [vmem:[%s14073_s29 + $0x120] ss:$48 sps:$4 sm:$0xff]  }
 0x85f   : > { %10319 = vmatprep.subr.bf16.mxu1 %v11101_v21  ;;  %v11123_v21 = vld [vmem:[%s14073_s29 + $0xc4] ss:$48 sps:$4 sm:$0xff]  }
 0x861   : > { %10571 = vmatpush3.bf16.msra.mxu0 %v11102_v22  ;;  %v11121_v22 = vld [vmem:[%s14073_s29 + $0xc0] ss:$48 sps:$4 sm:$0xff]  }
 0x862   : > { %10320 = vmatpush3.bf16.msra.mxu1 %v11103_v23  ;;  %10572 = vmatprep.subr.bf16.mxu0 %v12201_v24  ;;  %v11126_v23 = vld [vmem:[%s14073_s29 + $0x64] ss:$48 sps:$4 sm:$0xff]  }
 0x863   : > { %5844 = vmatprep.subr.bf16.mxu1 %v11108_v5  ;;  %v11166_v5 = vld [vmem:[%s14073_s29 + $0x660] ss:$48 sps:$4 sm:$0xff]  }
 0x865   : > { %3918 = vmatmul.mubr.bf16.vlgmr.msra.gmra.mxu1 %v3320_v56  ;;  %10573 = vmatpush3.bf16.msra.mxu0 %v11104_v26  ;;  %v11124_v26 = vld [vmem:[%s14073_s29 + $0x60] ss:$48 sps:$4 sm:$0xff]  }
 0x866   : > { %10574 = vmatprep.subr.bf16.mxu0 %v12201_v24  ;;  %v3968_v24 = vld [vmem:[%s14072_s23] sm:$0x7]  ;;  %5845 = vmatpush1.bf16.msra.mxu1 %v11106_v4  ;;  %v11171_v4 = vld [vmem:[%s14073_s29 + $0x364] ss:$48 sps:$4 sm:$0xff]  }
 0x867   : > { %v3977_v43 = vrot.slane %v3968_v24, %v12557_v11  ;;  %v3973_v47 = vrot.slane %v3968_v24, %v12563_v13  ;;  %v3981_v54 = vrot.slane %v3968_v24, %v12560_v12  ;;  %5846 = vmatprep.subr.bf16.mxu1 %v11111_v49  ;;  %v11169_v49 = vld [vmem:[%s14073_s29 + $0x360] ss:$48 sps:$4 sm:$0xff]  }
 0x869   : > { %10575 = vmatpush3.bf16.msra.mxu0 %v11105_v27  ;;  %v11129_v27 = vld [vmem:[%s14073_s29 + $0x4] ss:$48 sps:$4 sm:$0xff]  }
 0x86a   : > { %5847 = vmatpush1.bf16.msra.mxu1 %v11109_v46  ;;  %5885 = vmatprep.subr.bf16.mxu0 %v11132_v10  ;;  %v11174_v46 = vld [vmem:[%s14073_s29 + $0x604] ss:$48 sps:$4 sm:$0xff]   ;;  %v11175_v10 = vld [vmem:[%s14073_s29 + $0x300] ss:$48 sps:$4 sm:$0xff]  }
 0x86b   : > { %5848 = vmatprep.subr.bf16.mxu1 %v11114_v6  ;;  %v11177_v6 = vld [vmem:[%s14073_s29 + $0x304] ss:$48 sps:$4 sm:$0xff]  }
 0x86c   : > { %10577 = vmatmul.mubr.bf16.vlgmr.msra.gmra.mxu0 %v12985_v53 }
 0x86d   : > { %5917 = vmatprep.mubr.bf16.mxu0 %v12200_v61  ;;  %5886 = vmatpush1.bf16.msra.mxu0 %v11130_v7  ;;  %v11172_v7 = vld [vmem:[%s14073_s29 + $0x600] ss:$48 sps:$4 sm:$0xff]  }
 0x86e   : > { %5887 = vmatprep.subr.bf16.mxu0 %v11138_v15  ;;  %5849 = vmatpush1.bf16.msra.mxu1 %v11112_v14  ;;  %v11180_v14 = vld [vmem:[%s14073_s29 + $0x2ac] ss:$48 sps:$4 sm:$0xff]  }
 0x86f   : > { %5850 = vmatprep.subr.bf16.mxu1 %v11117_v16  ;;  %v11183_v15 = vld [vmem:[%s14073_s29 + $0x8ac] ss:$48 sps:$4 sm:$0xff]  }
 0x871   : > { %5888 = vmatpush1.bf16.msra.mxu0 %v11136_v17 }
 0x872   : > { %5851 = vmatpush1.bf16.msra.mxu1 %v11115_v18 }
 0x873   : > { %5852 = vmatprep.subr.bf16.mxu1 %v11120_v8  ;;  %v3988_v8 = vld [vmem:[%s728_s26] sm:$0x7]  ;;  %s14076_s26 = sld [smem:[#allocation22_spill]] }
 0x876   : > { %5853 = vmatpush1.bf16.msra.mxu1 %v11118_v19  ;;  %v3989_v19 = vld [vmem:[%s732_s13] sm:$0x7] }
 0x877   : > { %5854 = vmatprep.subr.bf16.mxu1 %v11123_v21  ;;  %v4019_v21 = vrot.slane %v3988_v8, %v12557_v11 }
 0x87a   : > { %5855 = vmatpush1.bf16.msra.mxu1 %v11121_v22  ;;  %v4023_v22 = vrot.slane %v3988_v8, %v12560_v12 }
 0x87b   : > { %5856 = vmatprep.subr.bf16.mxu1 %v11126_v23  ;;  %v4015_v23 = vrot.slane %v3988_v8, %v12563_v13  ;;  %v11228_v8 = vld [vmem:[%s14073_s29 + $0x5ac] ss:$48 sps:$4 sm:$0xff]  }
 0x87e   : > { %5857 = vmatpush1.bf16.msra.mxu1 %v11124_v26 }
 0x87f   : > { %5858 = vmatprep.subr.bf16.mxu1 %v11129_v27  ;;  %v4038_v27 = vrot.slane %v3989_v19, %v12557_v11 }
 0x905   : > { %v3878_v28 = vpop.f32.mrf.mxu1 }
 0x907   : > { %v3880_v29 = vpop.f32.mrf.mxu1 }
 0x909   : > { %v3882_v30 = vpop.f32.mrf.mxu1 }
 0x90a   : > { %v11133_v30 = vld [vmem:[%s14073_s29 + $0x5a0] ss:$48 sps:$4 sm:$0xff]  }
 0x90b   : > { %v3883_v37 = vpop.f32.mrf.mxu1 }
 0x90c   : > { %v3837_v1 = vpop.f32.mrf.mxu0  ;;  %v11141_v37 = vld [vmem:[%s14073_s29 + $0x544] ss:$48 sps:$4 sm:$0xff]  }
 0x90d   : > { %v3879_v40 = vadd.f32 %v3878_v28, %v3837_v1  ;;  %v11127_v28 = vld [vmem:[%s14073_s29] ss:$48 sps:$4 sm:$0xff]  }
 0x90e   : > { %v3839_v38 = vpop.f32.mrf.mxu0  ;;  %5859 = vmatpush1.bf16.msra.mxu1 %v11127_v28  ;;  %v11139_v1 = vld [vmem:[%s14073_s29 + $0x540] ss:$48 sps:$4 sm:$0xff]   ;;  %v4042_v28 = vrot.slane %v3989_v19, %v12560_v12 }
 0x90f   : > { %v3881_v58 = vadd.f32 %v3880_v29, %v3839_v38  ;;  %v3965_v45 = vadd.f32 %v11999_v44, %v3879_v40  ;;  %v11135_v29 = vld [vmem:[%s14073_s29 + $0x5a4] ss:$48 sps:$4 sm:$0xff]  }
 0x910   : > { %v3841_v20 = vpop.f32.mrf.mxu0  ;;  %5860 = vmatprep.subr.bf16.mxu1 %v11135_v29  ;;  %v11147_v44 = vld [vmem:[%s14073_s29 + $0x4e4] ss:$48 sps:$4 sm:$0xff]  }
 0x911   : > { %v3966_v33 = vadd.f32 %v11998_v42, %v3881_v58  ;;  %v13034_v57 = vadd.f32 %v3973_v47, %v3965_v45  ;;  %v11145_v45 = vld [vmem:[%s14073_s29 + $0x4e0] ss:$48 sps:$4 sm:$0xff]   ;;  %v11150_v47 = vld [vmem:[%s14073_s29 + $0x784] ss:$48 sps:$4 sm:$0xff]  }
 0x912   : > { %v3842_v34 = vpop.f32.mrf.mxu0  ;;  %5861 = vmatpush2.bf16.msra.mxu1 %v11133_v30 }
 0x913   : > { %v13031_v31 = vadd.f32 %v3977_v43, %v3966_v33  ;;  %5862 = vmatprep.subr.bf16.mxu1 %v11141_v37  ;;  %v11144_v43 = vld [vmem:[%s14073_s29 + $0x7e4] ss:$48 sps:$4 sm:$0xff]  }
 0x914   : > { %5889 = vmatprep.subr.bf16.mxu0 %v11144_v43 }
 0x915   : > { %v3990_v48 = vadd.f32 %v13031_v31, %v13034_v57 }
 0x916   : > { %5863 = vmatpush2.bf16.msra.mxu1 %v11139_v1  ;;  %v4034_v1 = vrot.slane %v3989_v19, %v12563_v13  ;;  %v11231_v19 = vld [vmem:[%s14073_s29 + $0x2b4] ss:$48 sps:$4 sm:$0xff]  }
 0x917   : > { %5864 = vmatprep.subr.bf16.mxu1 %v11147_v44  ;;  %v11189_v44 = vld [vmem:[%s14073_s29 + $0x84c] ss:$48 sps:$4 sm:$0xff]  }
 0x91a   : > { %5865 = vmatpush2.bf16.msra.mxu1 %v11145_v45  ;;  %v11184_v45 = vld [vmem:[%s14073_s29 + $0x248] ss:$48 sps:$4 sm:$0xff]  }
 0x925   : > { %v10321_v39 = vpop.f32.mrf.mxu1 }
 0x927   : > { %v10322_v41 = vpop.f32.mrf.mxu1 }
 0x928   : > { %v10323_v35 = vadd.f32 %v10322_v41, %v10321_v39 }
 0x929   : > { %v10324_v25 = vpop.f32.mrf.mxu1 }
 0x92a   : > { %v11142_v25 = vld [vmem:[%s14073_s29 + $0x7e0] ss:$48 sps:$4 sm:$0xff]  }
 0x92b   : > { %v10325_v50 = vpop.f32.mrf.mxu1  ;;  %5890 = vmatpush1.bf16.msra.mxu0 %v11142_v25 }
 0x92c   : > { %v3959_v51 = vpop.f32.mrf.mxu0  ;;  %v11151_v50 = vld [vmem:[%s14073_s29 + $0x480] ss:$48 sps:$4 sm:$0xff]   ;;  %5891 = vmatprep.subr.bf16.mxu0 %v11150_v47  ;;  %v11187_v47 = vld [vmem:[%s14073_s29 + $0x848] ss:$48 sps:$4 sm:$0xff]  }
 0x92d   : > { %v3960_v53 = vadd.f32 %v10323_v35, %v3959_v51  ;;  %v11148_v35 = vld [vmem:[%s14073_s29 + $0x780] ss:$48 sps:$4 sm:$0xff]   ;;  %v11153_v51 = vld [vmem:[%s14073_s29 + $0x484] ss:$48 sps:$4 sm:$0xff]  }
 0x92e   : > { %v10578_v55 = vpop.f32.mrf.mxu0  ;;  %5866 = vmatprep.subr.bf16.mxu1 %v11153_v51  ;;  %v11190_v51 = vld [vmem:[%s14073_s29 + $0x1e8] ss:$48 sps:$4 sm:$0xff]  }
 0x92f   : > { %v3967_v60 = vadd.f32 %v12000_v59, %v3960_v53  ;;  %v11156_v53 = vld [vmem:[%s14073_s29 + $0x724] ss:$48 sps:$4 sm:$0xff]   ;;  %5892 = vmatpush1.bf16.msra.mxu0 %v11148_v35  ;;  %5867 = vmatpush2.bf16.msra.mxu1 %v11151_v50  ;;  %v11157_v59 = vld [vmem:[%s14073_s29 + $0x420] ss:$48 sps:$4 sm:$0xff]   ;;  %v11192_v35 = vld [vmem:[%s14073_s29 + $0x1ec] ss:$48 sps:$4 sm:$0xff]  }
 0x930   : > { %v3962_v62 = vpop.f32.mrf.mxu0  ;;  %v11159_v55 = vld [vmem:[%s14073_s29 + $0x424] ss:$48 sps:$4 sm:$0xff]   ;;  %5893 = vmatprep.subr.bf16.mxu0 %v11156_v53  ;;  %v11195_v50 = vld [vmem:[%s14073_s29 + $0x7ec] ss:$48 sps:$4 sm:$0xff]   ;;  %v11193_v53 = vld [vmem:[%s14073_s29 + $0x7e8] ss:$48 sps:$4 sm:$0xff]  }
 0x931   : > { %v13036_v63 = vadd.f32 %v3981_v54, %v3967_v60  ;;  %v11154_v54 = vld [vmem:[%s14073_s29 + $0x720] ss:$48 sps:$4 sm:$0xff]   ;;  %v11162_v60 = vld [vmem:[%s14073_s29 + $0x6c4] ss:$48 sps:$4 sm:$0xff]   ;;  %5868 = vmatprep.subr.bf16.mxu1 %v11159_v55  ;;  %v11201_v55 = vld [vmem:[%s14073_s29 + $0x78c] ss:$48 sps:$4 sm:$0xff]  }
 0x932   : > { %v10579_v56 = vpop.f32.mrf.mxu0  ;;  %v11165_v62 = vld [vmem:[%s14073_s29 + $0x3c4] ss:$48 sps:$4 sm:$0xff]  }
 0x933   : > { %v3991_v0 = vadd.f32 %v3990_v48, %v13036_v63  ;;  %5894 = vmatpush1.bf16.msra.mxu0 %v11154_v54  ;;  %v11160_v48 = vld [vmem:[%s14073_s29 + $0x6c0] ss:$48 sps:$4 sm:$0xff]   ;;  %5869 = vmatpush2.bf16.msra.mxu1 %v11157_v59  ;;  %v11198_v54 = vld [vmem:[%s14073_s29 + $0x18c] ss:$48 sps:$4 sm:$0xff]   ;;  %v11196_v59 = vld [vmem:[%s14073_s29 + $0x188] ss:$48 sps:$4 sm:$0xff]  }
 0x934   : > { %5895 = vmatprep.subr.bf16.mxu0 %v11162_v60  ;;  %v11163_v56 = vld [vmem:[%s14073_s29 + $0x3c0] ss:$48 sps:$4 sm:$0xff]   ;;  %5870 = vmatprep.subr.bf16.mxu1 %v11165_v62  ;;  %v11199_v60 = vld [vmem:[%s14073_s29 + $0x788] ss:$48 sps:$4 sm:$0xff]   ;;  %v11204_v62 = vld [vmem:[%s14073_s29 + $0x12c] ss:$48 sps:$4 sm:$0xff]  }
 0x935   : > { %3992 = vadd.xlane.f32.xlu1 %v3991_v0  ;;  %v11168_v0 = vld [vmem:[%s14073_s29 + $0x664] ss:$48 sps:$4 sm:$0xff]  }
 0x937   : > { %5896 = vmatpush1.bf16.msra.mxu0 %v11160_v48  ;;  %5871 = vmatpush2.bf16.msra.mxu1 %v11163_v56  ;;  %v11207_v48 = vld [vmem:[%s14073_s29 + $0x72c] ss:$48 sps:$4 sm:$0xff]   ;;  %v11202_v56 = vld [vmem:[%s14073_s29 + $0x128] ss:$48 sps:$4 sm:$0xff]  }
 0x938   : > { %5897 = vmatprep.subr.bf16.mxu0 %v11168_v0  ;;  %5872 = vmatprep.subr.bf16.mxu1 %v11171_v4  ;;  %v11205_v0 = vld [vmem:[%s14073_s29 + $0x728] ss:$48 sps:$4 sm:$0xff]   ;;  %v11210_v4 = vld [vmem:[%s14073_s29 + $0xcc] ss:$48 sps:$4 sm:$0xff]  }
 0x93b   : > { %5898 = vmatpush1.bf16.msra.mxu0 %v11166_v5  ;;  %5873 = vmatpush2.bf16.msra.mxu1 %v11169_v49  ;;  %v11213_v5 = vld [vmem:[%s14073_s29 + $0x6cc] ss:$48 sps:$4 sm:$0xff]   ;;  %v11208_v49 = vld [vmem:[%s14073_s29 + $0xc8] ss:$48 sps:$4 sm:$0xff]  }
 0x93c   : > { %5899 = vmatprep.subr.bf16.mxu0 %v11174_v46  ;;  %5874 = vmatprep.subr.bf16.mxu1 %v11177_v6  ;;  %v11211_v46 = vld [vmem:[%s14073_s29 + $0x6c8] ss:$48 sps:$4 sm:$0xff]   ;;  %v11216_v6 = vld [vmem:[%s14073_s29 + $0x6c] ss:$48 sps:$4 sm:$0xff]  }
 0x93f   : > { %5900 = vmatpush1.bf16.msra.mxu0 %v11172_v7  ;;  %5875 = vmatpush2.bf16.msra.mxu1 %v11175_v10  ;;  %v11219_v7 = vld [vmem:[%s14073_s29 + $0x66c] ss:$48 sps:$4 sm:$0xff]   ;;  %v11214_v10 = vld [vmem:[%s14073_s29 + $0x68] ss:$48 sps:$4 sm:$0xff]  }
 0x940   : > { %5926 = vmatprep.subr.bf16.mxu0 %v11180_v14  ;;  %5967 = vmatprep.subr.bf16.mxu1 %v11183_v15  ;;  %v11217_v14 = vld [vmem:[%s14073_s29 + $0x668] ss:$48 sps:$4 sm:$0xff]   ;;  %v11222_v15 = vld [vmem:[%s14073_s29 + $0xc] ss:$48 sps:$4 sm:$0xff]  }
 0x9be   : > { %v3993_v38 = vpop.xlane.xlu1 %3992 }
 0x9bf   : > { %v3994_v20 = vmul.f32 0.0026041667, %v3993_v38 }
 0x9c1   : > { %v13066_v34 = vsub.f32 %v13034_v57, %v3994_v20  ;;  %v13069_v58 = vsub.f32 %v13031_v31, %v3994_v20  ;;  %v13072_v39 = vsub.f32 %v13036_v63, %v3994_v20 }
 0x9c3   : > { %v3998_v40 = vmul.f32 %v13066_v34, %v13066_v34  ;;  %v3999_v41 = vmul.f32 %v13069_v58, %v13069_v58  ;;  %v4000_v24 = vmul.f32 %v13072_v39, %v13072_v39 }
 0x9c5   : > { %v4001_v42 = vadd.f32 %v3999_v41, %v3998_v40 }
 0x9c7   : > { %v4002_v33 = vadd.f32 %v4001_v42, %v4000_v24 }
 0x9c9   : > { %4003 = vadd.xlane.f32.xlu0 %v4002_v33  ;;  %v11178_v33 = vld [vmem:[%s14073_s29 + $0x2a8] ss:$48 sps:$4 sm:$0xff]  }
 0xa52   : > { %v4004_v16 = vpop.xlane.xlu0 %4003 }
 0xa53   : > { %v4005_v17 = vmul.f32 0.0026041667, %v4004_v16  ;;  %v11225_v16 = vld [vmem:[%s14073_s29 + $0x60c] ss:$48 sps:$4 sm:$0xff]  }
 0xa55   : > { %v4006_v18 = vadd.f32 1e-06, %v4005_v17  ;;  %v11220_v17 = vld [vmem:[%s14073_s29 + $0x8] ss:$48 sps:$4 sm:$0xff]  }
 0xa57   : > { %11948 = vrsqrt.f32 %v4006_v18  ;;  %v11223_v18 = vld [vmem:[%s14073_s29 + $0x608] ss:$48 sps:$4 sm:$0xff]  }
 0xa64   : > { %v11949_v26 = vpop.eup %11948 }
 0xa65   : > { %v4009_v29 = vmul.f32 %v11949_v26, %v13069_v58  ;;  %v4010_v30 = vmul.f32 %v11949_v26, %v13072_v39  ;;  %v4008_v37 = vmul.f32 %v11949_v26, %v13066_v34  ;;  %v11181_v39 = vld [vmem:[%s14073_s29 + $0x8a8] ss:$48 sps:$4 sm:$0xff]   ;;  %v11186_v34 = vld [vmem:[%s14073_s29 + $0x24c] ss:$48 sps:$4 sm:$0xff]   ;;  %v11237_v26 = vld [vmem:[%s14073_s29 + $0x254] ss:$48 sps:$4 sm:$0xff]  }
 0xa67   : > { %v4028_v38 = vmul.f32 %v4019_v21, %v4009_v29  ;;  %v4029_v20 = vmul.f32 %v4023_v22, %v4010_v30  ;;  %v4027_v40 = vmul.f32 %v4015_v23, %v4008_v37  ;;  %v11226_v21 = vld [vmem:[%s14073_s29 + $0x5a8] ss:$48 sps:$4 sm:$0xff]   ;;  %v11229_v22 = vld [vmem:[%s14073_s29 + $0x2b0] ss:$48 sps:$4 sm:$0xff]   ;;  %v11234_v23 = vld [vmem:[%s14073_s29 + $0x54c] ss:$48 sps:$4 sm:$0xff]  }
 0xa68   : > { %v11240_v29 = vld [vmem:[%s14073_s29 + $0x4ec] ss:$48 sps:$4 sm:$0xff]   ;;  %v11243_v30 = vld [vmem:[%s14073_s29 + $0x1f4] ss:$48 sps:$4 sm:$0xff]   ;;  %v11238_v37 = vld [vmem:[%s14073_s29 + $0x4e8] ss:$48 sps:$4 sm:$0xff]  }
 0xa69   : > { %v4047_v41 = vadd.f32 %v4038_v27, %v4028_v38  ;;  %v4048_v24 = vadd.f32 %v4042_v28, %v4029_v20  ;;  %v4046_v42 = vadd.f32 %v4034_v1, %v4027_v40  ;;  %v11232_v27 = vld [vmem:[%s14073_s29 + $0x548] ss:$48 sps:$4 sm:$0xff]   ;;  %v11235_v28 = vld [vmem:[%s14073_s29 + $0x250] ss:$48 sps:$4 sm:$0xff]   ;;  %v11246_v38 = vld [vmem:[%s14073_s29 + $0x48c] ss:$48 sps:$4 sm:$0xff]  }
 0xa6a   : > { %v11241_v1 = vld [vmem:[%s14073_s29 + $0x1f0] ss:$48 sps:$4 sm:$0xff]   ;;  %v11249_v20 = vld [vmem:[%s14073_s29 + $0x194] ss:$48 sps:$4 sm:$0xff]   ;;  %v11244_v40 = vld [vmem:[%s14073_s29 + $0x488] ss:$48 sps:$4 sm:$0xff]  }
 0xa6b   : > { %v13126_v43 = vpack.c.bf16 %v4047_v41, %v4047_v41  ;;  %v13128_v58 = vpack.c.bf16 %v4048_v24, %v4048_v24  ;;  %v13131_v25 = vpack.c.bf16 %v4046_v42, %v4046_v42  ;;  %v11247_v41 = vld [vmem:[%s14073_s29 + $0x190] ss:$48 sps:$4 sm:$0xff]   ;;  %v11252_v24 = vld [vmem:[%s14073_s29 + $0x42c] ss:$48 sps:$4 sm:$0xff]   ;;  %v11255_v42 = vld [vmem:[%s14073_s29 + $0x134] ss:$48 sps:$4 sm:$0xff]  }
 0xa6d   : > { %5876 = vmatprep.mubr.bf16.mxu1 %v13126_v43  ;;  %5918 = vmatmul.mubr.bf16.vlgmr.msra.gmra.mxu0 %v13128_v58 }
 0xa6e   : > { %5927 = vmatpush1.bf16.msra.mxu0 %v11178_v33  ;;  %5877 = vmatmul.mubr.bf16.vlgmr.msra.gmra.mxu1 %v13131_v25  ;;  %v11250_v33 = vld [vmem:[%s14073_s29 + $0x428] ss:$48 sps:$4 sm:$0xff]  }
 0xa6f   : > { %5958 = vmatprep.mubr.bf16.mxu0 %v13126_v43  ;;  %5968 = vmatpush1.bf16.msra.mxu1 %v11181_v39  ;;  %v11253_v39 = vld [vmem:[%s14073_s29 + $0x130] ss:$48 sps:$4 sm:$0xff]  }
 0xa70   : > { %5928 = vmatprep.subr.bf16.mxu0 %v11186_v34  ;;  %5969 = vmatprep.subr.bf16.mxu1 %v11189_v44  ;;  %v11258_v34 = vld [vmem:[%s14073_s29 + $0x3cc] ss:$48 sps:$4 sm:$0xff]   ;;  %v11261_v44 = vld [vmem:[%s14073_s29 + $0xd4] ss:$48 sps:$4 sm:$0xff]  }
 0xa71   : > { %5999 = vmatprep.mubr.bf16.mxu1 %v12200_v61 }
 0xa72   : > { %5929 = vmatpush1.bf16.msra.mxu0 %v11184_v45  ;;  %v11256_v45 = vld [vmem:[%s14073_s29 + $0x3c8] ss:$48 sps:$4 sm:$0xff]  }
 0xa73   : > { %5970 = vmatpush1.bf16.msra.mxu1 %v11187_v47  ;;  %5930 = vmatprep.subr.bf16.mxu0 %v11192_v35  ;;  %v11259_v47 = vld [vmem:[%s14073_s29 + $0xd0] ss:$48 sps:$4 sm:$0xff]   ;;  %v11264_v35 = vld [vmem:[%s14073_s29 + $0x36c] ss:$48 sps:$4 sm:$0xff]  }
 0xa74   : > { %5971 = vmatprep.subr.bf16.mxu1 %v11195_v50  ;;  %v11267_v50 = vld [vmem:[%s14073_s29 + $0x74] ss:$48 sps:$4 sm:$0xff]  }
 0xa76   : > { %5931 = vmatpush1.bf16.msra.mxu0 %v11190_v51  ;;  %v11262_v51 = vld [vmem:[%s14073_s29 + $0x368] ss:$48 sps:$4 sm:$0xff]  }
 0xa77   : > { %5972 = vmatpush1.bf16.msra.mxu1 %v11193_v53  ;;  %5932 = vmatprep.subr.bf16.mxu0 %v11198_v54  ;;  %v11265_v53 = vld [vmem:[%s14073_s29 + $0x70] ss:$48 sps:$4 sm:$0xff]   ;;  %v11270_v54 = vld [vmem:[%s14073_s29 + $0x30c] ss:$48 sps:$4 sm:$0xff]  }
 0xa78   : > { %5973 = vmatprep.subr.bf16.mxu1 %v11201_v55  ;;  %v11273_v55 = vld [vmem:[%s14073_s29 + $0x14] ss:$48 sps:$4 sm:$0xff]  }
 0xa7a   : > { %5933 = vmatpush1.bf16.msra.mxu0 %v11196_v59  ;;  %v11268_v59 = vld [vmem:[%s14073_s29 + $0x308] ss:$48 sps:$4 sm:$0xff]  }
 0xa7b   : > { %5974 = vmatpush1.bf16.msra.mxu1 %v11199_v60  ;;  %5934 = vmatprep.subr.bf16.mxu0 %v11204_v62  ;;  %v11271_v60 = vld [vmem:[%s14073_s29 + $0x10] ss:$48 sps:$4 sm:$0xff]   ;;  %v11276_v62 = vld [vmem:[%s14073_s29 + $0x8b4] ss:$48 sps:$4 sm:$0xff]  }
 0xa7c   : > { %5975 = vmatprep.subr.bf16.mxu1 %v11207_v48  ;;  %v11279_v48 = vld [vmem:[%s14073_s29 + $0x5b4] ss:$48 sps:$4 sm:$0xff]  }
 0xa7e   : > { %5935 = vmatpush1.bf16.msra.mxu0 %v11202_v56  ;;  %v11274_v56 = vld [vmem:[%s14073_s29 + $0x8b0] ss:$48 sps:$4 sm:$0xff]  }
 0xa7f   : > { %5976 = vmatpush1.bf16.msra.mxu1 %v11205_v0  ;;  %5936 = vmatprep.subr.bf16.mxu0 %v11210_v4  ;;  %v11277_v0 = vld [vmem:[%s14073_s29 + $0x5b0] ss:$48 sps:$4 sm:$0xff]   ;;  %v11282_v4 = vld [vmem:[%s14073_s29 + $0x854] ss:$48 sps:$4 sm:$0xff]  }
 0xa80   : > { %5977 = vmatprep.subr.bf16.mxu1 %v11213_v5  ;;  %v11285_v5 = vld [vmem:[%s14073_s29 + $0x554] ss:$48 sps:$4 sm:$0xff]  }
 0xa82   : > { %5937 = vmatpush1.bf16.msra.mxu0 %v11208_v49  ;;  %v11280_v49 = vld [vmem:[%s14073_s29 + $0x850] ss:$48 sps:$4 sm:$0xff]  }
 0xa83   : > { %5978 = vmatpush1.bf16.msra.mxu1 %v11211_v46  ;;  %5938 = vmatprep.subr.bf16.mxu0 %v11216_v6  ;;  %v11283_v46 = vld [vmem:[%s14073_s29 + $0x550] ss:$48 sps:$4 sm:$0xff]   ;;  %v11288_v6 = vld [vmem:[%s14073_s29 + $0x7f4] ss:$48 sps:$4 sm:$0xff]  }
 0xa84   : > { %5979 = vmatprep.subr.bf16.mxu1 %v11219_v7  ;;  %v11291_v7 = vld [vmem:[%s14073_s29 + $0x4f4] ss:$48 sps:$4 sm:$0xff]  }
 0xa86   : > { %5939 = vmatpush1.bf16.msra.mxu0 %v11214_v10  ;;  %v11286_v10 = vld [vmem:[%s14073_s29 + $0x7f0] ss:$48 sps:$4 sm:$0xff]  }
 0xa87   : > { %5980 = vmatpush1.bf16.msra.mxu1 %v11217_v14  ;;  %5940 = vmatprep.subr.bf16.mxu0 %v11222_v15  ;;  %v11289_v14 = vld [vmem:[%s14073_s29 + $0x4f0] ss:$48 sps:$4 sm:$0xff]   ;;  %v11294_v15 = vld [vmem:[%s14073_s29 + $0x794] ss:$48 sps:$4 sm:$0xff]  }
 0xa88   : > { %5981 = vmatprep.subr.bf16.mxu1 %v11225_v16  ;;  %v11297_v16 = vld [vmem:[%s14073_s29 + $0x494] ss:$48 sps:$4 sm:$0xff]  }
 0xa8a   : > { %5941 = vmatpush1.bf16.msra.mxu0 %v11220_v17  ;;  %v11292_v17 = vld [vmem:[%s14073_s29 + $0x790] ss:$48 sps:$4 sm:$0xff]  }
 0xa8b   : > { %5982 = vmatpush1.bf16.msra.mxu1 %v11223_v18  ;;  %5942 = vmatprep.subr.bf16.mxu0 %v11228_v8  ;;  %v11295_v18 = vld [vmem:[%s14073_s29 + $0x490] ss:$48 sps:$4 sm:$0xff]   ;;  %v11300_v8 = vld [vmem:[%s14073_s29 + $0x734] ss:$48 sps:$4 sm:$0xff]  }
 0xa8c   : > { %6008 = vmatprep.subr.bf16.mxu1 %v11231_v19  ;;  %v11303_v19 = vld [vmem:[%s14073_s29 + $0x434] ss:$48 sps:$4 sm:$0xff]  }
 0xa8e   : > { %5943 = vmatpush2.bf16.msra.mxu0 %v11226_v21  ;;  %6000 = vmatmul.mubr.bf16.vlgmr.msra.gmra.mxu1 %v13128_v58  ;;  %v11298_v21 = vld [vmem:[%s14073_s29 + $0x730] ss:$48 sps:$4 sm:$0xff]  }
 0xa8f   : > { %6009 = vmatpush1.bf16.msra.mxu1 %v11229_v22  ;;  %6040 = vmatprep.mubr.bf16.mxu1 %v13126_v43  ;;  %v11301_v22 = vld [vmem:[%s14073_s29 + $0x430] ss:$48 sps:$4 sm:$0xff]  }
 0xa90   : > { %5944 = vmatprep.subr.bf16.mxu0 %v11234_v23  ;;  %6010 = vmatprep.subr.bf16.mxu1 %v11237_v26  ;;  %v11306_v23 = vld [vmem:[%s14073_s29 + $0x6d4] ss:$48 sps:$4 sm:$0xff]  }
 0xa91   : > { %v11309_v26 = vld [vmem:[%s14073_s29 + $0x3d4] ss:$48 sps:$4 sm:$0xff]  }
 0xa92   : > { %5945 = vmatpush2.bf16.msra.mxu0 %v11232_v27  ;;  %v11304_v27 = vld [vmem:[%s14073_s29 + $0x6d0] ss:$48 sps:$4 sm:$0xff]  }
 0xa93   : > { %6011 = vmatpush1.bf16.msra.mxu1 %v11235_v28  ;;  %5946 = vmatprep.subr.bf16.mxu0 %v11240_v29  ;;  %v11307_v28 = vld [vmem:[%s14073_s29 + $0x3d0] ss:$48 sps:$4 sm:$0xff]   ;;  %v11312_v29 = vld [vmem:[%s14073_s29 + $0x674] ss:$48 sps:$4 sm:$0xff]  }
 0xa94   : > { %6012 = vmatprep.subr.bf16.mxu1 %v11243_v30  ;;  %v11315_v30 = vld [vmem:[%s14073_s29 + $0x374] ss:$48 sps:$4 sm:$0xff]  }
 0xa96   : > { %5947 = vmatpush2.bf16.msra.mxu0 %v11238_v37  ;;  %v11310_v37 = vld [vmem:[%s14073_s29 + $0x670] ss:$48 sps:$4 sm:$0xff]  }
 0xa97   : > { %6013 = vmatpush1.bf16.msra.mxu1 %v11241_v1  ;;  %5948 = vmatprep.subr.bf16.mxu0 %v11246_v38  ;;  %v11313_v1 = vld [vmem:[%s14073_s29 + $0x370] ss:$48 sps:$4 sm:$0xff]   ;;  %v11318_v38 = vld [vmem:[%s14073_s29 + $0x614] ss:$48 sps:$4 sm:$0xff]  }
 0xa98   : > { %6014 = vmatprep.subr.bf16.mxu1 %v11249_v20  ;;  %v11321_v20 = vld [vmem:[%s14073_s29 + $0x314] ss:$48 sps:$4 sm:$0xff]  }
 0xa9a   : > { %5949 = vmatpush2.bf16.msra.mxu0 %v11244_v40  ;;  %v11316_v40 = vld [vmem:[%s14073_s29 + $0x610] ss:$48 sps:$4 sm:$0xff]  }
 0xa9b   : > { %6015 = vmatpush1.bf16.msra.mxu1 %v11247_v41  ;;  %5950 = vmatprep.subr.bf16.mxu0 %v11252_v24  ;;  %v11319_v41 = vld [vmem:[%s14073_s29 + $0x310] ss:$48 sps:$4 sm:$0xff]   ;;  %v11324_v24 = vld [vmem:[%s14073_s29 + $0x2bc] ss:$48 sps:$4 sm:$0xff]  }
 0xa9c   : > { %6016 = vmatprep.subr.bf16.mxu1 %v11255_v42  ;;  %v11327_v42 = vld [vmem:[%s14073_s29 + $0x8bc] ss:$48 sps:$4 sm:$0xff]  }
 0xa9e   : > { %5951 = vmatpush2.bf16.msra.mxu0 %v11250_v33  ;;  %v11322_v33 = vld [vmem:[%s14073_s29 + $0x2b8] ss:$48 sps:$4 sm:$0xff]  }
 0xa9f   : > { %6017 = vmatpush1.bf16.msra.mxu1 %v11253_v39  ;;  %5952 = vmatprep.subr.bf16.mxu0 %v11258_v34  ;;  %v11325_v39 = vld [vmem:[%s14073_s29 + $0x8b8] ss:$48 sps:$4 sm:$0xff]   ;;  %v11330_v34 = vld [vmem:[%s14073_s29 + $0x25c] ss:$48 sps:$4 sm:$0xff]  }
 0xaa0   : > { %6018 = vmatprep.subr.bf16.mxu1 %v11261_v44  ;;  %v11333_v44 = vld [vmem:[%s14073_s29 + $0x85c] ss:$48 sps:$4 sm:$0xff]  }
 0xaa2   : > { %5953 = vmatpush2.bf16.msra.mxu0 %v11256_v45  ;;  %v11328_v45 = vld [vmem:[%s14073_s29 + $0x258] ss:$48 sps:$4 sm:$0xff]  }
 0xaa3   : > { %6019 = vmatpush1.bf16.msra.mxu1 %v11259_v47  ;;  %5954 = vmatprep.subr.bf16.mxu0 %v11264_v35  ;;  %v11331_v47 = vld [vmem:[%s14073_s29 + $0x858] ss:$48 sps:$4 sm:$0xff]   ;;  %v11336_v35 = vld [vmem:[%s14073_s29 + $0x1fc] ss:$48 sps:$4 sm:$0xff]  }
 0xaa4   : > { %6020 = vmatprep.subr.bf16.mxu1 %v11267_v50  ;;  %v11339_v50 = vld [vmem:[%s14073_s29 + $0x7fc] ss:$48 sps:$4 sm:$0xff]  }
 0xaa6   : > { %5955 = vmatpush2.bf16.msra.mxu0 %v11262_v51  ;;  %v11334_v51 = vld [vmem:[%s14073_s29 + $0x1f8] ss:$48 sps:$4 sm:$0xff]  }
 0xaa7   : > { %6021 = vmatpush1.bf16.msra.mxu1 %v11265_v53  ;;  %5956 = vmatprep.subr.bf16.mxu0 %v11270_v54  ;;  %v11337_v53 = vld [vmem:[%s14073_s29 + $0x7f8] ss:$48 sps:$4 sm:$0xff]   ;;  %v11342_v54 = vld [vmem:[%s14073_s29 + $0x19c] ss:$48 sps:$4 sm:$0xff]  }
 0xaa8   : > { %6022 = vmatprep.subr.bf16.mxu1 %v11273_v55  ;;  %v11345_v55 = vld [vmem:[%s14073_s29 + $0x79c] ss:$48 sps:$4 sm:$0xff]  }
 0xaaa   : > { %5957 = vmatpush2.bf16.msra.mxu0 %v11268_v59  ;;  %v11340_v59 = vld [vmem:[%s14073_s29 + $0x198] ss:$48 sps:$4 sm:$0xff]  }
 0xaab   : > { %6023 = vmatpush1.bf16.msra.mxu1 %v11271_v60  ;;  %6049 = vmatprep.subr.bf16.mxu0 %v11276_v62  ;;  %v11343_v60 = vld [vmem:[%s14073_s29 + $0x798] ss:$48 sps:$4 sm:$0xff]   ;;  %v11348_v62 = vld [vmem:[%s14073_s29 + $0x13c] ss:$48 sps:$4 sm:$0xff]  }
 0xaac   : > { %6024 = vmatprep.subr.bf16.mxu1 %v11279_v48  ;;  %v11351_v48 = vld [vmem:[%s14073_s29 + $0x73c] ss:$48 sps:$4 sm:$0xff]  }
 0xaad   : > { %5959 = vmatmul.mubr.bf16.vlgmr.msra.gmra.mxu0 %v13131_v25 }
 0xaae   : > { %6050 = vmatpush1.bf16.msra.mxu0 %v11274_v56  ;;  %6081 = vmatprep.mubr.bf16.mxu0 %v12200_v61  ;;  %v11346_v56 = vld [vmem:[%s14073_s29 + $0x138] ss:$48 sps:$4 sm:$0xff]  }
 0xaaf   : > { %6025 = vmatpush2.bf16.msra.mxu1 %v11277_v0  ;;  %6051 = vmatprep.subr.bf16.mxu0 %v11282_v4  ;;  %v11349_v0 = vld [vmem:[%s14073_s29 + $0x738] ss:$48 sps:$4 sm:$0xff]   ;;  %v11354_v4 = vld [vmem:[%s14073_s29 + $0xdc] ss:$48 sps:$4 sm:$0xff]  }
 0xab0   : > { %6026 = vmatprep.subr.bf16.mxu1 %v11285_v5  ;;  %v11357_v5 = vld [vmem:[%s14073_s29 + $0x6dc] ss:$48 sps:$4 sm:$0xff]  }
 0xab2   : > { %6052 = vmatpush1.bf16.msra.mxu0 %v11280_v49  ;;  %v11352_v49 = vld [vmem:[%s14073_s29 + $0xd8] ss:$48 sps:$4 sm:$0xff]  }
 0xab3   : > { %6027 = vmatpush2.bf16.msra.mxu1 %v11283_v46  ;;  %6053 = vmatprep.subr.bf16.mxu0 %v11288_v6  ;;  %v11355_v46 = vld [vmem:[%s14073_s29 + $0x6d8] ss:$48 sps:$4 sm:$0xff]   ;;  %v11360_v6 = vld [vmem:[%s14073_s29 + $0x7c] ss:$48 sps:$4 sm:$0xff]  }
 0xab4   : > { %6028 = vmatprep.subr.bf16.mxu1 %v11291_v7  ;;  %v11363_v7 = vld [vmem:[%s14073_s29 + $0x67c] ss:$48 sps:$4 sm:$0xff]  }
 0xab6   : > { %6054 = vmatpush1.bf16.msra.mxu0 %v11286_v10  ;;  %v11358_v10 = vld [vmem:[%s14073_s29 + $0x78] ss:$48 sps:$4 sm:$0xff]  }
 0xab7   : > { %6029 = vmatpush2.bf16.msra.mxu1 %v11289_v14  ;;  %6055 = vmatprep.subr.bf16.mxu0 %v11294_v15  ;;  %v11361_v14 = vld [vmem:[%s14073_s29 + $0x678] ss:$48 sps:$4 sm:$0xff]   ;;  %v11366_v15 = vld [vmem:[%s14073_s29 + $0x1c] ss:$48 sps:$4 sm:$0xff]  }
 0xab8   : > { %6030 = vmatprep.subr.bf16.mxu1 %v11297_v16  ;;  %v11369_v16 = vld [vmem:[%s14073_s29 + $0x61c] ss:$48 sps:$4 sm:$0xff]  }
 0xaba   : > { %6056 = vmatpush1.bf16.msra.mxu0 %v11292_v17  ;;  %v11364_v17 = vld [vmem:[%s14073_s29 + $0x18] ss:$48 sps:$4 sm:$0xff]  }
 0xabb   : > { %6031 = vmatpush2.bf16.msra.mxu1 %v11295_v18  ;;  %6057 = vmatprep.subr.bf16.mxu0 %v11300_v8  ;;  %v11367_v18 = vld [vmem:[%s14073_s29 + $0x618] ss:$48 sps:$4 sm:$0xff]   ;;  %v11372_v8 = vld [vmem:[%s14073_s29 + $0x5bc] ss:$48 sps:$4 sm:$0xff]  }
 0xabc   : > { %6032 = vmatprep.subr.bf16.mxu1 %v11303_v19  ;;  %v11375_v19 = vld [vmem:[%s14073_s29 + $0x2c4] ss:$48 sps:$4 sm:$0xff]  }
 0xabe   : > { %6058 = vmatpush1.bf16.msra.mxu0 %v11298_v21  ;;  %v11370_v21 = vld [vmem:[%s14073_s29 + $0x5b8] ss:$48 sps:$4 sm:$0xff]  }
 0xabf   : > { %6033 = vmatpush2.bf16.msra.mxu1 %v11301_v22  ;;  %6059 = vmatprep.subr.bf16.mxu0 %v11306_v23  ;;  %v11373_v22 = vld [vmem:[%s14073_s29 + $0x2c0] ss:$48 sps:$4 sm:$0xff]   ;;  %v11378_v23 = vld [vmem:[%s14073_s29 + $0x55c] ss:$48 sps:$4 sm:$0xff]  }
 0xac0   : > { %6034 = vmatprep.subr.bf16.mxu1 %v11309_v26  ;;  %v11381_v26 = vld [vmem:[%s14073_s29 + $0x264] ss:$48 sps:$4 sm:$0xff]  }
 0xac2   : > { %6060 = vmatpush1.bf16.msra.mxu0 %v11304_v27  ;;  %v11376_v27 = vld [vmem:[%s14073_s29 + $0x558] ss:$48 sps:$4 sm:$0xff]  }
 0xac3   : > { %6035 = vmatpush2.bf16.msra.mxu1 %v11307_v28  ;;  %6061 = vmatprep.subr.bf16.mxu0 %v11312_v29  ;;  %v11379_v28 = vld [vmem:[%s14073_s29 + $0x260] ss:$48 sps:$4 sm:$0xff]   ;;  %v11384_v29 = vld [vmem:[%s14073_s29 + $0x4fc] ss:$48 sps:$4 sm:$0xff]  }
 0xac4   : > { %6036 = vmatprep.subr.bf16.mxu1 %v11315_v30  ;;  %v11387_v30 = vld [vmem:[%s14073_s29 + $0x204] ss:$48 sps:$4 sm:$0xff]  }
 0xac6   : > { %6062 = vmatpush1.bf16.msra.mxu0 %v11310_v37  ;;  %v11382_v37 = vld [vmem:[%s14073_s29 + $0x4f8] ss:$48 sps:$4 sm:$0xff]  }
 0xac7   : > { %6037 = vmatpush2.bf16.msra.mxu1 %v11313_v1  ;;  %6063 = vmatprep.subr.bf16.mxu0 %v11318_v38  ;;  %v11385_v1 = vld [vmem:[%s14073_s29 + $0x200] ss:$48 sps:$4 sm:$0xff]   ;;  %v11390_v38 = vld [vmem:[%s14073_s29 + $0x49c] ss:$48 sps:$4 sm:$0xff]  }
 0xac8   : > { %6038 = vmatprep.subr.bf16.mxu1 %v11321_v20  ;;  %v11393_v20 = vld [vmem:[%s14073_s29 + $0x1a4] ss:$48 sps:$4 sm:$0xff]  }
 0xaca   : > { %6064 = vmatpush1.bf16.msra.mxu0 %v11316_v40  ;;  %v11388_v40 = vld [vmem:[%s14073_s29 + $0x498] ss:$48 sps:$4 sm:$0xff]  }
 0xacb   : > { %6039 = vmatpush2.bf16.msra.mxu1 %v11319_v41  ;;  %6090 = vmatprep.subr.bf16.mxu0 %v11324_v24  ;;  %v11391_v41 = vld [vmem:[%s14073_s29 + $0x1a0] ss:$48 sps:$4 sm:$0xff]   ;;  %v11396_v24 = vld [vmem:[%s14073_s29 + $0x43c] ss:$48 sps:$4 sm:$0xff]  }
 0xacc   : > { %6131 = vmatprep.subr.bf16.mxu1 %v11327_v42  ;;  %v11399_v42 = vld [vmem:[%s14073_s29 + $0x144] ss:$48 sps:$4 sm:$0xff]  }
 0xacd   : > { %6082 = vmatmul.mubr.bf16.vlgmr.msra.gmra.mxu0 %v13128_v58 }
 0xace   : > { %6041 = vmatmul.mubr.bf16.vlgmr.msra.gmra.mxu1 %v13131_v25  ;;  %6091 = vmatpush1.bf16.msra.mxu0 %v11322_v33  ;;  %v11394_v33 = vld [vmem:[%s14073_s29 + $0x438] ss:$48 sps:$4 sm:$0xff]  }
 0xacf   : > { %6122 = vmatprep.mubr.bf16.mxu0 %v13126_v43  ;;  %6132 = vmatpush1.bf16.msra.mxu1 %v11325_v39  ;;  %v11397_v39 = vld [vmem:[%s14073_s29 + $0x140] ss:$48 sps:$4 sm:$0xff]  }
 0xad0   : > { %6092 = vmatprep.subr.bf16.mxu0 %v11330_v34  ;;  %6133 = vmatprep.subr.bf16.mxu1 %v11333_v44  ;;  %v11402_v34 = vld [vmem:[%s14073_s29 + $0x3dc] ss:$48 sps:$4 sm:$0xff]   ;;  %v11405_v44 = vld [vmem:[%s14073_s29 + $0xe4] ss:$48 sps:$4 sm:$0xff]  }
 0xad1   : > { %6163 = vmatprep.mubr.bf16.mxu1 %v12200_v61 }
 0xad2   : > { %6093 = vmatpush1.bf16.msra.mxu0 %v11328_v45  ;;  %v11400_v45 = vld [vmem:[%s14073_s29 + $0x3d8] ss:$48 sps:$4 sm:$0xff]  }
 0xad3   : > { %6134 = vmatpush1.bf16.msra.mxu1 %v11331_v47  ;;  %6094 = vmatprep.subr.bf16.mxu0 %v11336_v35  ;;  %v11403_v47 = vld [vmem:[%s14073_s29 + $0xe0] ss:$48 sps:$4 sm:$0xff]   ;;  %v11408_v35 = vld [vmem:[%s14073_s29 + $0x37c] ss:$48 sps:$4 sm:$0xff]  }
 0xad4   : > { %6135 = vmatprep.subr.bf16.mxu1 %v11339_v50  ;;  %v11411_v50 = vld [vmem:[%s14073_s29 + $0x84] ss:$48 sps:$4 sm:$0xff]  }
 0xad6   : > { %6095 = vmatpush1.bf16.msra.mxu0 %v11334_v51  ;;  %v11406_v51 = vld [vmem:[%s14073_s29 + $0x378] ss:$48 sps:$4 sm:$0xff]  }
 0xad7   : > { %6136 = vmatpush1.bf16.msra.mxu1 %v11337_v53  ;;  %6096 = vmatprep.subr.bf16.mxu0 %v11342_v54  ;;  %v11409_v53 = vld [vmem:[%s14073_s29 + $0x80] ss:$48 sps:$4 sm:$0xff]   ;;  %v11414_v54 = vld [vmem:[%s14073_s29 + $0x31c] ss:$48 sps:$4 sm:$0xff]  }
 0xad8   : > { %6137 = vmatprep.subr.bf16.mxu1 %v11345_v55  ;;  %v11417_v55 = vld [vmem:[%s14073_s29 + $0x24] ss:$48 sps:$4 sm:$0xff]  }
 0xada   : > { %6097 = vmatpush1.bf16.msra.mxu0 %v11340_v59  ;;  %v11412_v59 = vld [vmem:[%s14073_s29 + $0x318] ss:$48 sps:$4 sm:$0xff]  }
 0xadb   : > { %6138 = vmatpush1.bf16.msra.mxu1 %v11343_v60  ;;  %6098 = vmatprep.subr.bf16.mxu0 %v11348_v62  ;;  %v11415_v60 = vld [vmem:[%s14073_s29 + $0x20] ss:$48 sps:$4 sm:$0xff]   ;;  %v11420_v62 = vld [vmem:[%s14073_s29 + $0x8c4] ss:$48 sps:$4 sm:$0xff]  }
 0xadc   : > { %6139 = vmatprep.subr.bf16.mxu1 %v11351_v48  ;;  %v11423_v48 = vld [vmem:[%s14073_s29 + $0x5c4] ss:$48 sps:$4 sm:$0xff]  }
 0xade   : > { %6099 = vmatpush1.bf16.msra.mxu0 %v11346_v56  ;;  %v11418_v56 = vld [vmem:[%s14073_s29 + $0x8c0] ss:$48 sps:$4 sm:$0xff]  }
 0xadf   : > { %6140 = vmatpush1.bf16.msra.mxu1 %v11349_v0  ;;  %6100 = vmatprep.subr.bf16.mxu0 %v11354_v4  ;;  %v11421_v0 = vld [vmem:[%s14073_s29 + $0x5c0] ss:$48 sps:$4 sm:$0xff]   ;;  %v11426_v4 = vld [vmem:[%s14073_s29 + $0x864] ss:$48 sps:$4 sm:$0xff]  }
 0xae0   : > { %6141 = vmatprep.subr.bf16.mxu1 %v11357_v5  ;;  %v11429_v5 = vld [vmem:[%s14073_s29 + $0x564] ss:$48 sps:$4 sm:$0xff]  }
 0xae2   : > { %6101 = vmatpush1.bf16.msra.mxu0 %v11352_v49  ;;  %v11424_v49 = vld [vmem:[%s14073_s29 + $0x860] ss:$48 sps:$4 sm:$0xff]  }
 0xae3   : > { %6142 = vmatpush1.bf16.msra.mxu1 %v11355_v46  ;;  %6102 = vmatprep.subr.bf16.mxu0 %v11360_v6  ;;  %v11427_v46 = vld [vmem:[%s14073_s29 + $0x560] ss:$48 sps:$4 sm:$0xff]   ;;  %v11432_v6 = vld [vmem:[%s14073_s29 + $0x804] ss:$48 sps:$4 sm:$0xff]  }
 0xae4   : > { %6143 = vmatprep.subr.bf16.mxu1 %v11363_v7  ;;  %v11435_v7 = vld [vmem:[%s14073_s29 + $0x504] ss:$48 sps:$4 sm:$0xff]  }
 0xae6   : > { %6103 = vmatpush1.bf16.msra.mxu0 %v11358_v10  ;;  %v11430_v10 = vld [vmem:[%s14073_s29 + $0x800] ss:$48 sps:$4 sm:$0xff]  }
 0xae7   : > { %6144 = vmatpush1.bf16.msra.mxu1 %v11361_v14  ;;  %6104 = vmatprep.subr.bf16.mxu0 %v11366_v15  ;;  %v11433_v14 = vld [vmem:[%s14073_s29 + $0x500] ss:$48 sps:$4 sm:$0xff]   ;;  %v11438_v15 = vld [vmem:[%s14073_s29 + $0x7a4] ss:$48 sps:$4 sm:$0xff]  }
 0xae8   : > { %6145 = vmatprep.subr.bf16.mxu1 %v11369_v16  ;;  %v11441_v16 = vld [vmem:[%s14073_s29 + $0x4a4] ss:$48 sps:$4 sm:$0xff]  }
 0xaea   : > { %6105 = vmatpush1.bf16.msra.mxu0 %v11364_v17  ;;  %v11436_v17 = vld [vmem:[%s14073_s29 + $0x7a0] ss:$48 sps:$4 sm:$0xff]  }
 0xaeb   : > { %6146 = vmatpush1.bf16.msra.mxu1 %v11367_v18  ;;  %6106 = vmatprep.subr.bf16.mxu0 %v11372_v8  ;;  %v11439_v18 = vld [vmem:[%s14073_s29 + $0x4a0] ss:$48 sps:$4 sm:$0xff]   ;;  %v11444_v8 = vld [vmem:[%s14073_s29 + $0x744] ss:$48 sps:$4 sm:$0xff]  }
 0xaec   : > { %6172 = vmatprep.subr.bf16.mxu1 %v11375_v19  ;;  %v11447_v19 = vld [vmem:[%s14073_s29 + $0x444] ss:$48 sps:$4 sm:$0xff]  }
 0xaee   : > { %6107 = vmatpush2.bf16.msra.mxu0 %v11370_v21  ;;  %6164 = vmatmul.mubr.bf16.vlgmr.msra.gmra.mxu1 %v13128_v58  ;;  %v11442_v21 = vld [vmem:[%s14073_s29 + $0x740] ss:$48 sps:$4 sm:$0xff]  }
 0xaef   : > { %6173 = vmatpush1.bf16.msra.mxu1 %v11373_v22  ;;  %6204 = vmatprep.mubr.bf16.mxu1 %v13126_v43  ;;  %v11445_v22 = vld [vmem:[%s14073_s29 + $0x440] ss:$48 sps:$4 sm:$0xff]  }
 0xaf0   : > { %6108 = vmatprep.subr.bf16.mxu0 %v11378_v23  ;;  %6174 = vmatprep.subr.bf16.mxu1 %v11381_v26  ;;  %v11450_v23 = vld [vmem:[%s14073_s29 + $0x6e4] ss:$48 sps:$4 sm:$0xff]  }
 0xaf1   : > { %v11453_v26 = vld [vmem:[%s14073_s29 + $0x3e4] ss:$48 sps:$4 sm:$0xff]  }
 0xaf2   : > { %6109 = vmatpush2.bf16.msra.mxu0 %v11376_v27  ;;  %v11448_v27 = vld [vmem:[%s14073_s29 + $0x6e0] ss:$48 sps:$4 sm:$0xff]  }
 0xaf3   : > { %6175 = vmatpush1.bf16.msra.mxu1 %v11379_v28  ;;  %6110 = vmatprep.subr.bf16.mxu0 %v11384_v29  ;;  %v11451_v28 = vld [vmem:[%s14073_s29 + $0x3e0] ss:$48 sps:$4 sm:$0xff]   ;;  %v11456_v29 = vld [vmem:[%s14073_s29 + $0x684] ss:$48 sps:$4 sm:$0xff]  }
 0xaf4   : > { %6176 = vmatprep.subr.bf16.mxu1 %v11387_v30  ;;  %v11459_v30 = vld [vmem:[%s14073_s29 + $0x384] ss:$48 sps:$4 sm:$0xff]  }
 0xaf6   : > { %6111 = vmatpush2.bf16.msra.mxu0 %v11382_v37  ;;  %v11454_v37 = vld [vmem:[%s14073_s29 + $0x680] ss:$48 sps:$4 sm:$0xff]  }
 0xaf7   : > { %6177 = vmatpush1.bf16.msra.mxu1 %v11385_v1  ;;  %6112 = vmatprep.subr.bf16.mxu0 %v11390_v38  ;;  %v11457_v1 = vld [vmem:[%s14073_s29 + $0x380] ss:$48 sps:$4 sm:$0xff]   ;;  %v11462_v38 = vld [vmem:[%s14073_s29 + $0x624] ss:$48 sps:$4 sm:$0xff]  }
 0xaf8   : > { %6178 = vmatprep.subr.bf16.mxu1 %v11393_v20  ;;  %v11465_v20 = vld [vmem:[%s14073_s29 + $0x324] ss:$48 sps:$4 sm:$0xff]  }
 0xafa   : > { %6113 = vmatpush2.bf16.msra.mxu0 %v11388_v40  ;;  %v11460_v40 = vld [vmem:[%s14073_s29 + $0x620] ss:$48 sps:$4 sm:$0xff]  }
 0xafb   : > { %6179 = vmatpush1.bf16.msra.mxu1 %v11391_v41  ;;  %6114 = vmatprep.subr.bf16.mxu0 %v11396_v24  ;;  %v11463_v41 = vld [vmem:[%s14073_s29 + $0x320] ss:$48 sps:$4 sm:$0xff]   ;;  %v11468_v24 = vld [vmem:[%s14073_s29 + $0x2cc] ss:$48 sps:$4 sm:$0xff]  }
 0xafc   : > { %6180 = vmatprep.subr.bf16.mxu1 %v11399_v42  ;;  %v11471_v42 = vld [vmem:[%s14073_s29 + $0x8cc] ss:$48 sps:$4 sm:$0xff]  }
 0xafe   : > { %6115 = vmatpush2.bf16.msra.mxu0 %v11394_v33  ;;  %v13341_v33 = vld [vmem:[%s12482_s9] sm:$0xff] }
 0xaff   : > { %6181 = vmatpush1.bf16.msra.mxu1 %v11397_v39  ;;  %6116 = vmatprep.subr.bf16.mxu0 %v11402_v34  ;;  %v11466_v39 = vld [vmem:[%s14073_s29 + $0x2c8] ss:$48 sps:$4 sm:$0xff]  }
 0xb00   : > { %6182 = vmatprep.subr.bf16.mxu1 %v11405_v44  ;;  %v11469_v34 = vld [vmem:[%s14073_s29 + $0x8c8] ss:$48 sps:$4 sm:$0xff]   ;;  %v4347_v44 = vrot.slane %v13341_v33, %v12563_v13 }
 0xb02   : > { %6117 = vmatpush2.bf16.msra.mxu0 %v11400_v45  ;;  %v11474_v45 = vld [vmem:[%s14073_s29 + $0x26c] ss:$48 sps:$4 sm:$0xff]  }
 0xb03   : > { %6183 = vmatpush1.bf16.msra.mxu1 %v11403_v47  ;;  %6118 = vmatprep.subr.bf16.mxu0 %v11408_v35  ;;  %v11477_v47 = vld [vmem:[%s14073_s29 + $0x86c] ss:$48 sps:$4 sm:$0xff]  }
 0xb04   : > { %6184 = vmatprep.subr.bf16.mxu1 %v11411_v50  ;;  %v4351_v50 = vrot.slane %v13341_v33, %v12557_v11 }
 0xb06   : > { %6119 = vmatpush2.bf16.msra.mxu0 %v11406_v51 }
 0xb07   : > { %6185 = vmatpush1.bf16.msra.mxu1 %v11409_v53  ;;  %6120 = vmatprep.subr.bf16.mxu0 %v11414_v54  ;;  %v11472_v53 = vld [vmem:[%s14073_s29 + $0x268] ss:$48 sps:$4 sm:$0xff]  }
 0xb08   : > { %6186 = vmatprep.subr.bf16.mxu1 %v11417_v55 }
 0xb0a   : > { %6121 = vmatpush2.bf16.msra.mxu0 %v11412_v59  ;;  %v11475_v59 = vld [vmem:[%s14073_s29 + $0x868] ss:$48 sps:$4 sm:$0xff]  }
 0xb0b   : > { %6187 = vmatpush1.bf16.msra.mxu1 %v11415_v60  ;;  %6213 = vmatprep.subr.bf16.mxu0 %v11420_v62  ;;  %v11480_v60 = vld [vmem:[%s14073_s29 + $0x20c] ss:$48 sps:$4 sm:$0xff]  }
 0xb0c   : > { %6188 = vmatprep.subr.bf16.mxu1 %v11423_v48  ;;  %v11483_v48 = vld [vmem:[%s14073_s29 + $0x80c] ss:$48 sps:$4 sm:$0xff]  }
 0xb0d   : > { %6123 = vmatmul.mubr.bf16.vlgmr.msra.gmra.mxu0 %v13131_v25 }
 0xb0e   : > { %6214 = vmatpush1.bf16.msra.mxu0 %v11418_v56  ;;  %6245 = vmatprep.mubr.bf16.mxu0 %v12200_v61 }
 0xb0f   : > { %6189 = vmatpush2.bf16.msra.mxu1 %v11421_v0  ;;  %6215 = vmatprep.subr.bf16.mxu0 %v11426_v4 }
 0xb10   : > { %6190 = vmatprep.subr.bf16.mxu1 %v11429_v5  ;;  %v11478_v5 = vld [vmem:[%s14073_s29 + $0x208] ss:$48 sps:$4 sm:$0xff]  }
 0xb12   : > { %6216 = vmatpush1.bf16.msra.mxu0 %v11424_v49 }
 0xb13   : > { %6191 = vmatpush2.bf16.msra.mxu1 %v11427_v46  ;;  %6217 = vmatprep.subr.bf16.mxu0 %v11432_v6  ;;  %v11481_v6 = vld [vmem:[%s14073_s29 + $0x808] ss:$48 sps:$4 sm:$0xff]  }
 0xb14   : > { %6192 = vmatprep.subr.bf16.mxu1 %v11435_v7  ;;  %v11486_v7 = vld [vmem:[%s14073_s29 + $0x1ac] ss:$48 sps:$4 sm:$0xff]  }
 0xb16   : > { %6218 = vmatpush1.bf16.msra.mxu0 %v11430_v10 }
 0xb17   : > { %6193 = vmatpush2.bf16.msra.mxu1 %v11433_v14  ;;  %6219 = vmatprep.subr.bf16.mxu0 %v11438_v15 }
 0xb18   : > { %6194 = vmatprep.subr.bf16.mxu1 %v11441_v16  ;;  %v11484_v16 = vld [vmem:[%s14073_s29 + $0x1a8] ss:$48 sps:$4 sm:$0xff]  }
 0xb1a   : > { %6220 = vmatpush1.bf16.msra.mxu0 %v11436_v17 }
 0xb1b   : > { %6195 = vmatpush2.bf16.msra.mxu1 %v11439_v18  ;;  %6221 = vmatprep.subr.bf16.mxu0 %v11444_v8  ;;  %v11487_v18 = vld [vmem:[%s14073_s29 + $0x7a8] ss:$48 sps:$4 sm:$0xff]   ;;  %v11492_v8 = vld [vmem:[%s14073_s29 + $0x14c] ss:$48 sps:$4 sm:$0xff]  }
 0xb1c   : > { %6196 = vmatprep.subr.bf16.mxu1 %v11447_v19 }
 0xb1e   : > { %6222 = vmatpush1.bf16.msra.mxu0 %v11442_v21  ;;  %v11495_v21 = vld [vmem:[%s14073_s29 + $0x74c] ss:$48 sps:$4 sm:$0xff]  }
 0xb1f   : > { %6197 = vmatpush2.bf16.msra.mxu1 %v11445_v22  ;;  %6223 = vmatprep.subr.bf16.mxu0 %v11450_v23  ;;  %v11490_v23 = vld [vmem:[%s14073_s29 + $0x148] ss:$48 sps:$4 sm:$0xff]  }
 0xb20   : > { %6198 = vmatprep.subr.bf16.mxu1 %v11453_v26 }
 0xb22   : > { %6224 = vmatpush1.bf16.msra.mxu0 %v11448_v27  ;;  %v11493_v27 = vld [vmem:[%s14073_s29 + $0x748] ss:$48 sps:$4 sm:$0xff]  }
 0xb23   : > { %6199 = vmatpush2.bf16.msra.mxu1 %v11451_v28  ;;  %6225 = vmatprep.subr.bf16.mxu0 %v11456_v29  ;;  %v11498_v28 = vld [vmem:[%s14073_s29 + $0xec] ss:$48 sps:$4 sm:$0xff]  }
 0xb24   : > { %6200 = vmatprep.subr.bf16.mxu1 %v11459_v30  ;;  %v11501_v30 = vld [vmem:[%s14073_s29 + $0x6ec] ss:$48 sps:$4 sm:$0xff]  }
 0xb26   : > { %6226 = vmatpush1.bf16.msra.mxu0 %v11454_v37  ;;  %v11496_v37 = vld [vmem:[%s14073_s29 + $0xe8] ss:$48 sps:$4 sm:$0xff]  }
 0xb27   : > { %6201 = vmatpush2.bf16.msra.mxu1 %v11457_v1  ;;  %6227 = vmatprep.subr.bf16.mxu0 %v11462_v38  ;;  %v11499_v1 = vld [vmem:[%s14073_s29 + $0x6e8] ss:$48 sps:$4 sm:$0xff]   ;;  %v11504_v38 = vld [vmem:[%s14073_s29 + $0x8c] ss:$48 sps:$4 sm:$0xff]  }
 0xb28   : > { %6202 = vmatprep.subr.bf16.mxu1 %v11465_v20 }
 0xb2a   : > { %6228 = vmatpush1.bf16.msra.mxu0 %v11460_v40  ;;  %v11507_v40 = vld [vmem:[%s14073_s29 + $0x68c] ss:$48 sps:$4 sm:$0xff]  }
 0xb2b   : > { %6203 = vmatpush2.bf16.msra.mxu1 %v11463_v41  ;;  %6254 = vmatprep.subr.bf16.mxu0 %v11468_v24  ;;  %v11502_v41 = vld [vmem:[%s14073_s29 + $0x88] ss:$48 sps:$4 sm:$0xff]  }
 0xb2c   : > { %6295 = vmatprep.subr.bf16.mxu1 %v11471_v42  ;;  %v11505_v24 = vld [vmem:[%s14073_s29 + $0x688] ss:$48 sps:$4 sm:$0xff]   ;;  %v11510_v42 = vld [vmem:[%s14073_s29 + $0x2c] ss:$48 sps:$4 sm:$0xff]  }
 0xb2d   : > { %6246 = vmatmul.mubr.bf16.vlgmr.msra.gmra.mxu0 %v13128_v58  ;;  %v5919_v35 = vpop.f32.mrf.mxu0 }
 0xb2e   : > { %6205 = vmatmul.mubr.bf16.vlgmr.msra.gmra.mxu1 %v13131_v25  ;;  %6255 = vmatpush1.bf16.msra.mxu0 %v11466_v39  ;;  %v5878_v51 = vpop.f32.mrf.mxu1 }
 0xb2f   : > { %6286 = vmatprep.mubr.bf16.mxu0 %v13126_v43  ;;  %v5879_v54 = vadd.f32 %v5878_v51, %v4347_v44  ;;  %6296 = vmatpush1.bf16.msra.mxu1 %v11469_v34  ;;  %v5921_v55 = vpop.f32.mrf.mxu0  ;;  %v11513_v34 = vld [vmem:[%s14073_s29 + $0x62c] ss:$48 sps:$4 sm:$0xff]   ;;  %v11508_v44 = vld [vmem:[%s14073_s29 + $0x28] ss:$48 sps:$4 sm:$0xff]  }
 0xb30   : > { %v5880_v62 = vpop.f32.mrf.mxu1  ;;  %6256 = vmatprep.subr.bf16.mxu0 %v11474_v45  ;;  %6297 = vmatprep.subr.bf16.mxu1 %v11477_v47  ;;  %v11511_v45 = vld [vmem:[%s14073_s29 + $0x628] ss:$48 sps:$4 sm:$0xff]   ;;  %v11516_v47 = vld [vmem:[%s14073_s29 + $0x5cc] ss:$48 sps:$4 sm:$0xff]  }
 0xb31   : > { %v13358_v56 = vadd.f32 %v5919_v35, %v5879_v54  ;;  %v5881_v0 = vadd.f32 %v5880_v62, %v4351_v50  ;;  %v5923_v4 = vpop.f32.mrf.mxu0  ;;  %6327 = vmatprep.mubr.bf16.mxu1 %v12200_v61  ;;  %v11489_v61 = vld [vmem:[%s14073_s29 + $0x7ac] ss:$48 sps:$4 sm:$0xff]   ;;  %v11514_v51 = vld [vmem:[%s14073_s29 + $0x5c8] ss:$48 sps:$4 sm:$0xff]  }
 0xb32   : > { %6257 = vmatpush1.bf16.msra.mxu0 %v11472_v53  ;;  %v5882_v43 = vpop.f32.mrf.mxu1  ;;  %v11519_v50 = vld [vmem:[%s14076_s26 + $0xac] ss:$12 sps:$4 sm:$0xff]   ;;  %v11517_v54 = vld [vmem:[%s14076_s26 + $0xa8] ss:$12 sps:$4 sm:$0xff]  }
 0xb33   : > { %v13362_v49 = vadd.f32 %v5921_v55, %v5881_v0  ;;  %6298 = vmatpush1.bf16.msra.mxu1 %v11475_v59  ;;  %v5924_v46 = vpop.f32.mrf.mxu0  ;;  %6258 = vmatprep.subr.bf16.mxu0 %v11480_v60  ;;  %v13367_v10 = vmul.f32 0.70710677, %v13358_v56  ;;  %v11522_v55 = vld [vmem:[%s14073_s29 + $0x56c] ss:$48 sps:$4 sm:$0xff]   ;;  %v11525_v60 = vld [vmem:[%s14076_s26 + $0x94] ss:$12 sps:$4 sm:$0xff]  }
 0xb34   : > { %v5883_v14 = vpop.f32.mrf.mxu1  ;;  %6299 = vmatprep.subr.bf16.mxu1 %v11483_v48  ;;  %v11520_v0 = vld [vmem:[%s14073_s29 + $0x568] ss:$48 sps:$4 sm:$0xff]   ;;  %v11523_v43 = vld [vmem:[%s14076_s26 + $0x90] ss:$12 sps:$4 sm:$0xff]  }
 0xb35   : > { %v13371_v15 = vmul.f32 0.70710677, %v13362_v49  ;;  %v13378_v19 = vand.u32 2147483647, %v13367_v10  ;;  %vm6360_vm6 = vcmp.ge.f32.partialorder %v13367_v10, 0.0 }
 0xb36   : > { %6259 = vmatpush1.bf16.msra.mxu0 %v11478_v5  ;;  %v11528_v5 = vld [vmem:[%s14073_s29 + $0x50c] ss:$48 sps:$4 sm:$0xff]  }
 0xb37   : > { %v6385_v17 = vand.u32 2147483647, %v13371_v15  ;;  %6300 = vmatpush1.bf16.msra.mxu1 %v11481_v6  ;;  %6260 = vmatprep.subr.bf16.mxu0 %v11486_v7  ;;  %v6396_v29 = vmul.f32 0.3275911, %v13378_v19  ;;  %v11531_v6 = vld [vmem:[%s14076_s26 + $0x7c] ss:$12 sps:$4 sm:$0xff]  }
 0xb38   : > { %6301 = vmatprep.subr.bf16.mxu1 %v11489_v61  ;;  %vm6361_vm5 = vcmp.ge.f32.partialorder %v13371_v15, 0.0  ;;  %v11603_v10 = vld [vmem:[%s14076_s26 + $0xdc] ss:$12 sps:$4 sm:$0xff]  }
 0xb39   : > { %v6397_v22 = vmul.f32 0.3275911, %v6385_v17  ;;  %v6408_v20 = vadd.f32 1.0, %v6396_v29  ;;  %v6553_v39 = vsub.f32 0.0, %v6385_v17  ;;  %v11540_v29 = vld [vmem:[%s14073_s29 + $0x44c] ss:$48 sps:$4 sm:$0xff]  }
 0xb3a   : > { %6261 = vmatpush1.bf16.msra.mxu0 %v11484_v16 }
 0xb3b   : > { %v6409_v26 = vadd.f32 1.0, %v6397_v22  ;;  %6302 = vmatpush1.bf16.msra.mxu1 %v11487_v18  ;;  %6262 = vmatprep.subr.bf16.mxu0 %v11492_v8  ;;  %v6565_v35 = vmul.f32 %v6553_v39, %v6385_v17  ;;  %v11529_v17 = vld [vmem:[%s14076_s26 + $0x78] ss:$12 sps:$4 sm:$0xff]   ;;  %v11534_v18 = vld [vmem:[%s14073_s29 + $0x4ac] ss:$48 sps:$4 sm:$0xff]  }
 0xb3c   : > { %6303 = vmatprep.subr.bf16.mxu1 %v11495_v21  ;;  %v11537_v22 = vld [vmem:[%s14076_s26 + $0x64] ss:$12 sps:$4 sm:$0xff]  }
 0xb3d   : > { %11950 = vrcp.f32 %v6409_v26  ;;  %v6578_v59 = vmul.f32 1.442695, %v6565_v35  ;;  %v11532_v26 = vld [vmem:[%s14073_s29 + $0x4a8] ss:$48 sps:$4 sm:$0xff]   ;;  %v11547_v35 = vld [vmem:[%s14076_s26 + $0x30] ss:$12 sps:$4 sm:$0xff]  }
 0xb3e   : > { %6263 = vmatpush1.bf16.msra.mxu0 %v11490_v23  ;;  %11952 = vrcp.f32 %v6408_v20 }
 0xb3f   : > { %6304 = vmatpush1.bf16.msra.mxu1 %v11493_v27  ;;  %6264 = vmatprep.subr.bf16.mxu0 %v11498_v28  ;;  %11954 = vpow2.f32 %v6578_v59  ;;  %v11535_v28 = vld [vmem:[%s14076_s26 + $0x60] ss:$12 sps:$4 sm:$0xff]  }
 0xb40   : > { %6305 = vmatprep.subr.bf16.mxu1 %v11501_v30 }
 0xb42   : > { %6265 = vmatpush1.bf16.msra.mxu0 %v11496_v37  ;;  %v11543_v37 = vld [vmem:[%s14076_s26 + $0x4c] ss:$12 sps:$4 sm:$0xff]  }
 0xb43   : > { %6306 = vmatpush1.bf16.msra.mxu1 %v11499_v1  ;;  %6266 = vmatprep.subr.bf16.mxu0 %v11504_v38  ;;  %v11538_v38 = vld [vmem:[%s14073_s29 + $0x448] ss:$48 sps:$4 sm:$0xff]  }
 0xb44   : > { %6307 = vmatprep.subr.bf16.mxu1 %v11507_v40  ;;  %v11541_v40 = vld [vmem:[%s14076_s26 + $0x48] ss:$12 sps:$4 sm:$0xff]  }
 0xb46   : > { %6267 = vmatpush1.bf16.msra.mxu0 %v11502_v41  ;;  %v11546_v41 = vld [vmem:[%s14073_s29 + $0x3ec] ss:$48 sps:$4 sm:$0xff]  }
 0xb47   : > { %6308 = vmatpush1.bf16.msra.mxu1 %v11505_v24  ;;  %6268 = vmatprep.subr.bf16.mxu0 %v11510_v42  ;;  %v11549_v42 = vld [vmem:[%s14076_s26 + $0x34] ss:$12 sps:$4 sm:$0xff]  }
 0xb48   : > { %6309 = vmatprep.subr.bf16.mxu1 %v11513_v34 }
 0xb4a   : > { %6269 = vmatpush1.bf16.msra.mxu0 %v11508_v44  ;;  %v11951_v53 = vpop.eup %11950  ;;  %v6552_v44 = vsub.f32 0.0, %v13378_v19 }
 0xb4b   : > { %6310 = vmatpush1.bf16.msra.mxu1 %v11511_v45  ;;  %6270 = vmatprep.subr.bf16.mxu0 %v11516_v47  ;;  %v6445_v62 = vmul.f32 1.0614054, %v11951_v53  ;;  %v13411_v14 = vpop.eup %11952  ;;  %v11544_v45 = vld [vmem:[%s14073_s29 + $0x3e8] ss:$48 sps:$4 sm:$0xff]  }
 0xb4c   : > { %8592 = vmatprep.subr.bf16.mxu1 %v11519_v50  ;;  %v6444_v8 = vmul.f32 1.0614054, %v13411_v14  ;;  %v11955_v34 = vpop.eup %11954  ;;  %v11552_v50 = vld [vmem:[%s14073_s29 + $0x38c] ss:$48 sps:$4 sm:$0xff]   ;;  %v6564_v15 = vmul.f32 %v6552_v44, %v13378_v19  ;;  %v11556_v19 = vld [vmem:[%s14073_s29 + $0x328] ss:$48 sps:$4 sm:$0xff]  }
 0xb4d   : > { %v6457_v4 = vadd.f32 -1.4531521, %v6445_v62 }
 0xb4e   : > { %v13402_v48 = vpop.f32.mrf.mxu1  ;;  %6271 = vmatpush2.bf16.msra.mxu0 %v11514_v51  ;;  %6328 = vmatmul.mubr.bf16.vlgmr.msra.gmra.mxu1 %v13128_v58  ;;  %v11526_v58 = vld [vmem:[%s14073_s29 + $0x508] ss:$48 sps:$4 sm:$0xff]   ;;  %v6456_v30 = vadd.f32 -1.4531521, %v6444_v8 }
 0xb4f   : > { %8593 = vmatpush1.bf16.msra.mxu1 %v11517_v54  ;;  %6272 = vmatprep.subr.bf16.mxu0 %v11522_v55  ;;  %v6469_v7 = vmul.f32 %v11951_v53, %v6457_v4  ;;  %v11555_v54 = vld [vmem:[%s14076_s26 + $0x1c] ss:$12 sps:$4 sm:$0xff]   ;;  %v12205_v55 = vmov -1.0  }
 0xb50   : > { %v13408_v46 = vpop.f32.mrf.mxu1  ;;  %8594 = vmatprep.subr.bf16.mxu1 %v11525_v60  ;;  %v6468_v24 = vmul.f32 %v13411_v14, %v6456_v30  ;;  %v6373_v59 = vsel %vm6361_vm5, 1.0, %v12205_v55  ;;  %v11550_v60 = vld [vmem:[%s14073_s29 + $0x388] ss:$48 sps:$4 sm:$0xff]   ;;  %v11558_v4 = vld [vmem:[%s14073_s29 + $0x32c] ss:$48 sps:$4 sm:$0xff]  }
 0xb51   : > { %v6481_v16 = vadd.f32 1.4214138, %v6469_v7 }
 0xb52   : > { %v6005_v61 = vpop.f32.mrf.mxu1  ;;  %6273 = vmatpush2.bf16.msra.mxu0 %v11520_v0  ;;  %v6480_v51 = vadd.f32 1.4214138, %v6468_v24  ;;  %v11553_v0 = vld [vmem:[%s14076_s26 + $0x18] ss:$12 sps:$4 sm:$0xff]  }
 0xb53   : > { %8595 = vmatpush1.bf16.msra.mxu1 %v11523_v43  ;;  %6274 = vmatprep.subr.bf16.mxu0 %v11528_v5  ;;  %v6493_v23 = vmul.f32 %v11951_v53, %v6481_v16  ;;  %v6337_v5 = vmul.f32 0.5, %v13362_v49  ;;  %v6576_v61 = vmul.f32 1.442695, %v6564_v15  ;;  %v11559_v16 = vld [vmem:[%s14076_s26] ss:$12 sps:$4 sm:$0xff]  }
 0xb54   : > { %v6006_v21 = vpop.f32.mrf.mxu1  ;;  %8596 = vmatprep.subr.bf16.mxu1 %v11531_v6  ;;  %v6492_v43 = vmul.f32 %v13411_v14, %v6480_v51  ;;  %v11561_v6 = vld [vmem:[%s14076_s26 + $0x4] ss:$12 sps:$4 sm:$0xff]   ;;  %v11567_v49 = vld [vmem:[%s14076_s26 + $0x16c] ss:$12 sps:$4 sm:$0xff]  }
 0xb55   : > { %v6505_v27 = vadd.f32 -0.28449672, %v6493_v23  ;;  %11956 = vpow2.f32 %v6576_v61  ;;  %v4355_v21 = vrot.slane %v13341_v33, %v12560_v12  ;;  %v11565_v23 = vld [vmem:[%s14076_s26 + $0x168] ss:$12 sps:$4 sm:$0xff]   ;;  %v11580_v15 = vld [vmem:[%s14076_s26 + $0x1e0] ss:$12 sps:$4 sm:$0xff]  }
 0xb56   : > { %6275 = vmatpush2.bf16.msra.mxu0 %v11526_v58  ;;  %v11589_v61 = vld [vmem:[%s14076_s26 + $0x108] ss:$12 sps:$4 sm:$0xff]  }
 0xb57   : > { %8597 = vmatpush1.bf16.msra.mxu1 %v11529_v17  ;;  %6276 = vmatprep.subr.bf16.mxu0 %v11534_v18  ;;  %v6517_v1 = vmul.f32 %v11951_v53, %v6505_v27  ;;  %v11564_v17 = vld [vmem:[%s14076_s26 + $0x22c] ss:$12 sps:$4 sm:$0xff]   ;;  %v6504_v18 = vadd.f32 -0.28449672, %v6492_v43 }
 0xb58   : > { %8598 = vmatprep.subr.bf16.mxu1 %v11537_v22  ;;  %v11562_v22 = vld [vmem:[%s14076_s26 + $0x228] ss:$12 sps:$4 sm:$0xff]  }
 0xb59   : > { %v6529_v20 = vadd.f32 0.2548296, %v6517_v1  ;;  %v6516_v27 = vmul.f32 %v13411_v14, %v6504_v18  ;;  %v11568_v1 = vld [vmem:[%s14076_s26 + $0x210] ss:$12 sps:$4 sm:$0xff]   ;;  %v6372_v18 = vsel %vm6360_vm6, 1.0, %v12205_v55 }
 0xb5a   : > { %6277 = vmatpush2.bf16.msra.mxu0 %v11532_v26  ;;  %v11570_v26 = vld [vmem:[%s14076_s26 + $0x214] ss:$12 sps:$4 sm:$0xff]  }
 0xb5b   : > { %8599 = vmatpush1.bf16.msra.mxu1 %v11535_v28  ;;  %6278 = vmatprep.subr.bf16.mxu0 %v11540_v29  ;;  %v6541_v39 = vmul.f32 %v11951_v53, %v6529_v20  ;;  %v4359_v28 = vrot.slane %v13341_v33, %v12793_v52  ;;  %v11573_v29 = vld [vmem:[%s14076_s26 + $0x154] ss:$12 sps:$4 sm:$0xff]   ;;  %v11571_v20 = vld [vmem:[%s14076_s26 + $0x150] ss:$12 sps:$4 sm:$0xff]  }
 0xb5c   : > { %8600 = vmatprep.subr.bf16.mxu1 %v11543_v37 }
 0xb5d   : > { %v6601_v47 = vmul.f32 %v11955_v34, %v6541_v39  ;;  %v11579_v39 = vld [vmem:[%s14076_s26 + $0x13c] ss:$12 sps:$4 sm:$0xff]  }
 0xb5e   : > { %6279 = vmatpush2.bf16.msra.mxu0 %v11538_v38 }
 0xb5f   : > { %8601 = vmatpush1.bf16.msra.mxu1 %v11541_v40  ;;  %6280 = vmatprep.subr.bf16.mxu0 %v11546_v41  ;;  %v6613_v53 = vsub.f32 1.0, %v6601_v47  ;;  %v11576_v40 = vld [vmem:[%s14076_s26 + $0x1fc] ss:$12 sps:$4 sm:$0xff]   ;;  %v6528_v41 = vadd.f32 0.2548296, %v6516_v27 }
 0xb60   : > { %8602 = vmatprep.subr.bf16.mxu1 %v11549_v42  ;;  %v11601_v27 = vld [vmem:[%s14076_s26 + $0xd8] ss:$12 sps:$4 sm:$0xff]  }
 0xb61   : > { %v6625_v62 = vmul.f32 %v6613_v53, %v6373_v59 }
 0xb62   : > { %6281 = vmatpush2.bf16.msra.mxu0 %v11544_v45  ;;  %v11574_v45 = vld [vmem:[%s14076_s26 + $0x1f8] ss:$12 sps:$4 sm:$0xff]  }
 0xb63   : > { %8603 = vmatpush1.bf16.msra.mxu1 %v11547_v35  ;;  %6282 = vmatprep.subr.bf16.mxu0 %v11552_v50  ;;  %v6637_v7 = vadd.f32 1.0, %v6625_v62  ;;  %v11582_v35 = vld [vmem:[%s14076_s26 + $0x1e4] ss:$12 sps:$4 sm:$0xff]   ;;  %v6540_v50 = vmul.f32 %v13411_v14, %v6528_v41  ;;  %v11583_v14 = vld [vmem:[%s14076_s26 + $0x120] ss:$12 sps:$4 sm:$0xff]  }
 0xb64   : > { %8604 = vmatprep.subr.bf16.mxu1 %v11555_v54  ;;  %v11588_v62 = vld [vmem:[%s14076_s26 + $0x1cc] ss:$12 sps:$4 sm:$0xff]  }
 0xb65   : > { %v6649_v58 = vmul.f32 %v6637_v7, %v6337_v5  ;;  %v11591_v5 = vld [vmem:[%s14076_s26 + $0x10c] ss:$12 sps:$4 sm:$0xff]   ;;  %v11586_v7 = vld [vmem:[%s14076_s26 + $0x1c8] ss:$12 sps:$4 sm:$0xff]  }
 0xb66   : > { %6283 = vmatpush2.bf16.msra.mxu0 %v11550_v60  ;;  %v11957_v60 = vpop.eup %11956  ;;  %v11607_v41 = vld [vmem:[%s14076_s26 + $0xc0] ss:$12 sps:$4 sm:$0xff]  }
 0xb67   : > { %8605 = vmatpush1.bf16.msra.mxu1 %v11553_v0  ;;  %6284 = vmatprep.subr.bf16.mxu0 %v11558_v4  ;;  %v13444_v8 = vpack.c.bf16 %v6649_v58, %v6649_v58  ;;  %v6600_v0 = vmul.f32 %v11957_v60, %v6540_v50  ;;  %v11610_v50 = vld [vmem:[%s14076_s26 + $0x2e8] ss:$12 sps:$4 sm:$0xff]  }
 0xb68   : > { %8606 = vmatprep.subr.bf16.mxu1 %v11561_v6 }
 0xb69   : > { %8624 = vmatprep.mubr.bf16.mxu1 %v13444_v8  ;;  %v6612_v58 = vsub.f32 1.0, %v6600_v0 }
 0xb6a   : > { %6285 = vmatpush2.bf16.msra.mxu0 %v11556_v19  ;;  %v11594_v19 = vld [vmem:[%s14076_s26 + $0x1b4] ss:$12 sps:$4 sm:$0xff]  }
 0xb6b   : > { %8607 = vmatpush1.bf16.msra.mxu1 %v11559_v16  ;;  %8633 = vmatprep.subr.bf16.mxu0 %v11564_v17  ;;  %v11597_v16 = vld [vmem:[%s14076_s26 + $0xf4] ss:$12 sps:$4 sm:$0xff]   ;;  %v11592_v17 = vld [vmem:[%s14076_s26 + $0x1b0] ss:$12 sps:$4 sm:$0xff]  }
 0xb6c   : > { %8608 = vmatprep.subr.bf16.mxu1 %v11567_v49  ;;  %v11595_v49 = vld [vmem:[%s14076_s26 + $0xf0] ss:$12 sps:$4 sm:$0xff]  }
 0xb6d   : > { %v5960_v30 = vpop.f32.mrf.mxu0  ;;  %6287 = vmatmul.mubr.bf16.vlgmr.msra.gmra.mxu0 %v13131_v25 }
 0xb6e   : > { %v5961_v37 = vadd.f32 %v5960_v30, %v4355_v21  ;;  %8634 = vmatpush1.bf16.msra.mxu0 %v11562_v22  ;;  %v11600_v21 = vld [vmem:[%s14076_s26 + $0x19c] ss:$12 sps:$4 sm:$0xff]   ;;  %v6624_v22 = vmul.f32 %v6612_v58, %v6372_v18 }
 0xb6f   : > { %v5962_v38 = vpop.f32.mrf.mxu0  ;;  %8609 = vmatpush2.bf16.msra.mxu1 %v11565_v23  ;;  %8635 = vmatprep.subr.bf16.mxu0 %v11570_v26  ;;  %v11598_v26 = vld [vmem:[%s14076_s26 + $0x198] ss:$12 sps:$4 sm:$0xff]   ;;  %v11624_v58 = vld [vmem:[%s14076_s26 + $0x2bc] ss:$12 sps:$4 sm:$0xff]  }
 0xb70   : > { %v13462_v24 = vadd.f32 %v13402_v48, %v5961_v37  ;;  %v5963_v42 = vadd.f32 %v5962_v38, %v4359_v28  ;;  %8610 = vmatprep.subr.bf16.mxu1 %v11573_v29  ;;  %v11577_v48 = vld [vmem:[%s14076_s26 + $0x138] ss:$12 sps:$4 sm:$0xff]   ;;  %v6636_v29 = vadd.f32 1.0, %v6624_v22  ;;  %v6336_v38 = vmul.f32 0.5, %v13358_v56 }
 0xb71   : > { %v5964_v25 = vpop.f32.mrf.mxu0  ;;  %v11606_v28 = vld [vmem:[%s14076_s26 + $0x184] ss:$12 sps:$4 sm:$0xff]  }
 0xb72   : > { %v13466_v34 = vmul.f32 0.70710677, %v13462_v24  ;;  %v13469_v44 = vadd.f32 %v13408_v46, %v5963_v42  ;;  %8636 = vmatpush1.bf16.msra.mxu0 %v11568_v1  ;;  %v11585_v46 = vld [vmem:[%s14076_s26 + $0x124] ss:$12 sps:$4 sm:$0xff]   ;;  %v11612_v42 = vld [vmem:[%s14076_s26 + $0x2ec] ss:$12 sps:$4 sm:$0xff]  }
 0xb73   : > { %v5965_v47 = vpop.f32.mrf.mxu0  ;;  %8611 = vmatpush2.bf16.msra.mxu1 %v11571_v20  ;;  %8637 = vmatprep.subr.bf16.mxu0 %v11576_v40  ;;  %v11609_v1 = vld [vmem:[%s14076_s26 + $0xc4] ss:$12 sps:$4 sm:$0xff]   ;;  %v11604_v20 = vld [vmem:[%s14076_s26 + $0x180] ss:$12 sps:$4 sm:$0xff]  }
 0xb74   : > { %v6386_v51 = vand.u32 2147483647, %v13466_v34  ;;  %v13477_v54 = vmul.f32 0.70710677, %v13469_v44  ;;  %8612 = vmatprep.subr.bf16.mxu1 %v11579_v39  ;;  %v6648_v39 = vmul.f32 %v6636_v29, %v6336_v38  ;;  %vm6362_vm7 = vcmp.ge.f32.partialorder %v13466_v34, 0.0 }
 0xb75   : > { %v11640_v34 = vld [vmem:[%s14076_s26 + $0x270] ss:$12 sps:$4 sm:$0xff]  }
 0xb76   : > { %v6398_v53 = vmul.f32 0.3275911, %v6386_v51  ;;  %v6387_v59 = vand.u32 2147483647, %v13477_v54  ;;  %8638 = vmatpush1.bf16.msra.mxu0 %v11574_v45  ;;  %v6554_v23 = vsub.f32 0.0, %v6386_v51  ;;  %vm6363_vm8 = vcmp.ge.f32.partialorder %v13477_v54, 0.0 }
 0xb77   : > { %8613 = vmatpush2.bf16.msra.mxu1 %v11577_v48  ;;  %8639 = vmatprep.subr.bf16.mxu0 %v11582_v35  ;;  %v11615_v48 = vld [vmem:[%s14076_s26 + $0x3ac] ss:$12 sps:$4 sm:$0xff]  }
 0xb78   : > { %v6410_v4 = vadd.f32 1.0, %v6398_v53  ;;  %v6399_v43 = vmul.f32 0.3275911, %v6387_v59  ;;  %8614 = vmatprep.subr.bf16.mxu1 %v11585_v46  ;;  %v6566_v30 = vmul.f32 %v6554_v23, %v6386_v51  ;;  %v6555_v37 = vsub.f32 0.0, %v6387_v59  ;;  %v11613_v46 = vld [vmem:[%s14076_s26 + $0x3a8] ss:$12 sps:$4 sm:$0xff]  }
 0xb79   : > { %v4363_v51 = vrot.slane %v13341_v33, %v1087_v2  ;;  %v11618_v53 = vld [vmem:[%s14076_s26 + $0x2d4] ss:$12 sps:$4 sm:$0xff]   ;;  %v4367_v2 = vrot.slane %v13341_v33, %v1091_v3  ;;  %v11627_v33 = vld [vmem:[%s14076_s26 + $0x37c] ss:$12 sps:$4 sm:$0xff]  }
 0xb7a   : > { %11958 = vrcp.f32 %v6410_v4  ;;  %v6411_v6 = vadd.f32 1.0, %v6399_v43  ;;  %8640 = vmatpush1.bf16.msra.mxu0 %v11580_v15  ;;  %v6580_v45 = vmul.f32 1.442695, %v6566_v30  ;;  %v6567_v47 = vmul.f32 %v6555_v37, %v6387_v59  ;;  %v11625_v30 = vld [vmem:[%s14076_s26 + $0x378] ss:$12 sps:$4 sm:$0xff]  }
 0xb7b   : > { %8615 = vmatpush2.bf16.msra.mxu1 %v11583_v14  ;;  %8641 = vmatprep.subr.bf16.mxu0 %v11588_v62  ;;  %v13516_v59 = vpack.c.bf16 %v6648_v39, %v6648_v39  ;;  %v11621_v62 = vld [vmem:[%s14076_s26 + $0x394] ss:$12 sps:$4 sm:$0xff]   ;;  %v11630_v37 = vld [vmem:[%s14076_s26 + $0x2a4] ss:$12 sps:$4 sm:$0xff]  }
 0xb7c   : > { %8616 = vmatprep.subr.bf16.mxu1 %v11591_v5  ;;  %11960 = vrcp.f32 %v6411_v6  ;;  %v6582_v14 = vmul.f32 1.442695, %v6567_v47  ;;  %v11616_v6 = vld [vmem:[%s14076_s26 + $0x2d0] ss:$12 sps:$4 sm:$0xff]   ;;  %v11631_v47 = vld [vmem:[%s14076_s26 + $0x360] ss:$12 sps:$4 sm:$0xff]  }
 0xb7d   : > { %11962 = vpow2.f32 %v6580_v45 }
 0xb7e   : > { %8642 = vmatpush1.bf16.msra.mxu0 %v11586_v7  ;;  %11964 = vpow2.f32 %v6582_v14 }
 0xb7f   : > { %8617 = vmatpush2.bf16.msra.mxu1 %v11589_v61  ;;  %8643 = vmatprep.subr.bf16.mxu0 %v11594_v19  ;;  %v11619_v19 = vld [vmem:[%s14076_s26 + $0x390] ss:$12 sps:$4 sm:$0xff]  }
 0xb80   : > { %8618 = vmatprep.subr.bf16.mxu1 %v11597_v16 }
 0xb82   : > { %8644 = vmatpush1.bf16.msra.mxu0 %v11592_v17 }
 0xb83   : > { %8619 = vmatpush2.bf16.msra.mxu1 %v11595_v49  ;;  %8645 = vmatprep.subr.bf16.mxu0 %v11600_v21 }
 0xb84   : > { %8620 = vmatprep.subr.bf16.mxu1 %v11603_v10 }
 0xb86   : > { %8646 = vmatpush1.bf16.msra.mxu0 %v11598_v26  ;;  %v11622_v26 = vld [vmem:[%s14076_s26 + $0x2b8] ss:$12 sps:$4 sm:$0xff]  }
 0xb87   : > { %v13501_v40 = vpop.eup %11958  ;;  %8621 = vmatpush2.bf16.msra.mxu1 %v11601_v27  ;;  %8647 = vmatprep.subr.bf16.mxu0 %v11606_v28 }
 0xb88   : > { %v6446_v25 = vmul.f32 1.0614054, %v13501_v40  ;;  %8622 = vmatprep.subr.bf16.mxu1 %v11609_v1 }
 0xb89   : > { %v13507_v56 = vpop.eup %11960 }
 0xb8a   : > { %v6458_v35 = vadd.f32 -1.4531521, %v6446_v25  ;;  %8648 = vmatpush1.bf16.msra.mxu0 %v11604_v20  ;;  %v6447_v15 = vmul.f32 1.0614054, %v13507_v56  ;;  %v11628_v25 = vld [vmem:[%s14076_s26 + $0x2a0] ss:$12 sps:$4 sm:$0xff]  }
 0xb8b   : > { %8623 = vmatpush2.bf16.msra.mxu1 %v11607_v41  ;;  %8649 = vmatprep.subr.bf16.mxu0 %v11612_v42  ;;  %v11633_v41 = vld [vmem:[%s14076_s26 + $0x364] ss:$12 sps:$4 sm:$0xff]  }
 0xb8c   : > { %v6470_v60 = vmul.f32 %v13501_v40, %v6458_v35  ;;  %8674 = vmatprep.subr.bf16.mxu1 %v11615_v48  ;;  %v6459_v4 = vadd.f32 -1.4531521, %v6447_v15 }
 0xb8d   : > { %v6083_v0 = vpop.f32.mrf.mxu0 }
 0xb8e   : > { %v6482_v43 = vadd.f32 1.4214138, %v6470_v60  ;;  %v6042_v5 = vpop.f32.mrf.mxu1  ;;  %8625 = vmatmul.mubr.bf16.vlgmr.msra.gmra.mxu1 %v13516_v59  ;;  %8650 = vmatpush2.bf16.msra.mxu0 %v11610_v50  ;;  %v6471_v16 = vmul.f32 %v13507_v56, %v6459_v4  ;;  %v11963_v60 = vpop.eup %11962 }
 0xb8f   : > { %v6043_v7 = vadd.f32 %v6042_v5, %v4363_v51  ;;  %v6085_v61 = vpop.f32.mrf.mxu0  ;;  %8675 = vmatpush1.bf16.msra.mxu1 %v11613_v46  ;;  %8651 = vmatprep.subr.bf16.mxu0 %v11618_v53  ;;  %v11636_v51 = vld [vmem:[%s14076_s26 + $0x28c] ss:$12 sps:$4 sm:$0xff]   ;;  %v11642_v5 = vld [vmem:[%s14076_s26 + $0x274] ss:$12 sps:$4 sm:$0xff]  }
 0xb90   : > { %v6494_v17 = vmul.f32 %v13501_v40, %v6482_v43  ;;  %v6044_v3 = vpop.f32.mrf.mxu1  ;;  %8676 = vmatprep.subr.bf16.mxu1 %v11621_v62  ;;  %v6483_v22 = vadd.f32 1.4214138, %v6471_v16  ;;  %v11639_v53 = vld [vmem:[%s14076_s26 + $0x34c] ss:$12 sps:$4 sm:$0xff]   ;;  %v11637_v43 = vld [vmem:[%s14076_s26 + $0x348] ss:$12 sps:$4 sm:$0xff]  }
 0xb91   : > { %v13530_v18 = vadd.f32 %v6083_v0, %v6043_v7  ;;  %v6045_v49 = vadd.f32 %v6044_v3, %v4367_v2  ;;  %v6087_v21 = vpop.f32.mrf.mxu0  ;;  %v11634_v2 = vld [vmem:[%s14076_s26 + $0x288] ss:$12 sps:$4 sm:$0xff]   ;;  %v11643_v3 = vld [vmem:[%s14076_s26 + $0x330] ss:$12 sps:$4 sm:$0xff]  }
 0xb92   : > { %v6506_v23 = vadd.f32 -0.28449672, %v6494_v17  ;;  %v6046_v10 = vpop.f32.mrf.mxu1  ;;  %8652 = vmatpush2.bf16.msra.mxu0 %v11616_v6  ;;  %v6495_v1 = vmul.f32 %v13507_v56, %v6483_v22  ;;  %v11645_v7 = vld [vmem:[%s14076_s26 + $0x334] ss:$12 sps:$4 sm:$0xff]   ;;  %v6375_v21 = vsel %vm6363_vm8, 1.0, %v12205_v55 }
 0xb93   : > { %v13534_v27 = vmul.f32 0.70710677, %v13530_v18  ;;  %v13536_v28 = vadd.f32 %v6085_v61, %v6045_v49  ;;  %v6088_v29 = vpop.f32.mrf.mxu0  ;;  %8677 = vmatpush1.bf16.msra.mxu1 %v11619_v19  ;;  %8653 = vmatprep.subr.bf16.mxu0 %v11624_v58  ;;  %v11965_v19 = vpop.eup %11964  ;;  %v6374_v58 = vsel %vm6362_vm7, 1.0, %v12205_v55  ;;  %v11651_v49 = vld [vmem:[%s14076_s26 + $0x31c] ss:$12 sps:$4 sm:$0xff]  }
 0xb94   : > { %v6518_v38 = vmul.f32 %v13501_v40, %v6506_v23  ;;  %v6047_v20 = vpop.f32.mrf.mxu1  ;;  %8678 = vmatprep.subr.bf16.mxu1 %v11627_v33  ;;  %v6507_v48 = vadd.f32 -0.28449672, %v6495_v1  ;;  %v11648_v33 = vld [vmem:[%s14076_s26 + $0x25c] ss:$12 sps:$4 sm:$0xff]   ;;  %v11646_v22 = vld [vmem:[%s14076_s26 + $0x258] ss:$12 sps:$4 sm:$0xff]  }
 0xb95   : > { %v13544_v42 = vand.u32 2147483647, %v13534_v27  ;;  %v13547_v39 = vmul.f32 0.70710677, %v13536_v28  ;;  %v11654_v29 = vld [vmem:[%s14076_s26 + $0x244] ss:$12 sps:$4 sm:$0xff]  }
 0xb96   : > { %v6530_v45 = vadd.f32 0.2548296, %v6518_v38  ;;  %8654 = vmatpush2.bf16.msra.mxu0 %v11622_v26  ;;  %v6519_v15 = vmul.f32 %v13507_v56, %v6507_v48  ;;  %v11649_v26 = vld [vmem:[%s14076_s26 + $0x318] ss:$12 sps:$4 sm:$0xff]   ;;  %v6338_v20 = vmul.f32 0.5, %v13462_v24  ;;  %vm6364_vm9 = vcmp.ge.f32.partialorder %v13534_v27, 0.0 }
 0xb97   : > { %v6400_v35 = vmul.f32 0.3275911, %v13544_v42  ;;  %v13553_v50 = vand.u32 2147483647, %v13547_v39  ;;  %8679 = vmatpush1.bf16.msra.mxu1 %v11625_v30  ;;  %8655 = vmatprep.subr.bf16.mxu0 %v11630_v37  ;;  %v6556_v54 = vsub.f32 0.0, %v13544_v42  ;;  %v6339_v30 = vmul.f32 0.5, %v13469_v44 }
 0xb98   : > { %v6542_v46 = vmul.f32 %v13501_v40, %v6530_v45  ;;  %8680 = vmatprep.subr.bf16.mxu1 %v11633_v41  ;;  %v6531_v4 = vadd.f32 0.2548296, %v6519_v15  ;;  %v11657_v38 = vld [vmem:[%s14076_s26 + $0x304] ss:$12 sps:$4 sm:$0xff]   ;;  %v11652_v45 = vld [vmem:[%s14076_s26 + $0x240] ss:$12 sps:$4 sm:$0xff]  }
 0xb99   : > { %v6412_v14 = vadd.f32 1.0, %v6400_v35  ;;  %v6401_v62 = vmul.f32 0.3275911, %v13553_v50  ;;  %v6557_v37 = vsub.f32 0.0, %v13553_v50  ;;  %v6568_v41 = vmul.f32 %v6556_v54, %v13544_v42  ;;  %v11655_v48 = vld [vmem:[%s14076_s26 + $0x300] ss:$12 sps:$4 sm:$0xff]  }
 0xb9a   : > { %v6602_v0 = vmul.f32 %v11963_v60, %v6542_v46  ;;  %8656 = vmatpush2.bf16.msra.mxu0 %v11628_v25  ;;  %v6543_v61 = vmul.f32 %v13507_v56, %v6531_v4  ;;  %v11681_v44 = vld [vmem:[%s14076_s26 + $0x52c] ss:$12 sps:$4 sm:$0xff]   ;;  %v11679_v15 = vld [vmem:[%s14076_s26 + $0x528] ss:$12 sps:$4 sm:$0xff]   ;;  %vm6365_vm10 = vcmp.ge.f32.partialorder %v13547_v39, 0.0 }
 0xb9b   : > { %11966 = vrcp.f32 %v6412_v14  ;;  %v6413_v40 = vadd.f32 1.0, %v6401_v62  ;;  %8681 = vmatpush1.bf16.msra.mxu1 %v11631_v47  ;;  %8657 = vmatprep.subr.bf16.mxu0 %v11636_v51  ;;  %v6569_v51 = vmul.f32 %v6557_v37, %v13553_v50  ;;  %v11660_v24 = vld [vmem:[%s14076_s26 + $0x46c] ss:$12 sps:$4 sm:$0xff]   ;;  %v11658_v50 = vld [vmem:[%s14076_s26 + $0x468] ss:$12 sps:$4 sm:$0xff]  }
 0xb9c   : > { %v6614_v6 = vsub.f32 1.0, %v6602_v0  ;;  %8682 = vmatprep.subr.bf16.mxu1 %v11639_v53  ;;  %v6603_v16 = vmul.f32 %v11965_v19, %v6543_v61  ;;  %v6584_v53 = vmul.f32 1.442695, %v6568_v41  ;;  %v11687_v0 = vld [vmem:[%s14076_s26 + $0x514] ss:$12 sps:$4 sm:$0xff]  }
 0xb9d   : > { %11968 = vrcp.f32 %v6413_v40  ;;  %v11663_v4 = vld [vmem:[%s14076_s26 + $0x454] ss:$12 sps:$4 sm:$0xff]   ;;  %v11661_v19 = vld [vmem:[%s14076_s26 + $0x450] ss:$12 sps:$4 sm:$0xff]   ;;  %v11664_v54 = vld [vmem:[%s14076_s26 + $0x438] ss:$12 sps:$4 sm:$0xff]  }
 0xb9e   : > { %8658 = vmatpush2.bf16.msra.mxu0 %v11634_v2  ;;  %v6626_v17 = vmul.f32 %v6614_v6, %v6374_v58  ;;  %v6615_v56 = vsub.f32 1.0, %v6603_v16  ;;  %v6586_v2 = vmul.f32 1.442695, %v6569_v51  ;;  %11970 = vpow2.f32 %v6584_v53  ;;  %v11690_v58 = vld [vmem:[%s14076_s26 + $0x4fc] ss:$12 sps:$4 sm:$0xff]  }
 0xb9f   : > { %8683 = vmatpush1.bf16.msra.mxu1 %v11637_v43  ;;  %8659 = vmatprep.subr.bf16.mxu0 %v11642_v5  ;;  %v11666_v16 = vld [vmem:[%s14076_s26 + $0x43c] ss:$12 sps:$4 sm:$0xff]   ;;  %v11691_v37 = vld [vmem:[%s14076_s26 + $0x4e0] ss:$12 sps:$4 sm:$0xff]  }
 0xba0   : > { %8684 = vmatprep.subr.bf16.mxu1 %v11645_v7  ;;  %v6627_v23 = vmul.f32 %v6615_v56, %v6375_v21  ;;  %v6638_v10 = vadd.f32 1.0, %v6626_v17  ;;  %v11685_v7 = vld [vmem:[%s14076_s26 + $0x510] ss:$12 sps:$4 sm:$0xff]   ;;  %11972 = vpow2.f32 %v6586_v2  ;;  %v11688_v56 = vld [vmem:[%s14076_s26 + $0x4f8] ss:$12 sps:$4 sm:$0xff]   ;;  %v6376_v2 = vsel %vm6364_vm9, 1.0, %v12205_v55 }
 0xba1   : > { %v11672_v41 = vld [vmem:[%s14076_s26 + $0x40c] ss:$12 sps:$4 sm:$0xff]   ;;  %v11675_v53 = vld [vmem:[%s14076_s26 + $0x3f4] ss:$12 sps:$4 sm:$0xff]   ;;  %v11702_v27 = vld [vmem:[%s14076_s26 + $0x49c] ss:$12 sps:$4 sm:$0xff]  }
 0xba2   : > { %8660 = vmatpush2.bf16.msra.mxu0 %v11640_v34  ;;  %v6639_v1 = vadd.f32 1.0, %v6627_v23  ;;  %v6650_v47 = vmul.f32 %v6638_v10, %v6338_v20  ;;  %v11669_v10 = vld [vmem:[%s14076_s26 + $0x424] ss:$12 sps:$4 sm:$0xff]   ;;  %v11696_v20 = vld [vmem:[%s14076_s26 + $0x4cc] ss:$12 sps:$4 sm:$0xff]  }
 0xba3   : > { %8685 = vmatpush1.bf16.msra.mxu1 %v11643_v3  ;;  %8661 = vmatprep.subr.bf16.mxu0 %v11648_v33 }
 0xba4   : > { %8686 = vmatprep.subr.bf16.mxu1 %v11651_v49  ;;  %v6651_v25 = vmul.f32 %v6639_v1, %v6339_v30  ;;  %v13596_v14 = vpack.c.bf16 %v6650_v47, %v6650_v47 }
 0xba6   : > { %8662 = vmatpush2.bf16.msra.mxu0 %v11646_v22  ;;  %v13588_v46 = vpack.c.bf16 %v6651_v25, %v6651_v25  ;;  %v11693_v22 = vld [vmem:[%s14076_s26 + $0x4e4] ss:$12 sps:$4 sm:$0xff]  }
 0xba7   : > { %8687 = vmatpush1.bf16.msra.mxu1 %v11649_v26  ;;  %8663 = vmatprep.subr.bf16.mxu0 %v11654_v29 }
 0xba8   : > { %v13585_v35 = vpop.eup %11966  ;;  %8688 = vmatprep.subr.bf16.mxu1 %v11657_v38  ;;  %8665 = vmatprep.mubr.bf16.mxu0 %v13588_v46  ;;  %v11667_v38 = vld [vmem:[%s14076_s26 + $0x420] ss:$12 sps:$4 sm:$0xff]  }
 0xba9   : > { %v6448_v42 = vmul.f32 1.0614054, %v13585_v35 }
 0xbaa   : > { %8664 = vmatpush2.bf16.msra.mxu0 %v11652_v45  ;;  %v13594_v60 = vpop.eup %11968 }
 0xbab   : > { %v6460_v62 = vadd.f32 -1.4531521, %v6448_v42  ;;  %8689 = vmatpush1.bf16.msra.mxu1 %v11655_v48  ;;  %8715 = vmatprep.subr.bf16.mxu0 %v11681_v44  ;;  %v6449_v40 = vmul.f32 1.0614054, %v13594_v60  ;;  %v11971_v47 = vpop.eup %11970  ;;  %v11694_v44 = vld [vmem:[%s14076_s26 + $0x4c8] ss:$12 sps:$4 sm:$0xff]  }
 0xbac   : > { %8690 = vmatprep.subr.bf16.mxu1 %v11660_v24  ;;  %v11670_v24 = vld [vmem:[%s14076_s26 + $0x408] ss:$12 sps:$4 sm:$0xff]  }
 0xbad   : > { %v6472_v43 = vmul.f32 %v13585_v35, %v6460_v62  ;;  %8666 = vmatmul.mubr.bf16.vlgmr.msra.gmra.mxu0 %v13596_v14  ;;  %v6461_v6 = vadd.f32 -1.4531521, %v6449_v40  ;;  %v11699_v42 = vld [vmem:[%s14076_s26 + $0x4b4] ss:$12 sps:$4 sm:$0xff]  }
 0xbae   : > { %v13604_v5 = vpop.f32.mrf.mxu1  ;;  %8716 = vmatpush1.bf16.msra.mxu0 %v11679_v15 }
 0xbaf   : > { %v6484_v61 = vadd.f32 1.4214138, %v6472_v43  ;;  %8691 = vmatpush2.bf16.msra.mxu1 %v11658_v50  ;;  %8717 = vmatprep.subr.bf16.mxu0 %v11687_v0  ;;  %v6473_v17 = vmul.f32 %v13594_v60, %v6461_v6  ;;  %v11697_v0 = vld [vmem:[%s14076_s26 + $0x4b0] ss:$12 sps:$4 sm:$0xff]   ;;  %v6377_v6 = vsel %vm6365_vm10, 1.0, %v12205_v55 }
 0xbb0   : > { %v13609_v34 = vpop.f32.mrf.mxu1  ;;  %8692 = vmatprep.subr.bf16.mxu1 %v11663_v4  ;;  %v11673_v4 = vld [vmem:[%s14076_s26 + $0x3f0] ss:$12 sps:$4 sm:$0xff]  }
 0xbb1   : > { %v6496_v3 = vmul.f32 %v13585_v35, %v6484_v61  ;;  %v6485_v49 = vadd.f32 1.4214138, %v6473_v17  ;;  %v11676_v61 = vld [vmem:[%s14076_s26 + $0x3d8] ss:$12 sps:$4 sm:$0xff]  }
 0xbb2   : > { %v6169_v33 = vpop.f32.mrf.mxu1  ;;  %8718 = vmatpush1.bf16.msra.mxu0 %v11685_v7  ;;  %v11700_v7 = vld [vmem:[%s14076_s26 + $0x498] ss:$12 sps:$4 sm:$0xff]  }
 0xbb3   : > { %v6508_v21 = vadd.f32 -0.28449672, %v6496_v3  ;;  %8693 = vmatpush2.bf16.msra.mxu1 %v11661_v19  ;;  %8719 = vmatprep.subr.bf16.mxu0 %v11690_v58  ;;  %v6497_v26 = vmul.f32 %v13594_v60, %v6485_v49  ;;  %v11705_v19 = vld [vmem:[%s14076_s26 + $0x484] ss:$12 sps:$4 sm:$0xff]   ;;  %v6340_v33 = vmul.f32 0.5, %v13530_v18 }
 0xbb4   : > { %v6170_v23 = vpop.f32.mrf.mxu1  ;;  %8694 = vmatprep.subr.bf16.mxu1 %v11666_v16  ;;  %v6341_v16 = vmul.f32 0.5, %v13536_v28  ;;  %v11684_v3 = vld [vmem:[%s14076_s26 + $0x3c4] ss:$12 sps:$4 sm:$0xff]   ;;  %v11711_v28 = vld [vmem:[%s14076_s26 + $0x6ac] ss:$12 sps:$4 sm:$0xff]  }
 0xbb5   : > { %v6520_v29 = vmul.f32 %v13585_v35, %v6508_v21  ;;  %v6509_v30 = vadd.f32 -0.28449672, %v6497_v26  ;;  %v11682_v21 = vld [vmem:[%s14076_s26 + $0x3c0] ss:$12 sps:$4 sm:$0xff]   ;;  %v11706_v26 = vld [vmem:[%s14076_s26 + $0x5e8] ss:$12 sps:$4 sm:$0xff]  }
 0xbb6   : > { %8720 = vmatpush1.bf16.msra.mxu0 %v11688_v56  ;;  %v11703_v56 = vld [vmem:[%s14076_s26 + $0x480] ss:$12 sps:$4 sm:$0xff]  }
 0xbb7   : > { %v6532_v1 = vadd.f32 0.2548296, %v6520_v29  ;;  %8695 = vmatpush2.bf16.msra.mxu1 %v11664_v54  ;;  %8721 = vmatprep.subr.bf16.mxu0 %v11693_v22  ;;  %v6521_v25 = vmul.f32 %v13594_v60, %v6509_v30  ;;  %v11708_v54 = vld [vmem:[%s14076_s26 + $0x5ec] ss:$12 sps:$4 sm:$0xff]   ;;  %v11709_v29 = vld [vmem:[%s14076_s26 + $0x6a8] ss:$12 sps:$4 sm:$0xff]  }
 0xbb8   : > { %8696 = vmatprep.subr.bf16.mxu1 %v11669_v10  ;;  %v12001_v10 = vld [vmem:[%s12482_s9] sm:$0xff] }
 0xbb9   : > { %v6544_v45 = vmul.f32 %v13585_v35, %v6532_v1  ;;  %v6533_v48 = vadd.f32 0.2548296, %v6521_v25  ;;  %v11973_v35 = vpop.eup %11972  ;;  %v4371_v18 = vrot.slane %v12001_v10, %v1095_v32  ;;  %v11714_v30 = vld [vmem:[%s14076_s26 + $0x5d4] ss:$12 sps:$4 sm:$0xff]   ;;  %v4375_v1 = vrot.slane %v12001_v10, %v1099_v36  ;;  %v11712_v32 = vld [vmem:[%s14076_s26 + $0x5d0] ss:$12 sps:$4 sm:$0xff]  }
 0xbba   : > { %8722 = vmatpush1.bf16.msra.mxu0 %v11691_v37  ;;  %v11748_v10 = vld [vmem:[%s14076_s26 + $0x540] ss:$12 sps:$4 sm:$0xff]  }
 0xbbb   : > { %v6604_v51 = vmul.f32 %v11971_v47, %v6544_v45  ;;  %8697 = vmatpush2.bf16.msra.mxu1 %v11667_v38  ;;  %8723 = vmatprep.subr.bf16.mxu0 %v11696_v20  ;;  %v6545_v15 = vmul.f32 %v13594_v60, %v6533_v48  ;;  %v11678_v60 = vld [vmem:[%s14076_s26 + $0x3dc] ss:$12 sps:$4 sm:$0xff]   ;;  %v11717_v38 = vld [vmem:[%s14076_s26 + $0x694] ss:$12 sps:$4 sm:$0xff]  }
 0xbbc   : > { %8698 = vmatprep.subr.bf16.mxu1 %v11672_v41  ;;  %v11715_v45 = vld [vmem:[%s14076_s26 + $0x690] ss:$12 sps:$4 sm:$0xff]  }
 0xbbd   : > { %v6616_v62 = vsub.f32 1.0, %v6604_v51  ;;  %v6605_v50 = vmul.f32 %v11973_v35, %v6545_v15  ;;  %v11720_v47 = vld [vmem:[%s14076_s26 + $0x5bc] ss:$12 sps:$4 sm:$0xff]   ;;  %v11726_v15 = vld [vmem:[%s14076_s26 + $0x5a4] ss:$12 sps:$4 sm:$0xff]  }
 0xbbe   : > { %8724 = vmatpush1.bf16.msra.mxu0 %v11694_v44  ;;  %v11723_v48 = vld [vmem:[%s14076_s26 + $0x67c] ss:$12 sps:$4 sm:$0xff]  }
 0xbbf   : > { %8699 = vmatpush2.bf16.msra.mxu1 %v11670_v24  ;;  %8725 = vmatprep.subr.bf16.mxu0 %v11699_v42  ;;  %v6628_v40 = vmul.f32 %v6616_v62, %v6376_v2  ;;  %v6617_v43 = vsub.f32 1.0, %v6605_v50  ;;  %v11718_v42 = vld [vmem:[%s14076_s26 + $0x5b8] ss:$12 sps:$4 sm:$0xff]   ;;  %v11724_v2 = vld [vmem:[%s14076_s26 + $0x5a0] ss:$12 sps:$4 sm:$0xff]  }
 0xbc0   : > { %8700 = vmatprep.subr.bf16.mxu1 %v11675_v53  ;;  %v11729_v50 = vld [vmem:[%s14076_s26 + $0x664] ss:$12 sps:$4 sm:$0xff]  }
 0xbc1   : > { %v6629_v39 = vmul.f32 %v6617_v43, %v6377_v6  ;;  %v6640_v58 = vadd.f32 1.0, %v6628_v40  ;;  %v11735_v43 = vld [vmem:[%s14076_s26 + $0x64c] ss:$12 sps:$4 sm:$0xff]  }
 0xbc2   : > { %8726 = vmatpush1.bf16.msra.mxu0 %v11697_v0 }
 0xbc3   : > { %8701 = vmatpush2.bf16.msra.mxu1 %v11673_v4  ;;  %8727 = vmatprep.subr.bf16.mxu0 %v11702_v27  ;;  %v6641_v17 = vadd.f32 1.0, %v6629_v39  ;;  %v6652_v22 = vmul.f32 %v6640_v58, %v6340_v33  ;;  %v11727_v4 = vld [vmem:[%s14076_s26 + $0x660] ss:$12 sps:$4 sm:$0xff]   ;;  %v11730_v39 = vld [vmem:[%s14076_s26 + $0x588] ss:$12 sps:$4 sm:$0xff]  }
 0xbc4   : > { %8702 = vmatprep.subr.bf16.mxu1 %v11678_v60  ;;  %v11732_v27 = vld [vmem:[%s14076_s26 + $0x58c] ss:$12 sps:$4 sm:$0xff]   ;;  %v11736_v58 = vld [vmem:[%s14076_s26 + $0x570] ss:$12 sps:$4 sm:$0xff]  }
 0xbc5   : > { %v6653_v49 = vmul.f32 %v6641_v17, %v6341_v16  ;;  %v13658_v37 = vpack.c.bf16 %v6652_v22, %v6652_v22  ;;  %v11739_v16 = vld [vmem:[%s14076_s26 + $0x630] ss:$12 sps:$4 sm:$0xff]  }
 0xbc6   : > { %8728 = vmatpush1.bf16.msra.mxu0 %v11700_v7  ;;  %v11733_v7 = vld [vmem:[%s14076_s26 + $0x648] ss:$12 sps:$4 sm:$0xff]  }
 0xbc7   : > { %8703 = vmatpush2.bf16.msra.mxu1 %v11676_v61  ;;  %8729 = vmatprep.subr.bf16.mxu0 %v11705_v19  ;;  %v13648_v23 = vpack.c.bf16 %v6653_v49, %v6653_v49  ;;  %v11738_v61 = vld [vmem:[%s14076_s26 + $0x574] ss:$12 sps:$4 sm:$0xff]   ;;  %v11744_v17 = vld [vmem:[%s14076_s26 + $0x55c] ss:$12 sps:$4 sm:$0xff]   ;;  %v11742_v49 = vld [vmem:[%s14076_s26 + $0x558] ss:$12 sps:$4 sm:$0xff]  }
 0xbc8   : > { %8704 = vmatprep.subr.bf16.mxu1 %v11684_v3  ;;  %v11741_v19 = vld [vmem:[%s14076_s26 + $0x634] ss:$12 sps:$4 sm:$0xff]   ;;  %v11747_v33 = vld [vmem:[%s14076_s26 + $0x61c] ss:$12 sps:$4 sm:$0xff]  }
 0xbc9   : > { %8706 = vmatprep.mubr.bf16.mxu1 %v13648_v23 }
 0xbca   : > { %8730 = vmatpush1.bf16.msra.mxu0 %v11703_v56  ;;  %v11745_v56 = vld [vmem:[%s14076_s26 + $0x618] ss:$12 sps:$4 sm:$0xff]  }
 0xbcb   : > { %8705 = vmatpush2.bf16.msra.mxu1 %v11682_v21  ;;  %8731 = vmatprep.subr.bf16.mxu0 %v11708_v54  ;;  %v11750_v21 = vld [vmem:[%s14076_s26 + $0x544] ss:$12 sps:$4 sm:$0xff]  }
 0xbcc   : > { %8756 = vmatprep.subr.bf16.mxu1 %v11711_v28  ;;  %v11753_v28 = vld [vmem:[%s14076_s26 + $0x604] ss:$12 sps:$4 sm:$0xff]  }
 0xbcd   : > { %v6124_v20 = vpop.f32.mrf.mxu0 }
 0xbce   : > { %v6125_v41 = vadd.f32 %v6124_v20, %v4371_v18  ;;  %8707 = vmatmul.mubr.bf16.vlgmr.msra.gmra.mxu1 %v13658_v37  ;;  %8732 = vmatpush2.bf16.msra.mxu0 %v11706_v26  ;;  %v13706_v26 = vld [vmem:[%s12482_s9 + $0x8] sm:$0xf] }
 0xbcf   : > { %v6126_v25 = vpop.f32.mrf.mxu0  ;;  %8757 = vmatpush1.bf16.msra.mxu1 %v11709_v29  ;;  %8733 = vmatprep.subr.bf16.mxu0 %v11714_v30  ;;  %v11751_v29 = vld [vmem:[%s14076_s26 + $0x600] ss:$12 sps:$4 sm:$0xff]  }
 0xbd0   : > { %v13668_v9 = vadd.f32 %v13604_v5, %v6125_v41  ;;  %v6127_v36 = vadd.f32 %v6126_v25, %v4375_v1  ;;  %8758 = vmatprep.subr.bf16.mxu1 %v11717_v38  ;;  %v11721_v5 = vld [vmem:[%s14076_s26 + $0x678] ss:$12 sps:$4 sm:$0xff]  }
 0xbd1   : > { %v6128_v44 = vpop.f32.mrf.mxu0  ;;  %v11780_v30 = vld [vmem:[%s14076_s26 + $0x82c] ss:$12 sps:$4 sm:$0xff]  }
 0xbd2   : > { %v13672_v51 = vmul.f32 0.70710677, %v13668_v9  ;;  %v13675_v24 = vadd.f32 %v13609_v34, %v6127_v36  ;;  %8734 = vmatpush2.bf16.msra.mxu0 %v11712_v32  ;;  %v11756_v41 = vld [vmem:[%s14076_s26 + $0x76c] ss:$12 sps:$4 sm:$0xff]   ;;  %v11754_v36 = vld [vmem:[%s14076_s26 + $0x768] ss:$12 sps:$4 sm:$0xff]  }
 0xbd3   : > { %v6129_v53 = vpop.f32.mrf.mxu0  ;;  %8759 = vmatpush1.bf16.msra.mxu1 %v11715_v45  ;;  %8735 = vmatprep.subr.bf16.mxu0 %v11720_v47  ;;  %v4379_v45 = vrot.slane %v13706_v26, %v12563_v13 }
 0xbd4   : > { %v6390_v35 = vand.u32 2147483647, %v13672_v51  ;;  %v13682_v62 = vmul.f32 0.70710677, %v13675_v24  ;;  %8760 = vmatprep.subr.bf16.mxu1 %v11723_v48  ;;  %vm6366_vm11 = vcmp.ge.f32.partialorder %v13672_v51, 0.0 }
 0xbd6   : > { %v6402_v34 = vmul.f32 0.3275911, %v6390_v35  ;;  %v6391_v0 = vand.u32 2147483647, %v13682_v62  ;;  %8736 = vmatpush2.bf16.msra.mxu0 %v11718_v42  ;;  %v6558_v3 = vsub.f32 0.0, %v6390_v35  ;;  %vm6367_vm12 = vcmp.ge.f32.partialorder %v13682_v62, 0.0 }
 0xbd7   : > { %8761 = vmatpush1.bf16.msra.mxu1 %v11721_v5  ;;  %8737 = vmatprep.subr.bf16.mxu0 %v11726_v15  ;;  %v11759_v42 = vld [vmem:[%s14076_s26 + $0x754] ss:$12 sps:$4 sm:$0xff]   ;;  %v4383_v5 = vrot.slane %v13706_v26, %v12557_v11  ;;  %v6343_v62 = vmul.f32 0.5, %v13675_v24 }
 0xbd8   : > { %v6414_v40 = vadd.f32 1.0, %v6402_v34  ;;  %v6403_v60 = vmul.f32 0.3275911, %v6391_v0  ;;  %8762 = vmatprep.subr.bf16.mxu1 %v11729_v50  ;;  %v6570_v54 = vmul.f32 %v6558_v3, %v6390_v35  ;;  %v6559_v22 = vsub.f32 0.0, %v6391_v0 }
 0xbda   : > { %11974 = vrcp.f32 %v6414_v40  ;;  %v6415_v6 = vadd.f32 1.0, %v6403_v60  ;;  %8738 = vmatpush2.bf16.msra.mxu0 %v11724_v2  ;;  %v6588_v38 = vmul.f32 1.442695, %v6570_v54  ;;  %v6571_v20 = vmul.f32 %v6559_v22, %v6391_v0  ;;  %v11762_v60 = vld [vmem:[%s14076_s26 + $0x73c] ss:$12 sps:$4 sm:$0xff]  }
 0xbdb   : > { %8763 = vmatpush1.bf16.msra.mxu1 %v11727_v4  ;;  %8739 = vmatprep.subr.bf16.mxu0 %v11732_v27  ;;  %v11757_v4 = vld [vmem:[%s14076_s26 + $0x750] ss:$12 sps:$4 sm:$0xff]  }
 0xbdc   : > { %8764 = vmatprep.subr.bf16.mxu1 %v11735_v43  ;;  %11976 = vrcp.f32 %v6415_v6  ;;  %v6590_v44 = vmul.f32 1.442695, %v6571_v20 }
 0xbdd   : > { %11978 = vpow2.f32 %v6588_v38 }
 0xbde   : > { %8740 = vmatpush2.bf16.msra.mxu0 %v11730_v39  ;;  %11980 = vpow2.f32 %v6590_v44 }
 0xbdf   : > { %8765 = vmatpush1.bf16.msra.mxu1 %v11733_v7  ;;  %8741 = vmatprep.subr.bf16.mxu0 %v11738_v61 }
 0xbe0   : > { %8766 = vmatprep.subr.bf16.mxu1 %v11741_v19 }
 0xbe2   : > { %8742 = vmatpush2.bf16.msra.mxu0 %v11736_v58 }
 0xbe3   : > { %8767 = vmatpush1.bf16.msra.mxu1 %v11739_v16  ;;  %8743 = vmatprep.subr.bf16.mxu0 %v11744_v17 }
 0xbe4   : > { %8768 = vmatprep.subr.bf16.mxu1 %v11747_v33  ;;  %v11760_v33 = vld [vmem:[%s14076_s26 + $0x738] ss:$12 sps:$4 sm:$0xff]  }
 0xbe6   : > { %8744 = vmatpush2.bf16.msra.mxu0 %v11742_v49 }
 0xbe7   : > { %v13703_v18 = vpop.eup %11974  ;;  %8769 = vmatpush1.bf16.msra.mxu1 %v11745_v56  ;;  %8745 = vmatprep.subr.bf16.mxu0 %v11750_v21  ;;  %v11765_v21 = vld [vmem:[%s14076_s26 + $0x724] ss:$12 sps:$4 sm:$0xff]  }
 0xbe8   : > { %v6450_v1 = vmul.f32 1.0614054, %v13703_v18  ;;  %8770 = vmatprep.subr.bf16.mxu1 %v11753_v28 }
 0xbe9   : > { %v13712_v32 = vpop.eup %11976 }
 0xbea   : > { %v6462_v25 = vadd.f32 -1.4531521, %v6450_v1  ;;  %8746 = vmatpush2.bf16.msra.mxu0 %v11748_v10  ;;  %v6451_v47 = vmul.f32 1.0614054, %v13712_v32  ;;  %v11763_v1 = vld [vmem:[%s14076_s26 + $0x720] ss:$12 sps:$4 sm:$0xff]  }
 0xbeb   : > { %8771 = vmatpush1.bf16.msra.mxu1 %v11751_v29  ;;  %8797 = vmatprep.subr.bf16.mxu0 %v11780_v30 }
 0xbec   : > { %v6474_v48 = vmul.f32 %v13703_v18, %v6462_v25  ;;  %8772 = vmatprep.subr.bf16.mxu1 %v11756_v41  ;;  %v6463_v15 = vadd.f32 -1.4531521, %v6451_v47  ;;  %v11768_v41 = vld [vmem:[%s14076_s26 + $0x70c] ss:$12 sps:$4 sm:$0xff]   ;;  %v11979_v25 = vpop.eup %11978 }
 0xbed   : > { %v6247_v53 = vpop.f32.mrf.mxu0 }
 0xbee   : > { %v6486_v35 = vadd.f32 1.4214138, %v6474_v48  ;;  %v6206_v50 = vpop.f32.mrf.mxu1  ;;  %v6475_v2 = vmul.f32 %v13712_v32, %v6463_v15  ;;  %v11981_v15 = vpop.eup %11980 }
 0xbef   : > { %v6207_v34 = vadd.f32 %v6206_v50, %v4379_v45  ;;  %v6249_v0 = vpop.f32.mrf.mxu0  ;;  %8773 = vmatpush2.bf16.msra.mxu1 %v11754_v36 }
 0xbf0   : > { %v6498_v27 = vmul.f32 %v13703_v18, %v6486_v35  ;;  %v6208_v40 = vpop.f32.mrf.mxu1  ;;  %8774 = vmatprep.subr.bf16.mxu1 %v11759_v42  ;;  %v6487_v7 = vadd.f32 1.4214138, %v6475_v2  ;;  %v11766_v42 = vld [vmem:[%s14076_s26 + $0x708] ss:$12 sps:$4 sm:$0xff]   ;;  %v6378_v35 = vsel %vm6366_vm11, 1.0, %v12205_v55 }
 0xbf1   : > { %v13726_v43 = vadd.f32 %v6247_v53, %v6207_v34  ;;  %v6209_v6 = vadd.f32 %v6208_v40, %v4383_v5  ;;  %v6251_v39 = vpop.f32.mrf.mxu0  ;;  %v11771_v5 = vld [vmem:[%s14076_s26 + $0x6f4] ss:$12 sps:$4 sm:$0xff]   ;;  %v11769_v34 = vld [vmem:[%s14076_s26 + $0x6f0] ss:$12 sps:$4 sm:$0xff]  }
 0xbf2   : > { %v6510_v61 = vadd.f32 -0.28449672, %v6498_v27  ;;  %v6210_v19 = vpop.f32.mrf.mxu1  ;;  %v6499_v3 = vmul.f32 %v13712_v32, %v6487_v7  ;;  %v11774_v2 = vld [vmem:[%s14076_s26 + $0x6dc] ss:$12 sps:$4 sm:$0xff]  }
 0xbf3   : > { %v13729_v58 = vmul.f32 0.70710677, %v13726_v43  ;;  %v13731_v16 = vadd.f32 %v6249_v0, %v6209_v6  ;;  %v6252_v17 = vpop.f32.mrf.mxu0  ;;  %8775 = vmatpush2.bf16.msra.mxu1 %v11757_v4  ;;  %v11772_v6 = vld [vmem:[%s14076_s26 + $0x6d8] ss:$12 sps:$4 sm:$0xff]  }
 0xbf4   : > { %v6522_v49 = vmul.f32 %v13703_v18, %v6510_v61  ;;  %v6211_v56 = vpop.f32.mrf.mxu1  ;;  %8776 = vmatprep.subr.bf16.mxu1 %v11762_v60  ;;  %v6511_v10 = vadd.f32 -0.28449672, %v6499_v3  ;;  %v6342_v60 = vmul.f32 0.5, %v13668_v9  ;;  %v11777_v61 = vld [vmem:[%s14076_s26 + $0x6c4] ss:$12 sps:$4 sm:$0xff]  }
 0xbf5   : > { %v6392_v54 = vand.u32 2147483647, %v13729_v58  ;;  %v13739_v22 = vmul.f32 0.70710677, %v13731_v16  ;;  %v11778_v9 = vld [vmem:[%s14076_s26 + $0x828] ss:$12 sps:$4 sm:$0xff]  }
 0xbf6   : > { %v6534_v28 = vadd.f32 0.2548296, %v6522_v49  ;;  %v6523_v20 = vmul.f32 %v13712_v32, %v6511_v10  ;;  %vm6368_vm13 = vcmp.ge.f32.partialorder %v13729_v58, 0.0  ;;  %v11808_v58 = vld [vmem:[%s14076_s26 + $0x798] ss:$12 sps:$4 sm:$0xff]  }
 0xbf7   : > { %v6404_v29 = vmul.f32 0.3275911, %v6392_v54  ;;  %v6393_v30 = vand.u32 2147483647, %v13739_v22  ;;  %8777 = vmatpush2.bf16.msra.mxu1 %v11760_v33  ;;  %v6560_v27 = vsub.f32 0.0, %v6392_v54  ;;  %vm6369_vm14 = vcmp.ge.f32.partialorder %v13739_v22, 0.0 }
 0xbf8   : > { %v6546_v38 = vmul.f32 %v13703_v18, %v6534_v28  ;;  %8778 = vmatprep.subr.bf16.mxu1 %v11765_v21  ;;  %v6535_v48 = vadd.f32 0.2548296, %v6523_v20  ;;  %v11775_v33 = vld [vmem:[%s14076_s26 + $0x6c0] ss:$12 sps:$4 sm:$0xff]   ;;  %v11781_v28 = vld [vmem:[%s14076_s26 + $0x170] ss:$12 sps:$4 sm:$0xff]  }
 0xbf9   : > { %v6416_v45 = vadd.f32 1.0, %v6404_v29  ;;  %v6405_v47 = vmul.f32 0.3275911, %v6393_v30  ;;  %v6561_v39 = vsub.f32 0.0, %v6393_v30  ;;  %v6572_v17 = vmul.f32 %v6560_v27, %v6392_v54 }
 0xbfa   : > { %v6606_v36 = vmul.f32 %v11979_v25, %v6546_v38  ;;  %v6547_v18 = vmul.f32 %v13712_v32, %v6535_v48  ;;  %v6379_v32 = vsel %vm6367_vm12, 1.0, %v12205_v55 }
 0xbfb   : > { %11982 = vrcp.f32 %v6416_v45  ;;  %v6417_v44 = vadd.f32 1.0, %v6405_v47  ;;  %8779 = vmatpush2.bf16.msra.mxu1 %v11763_v1  ;;  %v6573_v56 = vmul.f32 %v6561_v39, %v6393_v30  ;;  %v6592_v29 = vmul.f32 1.442695, %v6572_v17  ;;  %v11785_v1 = vld [vmem:[%s14076_s26 + $0x814] ss:$12 sps:$4 sm:$0xff]  }
 0xbfc   : > { %v6618_v53 = vsub.f32 1.0, %v6606_v36  ;;  %8780 = vmatprep.subr.bf16.mxu1 %v11768_v41  ;;  %v6607_v51 = vmul.f32 %v11981_v15, %v6547_v18  ;;  %v11783_v41 = vld [vmem:[%s14076_s26 + $0x810] ss:$12 sps:$4 sm:$0xff]  }
 0xbfd   : > { %11984 = vrcp.f32 %v6417_v44  ;;  %v6594_v30 = vmul.f32 1.442695, %v6573_v56  ;;  %v11790_v45 = vld [vmem:[%s14076_s26 + $0x7fc] ss:$12 sps:$4 sm:$0xff]  }
 0xbfe   : > { %v6630_v50 = vmul.f32 %v6618_v53, %v6378_v35  ;;  %v6619_v0 = vsub.f32 1.0, %v6607_v51  ;;  %11986 = vpow2.f32 %v6592_v29  ;;  %v11788_v53 = vld [vmem:[%s14076_s26 + $0x7f8] ss:$12 sps:$4 sm:$0xff]   ;;  %v11803_v17 = vld [vmem:[%s14076_s26 + $0x7b0] ss:$12 sps:$4 sm:$0xff]  }
 0xbff   : > { %8781 = vmatpush2.bf16.msra.mxu1 %v11766_v42  ;;  %11988 = vpow2.f32 %v6594_v30  ;;  %v11810_v56 = vld [vmem:[%s14076_s26 + $0x79c] ss:$12 sps:$4 sm:$0xff]   ;;  %v6344_v30 = vmul.f32 0.5, %v13726_v43  ;;  %v11786_v43 = vld [vmem:[%s14076_s26 + $0x158] ss:$12 sps:$4 sm:$0xff]  }
 0xc00   : > { %8782 = vmatprep.subr.bf16.mxu1 %v11771_v5  ;;  %v6642_v4 = vadd.f32 1.0, %v6630_v50  ;;  %v6631_v40 = vmul.f32 %v6619_v0, %v6379_v32  ;;  %v11795_v5 = vld [vmem:[%s14076_s26 + $0x7e4] ss:$12 sps:$4 sm:$0xff]   ;;  %v11793_v0 = vld [vmem:[%s14076_s26 + $0x7e0] ss:$12 sps:$4 sm:$0xff]  }
 0xc02   : > { %v6643_v7 = vadd.f32 1.0, %v6631_v40  ;;  %v6654_v19 = vmul.f32 %v6642_v4, %v6342_v60  ;;  %v11800_v4 = vld [vmem:[%s14076_s26 + $0x7cc] ss:$12 sps:$4 sm:$0xff]   ;;  %v11798_v60 = vld [vmem:[%s14076_s26 + $0x7c8] ss:$12 sps:$4 sm:$0xff]  }
 0xc03   : > { %8783 = vmatpush2.bf16.msra.mxu1 %v11769_v34 }
 0xc04   : > { %8784 = vmatprep.subr.bf16.mxu1 %v11774_v2  ;;  %v6655_v3 = vmul.f32 %v6643_v7, %v6343_v62  ;;  %v13764_v10 = vpack.c.bf16 %v6654_v19, %v6654_v19  ;;  %v11805_v62 = vld [vmem:[%s14076_s26 + $0x7b4] ss:$12 sps:$4 sm:$0xff]  }
 0xc06   : > { %v13760_v21 = vpack.c.bf16 %v6655_v3, %v6655_v3 }
 0xc07   : > { %8785 = vmatpush2.bf16.msra.mxu1 %v11772_v6 }
 0xc08   : > { %v11983_v49 = vpop.eup %11982  ;;  %8786 = vmatprep.subr.bf16.mxu1 %v11777_v61  ;;  %8747 = vmatprep.mubr.bf16.mxu0 %v13760_v21 }
 0xc09   : > { %v6452_v24 = vmul.f32 1.0614054, %v11983_v49  ;;  %8748 = vmatmul.mubr.bf16.vlgmr.msra.gmra.mxu0 %v13764_v10 }
 0xc0a   : > { %v11985_v54 = vpop.eup %11984  ;;  %8798 = vmatpush1.bf16.msra.mxu0 %v11778_v9  ;;  %v6380_v9 = vsel %vm6368_vm13, 1.0, %v12205_v55 }
 0xc0b   : > { %v6464_v38 = vadd.f32 -1.4531521, %v6452_v24  ;;  %8787 = vmatpush2.bf16.msra.mxu1 %v11775_v33  ;;  %v6453_v20 = vmul.f32 1.0614054, %v11985_v54  ;;  %8799 = vmatprep.subr.bf16.mxu0 %v11785_v1  ;;  %v11987_v39 = vpop.eup %11986  ;;  %v6381_v1 = vsel %vm6369_vm14, 1.0, %v12205_v55 }
 0xc0c   : > { %10336 = vmatprep.subr.bf16.mxu1 %v11781_v28  ;;  %v11989_v3 = vpop.eup %11988 }
 0xc0d   : > { %v6476_v25 = vmul.f32 %v11983_v49, %v6464_v38  ;;  %v6465_v36 = vadd.f32 -1.4531521, %v6453_v20  ;;  %v6345_v20 = vmul.f32 0.5, %v13731_v16  ;;  %v4387_v16 = vrot.slane %v13706_v26, %v12560_v12 }
 0xc0e   : > { %v13771_v47 = vpop.f32.mrf.mxu1  ;;  %8800 = vmatpush1.bf16.msra.mxu0 %v11783_v41  ;;  %v11813_v41 = vld [vmem:[%s14076_s26 + $0x780] ss:$12 sps:$4 sm:$0xff]  }
 0xc0f   : > { %v6488_v48 = vadd.f32 1.4214138, %v6476_v25  ;;  %v6477_v42 = vmul.f32 %v11985_v54, %v6465_v36  ;;  %8801 = vmatprep.subr.bf16.mxu0 %v11790_v45  ;;  %v11820_v45 = vld [vmem:[%s14076_s26 + $0x8ec] ss:$12 sps:$4 sm:$0xff]  }
 0xc10   : > { %v13773_v44 = vpop.f32.mrf.mxu1 }
 0xc11   : > { %v6500_v18 = vmul.f32 %v11983_v49, %v6488_v48  ;;  %v6489_v35 = vadd.f32 1.4214138, %v6477_v42  ;;  %v11782_v42 = vld [vmem:[%s14076_s26 + $0xb0] ss:$12 sps:$4 sm:$0xff]  }
 0xc12   : > { %v6333_v15 = vpop.f32.mrf.mxu1  ;;  %8802 = vmatpush1.bf16.msra.mxu0 %v11788_v53 }
 0xc13   : > { %v6512_v50 = vadd.f32 -0.28449672, %v6500_v18  ;;  %v6501_v34 = vmul.f32 %v11985_v54, %v6489_v35  ;;  %8803 = vmatprep.subr.bf16.mxu0 %v11795_v5  ;;  %v11818_v18 = vld [vmem:[%s14076_s26 + $0x8e8] ss:$12 sps:$4 sm:$0xff]   ;;  %v11787_v15 = vld [vmem:[%s14076_s26 + $0x98] ss:$12 sps:$4 sm:$0xff]   ;;  %v4391_v35 = vrot.slane %v13706_v26, %v12793_v52 }
 0xc14   : > { %v6334_v51 = vpop.f32.mrf.mxu1  ;;  %v11825_v5 = vld [vmem:[%s14076_s26 + $0x8d4] ss:$12 sps:$4 sm:$0xff]  }
 0xc15   : > { %v6524_v2 = vmul.f32 %v11983_v49, %v6512_v50  ;;  %v6513_v32 = vadd.f32 -0.28449672, %v6501_v34  ;;  %v11791_v51 = vld [vmem:[%s14076_s26 + $0x140] ss:$12 sps:$4 sm:$0xff]   ;;  %v11823_v34 = vld [vmem:[%s14076_s26 + $0x8d0] ss:$12 sps:$4 sm:$0xff]  }
 0xc16   : > { %8804 = vmatpush1.bf16.msra.mxu0 %v11793_v0  ;;  %v11796_v26 = vld [vmem:[%s14076_s26 + $0x128] ss:$12 sps:$4 sm:$0xff]  }
 0xc17   : > { %v6536_v27 = vadd.f32 0.2548296, %v6524_v2  ;;  %v6525_v40 = vmul.f32 %v11985_v54, %v6513_v32  ;;  %8805 = vmatprep.subr.bf16.mxu0 %v11800_v4  ;;  %v11830_v2 = vld [vmem:[%s14076_s26 + $0x8bc] ss:$12 sps:$4 sm:$0xff]  }
 0xc19   : > { %v6548_v6 = vmul.f32 %v11983_v49, %v6536_v27  ;;  %v6537_v7 = vadd.f32 0.2548296, %v6525_v40  ;;  %v11792_v27 = vld [vmem:[%s14076_s26 + $0x80] ss:$12 sps:$4 sm:$0xff]   ;;  %v11828_v40 = vld [vmem:[%s14076_s26 + $0x8b8] ss:$12 sps:$4 sm:$0xff]  }
 0xc1a   : > { %8806 = vmatpush1.bf16.msra.mxu0 %v11798_v60 }
 0xc1b   : > { %v6608_v61 = vmul.f32 %v11987_v39, %v6548_v6  ;;  %v6549_v19 = vmul.f32 %v11985_v54, %v6537_v7  ;;  %8807 = vmatprep.subr.bf16.mxu0 %v11805_v62  ;;  %v11815_v54 = vld [vmem:[%s14076_s26 + $0x784] ss:$12 sps:$4 sm:$0xff]  }
 0xc1d   : > { %v6620_v33 = vsub.f32 1.0, %v6608_v61  ;;  %v6609_v49 = vmul.f32 %v11989_v3, %v6549_v19  ;;  %v11797_v61 = vld [vmem:[%s14076_s26 + $0x68] ss:$12 sps:$4 sm:$0xff]   ;;  %v11801_v19 = vld [vmem:[%s14076_s26 + $0x110] ss:$12 sps:$4 sm:$0xff]  }
 0xc1e   : > { %8808 = vmatpush1.bf16.msra.mxu0 %v11803_v17  ;;  %v11833_v17 = vld [vmem:[%s14076_s26 + $0x8a0] ss:$12 sps:$4 sm:$0xff]  }
 0xc1f   : > { %v6632_v28 = vmul.f32 %v6620_v33, %v6380_v9  ;;  %v6621_v24 = vsub.f32 1.0, %v6609_v49  ;;  %8809 = vmatprep.subr.bf16.mxu0 %v11810_v56  ;;  %v11840_v33 = vld [vmem:[%s14076_s26 + $0x88c] ss:$12 sps:$4 sm:$0xff]   ;;  %v11802_v49 = vld [vmem:[%s14076_s26 + $0x50] ss:$12 sps:$4 sm:$0xff]  }
 0xc21   : > { %v6644_v29 = vadd.f32 1.0, %v6632_v28  ;;  %v6633_v38 = vmul.f32 %v6621_v24, %v6381_v1  ;;  %v11806_v28 = vld [vmem:[%s14076_s26 + $0xf8] ss:$12 sps:$4 sm:$0xff]   ;;  %v11838_v24 = vld [vmem:[%s14076_s26 + $0x888] ss:$12 sps:$4 sm:$0xff]  }
 0xc22   : > { %8810 = vmatpush1.bf16.msra.mxu0 %v11808_v58  ;;  %v11807_v1 = vld [vmem:[%s14076_s26 + $0x38] ss:$12 sps:$4 sm:$0xff]  }
 0xc23   : > { %v6645_v22 = vadd.f32 1.0, %v6633_v38  ;;  %v6656_v25 = vmul.f32 %v6644_v29, %v6344_v30  ;;  %8811 = vmatprep.subr.bf16.mxu0 %v11815_v54  ;;  %v11845_v29 = vld [vmem:[%s14076_s26 + $0x874] ss:$12 sps:$4 sm:$0xff]   ;;  %v11843_v38 = vld [vmem:[%s14076_s26 + $0x870] ss:$12 sps:$4 sm:$0xff]  }
 0xc24   : > { %v11811_v54 = vld [vmem:[%s14076_s26 + $0xe0] ss:$12 sps:$4 sm:$0xff]   ;;  %v11850_v30 = vld [vmem:[%s14076_s26 + $0x85c] ss:$12 sps:$4 sm:$0xff]  }
 0xc25   : > { %v6657_v36 = vmul.f32 %v6645_v22, %v6345_v20  ;;  %v13796_v53 = vpack.c.bf16 %v6656_v25, %v6656_v25  ;;  %v11812_v22 = vld [vmem:[%s14076_s26 + $0x20] ss:$12 sps:$4 sm:$0xff]   ;;  %v11848_v25 = vld [vmem:[%s14076_s26 + $0x858] ss:$12 sps:$4 sm:$0xff]  }
 0xc26   : > { %8812 = vmatpush1.bf16.msra.mxu0 %v11813_v41  ;;  %v11816_v41 = vld [vmem:[%s14076_s26 + $0xc8] ss:$12 sps:$4 sm:$0xff]  }
 0xc27   : > { %v13793_v48 = vpack.c.bf16 %v6657_v36, %v6657_v36  ;;  %8813 = vmatprep.subr.bf16.mxu0 %v11820_v45  ;;  %v11855_v45 = vld [vmem:[%s14076_s26 + $0x844] ss:$12 sps:$4 sm:$0xff]  }
 0xc29   : > { %8788 = vmatprep.mubr.bf16.mxu1 %v13793_v48 }
 0xc2a   : > { %8789 = vmatmul.mubr.bf16.vlgmr.msra.gmra.mxu1 %v13796_v53  ;;  %8814 = vmatpush2.bf16.msra.mxu0 %v11818_v18  ;;  %v11821_v18 = vld [vmem:[%s14076_s26 + $0x470] ss:$12 sps:$4 sm:$0xff]  }
 0xc2b   : > { %10337 = vmatpush3.bf16.msra.mxu1 %v11782_v42  ;;  %8870 = vmatprep.mubr.bf16.mxu1 %v13444_v8 }
 0xc2c   : > { %10338 = vmatprep.subr.bf16.mxu1 %v11786_v43  ;;  %8815 = vmatprep.subr.bf16.mxu0 %v11825_v5  ;;  %v11817_v43 = vld [vmem:[%s14076_s26 + $0x8] ss:$12 sps:$4 sm:$0xff]   ;;  %v11858_v5 = vld [vmem:[%s14076_s26 + $0x2f0] ss:$12 sps:$4 sm:$0xff]  }
 0xc2d   : > { %v6288_v50 = vpop.f32.mrf.mxu0 }
 0xc2e   : > { %v6289_v0 = vadd.f32 %v6288_v50, %v4387_v16  ;;  %8816 = vmatpush2.bf16.msra.mxu0 %v11823_v34  ;;  %v11853_v16 = vld [vmem:[%s14076_s26 + $0x840] ss:$12 sps:$4 sm:$0xff]   ;;  %v11822_v34 = vld [vmem:[%s14076_s26 + $0x3b0] ss:$12 sps:$4 sm:$0xff]  }
 0xc2f   : > { %v6290_v4 = vpop.f32.mrf.mxu0  ;;  %10339 = vmatpush3.bf16.msra.mxu1 %v11787_v15  ;;  %8817 = vmatprep.subr.bf16.mxu0 %v11830_v2 }
 0xc30   : > { %v13813_v32 = vadd.f32 %v13771_v47, %v6289_v0  ;;  %v6291_v8 = vadd.f32 %v6290_v4, %v4391_v35  ;;  %10340 = vmatprep.subr.bf16.mxu1 %v11791_v51  ;;  %v11835_v47 = vld [vmem:[%s14076_s26 + $0x8a4] ss:$12 sps:$4 sm:$0xff]  }
 0xc31   : > { %v6292_v52 = vpop.f32.mrf.mxu0  ;;  %v11826_v0 = vld [vmem:[%s14076_s26 + $0x458] ss:$12 sps:$4 sm:$0xff]  }
 0xc32   : > { %v13819_v60 = vmul.f32 0.70710677, %v13813_v32  ;;  %v13822_v6 = vadd.f32 %v13773_v44, %v6291_v8  ;;  %8818 = vmatpush2.bf16.msra.mxu0 %v11828_v40  ;;  %v11831_v40 = vld [vmem:[%s14076_s26 + $0x440] ss:$12 sps:$4 sm:$0xff]  }
 0xc33   : > { %v6293_v62 = vpop.f32.mrf.mxu0  ;;  %10341 = vmatpush3.bf16.msra.mxu1 %v11792_v27  ;;  %8819 = vmatprep.subr.bf16.mxu0 %v11835_v47 }
 0xc34   : > { %v6394_v39 = vand.u32 2147483647, %v13819_v60  ;;  %v13827_v7 = vmul.f32 0.70710677, %v13822_v6  ;;  %10342 = vmatprep.subr.bf16.mxu1 %v11796_v26  ;;  %v11827_v26 = vld [vmem:[%s14076_s26 + $0x398] ss:$12 sps:$4 sm:$0xff]  }
 0xc35   : > { %vm6370_vm15 = vcmp.ge.f32.partialorder %v13819_v60, 0.0 }
 0xc36   : > { %v6406_v44 = vmul.f32 0.3275911, %v6394_v39  ;;  %v6395_v3 = vand.u32 2147483647, %v13827_v7  ;;  %8820 = vmatpush2.bf16.msra.mxu0 %v11833_v17  ;;  %v6562_v20 = vsub.f32 0.0, %v6394_v39  ;;  %vm6371_vm0 = vcmp.ge.f32.partialorder %v13827_v7, 0.0 }
 0xc37   : > { %10343 = vmatpush3.bf16.msra.mxu1 %v11797_v61  ;;  %8821 = vmatprep.subr.bf16.mxu0 %v11840_v33  ;;  %v11832_v17 = vld [vmem:[%s14076_s26 + $0x380] ss:$12 sps:$4 sm:$0xff]   ;;  %v6347_v7 = vmul.f32 0.5, %v13822_v6  ;;  %v11862_v6 = vld [vmem:[%s14076_s26 + $0x2d8] ss:$12 sps:$4 sm:$0xff]  }
 0xc38   : > { %v6418_v56 = vadd.f32 1.0, %v6406_v44  ;;  %v6407_v9 = vmul.f32 0.3275911, %v6395_v3  ;;  %10344 = vmatprep.subr.bf16.mxu1 %v11801_v19  ;;  %v6563_v36 = vsub.f32 0.0, %v6395_v3  ;;  %v6574_v42 = vmul.f32 %v6562_v20, %v6394_v39  ;;  %v11836_v44 = vld [vmem:[%s14076_s26 + $0x428] ss:$12 sps:$4 sm:$0xff]  }
 0xc39   : > { %v11846_v20 = vld [vmem:[%s14076_s26 + $0x3f8] ss:$12 sps:$4 sm:$0xff]  }
 0xc3a   : > { %11990 = vrcp.f32 %v6418_v56  ;;  %v6419_v58 = vadd.f32 1.0, %v6407_v9  ;;  %8822 = vmatpush2.bf16.msra.mxu0 %v11838_v24  ;;  %v6575_v35 = vmul.f32 %v6563_v36, %v6395_v3  ;;  %v6596_v51 = vmul.f32 1.442695, %v6574_v42  ;;  %v11841_v24 = vld [vmem:[%s14076_s26 + $0x410] ss:$12 sps:$4 sm:$0xff]  }
 0xc3b   : > { %10345 = vmatpush3.bf16.msra.mxu1 %v11802_v49  ;;  %8823 = vmatprep.subr.bf16.mxu0 %v11845_v29  ;;  %v11847_v42 = vld [vmem:[%s14076_s26 + $0x338] ss:$12 sps:$4 sm:$0xff]  }
 0xc3c   : > { %11992 = vrcp.f32 %v6419_v58  ;;  %10346 = vmatprep.subr.bf16.mxu1 %v11806_v28  ;;  %v6598_v8 = vmul.f32 1.442695, %v6575_v35  ;;  %v11837_v28 = vld [vmem:[%s14076_s26 + $0x368] ss:$12 sps:$4 sm:$0xff]   ;;  %v6383_v35 = vsel %vm6371_vm0, 1.0, %v12205_v55 }
 0xc3d   : > { %11994 = vpow2.f32 %v6596_v51  ;;  %v11856_v51 = vld [vmem:[%s14076_s26 + $0x3c8] ss:$12 sps:$4 sm:$0xff]  }
 0xc3e   : > { %8824 = vmatpush2.bf16.msra.mxu0 %v11843_v38  ;;  %11996 = vpow2.f32 %v6598_v8  ;;  %v11842_v38 = vld [vmem:[%s14076_s26 + $0x350] ss:$12 sps:$4 sm:$0xff]   ;;  %v11857_v8 = vld [vmem:[%s14076_s26 + $0x308] ss:$12 sps:$4 sm:$0xff]  }
 0xc3f   : > { %10347 = vmatpush3.bf16.msra.mxu1 %v11807_v1  ;;  %8825 = vmatprep.subr.bf16.mxu0 %v11850_v30 }
 0xc40   : > { %10348 = vmatprep.subr.bf16.mxu1 %v11811_v54 }
 0xc42   : > { %8826 = vmatpush2.bf16.msra.mxu0 %v11848_v25 }
 0xc43   : > { %10349 = vmatpush3.bf16.msra.mxu1 %v11812_v22  ;;  %8827 = vmatprep.subr.bf16.mxu0 %v11855_v45 }
 0xc44   : > { %10350 = vmatprep.subr.bf16.mxu1 %v11816_v41 }
 0xc46   : > { %8828 = vmatpush2.bf16.msra.mxu0 %v11853_v16 }
 0xc47   : > { %v11991_v15 = vpop.eup %11990  ;;  %10351 = vmatpush3.bf16.msra.mxu1 %v11817_v43  ;;  %10358 = vmatprep.subr.bf16.mxu0 %v11858_v5  ;;  %v6382_v43 = vsel %vm6370_vm15, 1.0, %v12205_v55 }
 0xc48   : > { %v6454_v50 = vmul.f32 1.0614054, %v11991_v15  ;;  %10380 = vmatprep.subr.bf16.mxu1 %v11821_v18  ;;  %v11851_v18 = vld [vmem:[%s14076_s26 + $0x3e0] ss:$12 sps:$4 sm:$0xff]  }
 0xc49   : > { %v11993_v2 = vpop.eup %11992 }
 0xc4a   : > { %v6466_v4 = vadd.f32 -1.4531521, %v6454_v50  ;;  %8871 = vmatmul.mubr.bf16.vlgmr.msra.gmra.mxu1 %v13516_v59  ;;  %v6455_v27 = vmul.f32 1.0614054, %v11993_v2  ;;  %v11995_v30 = vpop.eup %11994  ;;  %v11852_v50 = vld [vmem:[%s14076_s26 + $0x320] ss:$12 sps:$4 sm:$0xff]  }
 0xc4b   : > { %10381 = vmatpush3.bf16.msra.mxu1 %v11822_v34  ;;  %8950 = vmatprep.mubr.bf16.mxu1 %v13648_v23  ;;  %v11997_v45 = vpop.eup %11996 }
 0xc4c   : > { %v6478_v52 = vmul.f32 %v11991_v15, %v6466_v4  ;;  %10382 = vmatprep.subr.bf16.mxu1 %v11826_v0  ;;  %v6467_v47 = vadd.f32 -1.4531521, %v6455_v27  ;;  %v6346_v0 = vmul.f32 0.5, %v13813_v32  ;;  %v11860_v27 = vld [vmem:[%s14076_s26 + $0x770] ss:$12 sps:$4 sm:$0xff]  }
 0xc4d   : > { %v11861_v32 = vld [vmem:[%s14076_s26 + $0x6b0] ss:$12 sps:$4 sm:$0xff]  }
 0xc4e   : > { %v6490_v62 = vadd.f32 1.4214138, %v6478_v52  ;;  %v13856_v39 = vpop.f32.mrf.mxu1  ;;  %v6479_v61 = vmul.f32 %v11993_v2, %v6467_v47  ;;  %v11864_v47 = vld [vmem:[%s14076_s26 + $0x758] ss:$12 sps:$4 sm:$0xff]  }
 0xc4f   : > { %10383 = vmatpush3.bf16.msra.mxu1 %v11827_v26  ;;  %v11859_v26 = vld [vmem:[%s14076_s26 + $0x230] ss:$12 sps:$4 sm:$0xff]  }
 0xc50   : > { %v6502_v59 = vmul.f32 %v11991_v15, %v6490_v62  ;;  %v13858_v19 = vpop.f32.mrf.mxu1  ;;  %10384 = vmatprep.subr.bf16.mxu1 %v11831_v40  ;;  %v6491_v23 = vadd.f32 1.4214138, %v6479_v61  ;;  %v11863_v62 = vld [vmem:[%s14076_s26 + $0x218] ss:$12 sps:$4 sm:$0xff]  }
 0xc51   : > { %v11865_v61 = vld [vmem:[%s14076_s26 + $0x698] ss:$12 sps:$4 sm:$0xff]  }
 0xc52   : > { %v6514_v3 = vadd.f32 -0.28449672, %v6502_v59  ;;  %v8630_v33 = vpop.f32.mrf.mxu1  ;;  %v6503_v56 = vmul.f32 %v11993_v2, %v6491_v23  ;;  %v11866_v59 = vld [vmem:[%s14076_s26 + $0x2c0] ss:$12 sps:$4 sm:$0xff]  }
 0xc53   : > { %10385 = vmatpush3.bf16.msra.mxu1 %v11832_v17  ;;  %v11870_v33 = vld [vmem:[%s14076_s26 + $0x2a8] ss:$12 sps:$4 sm:$0xff]  }
 0xc54   : > { %v6526_v9 = vmul.f32 %v11991_v15, %v6514_v3  ;;  %v8631_v49 = vpop.f32.mrf.mxu1  ;;  %10386 = vmatprep.subr.bf16.mxu1 %v11836_v44  ;;  %v6515_v58 = vadd.f32 -0.28449672, %v6503_v56  ;;  %v11868_v44 = vld [vmem:[%s14076_s26 + $0x740] ss:$12 sps:$4 sm:$0xff]  }
 0xc55   : > { %v11871_v49 = vld [vmem:[%s14076_s26 + $0x1e8] ss:$12 sps:$4 sm:$0xff]  }
 0xc56   : > { %v6538_v29 = vadd.f32 0.2548296, %v6526_v9  ;;  %v6527_v1 = vmul.f32 %v11993_v2, %v6515_v58  ;;  %v11875_v58 = vld [vmem:[%s14076_s26 + $0x1d0] ss:$12 sps:$4 sm:$0xff]  }
 0xc57   : > { %10387 = vmatpush3.bf16.msra.mxu1 %v11837_v28  ;;  %v11873_v28 = vld [vmem:[%s14076_s26 + $0x668] ss:$12 sps:$4 sm:$0xff]  }
 0xc58   : > { %v6550_v54 = vmul.f32 %v11991_v15, %v6538_v29  ;;  %10388 = vmatprep.subr.bf16.mxu1 %v11841_v24  ;;  %v6539_v22 = vadd.f32 0.2548296, %v6527_v1  ;;  %v11876_v24 = vld [vmem:[%s14076_s26 + $0x710] ss:$12 sps:$4 sm:$0xff]   ;;  %v11878_v1 = vld [vmem:[%s14076_s26 + $0x278] ss:$12 sps:$4 sm:$0xff]  }
 0xc59   : > { %v11877_v29 = vld [vmem:[%s14076_s26 + $0x650] ss:$12 sps:$4 sm:$0xff]  }
 0xc5a   : > { %v6610_v41 = vmul.f32 %v11995_v30, %v6550_v54  ;;  %v6551_v25 = vmul.f32 %v11993_v2, %v6539_v22  ;;  %v11880_v54 = vld [vmem:[%s14076_s26 + $0x6f8] ss:$12 sps:$4 sm:$0xff]   ;;  %v11884_v22 = vld [vmem:[%s14076_s26 + $0x6e0] ss:$12 sps:$4 sm:$0xff]  }
 0xc5b   : > { %10389 = vmatpush3.bf16.msra.mxu1 %v11842_v38  ;;  %v11879_v38 = vld [vmem:[%s14076_s26 + $0x1b8] ss:$12 sps:$4 sm:$0xff]  }
 0xc5c   : > { %v6622_v36 = vsub.f32 1.0, %v6610_v41  ;;  %10390 = vmatprep.subr.bf16.mxu1 %v11846_v20  ;;  %v6611_v16 = vmul.f32 %v11997_v45, %v6551_v25  ;;  %v11881_v30 = vld [vmem:[%s14076_s26 + $0x638] ss:$12 sps:$4 sm:$0xff]   ;;  %v11882_v20 = vld [vmem:[%s14076_s26 + $0x260] ss:$12 sps:$4 sm:$0xff]  }
 0xc5d   : > { %v11883_v41 = vld [vmem:[%s14076_s26 + $0x1a0] ss:$12 sps:$4 sm:$0xff]   ;;  %v11886_v45 = vld [vmem:[%s14076_s26 + $0x248] ss:$12 sps:$4 sm:$0xff]  }
 0xc5e   : > { %v6634_v5 = vmul.f32 %v6622_v36, %v6382_v43  ;;  %v6623_v15 = vsub.f32 1.0, %v6611_v16  ;;  %v11885_v25 = vld [vmem:[%s14076_s26 + $0x620] ss:$12 sps:$4 sm:$0xff]   ;;  %v11888_v36 = vld [vmem:[%s14076_s26 + $0x6c8] ss:$12 sps:$4 sm:$0xff]  }
 0xc5f   : > { %10391 = vmatpush3.bf16.msra.mxu1 %v11847_v42  ;;  %v11887_v42 = vld [vmem:[%s14076_s26 + $0x188] ss:$12 sps:$4 sm:$0xff]   ;;  %v11891_v16 = vld [vmem:[%s14076_s26 + $0x530] ss:$12 sps:$4 sm:$0xff]  }
 0xc60   : > { %v6646_v60 = vadd.f32 1.0, %v6634_v5  ;;  %10392 = vmatprep.subr.bf16.mxu1 %v11851_v18  ;;  %v6635_v34 = vmul.f32 %v6623_v15, %v6383_v35  ;;  %v11889_v43 = vld [vmem:[%s14076_s26 + $0x608] ss:$12 sps:$4 sm:$0xff]   ;;  %v11890_v18 = vld [vmem:[%s14076_s26 + $0x5f0] ss:$12 sps:$4 sm:$0xff]  }
 0xc61   : > { %v11892_v5 = vld [vmem:[%s14076_s26 + $0x5d8] ss:$12 sps:$4 sm:$0xff]  }
 0xc62   : > { %v6647_v2 = vadd.f32 1.0, %v6635_v34  ;;  %v6658_v4 = vmul.f32 %v6646_v60, %v6346_v0  ;;  %v11893_v15 = vld [vmem:[%s14076_s26 + $0x518] ss:$12 sps:$4 sm:$0xff]   ;;  %v11894_v60 = vld [vmem:[%s14076_s26 + $0x5c0] ss:$12 sps:$4 sm:$0xff]  }
 0xc63   : > { %10393 = vmatpush3.bf16.msra.mxu1 %v11852_v50  ;;  %v11896_v34 = vld [vmem:[%s14076_s26 + $0x5a8] ss:$12 sps:$4 sm:$0xff]  }
 0xc64   : > { %10394 = vmatprep.subr.bf16.mxu1 %v11856_v51  ;;  %v6659_v55 = vmul.f32 %v6647_v2, %v6347_v7  ;;  %v13881_v40 = vpack.c.bf16 %v6658_v4, %v6658_v4  ;;  %v11895_v51 = vld [vmem:[%s14076_s26 + $0x500] ss:$12 sps:$4 sm:$0xff]   ;;  %v11897_v0 = vld [vmem:[%s14076_s26 + $0x4e8] ss:$12 sps:$4 sm:$0xff]   ;;  %v11898_v2 = vld [vmem:[%s14076_s26 + $0x590] ss:$12 sps:$4 sm:$0xff]  }
 0xc65   : > { %v11899_v4 = vld [vmem:[%s14076_s26 + $0x4d0] ss:$12 sps:$4 sm:$0xff]  }
 0xc66   : > { %v13878_v52 = vpack.c.bf16 %v6659_v55, %v6659_v55  ;;  %v11901_v55 = vld [vmem:[%s14076_s26 + $0x4b8] ss:$12 sps:$4 sm:$0xff]  }
 0xc67   : > { %10395 = vmatpush3.bf16.msra.mxu1 %v11857_v8  ;;  %v11900_v8 = vld [vmem:[%s14076_s26 + $0x578] ss:$12 sps:$4 sm:$0xff]  }
 0xc68   : > { %8829 = vmatprep.mubr.bf16.mxu0 %v13878_v52  ;;  %10424 = vmatprep.subr.bf16.mxu1 %v11860_v27  ;;  %v11902_v27 = vld [vmem:[%s14076_s26 + $0x560] ss:$12 sps:$4 sm:$0xff]  }
 0xc69   : > { %8830 = vmatmul.mubr.bf16.vlgmr.msra.gmra.mxu0 %v13881_v40 }
 0xc6a   : > { %10359 = vmatpush3.bf16.msra.mxu0 %v11859_v26  ;;  %8951 = vmatmul.mubr.bf16.vlgmr.msra.gmra.mxu1 %v13658_v37  ;;  %v11903_v26 = vld [vmem:[%s14076_s26 + $0x4a0] ss:$12 sps:$4 sm:$0xff]  }
 0xc6b   : > { %8910 = vmatprep.mubr.bf16.mxu0 %v13588_v46  ;;  %10425 = vmatpush3.bf16.msra.mxu1 %v11861_v32  ;;  %v11867_v46 = vld [vmem:[%s14076_s26 + $0x200] ss:$12 sps:$4 sm:$0xff]   ;;  %v11904_v32 = vld [vmem:[%s14076_s26 + $0x548] ss:$12 sps:$4 sm:$0xff]  }
 0xc6c   : > { %9030 = vmatprep.mubr.bf16.mxu1 %v13793_v48  ;;  %10360 = vmatprep.subr.bf16.mxu0 %v11862_v6  ;;  %v11869_v48 = vld [vmem:[%s14076_s26 + $0x680] ss:$12 sps:$4 sm:$0xff]   ;;  %v11905_v6 = vld [vmem:[%s14076_s26 + $0x488] ss:$12 sps:$4 sm:$0xff]  }
 0xc6d   : > { %v8667_v17 = vpop.f32.mrf.mxu0  ;;  %10426 = vmatprep.subr.bf16.mxu1 %v11864_v47  ;;  %v11906_v47 = vld [vmem:[%s14076_s26 + $0x8f0] ss:$12 sps:$4 sm:$0xff]  }
 0xc6e   : > { %v13896_v23 = vadd.f32 %v8667_v17, %v13856_v39  ;;  %10361 = vmatpush3.bf16.msra.mxu0 %v11863_v62  ;;  %v11872_v39 = vld [vmem:[%s14076_s26 + $0x728] ss:$12 sps:$4 sm:$0xff]   ;;  %v11907_v62 = vld [vmem:[%s14076_s26 + $0x830] ss:$12 sps:$4 sm:$0xff]   ;;  %v11910_v17 = vld [vmem:[%s14076_s26 + $0x8c0] ss:$12 sps:$4 sm:$0xff]  }
 0xc6f   : > { %v8669_v37 = vpop.f32.mrf.mxu0  ;;  %10427 = vmatpush3.bf16.msra.mxu1 %v11865_v61  ;;  %10362 = vmatprep.subr.bf16.mxu0 %v11866_v59  ;;  %v11908_v61 = vld [vmem:[%s14076_s26 + $0x8d8] ss:$12 sps:$4 sm:$0xff]  }
 0xc70   : > { %v13900_v3 = vadd.f32 %v8669_v37, %v13858_v19  ;;  %10428 = vmatprep.subr.bf16.mxu1 %v11868_v44  ;;  %v11874_v19 = vld [vmem:[%s14076_s26 + $0x290] ss:$12 sps:$4 sm:$0xff]   ;;  %v11909_v59 = vld [vmem:[%s14076_s26 + $0x818] ss:$12 sps:$4 sm:$0xff]   ;;  %v11911_v44 = vld [vmem:[%s14076_s26 + $0x800] ss:$12 sps:$4 sm:$0xff]  }
 0xc71   : > { %v8671_v56 = vpop.f32.mrf.mxu0  ;;  %v11913_v37 = vld [vmem:[%s14076_s26 + $0x7e8] ss:$12 sps:$4 sm:$0xff]  }
 0xc72   : > { %10363 = vmatpush3.bf16.msra.mxu0 %v11867_v46  ;;  %v11915_v46 = vld [vmem:[%s14076_s26 + $0x7d0] ss:$12 sps:$4 sm:$0xff]   ;;  %v11920_v56 = vld [vmem:[%s14076_s26 + $0x848] ss:$12 sps:$4 sm:$0xff]  }
 0xc73   : > { %v8672_v9 = vpop.f32.mrf.mxu0  ;;  %10429 = vmatpush3.bf16.msra.mxu1 %v11869_v48  ;;  %10364 = vmatprep.subr.bf16.mxu0 %v11870_v33  ;;  %v11918_v48 = vld [vmem:[%s14076_s26 + $0x860] ss:$12 sps:$4 sm:$0xff]  }
 0xc74   : > { %10430 = vmatprep.subr.bf16.mxu1 %v11872_v39  ;;  %v11919_v33 = vld [vmem:[%s14076_s26 + $0x7a0] ss:$12 sps:$4 sm:$0xff]   ;;  %v11921_v39 = vld [vmem:[%s14076_s26 + $0x788] ss:$12 sps:$4 sm:$0xff]  }
 0xc76   : > { %10365 = vmatpush3.bf16.msra.mxu0 %v11871_v49 }
 0xc77   : > { %10431 = vmatpush3.bf16.msra.mxu1 %v11873_v28  ;;  %10366 = vmatprep.subr.bf16.mxu0 %v11874_v19 }
 0xc78   : > { %10432 = vmatprep.subr.bf16.mxu1 %v11876_v24 }
 0xc7a   : > { %10367 = vmatpush3.bf16.msra.mxu0 %v11875_v58 }
 0xc7b   : > { %10433 = vmatpush3.bf16.msra.mxu1 %v11877_v29  ;;  %10368 = vmatprep.subr.bf16.mxu0 %v11878_v1 }
 0xc7c   : > { %10434 = vmatprep.subr.bf16.mxu1 %v11880_v54 }
 0xc7e   : > { %10369 = vmatpush3.bf16.msra.mxu0 %v11879_v38 }
 0xc7f   : > { %10435 = vmatpush3.bf16.msra.mxu1 %v11881_v30  ;;  %10370 = vmatprep.subr.bf16.mxu0 %v11882_v20 }
 0xc80   : > { %10436 = vmatprep.subr.bf16.mxu1 %v11884_v22 }
 0xc82   : > { %10371 = vmatpush3.bf16.msra.mxu0 %v11883_v41 }
 0xc83   : > { %10437 = vmatpush3.bf16.msra.mxu1 %v11885_v25  ;;  %10372 = vmatprep.subr.bf16.mxu0 %v11886_v45 }
 0xc84   : > { %10438 = vmatprep.subr.bf16.mxu1 %v11888_v36 }
 0xc86   : > { %10373 = vmatpush3.bf16.msra.mxu0 %v11887_v42 }
 0xc87   : > { %10439 = vmatpush3.bf16.msra.mxu1 %v11889_v43  ;;  %10402 = vmatprep.subr.bf16.mxu0 %v11890_v18 }
 0xc89   : > { %8911 = vmatmul.mubr.bf16.vlgmr.msra.gmra.mxu0 %v13596_v14 }
 0xc8a   : > { %10403 = vmatpush3.bf16.msra.mxu0 %v11891_v16  ;;  %8990 = vmatprep.mubr.bf16.mxu0 %v13760_v21 }
 0xc8b   : > { %9031 = vmatmul.mubr.bf16.vlgmr.msra.gmra.mxu1 %v13796_v53  ;;  %10404 = vmatprep.subr.bf16.mxu0 %v11892_v5 }
 0xc8e   : > { %v8708_v35 = vpop.f32.mrf.mxu1  ;;  %10405 = vmatpush3.bf16.msra.mxu0 %v11893_v15 }
 0xc8f   : > { %v13932_v50 = vadd.f32 %v8708_v35, %v13896_v23  ;;  %10406 = vmatprep.subr.bf16.mxu0 %v11894_v60  ;;  %v11912_v23 = vld [vmem:[%s14076_s26 + $0x8a8] ss:$12 sps:$4 sm:$0xff]  }
 0xc90   : > { %v8710_v14 = vpop.f32.mrf.mxu1 }
 0xc91   : > { %v8711_v21 = vadd.f32 %v8710_v14, %v13900_v3  ;;  %v11917_v3 = vld [vmem:[%s14076_s26 + $0x7b8] ss:$12 sps:$4 sm:$0xff]  }
 0xc92   : > { %v8712_v53 = vpop.f32.mrf.mxu1  ;;  %10407 = vmatpush3.bf16.msra.mxu0 %v11895_v51 }
 0xc93   : > { %10408 = vmatprep.subr.bf16.mxu0 %v11896_v34 }
 0xc94   : > { %v8713_v7 = vpop.f32.mrf.mxu1 }
 0xc96   : > { %10409 = vmatpush3.bf16.msra.mxu0 %v11897_v0 }
 0xc97   : > { %10410 = vmatprep.subr.bf16.mxu0 %v11898_v2 }
 0xc9a   : > { %10411 = vmatpush3.bf16.msra.mxu0 %v11899_v4 }
 0xc9b   : > { %10412 = vmatprep.subr.bf16.mxu0 %v11900_v8 }
 0xc9e   : > { %10413 = vmatpush3.bf16.msra.mxu0 %v11901_v55 }
 0xc9f   : > { %10414 = vmatprep.subr.bf16.mxu0 %v11902_v27 }
 0xca2   : > { %10415 = vmatpush3.bf16.msra.mxu0 %v11903_v26 }
 0xca3   : > { %10416 = vmatprep.subr.bf16.mxu0 %v11904_v32 }
 0xca6   : > { %10417 = vmatpush3.bf16.msra.mxu0 %v11905_v6 }
 0xca7   : > { %10446 = vmatprep.subr.bf16.mxu0 %v11906_v47 }
 0xca9   : > { %8991 = vmatmul.mubr.bf16.vlgmr.msra.gmra.mxu0 %v13764_v10  ;;  %v11914_v10 = vld [vmem:[%s14076_s26 + $0x890] ss:$12 sps:$4 sm:$0xff]  }
 0xcaa   : > { %10447 = vmatpush3.bf16.msra.mxu0 %v11907_v62  ;;  %9070 = vmatprep.mubr.bf16.mxu0 %v13878_v52  ;;  %v11916_v52 = vld [vmem:[%s14076_s26 + $0x878] ss:$12 sps:$4 sm:$0xff]  }
 0xcab   : > { %10448 = vmatprep.subr.bf16.mxu0 %v11908_v61 }
 0xcae   : > { %10449 = vmatpush3.bf16.msra.mxu0 %v11909_v59 }
 0xcaf   : > { %10450 = vmatprep.subr.bf16.mxu0 %v11910_v17 }
 0xcb2   : > { %10451 = vmatpush3.bf16.msra.mxu0 %v11911_v44 }
 0xcb3   : > { %10452 = vmatprep.subr.bf16.mxu0 %v11912_v23 }
 0xcb6   : > { %10453 = vmatpush3.bf16.msra.mxu0 %v11913_v37 }
 0xcb7   : > { %10454 = vmatprep.subr.bf16.mxu0 %v11914_v10 }
 0xcba   : > { %10455 = vmatpush3.bf16.msra.mxu0 %v11915_v46 }
 0xcbb   : > { %10456 = vmatprep.subr.bf16.mxu0 %v11916_v52 }
 0xcbe   : > { %10457 = vmatpush3.bf16.msra.mxu0 %v11917_v3 }
 0xcbf   : > { %10458 = vmatprep.subr.bf16.mxu0 %v11918_v48 }
 0xcc2   : > { %10459 = vmatpush3.bf16.msra.mxu0 %v11919_v33 }
 0xcc3   : > { %10460 = vmatprep.subr.bf16.mxu0 %v11920_v56 }
 0xcc6   : > { %10461 = vmatpush3.bf16.msra.mxu0 %v11921_v39 }
 0xcc9   : > { %9071 = vmatmul.mubr.bf16.vlgmr.msra.gmra.mxu0 %v13881_v40  ;;  %v8749_v9 = vpop.f32.mrf.mxu0  ;;  %v9081_v40 = vld [vmem:[%s740_s10] sm:$0x7] }
 0xcca   : > { %v8750_v49 = vadd.f32 %v8749_v9, %v13932_v50  ;;  %v9086_v18 = vrot.slane %v9081_v40, %v12563_v13  ;;  %v9090_v35 = vrot.slane %v9081_v40, %v12557_v11  ;;  %v9094_v33 = vrot.slane %v9081_v40, %v12560_v12 }
 0xccb   : > { %v8751_v28 = vpop.f32.mrf.mxu0 }
 0xccc   : > { %v8752_v19 = vadd.f32 %v8751_v28, %v8711_v21 }
 0xccd   : > { %v8753_v24 = vpop.f32.mrf.mxu0 }
 0xccf   : > { %v8754_v58 = vpop.f32.mrf.mxu0 }
 0xcea   : > { %v8790_v29 = vpop.f32.mrf.mxu1 }
 0xceb   : > { %v8791_v45 = vadd.f32 %v8790_v29, %v8750_v49 }
 0xcec   : > { %v8792_v1 = vpop.f32.mrf.mxu1 }
 0xced   : > { %v8793_v42 = vadd.f32 %v8792_v1, %v8752_v19 }
 0xcee   : > { %v8794_v54 = vpop.f32.mrf.mxu1 }
 0xcf0   : > { %v8795_v38 = vpop.f32.mrf.mxu1 }
 0xd0a   : > { %v10352_v30 = vpop.f32.mrf.mxu1 }
 0xd0c   : > { %v10353_v20 = vpop.f32.mrf.mxu1 }
 0xd0d   : > { %v10354_v22 = vadd.f32 %v10353_v20, %v10352_v30 }
 0xd0e   : > { %v10355_v41 = vpop.f32.mrf.mxu1 }
 0xd10   : > { %v10356_v25 = vpop.f32.mrf.mxu1 }
 0xd29   : > { %v8831_v36 = vpop.f32.mrf.mxu0 }
 0xd2a   : > { %v8832_v43 = vadd.f32 %v8831_v36, %v8791_v45  ;;  %v10396_v16 = vpop.f32.mrf.mxu1 }
 0xd2b   : > { %v8833_v5 = vpop.f32.mrf.mxu0 }
 0xd2c   : > { %v9078_v15 = vadd.f32 %v8832_v43, %v13034_v57  ;;  %v8834_v60 = vadd.f32 %v8833_v5, %v8793_v42  ;;  %v10397_v50 = vpop.f32.mrf.mxu1 }
 0xd2d   : > { %v10398_v51 = vadd.f32 %v10397_v50, %v10396_v16  ;;  %v8835_v14 = vpop.f32.mrf.mxu0 }
 0xd2e   : > { %v9098_v34 = vadd.f32 %v9086_v18, %v9078_v15  ;;  %v9079_v21 = vadd.f32 %v8834_v60, %v13031_v31  ;;  %v10399_v53 = vpop.f32.mrf.mxu1 }
 0xd2f   : > { %v8836_v0 = vpop.f32.mrf.mxu0 }
 0xd30   : > { %9101 = vst [vmem:[#allocation2 + $0x10] sm:$0xff] %v9098_v34  ;;  %9104 = vst [vmem:[%s12477_s24] sm:$0xff] %v9098_v34  ;;  %v9099_v7 = vadd.f32 %v9090_v35, %v9079_v21  ;;  %v10400_v13 = vpop.f32.mrf.mxu1 }
 0xd32   : > { %9102 = vst [vmem:[#allocation2] sm:$0xff] %v9099_v7  ;;  %9105 = vst [vmem:[%s12477_s24 + $0x8] sm:$0xff] %v9099_v7 }
 0xd49   : > { %v10374_v2 = vpop.f32.mrf.mxu0 }
 0xd4b   : > { %v10440_v4 = vpop.f32.mrf.mxu1  ;;  %v10375_v57 = vpop.f32.mrf.mxu0 }
 0xd4c   : > { %v10376_v8 = vadd.f32 %v10375_v57, %v10374_v2 }
 0xd4d   : > { %v10441_v55 = vpop.f32.mrf.mxu1  ;;  %v10377_v11 = vpop.f32.mrf.mxu0 }
 0xd4e   : > { %v8913_v27 = vadd.f32 %v10376_v8, %v10354_v22  ;;  %v10442_v37 = vadd.f32 %v10441_v55, %v10440_v4 }
 0xd4f   : > { %v10443_v26 = vpop.f32.mrf.mxu1  ;;  %v10378_v32 = vpop.f32.mrf.mxu0 }
 0xd50   : > { %v8953_v6 = vadd.f32 %v10398_v51, %v8913_v27 }
 0xd51   : > { %v10444_v47 = vpop.f32.mrf.mxu1 }
 0xd69   : > { %v10418_v31 = vpop.f32.mrf.mxu0 }
 0xd6b   : > { %v10419_v62 = vpop.f32.mrf.mxu0 }
 0xd6c   : > { %v10420_v17 = vadd.f32 %v10419_v62, %v10418_v31 }
 0xd6d   : > { %v10421_v61 = vpop.f32.mrf.mxu0 }
 0xd6e   : > { %v8993_v44 = vadd.f32 %v10420_v17, %v8953_v6 }
 0xd6f   : > { %v10422_v59 = vpop.f32.mrf.mxu0 }
 0xd70   : > { %v9033_v46 = vadd.f32 %v10442_v37, %v8993_v44 }
 0xd89   : > { %v10462_v23 = vpop.f32.mrf.mxu0 }
 0xd8b   : > { %v10463_v10 = vpop.f32.mrf.mxu0 }
 0xd8c   : > { %v10464_v52 = vadd.f32 %v10463_v10, %v10462_v23 }
 0xd8d   : > { %v10465_v3 = vpop.f32.mrf.mxu0 }
 0xd8e   : > { %v9073_v48 = vadd.f32 %v10464_v52, %v9033_v46 }
 0xd8f   : > { %v10466_v56 = vpop.f32.mrf.mxu0 }
 0xd90   : > { %v9080_v39 = vadd.f32 %v9073_v48, %v13036_v63 }
 0xd92   : > { %v9100_v9 = vadd.f32 %v9094_v33, %v9080_v39 }
 0xd94   : > { %9103 = vst [vmem:[#allocation2 + $0x8] sm:$0xff] %v9100_v9  ;;  %9106 = vst [vmem:[%s12477_s24 + $0x10] sm:$0xff] %v9100_v9 }
 0xd95 PF: > { %s14078_s10 = sld [smem:[#allocation17_spill]] }
 0xd96   : > { %s14079_s25 = sld [smem:[#allocation13_spill]] }
 0xd97   : > { %s14080_s26 = sld [smem:[#allocation14_spill]] }
 0xd98   : > { %s14081_s27 = sld [smem:[#allocation20_spill]] }
 0xd99   : > { %s14082_s28 = sld [smem:[#allocation15_spill]] }
 0xd9a   : > { %s14083_s29 = sld [smem:[#allocation16_spill]] }
 0xd9b   : > { %s32_s15 = sadd.s32 1, %s14078_s10   ;;  %s14084_s30 = sld [smem:[#allocation18_spill]] }
 0xd9c   : > { %p29_p7 = scmp.ge.s32.totalorder %s32_s15, 26   ;;  %s14085_s14 = sld [smem:[#allocation19_spill]] }
 0xd9e   :  { %31 = sbr.rel (!%p29_p7) target bundleno = 22 (0x16), region = 180 }
 0xda3   :  { %9128 = vsyncpa [#allocation4], 1 }
 0xda4   :  { %9130 = vsyncpa [#allocation4 + $0x1], 1 }
 0xda5   :  { %9131 = vsyncpa [#allocation6], 1 }
 0xda6   :  { %9133 = vsyncpa [#allocation6 + $0x1], 1 }
 0xda7   :  { %9134 = vsyncpa [#allocation9], 1 }
 0xda8   :  { %9136 = vsyncpa [#allocation9 + $0x1], 1 }

</bundles_post_ra>
